<compile_context>
chip_gen: v5e
topology: v5e:2x2
jax: 0.10.0
libtpu: 0.0.40
codegen_flags: <defaults>
</compile_context>

<pallas_src>
import functools

import jax
import jax.numpy as jnp
from jax.experimental import pallas as pl
from jax.experimental.pallas import tpu as pltpu

_EPS = 1e-5
_LANE = 128
_SUBLANE = 8
_TK_CAP = 2048          # review: tk in the 1024-2048 range amply amortizes per-step cost


# ----------------------------------------------------------------------------
# Tiling / budget helpers
# ----------------------------------------------------------------------------
def _round_up(n, m):
    return ((n + m - 1) // m) * m


def _vmem_budgets():
    """(vmem_limit_bytes, per-weight-block byte budget) derived per TPU generation."""
    vmem = 64 * 1024 * 1024                      # conservative default (v7x per-core VMEM)
    try:
        info = pltpu.get_tpu_info()
        v = getattr(info, "vmem_capacity_bytes", None)
        if v:
            vmem = int(v)
    except Exception:
        pass
    vmem_limit = min(int(vmem * 0.85), 112 * 1024 * 1024)
    block_budget = vmem // 5                     # weight stream is double-buffered -> <=40% VMEM
    return vmem_limit, block_budget


def _pick_tn(dout_pad):
    """Output-column tile.  Split in two (>=2 'parallel' tiles -> v7x megacore uses both
    TensorCores) only when both halves stay multiples of 128; otherwise keep the full
    width so each weight DMA is one contiguous (tk, Dout) slab."""
    if dout_pad >= 512 and dout_pad % 256 == 0:
        return dout_pad // 2
    return dout_pad


def _pick_tk(din_pad, tn, block_budget_bytes, itemsize=2):
    """Largest multiple of 128 dividing din_pad, under the VMEM weight-block budget."""
    budget_tk = block_budget_bytes // max(tn * itemsize, 1)
    tk = min(din_pad, _TK_CAP, max(budget_tk, _LANE))
    tk = max((tk // _LANE) * _LANE, _LANE)
    while tk > _LANE and din_pad % tk != 0:
        tk -= _LANE
    return tk            # din_pad is a multiple of 128, so tk == 128 always divides


def _masked_layer_norm(xf, g, b, d_true):
    """LayerNorm over the true (unpadded) feature count.  Padded columns of xf/g/b are
    zero, so sums are exact and the padded outputs stay exactly zero."""
    inv = jnp.float32(1.0 / d_true)
    mean = jnp.sum(xf, axis=-1, keepdims=True) * inv
    var = jnp.sum(xf * xf, axis=-1, keepdims=True) * inv - mean * mean
    return (xf - mean) * jax.lax.rsqrt(var + _EPS) * g + b


# ----------------------------------------------------------------------------
# Kernels
# ----------------------------------------------------------------------------
def _fused_block_kernel(x_ref, g_ref, bln_ref, w_ref, bias_ref, o_ref,
                        norm_sc, acc_sc, *, d_in_true, apply_relu):
    """o[:, n] = maybe_relu(LayerNorm(x) @ W + b)[:, n], K-accumulated in f32."""
    k = pl.program_id(1)
    tk = w_ref.shape[0]

    @pl.when(k == 0)
    def _():
        # Normalize the whole resident activation row ONCE per N tile (safe under
        # megacore: gated on k only).  Steady state is then pure DMA + vmatmul.
        norm_sc[...] = _masked_layer_norm(
            x_ref[...], g_ref[...], bln_ref[...], d_in_true).astype(jnp.bfloat16)
        acc_sc[...] = jnp.zeros_like(acc_sc)

    off = pl.multiple_of(k * tk, _LANE)
    acc_sc[...] += jnp.dot(norm_sc[:, pl.ds(off, tk)], w_ref[...],
                           preferred_element_type=jnp.float32)

    @pl.when(k == pl.num_programs(1) - 1)
    def _():
        y = acc_sc[...] + bias_ref[...]
        if apply_relu:
            y = jnp.maximum(y, 0.0)
        o_ref[...] = y.astype(o_ref.dtype)


def _fused_tail_kernel(x_ref, g_ref, bln_ref,
                       w5_ref, b5_ref, g5_ref, be5_ref,
                       w6_ref, b6_ref, g6_ref, be6_ref,
                       wcls_ref, bcls_ref,
                       o_ref, norm_sc, acc_sc,
                       *, d_in_true, d_mid_true, d_last_true):
    """Last three layers fused (W6 / W_cls stay resident in VMEM):
       h5 = relu(LN_in(x) @ W5 + b5)
       h6 = relu(LN5(h5) @ W6 + b6)
       o  = LN6(h6) @ W_cls + b_cls
    """
    k = pl.program_id(0)
    tk = w5_ref.shape[0]

    @pl.when(k == 0)
    def _():
        norm_sc[...] = _masked_layer_norm(
            x_ref[...], g_ref[...], bln_ref[...], d_in_true).astype(jnp.bfloat16)
        acc_sc[...] = jnp.zeros_like(acc_sc)

    off = pl.multiple_of(k * tk, _LANE)
    acc_sc[...] += jnp.dot(norm_sc[:, pl.ds(off, tk)], w5_ref[...],
                           preferred_element_type=jnp.float32)

    @pl.when(k == pl.num_programs(0) - 1)
    def _():
        h5 = jnp.maximum(acc_sc[...] + b5_ref[...], 0.0)
        z5 = _masked_layer_norm(h5, g5_ref[...], be5_ref[...], d_mid_true)
        h6 = jnp.dot(z5.astype(jnp.bfloat16), w6_ref[...],
                     preferred_element_type=jnp.float32) + b6_ref[...]
        h6 = jnp.maximum(h6, 0.0)
        z6 = _masked_layer_norm(h6, g6_ref[...], be6_ref[...], d_last_true)
        logits = jnp.dot(z6.astype(jnp.bfloat16), wcls_ref[...],
                         preferred_element_type=jnp.float32) + bcls_ref[...]
        o_ref[...] = logits.astype(o_ref.dtype)


# ----------------------------------------------------------------------------
# pallas_call wrappers
# ----------------------------------------------------------------------------
def fused_block(x, g_in, b_in, w, b, *, d_in_true, apply_relu):
    """maybe_relu(LayerNorm(x; g_in, b_in) @ w + b) as one tiled pallas_call."""
    M, din_pad = x.shape
    dk, dout_pad = w.shape
    assert din_pad == dk
    vmem_limit, block_budget = _vmem_budgets()
    tn = _pick_tn(dout_pad)
    tk = _pick_tk(din_pad, tn, block_budget)
    grid = (dout_pad // tn, din_pad // tk)       # N outer (parallel), K inner (reduction)
    kernel = functools.partial(_fused_block_kernel,
                               d_in_true=d_in_true, apply_relu=apply_relu)
    return pl.pallas_call(
        kernel,
        out_shape=jax.ShapeDtypeStruct((M, dout_pad), jnp.float32),
        grid_spec=pltpu.PrefetchScalarGridSpec(
            num_scalar_prefetch=0,
            grid=grid,
            in_specs=[
                pl.BlockSpec((M, din_pad), lambda n, k: (0, 0)),   # resident activation
                pl.BlockSpec((1, din_pad), lambda n, k: (0, 0)),   # resident gamma_in
                pl.BlockSpec((1, din_pad), lambda n, k: (0, 0)),   # resident beta_in
                pl.BlockSpec((tk, tn), lambda n, k: (k, n)),       # weight stream (bf16)
                pl.BlockSpec((1, tn), lambda n, k: (0, n)),        # bias
            ],
            out_specs=pl.BlockSpec((M, tn), lambda n, k: (0, n)),
            scratch_shapes=[pltpu.VMEM((M, din_pad), jnp.bfloat16),  # normalized x (bf16)
                            pltpu.VMEM((M, tn), jnp.float32)],       # f32 accumulator
        ),
        compiler_params=pltpu.CompilerParams(
            dimension_semantics=("parallel", "arbitrary"),
            vmem_limit_bytes=vmem_limit),
    )(x, g_in.reshape(1, -1), b_in.reshape(1, -1), w, b.reshape(1, -1))


def fused_tail(x, g_in, b_in, w5, b5, g5, be5, w6, b6, g6, be6, wcls, bcls,
               *, d_in_true, d_mid_true, d_last_true):
    """Final three layers in a single pallas_call (small weights stay VMEM-resident)."""
    M, din_pad = x.shape
    dk5, d5_pad = w5.shape
    dk6, d6_pad = w6.shape
    dk7, dcls_pad = wcls.shape
    assert din_pad == dk5 and d5_pad == dk6 and d6_pad == dk7
    vmem_limit, block_budget = _vmem_budgets()
    tk = _pick_tk(din_pad, d5_pad, block_budget)
    grid = (din_pad // tk,)
    kernel = functools.partial(_fused_tail_kernel, d_in_true=d_in_true,
                               d_mid_true=d_mid_true, d_last_true=d_last_true)
    return pl.pallas_call(
        kernel,
        out_shape=jax.ShapeDtypeStruct((M, dcls_pad), jnp.float32),
        grid_spec=pltpu.PrefetchScalarGridSpec(
            num_scalar_prefetch=0,
            grid=grid,
            in_specs=[
                pl.BlockSpec((M, din_pad), lambda k: (0, 0)),
                pl.BlockSpec((1, din_pad), lambda k: (0, 0)),
                pl.BlockSpec((1, din_pad), lambda k: (0, 0)),
                pl.BlockSpec((tk, d5_pad), lambda k: (k, 0)),      # W5 streamed over K
                pl.BlockSpec((1, d5_pad), lambda k: (0, 0)),
                pl.BlockSpec((1, d5_pad), lambda k: (0, 0)),
                pl.BlockSpec((1, d5_pad), lambda k: (0, 0)),
                pl.BlockSpec((d5_pad, d6_pad), lambda k: (0, 0)),  # W6 resident
                pl.BlockSpec((1, d6_pad), lambda k: (0, 0)),
                pl.BlockSpec((1, d6_pad), lambda k: (0, 0)),
                pl.BlockSpec((1, d6_pad), lambda k: (0, 0)),
                pl.BlockSpec((d6_pad, dcls_pad), lambda k: (0, 0)),  # W_cls resident
                pl.BlockSpec((1, dcls_pad), lambda k: (0, 0)),
            ],
            out_specs=pl.BlockSpec((M, dcls_pad), lambda k: (0, 0)),
            scratch_shapes=[pltpu.VMEM((M, din_pad), jnp.bfloat16),
                            pltpu.VMEM((M, d5_pad), jnp.float32)],
        ),
        compiler_params=pltpu.CompilerParams(
            dimension_semantics=("arbitrary",),
            vmem_limit_bytes=vmem_limit),
    )(x, g_in.reshape(1, -1), b_in.reshape(1, -1),
      w5, b5.reshape(1, -1), g5.reshape(1, -1), be5.reshape(1, -1),
      w6, b6.reshape(1, -1), g6.reshape(1, -1), be6.reshape(1, -1),
      wcls, bcls.reshape(1, -1))


# ----------------------------------------------------------------------------
# FFN model (params stored pre-padded to 128-multiples, weights in bf16)
# ----------------------------------------------------------------------------
def _pad_to(a, shape):
    return jnp.pad(a, [(0, t - s) for s, t in zip(a.shape, shape)])


def init_ffn_params(key, dims):
    """dims = [D0, D1, ..., D_hidden, num_classes] (true sizes).  All tensors are
    zero-padded to 128-multiples so every layer tiles cleanly on the MXU/lanes."""
    d0, d0p = dims[0], _round_up(dims[0], _LANE)
    key, kg, kb = jax.random.split(key, 3)
    params = {
        "ln0_g": _pad_to(jax.random.uniform(kg, (d0,), jnp.float32, 0.5, 1.5), (d0p,)),
        "ln0_b": _pad_to(jax.random.uniform(kb, (d0,), jnp.float32, -0.1, 0.1), (d0p,)),
    }
    layers = []
    for i in range(1, len(dims)):
        din, dout = dims[i - 1], dims[i]
        dinp, doutp = _round_up(din, _LANE), _round_up(dout, _LANE)
        key, kw, kbias, kgm, kbe = jax.random.split(key, 5)
        bound = 1.0 / (din ** 0.5)               # PyTorch nn.Linear default init range.
        w = jax.random.uniform(kw, (din, dout), jnp.float32, -bound, bound)
        bb = jax.random.uniform(kbias, (dout,), jnp.float32, -bound, bound)
        layer = {"w": _pad_to(w.astype(jnp.bfloat16), (dinp, doutp)),
                 "b": _pad_to(bb, (doutp,))}
        if i < len(dims) - 1:                    # all but linear_out feed a LayerNorm
            layer["ln_g"] = _pad_to(
                jax.random.uniform(kgm, (dout,), jnp.float32, 0.5, 1.5), (doutp,))
            layer["ln_b"] = _pad_to(
                jax.random.uniform(kbe, (dout,), jnp.float32, -0.1, 0.1), (doutp,))
        layers.append(layer)
    params["layers"] = layers
    return params


@functools.partial(jax.jit, static_argnames=("dims",))
def ffn_forward(params, x, dims):
    B, d0 = x.shape
    assert d0 == dims[0]
    layers = params["layers"]
    assert len(layers) >= 3
    d0_pad = _round_up(dims[0], _LANE)
    M = max(_round_up(B, _SUBLANE), _SUBLANE)    # pad batch to a full sublane group
    x = jnp.pad(x.astype(jnp.float32), ((0, M - B), (0, d0_pad - d0)))

    g_in, b_in = params["ln0_g"], params["ln0_b"]
    d_in_true = dims[0]
    n_stream = len(layers) - 3                   # last 3 layers handled by the tail
    for i in range(n_stream):
        layer = layers[i]
        x = fused_block(x, g_in, b_in, layer["w"], layer["b"],
                        d_in_true=d_in_true, apply_relu=True)
        g_in, b_in = layer["ln_g"], layer["ln_b"]
        d_in_true = dims[i + 1]
        # Dropout(0.2) -> identity in eval mode.

    l5, l6, lout = layers[-3], layers[-2], layers[-1]
    y = fused_tail(x, g_in, b_in,
                   l5["w"], l5["b"], l5["ln_g"], l5["ln_b"],
                   l6["w"], l6["b"], l6["ln_g"], l6["ln_b"],
                   lout["w"], lout["b"],
                   d_in_true=d_in_true, d_mid_true=dims[-3], d_last_true=dims[-2])
    return y[:B, :dims[-1]]


# Pure-JAX reference mirroring the kernel's precision and padding (bf16 matmul
# operands, f32 accumulation, masked LayerNorm statistics over the true widths).
def ffn_reference(params, x, dims):
    d0_pad = params["ln0_g"].shape[0]
    h = jnp.pad(x.astype(jnp.float32), ((0, 0), (0, d0_pad - dims[0])))
    g, b = params["ln0_g"], params["ln0_b"]
    d_true = dims[0]
    layers = params["layers"]
    for i, layer in enumerate(layers[:-1]):
        z = _masked_layer_norm(h, g, b, d_true)
        h = jnp.maximum(jnp.dot(z.astype(jnp.bfloat16), layer["w"],
                                preferred_element_type=jnp.float32) + layer["b"], 0.0)
        g, b = layer["ln_g"], layer["ln_b"]
        d_true = dims[i + 1]
    last = layers[-1]
    z = _masked_layer_norm(h, g, b, d_true)
    out = jnp.dot(z.astype(jnp.bfloat16), last["w"],
                  preferred_element_type=jnp.float32) + last["b"]
    return out[:, :dims[-1]]


if __name__ == "__main__":
    # Small shapes consistent with the module (batch, features), monotonically shrinking
    # feature chain ending in 8 classes.  Deliberately includes non-128-multiple dims
    # (2200, 640->..., 250, 100, 8) to exercise the padding/masked-LN path, plus dims
    # that trigger multiple K tiles and the split (2-tile) parallel N axis.
    dims = (2200, 1024, 640, 512, 384, 250, 100, 8)
    batch = 2

    key = jax.random.PRNGKey(0)
    key, kx, kp = jax.random.split(key, 3)
    x = jax.random.normal(kx, (batch, dims[0]), jnp.float32)
    params = init_ffn_params(kp, dims)

    out = jax.block_until_ready(ffn_forward(params, x, dims))
    assert out.shape == (batch, dims[-1])
    assert bool(jnp.all(jnp.isfinite(out)))

    ref = ffn_reference(params, x, dims)
    max_err = float(jnp.max(jnp.abs(out - ref)))
    assert jnp.allclose(out, ref, atol=1e-2, rtol=1e-2), (
        f"mismatch vs reference: max abs err {max_err:.3e}")

    print("KERNEL_OK")
</pallas_src>

<mosaic_0001>
module attributes {stable_mosaic.version = 11 : i64} {
  func.func @_fused_block_kernel(%arg0: i32, %arg1: i32, %arg2: memref<8x2304xf32, #tpu.memory_space<vmem>>, %arg3: memref<1x2304xf32, #tpu.memory_space<vmem>>, %arg4: memref<1x2304xf32, #tpu.memory_space<vmem>>, %arg5: memref<1152x512xbf16, #tpu.memory_space<vmem>>, %arg6: memref<1x512xf32, #tpu.memory_space<vmem>>, %arg7: memref<8x512xf32, #tpu.memory_space<vmem>>, %arg8: memref<8x2304xbf16, #tpu.memory_space<vmem>>, %arg9: memref<8x512xf32, #tpu.memory_space<vmem>>) attributes {dimension_semantics = [#tpu.dimension_semantics<parallel>, #tpu.dimension_semantics<arbitrary>], iteration_bounds = array<i64: 2, 2>, scalar_prefetch = 0 : i64, scratch_operands = 2 : i64, tpu.core_type = #tpu.core_type<tc>, window_params = [{pipeline_mode = #tpu.pipeline_mode<synchronous>, transform_indices = @transform_0, window_bounds = array<i64: 8, 2304>}, {pipeline_mode = #tpu.pipeline_mode<synchronous>, transform_indices = @transform_1, window_bounds = array<i64: 1, 2304>}, {pipeline_mode = #tpu.pipeline_mode<synchronous>, transform_indices = @transform_2, window_bounds = array<i64: 1, 2304>}, {transform_indices = @transform_3, window_bounds = array<i64: 1152, 512>}, {transform_indices = @transform_4, window_bounds = array<i64: 1, 512>}, {transform_indices = @transform_5, window_bounds = array<i64: 8, 512>}]} {
    %c0_i32 = arith.constant 0 : i32
    %0 = arith.cmpi eq, %arg1, %c0_i32 : i32
    %1 = arith.extui %0 : i1 to i32
    %c0_i32_0 = arith.constant 0 : i32
    %2 = arith.cmpi ne, %1, %c0_i32_0 : i32
    scf.if %2 {
      %c0_8 = arith.constant 0 : index
      %c0_9 = arith.constant 0 : index
      %15 = vector.load %arg2[%c0_8, %c0_9] : memref<8x2304xf32, #tpu.memory_space<vmem>>, vector<8x2304xf32>
      %c0_10 = arith.constant 0 : index
      %c0_11 = arith.constant 0 : index
      %16 = vector.load %arg3[%c0_10, %c0_11] : memref<1x2304xf32, #tpu.memory_space<vmem>>, vector<1x2304xf32>
      %c0_12 = arith.constant 0 : index
      %c0_13 = arith.constant 0 : index
      %17 = vector.load %arg4[%c0_12, %c0_13] : memref<1x2304xf32, #tpu.memory_space<vmem>>, vector<1x2304xf32>
      %cst_14 = arith.constant dense<0.000000e+00> : vector<8xf32>
      %18 = vector.multi_reduction <add>, %15, %cst_14 [1] : vector<8x2304xf32> to vector<8xf32>
      %19 = vector.shape_cast %18 : vector<8xf32> to vector<8x1xf32>
      %cst_15 = arith.constant 4.54545458E-4 : f32
      %20 = vector.broadcast %cst_15 : f32 to vector<8x1xf32>
      %21 = arith.mulf %19, %20 : vector<8x1xf32>
      %22 = arith.mulf %15, %15 : vector<8x2304xf32>
      %cst_16 = arith.constant dense<0.000000e+00> : vector<8xf32>
      %23 = vector.multi_reduction <add>, %22, %cst_16 [1] : vector<8x2304xf32> to vector<8xf32>
      %24 = vector.shape_cast %23 : vector<8xf32> to vector<8x1xf32>
      %cst_17 = arith.constant 4.54545458E-4 : f32
      %25 = vector.broadcast %cst_17 : f32 to vector<8x1xf32>
      %26 = arith.mulf %24, %25 : vector<8x1xf32>
      %27 = arith.mulf %21, %21 : vector<8x1xf32>
      %28 = arith.subf %26, %27 : vector<8x1xf32>
      %29 = vector.broadcast %21 : vector<8x1xf32> to vector<8x2304xf32>
      %30 = arith.subf %15, %29 : vector<8x2304xf32>
      %cst_18 = arith.constant 9.99999974E-6 : f32
      %31 = vector.broadcast %cst_18 : f32 to vector<8x1xf32>
      %32 = arith.addf %28, %31 : vector<8x1xf32>
      %33 = math.rsqrt %32 : vector<8x1xf32>
      %34 = vector.broadcast %33 : vector<8x1xf32> to vector<8x2304xf32>
      %35 = arith.mulf %30, %34 : vector<8x2304xf32>
      %36 = vector.broadcast %16 : vector<1x2304xf32> to vector<8x2304xf32>
      %37 = arith.mulf %35, %36 : vector<8x2304xf32>
      %38 = vector.broadcast %17 : vector<1x2304xf32> to vector<8x2304xf32>
      %39 = arith.addf %37, %38 : vector<8x2304xf32>
      %40 = arith.truncf %39 : vector<8x2304xf32> to vector<8x2304xbf16>
      %c0_19 = arith.constant 0 : index
      %c0_20 = arith.constant 0 : index
      %41 = vector.load %arg8[%c0_19, %c0_20] : memref<8x2304xbf16, #tpu.memory_space<vmem>>, vector<8x2304xbf16>
      tpu.vector_store %arg8[%c0_19, %c0_20], %40 {strides = array<i32>} : memref<8x2304xbf16, #tpu.memory_space<vmem>>, vector<8x2304xbf16>,
      %cst_21 = arith.constant 0.000000e+00 : f32
      %42 = vector.broadcast %cst_21 : f32 to vector<8x512xf32>
      %c0_22 = arith.constant 0 : index
      %c0_23 = arith.constant 0 : index
      %43 = vector.load %arg9[%c0_22, %c0_23] : memref<8x512xf32, #tpu.memory_space<vmem>>, vector<8x512xf32>
      tpu.vector_store %arg9[%c0_22, %c0_23], %42 {strides = array<i32>} : memref<8x512xf32, #tpu.memory_space<vmem>>, vector<8x512xf32>,
    } else {
    }
    %c1152_i32 = arith.constant 1152 : i32
    %3 = arith.muli %arg1, %c1152_i32 : i32
    %4 = tpu.assume_multiple %3, 128 : i32
    %c0 = arith.constant 0 : index
    %c0_1 = arith.constant 0 : index
    %5 = vector.load %arg9[%c0, %c0_1] : memref<8x512xf32, #tpu.memory_space<vmem>>, vector<8x512xf32>
    %c0_2 = arith.constant 0 : index
    %6 = arith.index_cast %4 : i32 to index
    %7 = vector.load %arg8[%c0_2, %6] : memref<8x2304xbf16, #tpu.memory_space<vmem>>, vector<8x1152xbf16>
    %c0_3 = arith.constant 0 : index
    %c0_4 = arith.constant 0 : index
    %8 = vector.load %arg5[%c0_3, %c0_4] : memref<1152x512xbf16, #tpu.memory_space<vmem>>, vector<1152x512xbf16>
    %cst = arith.constant dense<0.000000e+00> : vector<8x512xf32>
    %9 = tpu.matmul %7, %8, %cst {dimension_numbers = #tpu.dot_dimension_numbers<[1], [0], [0], [1], [0, 0, 1, 1], [], []>} : vector<8x1152xbf16>, vector<1152x512xbf16>, vector<8x512xf32> -> vector<8x512xf32>
    %10 = arith.addf %5, %9 : vector<8x512xf32>
    %c0_5 = arith.constant 0 : index
    %c0_6 = arith.constant 0 : index
    %11 = vector.load %arg9[%c0_5, %c0_6] : memref<8x512xf32, #tpu.memory_space<vmem>>, vector<8x512xf32>
    tpu.vector_store %arg9[%c0_5, %c0_6], %10 {strides = array<i32>} : memref<8x512xf32, #tpu.memory_space<vmem>>, vector<8x512xf32>,
    %c1_i32 = arith.constant 1 : i32
    %12 = arith.cmpi eq, %arg1, %c1_i32 : i32
    %13 = arith.extui %12 : i1 to i32
    %c0_i32_7 = arith.constant 0 : i32
    %14 = arith.cmpi ne, %13, %c0_i32_7 : i32
    scf.if %14 {
      %c0_8 = arith.constant 0 : index
      %c0_9 = arith.constant 0 : index
      %15 = vector.load %arg9[%c0_8, %c0_9] : memref<8x512xf32, #tpu.memory_space<vmem>>, vector<8x512xf32>
      %c0_10 = arith.constant 0 : index
      %c0_11 = arith.constant 0 : index
      %16 = vector.load %arg6[%c0_10, %c0_11] : memref<1x512xf32, #tpu.memory_space<vmem>>, vector<1x512xf32>
      %17 = vector.broadcast %16 : vector<1x512xf32> to vector<8x512xf32>
      %18 = arith.addf %15, %17 : vector<8x512xf32>
      %cst_12 = arith.constant 0.000000e+00 : f32
      %19 = vector.broadcast %cst_12 : f32 to vector<8x512xf32>
      %20 = arith.maximumf %18, %19 : vector<8x512xf32>
      %c0_13 = arith.constant 0 : index
      %c0_14 = arith.constant 0 : index
      %21 = vector.load %arg7[%c0_13, %c0_14] : memref<8x512xf32, #tpu.memory_space<vmem>>, vector<8x512xf32>
      tpu.vector_store %arg7[%c0_13, %c0_14], %20 {strides = array<i32>} : memref<8x512xf32, #tpu.memory_space<vmem>>, vector<8x512xf32>,
    } else {
    }
    return
  }
  func.func @transform_0(%arg0: i32, %arg1: i32) -> (i32, i32) {
    %c0_i32 = arith.constant 0 : i32
    %c0_i32_0 = arith.constant 0 : i32
    %c0_i32_1 = arith.constant 0 : i32
    return %c0_i32, %c0_i32_0 : i32, i32
  }
  func.func @transform_1(%arg0: i32, %arg1: i32) -> (i32, i32) {
    %c0_i32 = arith.constant 0 : i32
    %c0_i32_0 = arith.constant 0 : i32
    %c0_i32_1 = arith.constant 0 : i32
    return %c0_i32, %c0_i32_0 : i32, i32
  }
  func.func @transform_2(%arg0: i32, %arg1: i32) -> (i32, i32) {
    %c0_i32 = arith.constant 0 : i32
    %c0_i32_0 = arith.constant 0 : i32
    %c0_i32_1 = arith.constant 0 : i32
    return %c0_i32, %c0_i32_0 : i32, i32
  }
  func.func @transform_3(%arg0: i32, %arg1: i32) -> (i32, i32) {
    %c0_i32 = arith.constant 0 : i32
    return %arg1, %arg0 : i32, i32
  }
  func.func @transform_4(%arg0: i32, %arg1: i32) -> (i32, i32) {
    %c0_i32 = arith.constant 0 : i32
    %c0_i32_0 = arith.constant 0 : i32
    return %c0_i32, %arg0 : i32, i32
  }
  func.func @transform_5(%arg0: i32, %arg1: i32) -> (i32, i32) {
    %c0_i32 = arith.constant 0 : i32
    %c0_i32_0 = arith.constant 0 : i32
    return %c0_i32, %arg0 : i32, i32
  }
}

module attributes {stable_mosaic.version = 11 : i64} {
  func.func @_fused_block_kernel(%arg0: i32, %arg1: i32, %arg2: memref<8x640xf32, #tpu.memory_space<vmem>>, %arg3: memref<1x640xf32, #tpu.memory_space<vmem>>, %arg4: memref<1x640xf32, #tpu.memory_space<vmem>>, %arg5: memref<640x256xbf16, #tpu.memory_space<vmem>>, %arg6: memref<1x256xf32, #tpu.memory_space<vmem>>, %arg7: memref<8x256xf32, #tpu.memory_space<vmem>>, %arg8: memref<8x640xbf16, #tpu.memory_space<vmem>>, %arg9: memref<8x256xf32, #tpu.memory_space<vmem>>) attributes {dimension_semantics = [#tpu.dimension_semantics<parallel>, #tpu.dimension_semantics<arbitrary>], iteration_bounds = array<i64: 2, 1>, scalar_prefetch = 0 : i64, scratch_operands = 2 : i64, tpu.core_type = #tpu.core_type<tc>, window_params = [{pipeline_mode = #tpu.pipeline_mode<synchronous>, transform_indices = @transform_0, window_bounds = array<i64: 8, 640>}, {pipeline_mode = #tpu.pipeline_mode<synchronous>, transform_indices = @transform_1, window_bounds = array<i64: 1, 640>}, {pipeline_mode = #tpu.pipeline_mode<synchronous>, transform_indices = @transform_2, window_bounds = array<i64: 1, 640>}, {transform_indices = @transform_3, window_bounds = array<i64: 640, 256>}, {transform_indices = @transform_4, window_bounds = array<i64: 1, 256>}, {transform_indices = @transform_5, window_bounds = array<i64: 8, 256>}]} {
    %c0_i32 = arith.constant 0 : i32
    %0 = arith.cmpi eq, %arg1, %c0_i32 : i32
    %1 = arith.extui %0 : i1 to i32
    %c0_i32_0 = arith.constant 0 : i32
    %2 = arith.cmpi ne, %1, %c0_i32_0 : i32
    scf.if %2 {
      %c0_9 = arith.constant 0 : index
      %c0_10 = arith.constant 0 : index
      %15 = vector.load %arg2[%c0_9, %c0_10] : memref<8x640xf32, #tpu.memory_space<vmem>>, vector<8x640xf32>
      %c0_11 = arith.constant 0 : index
      %c0_12 = arith.constant 0 : index
      %16 = vector.load %arg3[%c0_11, %c0_12] : memref<1x640xf32, #tpu.memory_space<vmem>>, vector<1x640xf32>
      %c0_13 = arith.constant 0 : index
      %c0_14 = arith.constant 0 : index
      %17 = vector.load %arg4[%c0_13, %c0_14] : memref<1x640xf32, #tpu.memory_space<vmem>>, vector<1x640xf32>
      %cst_15 = arith.constant dense<0.000000e+00> : vector<8xf32>
      %18 = vector.multi_reduction <add>, %15, %cst_15 [1] : vector<8x640xf32> to vector<8xf32>
      %19 = vector.shape_cast %18 : vector<8xf32> to vector<8x1xf32>
      %cst_16 = arith.constant 1.562500e-03 : f32
      %20 = vector.broadcast %cst_16 : f32 to vector<8x1xf32>
      %21 = arith.mulf %19, %20 : vector<8x1xf32>
      %22 = arith.mulf %15, %15 : vector<8x640xf32>
      %cst_17 = arith.constant dense<0.000000e+00> : vector<8xf32>
      %23 = vector.multi_reduction <add>, %22, %cst_17 [1] : vector<8x640xf32> to vector<8xf32>
      %24 = vector.shape_cast %23 : vector<8xf32> to vector<8x1xf32>
      %cst_18 = arith.constant 1.562500e-03 : f32
      %25 = vector.broadcast %cst_18 : f32 to vector<8x1xf32>
      %26 = arith.mulf %24, %25 : vector<8x1xf32>
      %27 = arith.mulf %21, %21 : vector<8x1xf32>
      %28 = arith.subf %26, %27 : vector<8x1xf32>
      %29 = vector.broadcast %21 : vector<8x1xf32> to vector<8x640xf32>
      %30 = arith.subf %15, %29 : vector<8x640xf32>
      %cst_19 = arith.constant 9.99999974E-6 : f32
      %31 = vector.broadcast %cst_19 : f32 to vector<8x1xf32>
      %32 = arith.addf %28, %31 : vector<8x1xf32>
      %33 = math.rsqrt %32 : vector<8x1xf32>
      %34 = vector.broadcast %33 : vector<8x1xf32> to vector<8x640xf32>
      %35 = arith.mulf %30, %34 : vector<8x640xf32>
      %36 = vector.broadcast %16 : vector<1x640xf32> to vector<8x640xf32>
      %37 = arith.mulf %35, %36 : vector<8x640xf32>
      %38 = vector.broadcast %17 : vector<1x640xf32> to vector<8x640xf32>
      %39 = arith.addf %37, %38 : vector<8x640xf32>
      %40 = arith.truncf %39 : vector<8x640xf32> to vector<8x640xbf16>
      %c0_20 = arith.constant 0 : index
      %c0_21 = arith.constant 0 : index
      %41 = vector.load %arg8[%c0_20, %c0_21] : memref<8x640xbf16, #tpu.memory_space<vmem>>, vector<8x640xbf16>
      tpu.vector_store %arg8[%c0_20, %c0_21], %40 {strides = array<i32>} : memref<8x640xbf16, #tpu.memory_space<vmem>>, vector<8x640xbf16>,
      %cst_22 = arith.constant 0.000000e+00 : f32
      %42 = vector.broadcast %cst_22 : f32 to vector<8x256xf32>
      %c0_23 = arith.constant 0 : index
      %c0_24 = arith.constant 0 : index
      %43 = vector.load %arg9[%c0_23, %c0_24] : memref<8x256xf32, #tpu.memory_space<vmem>>, vector<8x256xf32>
      tpu.vector_store %arg9[%c0_23, %c0_24], %42 {strides = array<i32>} : memref<8x256xf32, #tpu.memory_space<vmem>>, vector<8x256xf32>,
    } else {
    }
    %c640_i32 = arith.constant 640 : i32
    %3 = arith.muli %arg1, %c640_i32 : i32
    %4 = tpu.assume_multiple %3, 128 : i32
    %c0 = arith.constant 0 : index
    %c0_1 = arith.constant 0 : index
    %5 = vector.load %arg9[%c0, %c0_1] : memref<8x256xf32, #tpu.memory_space<vmem>>, vector<8x256xf32>
    %c0_2 = arith.constant 0 : index
    %6 = arith.index_cast %4 : i32 to index
    %7 = vector.load %arg8[%c0_2, %6] : memref<8x640xbf16, #tpu.memory_space<vmem>>, vector<8x640xbf16>
    %c0_3 = arith.constant 0 : index
    %c0_4 = arith.constant 0 : index
    %8 = vector.load %arg5[%c0_3, %c0_4] : memref<640x256xbf16, #tpu.memory_space<vmem>>, vector<640x256xbf16>
    %cst = arith.constant dense<0.000000e+00> : vector<8x256xf32>
    %9 = tpu.matmul %7, %8, %cst {dimension_numbers = #tpu.dot_dimension_numbers<[1], [0], [0], [1], [0, 0, 1, 1], [], []>} : vector<8x640xbf16>, vector<640x256xbf16>, vector<8x256xf32> -> vector<8x256xf32>
    %10 = arith.addf %5, %9 : vector<8x256xf32>
    %c0_5 = arith.constant 0 : index
    %c0_6 = arith.constant 0 : index
    %11 = vector.load %arg9[%c0_5, %c0_6] : memref<8x256xf32, #tpu.memory_space<vmem>>, vector<8x256xf32>
    tpu.vector_store %arg9[%c0_5, %c0_6], %10 {strides = array<i32>} : memref<8x256xf32, #tpu.memory_space<vmem>>, vector<8x256xf32>,
    %c0_i32_7 = arith.constant 0 : i32
    %12 = arith.cmpi eq, %arg1, %c0_i32_7 : i32
    %13 = arith.extui %12 : i1 to i32
    %c0_i32_8 = arith.constant 0 : i32
    %14 = arith.cmpi ne, %13, %c0_i32_8 : i32
    scf.if %14 {
      %c0_9 = arith.constant 0 : index
      %c0_10 = arith.constant 0 : index
      %15 = vector.load %arg9[%c0_9, %c0_10] : memref<8x256xf32, #tpu.memory_space<vmem>>, vector<8x256xf32>
      %c0_11 = arith.constant 0 : index
      %c0_12 = arith.constant 0 : index
      %16 = vector.load %arg6[%c0_11, %c0_12] : memref<1x256xf32, #tpu.memory_space<vmem>>, vector<1x256xf32>
      %17 = vector.broadcast %16 : vector<1x256xf32> to vector<8x256xf32>
      %18 = arith.addf %15, %17 : vector<8x256xf32>
      %cst_13 = arith.constant 0.000000e+00 : f32
      %19 = vector.broadcast %cst_13 : f32 to vector<8x256xf32>
      %20 = arith.maximumf %18, %19 : vector<8x256xf32>
      %c0_14 = arith.constant 0 : index
      %c0_15 = arith.constant 0 : index
      %21 = vector.load %arg7[%c0_14, %c0_15] : memref<8x256xf32, #tpu.memory_space<vmem>>, vector<8x256xf32>
      tpu.vector_store %arg7[%c0_14, %c0_15], %20 {strides = array<i32>} : memref<8x256xf32, #tpu.memory_space<vmem>>, vector<8x256xf32>,
    } else {
    }
    return
  }
  func.func @transform_0(%arg0: i32, %arg1: i32) -> (i32, i32) {
    %c0_i32 = arith.constant 0 : i32
    %c0_i32_0 = arith.constant 0 : i32
    %c0_i32_1 = arith.constant 0 : i32
    return %c0_i32, %c0_i32_0 : i32, i32
  }
  func.func @transform_1(%arg0: i32, %arg1: i32) -> (i32, i32) {
    %c0_i32 = arith.constant 0 : i32
    %c0_i32_0 = arith.constant 0 : i32
    %c0_i32_1 = arith.constant 0 : i32
    return %c0_i32, %c0_i32_0 : i32, i32
  }
  func.func @transform_2(%arg0: i32, %arg1: i32) -> (i32, i32) {
    %c0_i32 = arith.constant 0 : i32
    %c0_i32_0 = arith.constant 0 : i32
    %c0_i32_1 = arith.constant 0 : i32
    return %c0_i32, %c0_i32_0 : i32, i32
  }
  func.func @transform_3(%arg0: i32, %arg1: i32) -> (i32, i32) {
    %c0_i32 = arith.constant 0 : i32
    return %arg1, %arg0 : i32, i32
  }
  func.func @transform_4(%arg0: i32, %arg1: i32) -> (i32, i32) {
    %c0_i32 = arith.constant 0 : i32
    %c0_i32_0 = arith.constant 0 : i32
    return %c0_i32, %arg0 : i32, i32
  }
  func.func @transform_5(%arg0: i32, %arg1: i32) -> (i32, i32) {
    %c0_i32 = arith.constant 0 : i32
    %c0_i32_0 = arith.constant 0 : i32
    return %c0_i32, %arg0 : i32, i32
  }
}

module attributes {stable_mosaic.version = 11 : i64} {
  func.func @_fused_block_kernel(%arg0: i32, %arg1: i32, %arg2: memref<8x1024xf32, #tpu.memory_space<vmem>>, %arg3: memref<1x1024xf32, #tpu.memory_space<vmem>>, %arg4: memref<1x1024xf32, #tpu.memory_space<vmem>>, %arg5: memref<1024x640xbf16, #tpu.memory_space<vmem>>, %arg6: memref<1x640xf32, #tpu.memory_space<vmem>>, %arg7: memref<8x640xf32, #tpu.memory_space<vmem>>, %arg8: memref<8x1024xbf16, #tpu.memory_space<vmem>>, %arg9: memref<8x640xf32, #tpu.memory_space<vmem>>) attributes {dimension_semantics = [#tpu.dimension_semantics<parallel>, #tpu.dimension_semantics<arbitrary>], iteration_bounds = array<i64: 1, 1>, scalar_prefetch = 0 : i64, scratch_operands = 2 : i64, tpu.core_type = #tpu.core_type<tc>, window_params = [{pipeline_mode = #tpu.pipeline_mode<synchronous>, transform_indices = @transform_0, window_bounds = array<i64: 8, 1024>}, {pipeline_mode = #tpu.pipeline_mode<synchronous>, transform_indices = @transform_1, window_bounds = array<i64: 1, 1024>}, {pipeline_mode = #tpu.pipeline_mode<synchronous>, transform_indices = @transform_2, window_bounds = array<i64: 1, 1024>}, {transform_indices = @transform_3, window_bounds = array<i64: 1024, 640>}, {transform_indices = @transform_4, window_bounds = array<i64: 1, 640>}, {transform_indices = @transform_5, window_bounds = array<i64: 8, 640>}]} {
    %c0_i32 = arith.constant 0 : i32
    %0 = arith.cmpi eq, %arg1, %c0_i32 : i32
    %1 = arith.extui %0 : i1 to i32
    %c0_i32_0 = arith.constant 0 : i32
    %2 = arith.cmpi ne, %1, %c0_i32_0 : i32
    scf.if %2 {
      %c0_9 = arith.constant 0 : index
      %c0_10 = arith.constant 0 : index
      %15 = vector.load %arg2[%c0_9, %c0_10] : memref<8x1024xf32, #tpu.memory_space<vmem>>, vector<8x1024xf32>
      %c0_11 = arith.constant 0 : index
      %c0_12 = arith.constant 0 : index
      %16 = vector.load %arg3[%c0_11, %c0_12] : memref<1x1024xf32, #tpu.memory_space<vmem>>, vector<1x1024xf32>
      %c0_13 = arith.constant 0 : index
      %c0_14 = arith.constant 0 : index
      %17 = vector.load %arg4[%c0_13, %c0_14] : memref<1x1024xf32, #tpu.memory_space<vmem>>, vector<1x1024xf32>
      %cst_15 = arith.constant dense<0.000000e+00> : vector<8xf32>
      %18 = vector.multi_reduction <add>, %15, %cst_15 [1] : vector<8x1024xf32> to vector<8xf32>
      %19 = vector.shape_cast %18 : vector<8xf32> to vector<8x1xf32>
      %cst_16 = arith.constant 9.765625E-4 : f32
      %20 = vector.broadcast %cst_16 : f32 to vector<8x1xf32>
      %21 = arith.mulf %19, %20 : vector<8x1xf32>
      %22 = arith.mulf %15, %15 : vector<8x1024xf32>
      %cst_17 = arith.constant dense<0.000000e+00> : vector<8xf32>
      %23 = vector.multi_reduction <add>, %22, %cst_17 [1] : vector<8x1024xf32> to vector<8xf32>
      %24 = vector.shape_cast %23 : vector<8xf32> to vector<8x1xf32>
      %cst_18 = arith.constant 9.765625E-4 : f32
      %25 = vector.broadcast %cst_18 : f32 to vector<8x1xf32>
      %26 = arith.mulf %24, %25 : vector<8x1xf32>
      %27 = arith.mulf %21, %21 : vector<8x1xf32>
      %28 = arith.subf %26, %27 : vector<8x1xf32>
      %29 = vector.broadcast %21 : vector<8x1xf32> to vector<8x1024xf32>
      %30 = arith.subf %15, %29 : vector<8x1024xf32>
      %cst_19 = arith.constant 9.99999974E-6 : f32
      %31 = vector.broadcast %cst_19 : f32 to vector<8x1xf32>
      %32 = arith.addf %28, %31 : vector<8x1xf32>
      %33 = math.rsqrt %32 : vector<8x1xf32>
      %34 = vector.broadcast %33 : vector<8x1xf32> to vector<8x1024xf32>
      %35 = arith.mulf %30, %34 : vector<8x1024xf32>
      %36 = vector.broadcast %16 : vector<1x1024xf32> to vector<8x1024xf32>
      %37 = arith.mulf %35, %36 : vector<8x1024xf32>
      %38 = vector.broadcast %17 : vector<1x1024xf32> to vector<8x1024xf32>
      %39 = arith.addf %37, %38 : vector<8x1024xf32>
      %40 = arith.truncf %39 : vector<8x1024xf32> to vector<8x1024xbf16>
      %c0_20 = arith.constant 0 : index
      %c0_21 = arith.constant 0 : index
      %41 = vector.load %arg8[%c0_20, %c0_21] : memref<8x1024xbf16, #tpu.memory_space<vmem>>, vector<8x1024xbf16>
      tpu.vector_store %arg8[%c0_20, %c0_21], %40 {strides = array<i32>} : memref<8x1024xbf16, #tpu.memory_space<vmem>>, vector<8x1024xbf16>,
      %cst_22 = arith.constant 0.000000e+00 : f32
      %42 = vector.broadcast %cst_22 : f32 to vector<8x640xf32>
      %c0_23 = arith.constant 0 : index
      %c0_24 = arith.constant 0 : index
      %43 = vector.load %arg9[%c0_23, %c0_24] : memref<8x640xf32, #tpu.memory_space<vmem>>, vector<8x640xf32>
      tpu.vector_store %arg9[%c0_23, %c0_24], %42 {strides = array<i32>} : memref<8x640xf32, #tpu.memory_space<vmem>>, vector<8x640xf32>,
    } else {
    }
    %c1024_i32 = arith.constant 1024 : i32
    %3 = arith.muli %arg1, %c1024_i32 : i32
    %4 = tpu.assume_multiple %3, 128 : i32
    %c0 = arith.constant 0 : index
    %c0_1 = arith.constant 0 : index
    %5 = vector.load %arg9[%c0, %c0_1] : memref<8x640xf32, #tpu.memory_space<vmem>>, vector<8x640xf32>
    %c0_2 = arith.constant 0 : index
    %6 = arith.index_cast %4 : i32 to index
    %7 = vector.load %arg8[%c0_2, %6] : memref<8x1024xbf16, #tpu.memory_space<vmem>>, vector<8x1024xbf16>
    %c0_3 = arith.constant 0 : index
    %c0_4 = arith.constant 0 : index
    %8 = vector.load %arg5[%c0_3, %c0_4] : memref<1024x640xbf16, #tpu.memory_space<vmem>>, vector<1024x640xbf16>
    %cst = arith.constant dense<0.000000e+00> : vector<8x640xf32>
    %9 = tpu.matmul %7, %8, %cst {dimension_numbers = #tpu.dot_dimension_numbers<[1], [0], [0], [1], [0, 0, 1, 1], [], []>} : vector<8x1024xbf16>, vector<1024x640xbf16>, vector<8x640xf32> -> vector<8x640xf32>
    %10 = arith.addf %5, %9 : vector<8x640xf32>
    %c0_5 = arith.constant 0 : index
    %c0_6 = arith.constant 0 : index
    %11 = vector.load %arg9[%c0_5, %c0_6] : memref<8x640xf32, #tpu.memory_space<vmem>>, vector<8x640xf32>
    tpu.vector_store %arg9[%c0_5, %c0_6], %10 {strides = array<i32>} : memref<8x640xf32, #tpu.memory_space<vmem>>, vector<8x640xf32>,
    %c0_i32_7 = arith.constant 0 : i32
    %12 = arith.cmpi eq, %arg1, %c0_i32_7 : i32
    %13 = arith.extui %12 : i1 to i32
    %c0_i32_8 = arith.constant 0 : i32
    %14 = arith.cmpi ne, %13, %c0_i32_8 : i32
    scf.if %14 {
      %c0_9 = arith.constant 0 : index
      %c0_10 = arith.constant 0 : index
      %15 = vector.load %arg9[%c0_9, %c0_10] : memref<8x640xf32, #tpu.memory_space<vmem>>, vector<8x640xf32>
      %c0_11 = arith.constant 0 : index
      %c0_12 = arith.constant 0 : index
      %16 = vector.load %arg6[%c0_11, %c0_12] : memref<1x640xf32, #tpu.memory_space<vmem>>, vector<1x640xf32>
      %17 = vector.broadcast %16 : vector<1x640xf32> to vector<8x640xf32>
      %18 = arith.addf %15, %17 : vector<8x640xf32>
      %cst_13 = arith.constant 0.000000e+00 : f32
      %19 = vector.broadcast %cst_13 : f32 to vector<8x640xf32>
      %20 = arith.maximumf %18, %19 : vector<8x640xf32>
      %c0_14 = arith.constant 0 : index
      %c0_15 = arith.constant 0 : index
      %21 = vector.load %arg7[%c0_14, %c0_15] : memref<8x640xf32, #tpu.memory_space<vmem>>, vector<8x640xf32>
      tpu.vector_store %arg7[%c0_14, %c0_15], %20 {strides = array<i32>} : memref<8x640xf32, #tpu.memory_space<vmem>>, vector<8x640xf32>,
    } else {
    }
    return
  }
  func.func @transform_0(%arg0: i32, %arg1: i32) -> (i32, i32) {
    %c0_i32 = arith.constant 0 : i32
    %c0_i32_0 = arith.constant 0 : i32
    %c0_i32_1 = arith.constant 0 : i32
    return %c0_i32, %c0_i32_0 : i32, i32
  }
  func.func @transform_1(%arg0: i32, %arg1: i32) -> (i32, i32) {
    %c0_i32 = arith.constant 0 : i32
    %c0_i32_0 = arith.constant 0 : i32
    %c0_i32_1 = arith.constant 0 : i32
    return %c0_i32, %c0_i32_0 : i32, i32
  }
  func.func @transform_2(%arg0: i32, %arg1: i32) -> (i32, i32) {
    %c0_i32 = arith.constant 0 : i32
    %c0_i32_0 = arith.constant 0 : i32
    %c0_i32_1 = arith.constant 0 : i32
    return %c0_i32, %c0_i32_0 : i32, i32
  }
  func.func @transform_3(%arg0: i32, %arg1: i32) -> (i32, i32) {
    %c0_i32 = arith.constant 0 : i32
    return %arg1, %arg0 : i32, i32
  }
  func.func @transform_4(%arg0: i32, %arg1: i32) -> (i32, i32) {
    %c0_i32 = arith.constant 0 : i32
    %c0_i32_0 = arith.constant 0 : i32
    return %c0_i32, %arg0 : i32, i32
  }
  func.func @transform_5(%arg0: i32, %arg1: i32) -> (i32, i32) {
    %c0_i32 = arith.constant 0 : i32
    %c0_i32_0 = arith.constant 0 : i32
    return %c0_i32, %arg0 : i32, i32
  }
}

module attributes {stable_mosaic.version = 11 : i64} {
  func.func @_fused_block_kernel(%arg0: i32, %arg1: i32, %arg2: memref<8x512xf32, #tpu.memory_space<vmem>>, %arg3: memref<1x512xf32, #tpu.memory_space<vmem>>, %arg4: memref<1x512xf32, #tpu.memory_space<vmem>>, %arg5: memref<512x384xbf16, #tpu.memory_space<vmem>>, %arg6: memref<1x384xf32, #tpu.memory_space<vmem>>, %arg7: memref<8x384xf32, #tpu.memory_space<vmem>>, %arg8: memref<8x512xbf16, #tpu.memory_space<vmem>>, %arg9: memref<8x384xf32, #tpu.memory_space<vmem>>) attributes {dimension_semantics = [#tpu.dimension_semantics<parallel>, #tpu.dimension_semantics<arbitrary>], iteration_bounds = array<i64: 1, 1>, scalar_prefetch = 0 : i64, scratch_operands = 2 : i64, tpu.core_type = #tpu.core_type<tc>, window_params = [{pipeline_mode = #tpu.pipeline_mode<synchronous>, transform_indices = @transform_0, window_bounds = array<i64: 8, 512>}, {pipeline_mode = #tpu.pipeline_mode<synchronous>, transform_indices = @transform_1, window_bounds = array<i64: 1, 512>}, {pipeline_mode = #tpu.pipeline_mode<synchronous>, transform_indices = @transform_2, window_bounds = array<i64: 1, 512>}, {transform_indices = @transform_3, window_bounds = array<i64: 512, 384>}, {transform_indices = @transform_4, window_bounds = array<i64: 1, 384>}, {transform_indices = @transform_5, window_bounds = array<i64: 8, 384>}]} {
    %c0_i32 = arith.constant 0 : i32
    %0 = arith.cmpi eq, %arg1, %c0_i32 : i32
    %1 = arith.extui %0 : i1 to i32
    %c0_i32_0 = arith.constant 0 : i32
    %2 = arith.cmpi ne, %1, %c0_i32_0 : i32
    scf.if %2 {
      %c0_9 = arith.constant 0 : index
      %c0_10 = arith.constant 0 : index
      %15 = vector.load %arg2[%c0_9, %c0_10] : memref<8x512xf32, #tpu.memory_space<vmem>>, vector<8x512xf32>
      %c0_11 = arith.constant 0 : index
      %c0_12 = arith.constant 0 : index
      %16 = vector.load %arg3[%c0_11, %c0_12] : memref<1x512xf32, #tpu.memory_space<vmem>>, vector<1x512xf32>
      %c0_13 = arith.constant 0 : index
      %c0_14 = arith.constant 0 : index
      %17 = vector.load %arg4[%c0_13, %c0_14] : memref<1x512xf32, #tpu.memory_space<vmem>>, vector<1x512xf32>
      %cst_15 = arith.constant dense<0.000000e+00> : vector<8xf32>
      %18 = vector.multi_reduction <add>, %15, %cst_15 [1] : vector<8x512xf32> to vector<8xf32>
      %19 = vector.shape_cast %18 : vector<8xf32> to vector<8x1xf32>
      %cst_16 = arith.constant 0.001953125 : f32
      %20 = vector.broadcast %cst_16 : f32 to vector<8x1xf32>
      %21 = arith.mulf %19, %20 : vector<8x1xf32>
      %22 = arith.mulf %15, %15 : vector<8x512xf32>
      %cst_17 = arith.constant dense<0.000000e+00> : vector<8xf32>
      %23 = vector.multi_reduction <add>, %22, %cst_17 [1] : vector<8x512xf32> to vector<8xf32>
      %24 = vector.shape_cast %23 : vector<8xf32> to vector<8x1xf32>
      %cst_18 = arith.constant 0.001953125 : f32
      %25 = vector.broadcast %cst_18 : f32 to vector<8x1xf32>
      %26 = arith.mulf %24, %25 : vector<8x1xf32>
      %27 = arith.mulf %21, %21 : vector<8x1xf32>
      %28 = arith.subf %26, %27 : vector<8x1xf32>
      %29 = vector.broadcast %21 : vector<8x1xf32> to vector<8x512xf32>
      %30 = arith.subf %15, %29 : vector<8x512xf32>
      %cst_19 = arith.constant 9.99999974E-6 : f32
      %31 = vector.broadcast %cst_19 : f32 to vector<8x1xf32>
      %32 = arith.addf %28, %31 : vector<8x1xf32>
      %33 = math.rsqrt %32 : vector<8x1xf32>
      %34 = vector.broadcast %33 : vector<8x1xf32> to vector<8x512xf32>
      %35 = arith.mulf %30, %34 : vector<8x512xf32>
      %36 = vector.broadcast %16 : vector<1x512xf32> to vector<8x512xf32>
      %37 = arith.mulf %35, %36 : vector<8x512xf32>
      %38 = vector.broadcast %17 : vector<1x512xf32> to vector<8x512xf32>
      %39 = arith.addf %37, %38 : vector<8x512xf32>
      %40 = arith.truncf %39 : vector<8x512xf32> to vector<8x512xbf16>
      %c0_20 = arith.constant 0 : index
      %c0_21 = arith.constant 0 : index
      %41 = vector.load %arg8[%c0_20, %c0_21] : memref<8x512xbf16, #tpu.memory_space<vmem>>, vector<8x512xbf16>
      tpu.vector_store %arg8[%c0_20, %c0_21], %40 {strides = array<i32>} : memref<8x512xbf16, #tpu.memory_space<vmem>>, vector<8x512xbf16>,
      %cst_22 = arith.constant 0.000000e+00 : f32
      %42 = vector.broadcast %cst_22 : f32 to vector<8x384xf32>
      %c0_23 = arith.constant 0 : index
      %c0_24 = arith.constant 0 : index
      %43 = vector.load %arg9[%c0_23, %c0_24] : memref<8x384xf32, #tpu.memory_space<vmem>>, vector<8x384xf32>
      tpu.vector_store %arg9[%c0_23, %c0_24], %42 {strides = array<i32>} : memref<8x384xf32, #tpu.memory_space<vmem>>, vector<8x384xf32>,
    } else {
    }
    %c512_i32 = arith.constant 512 : i32
    %3 = arith.muli %arg1, %c512_i32 : i32
    %4 = tpu.assume_multiple %3, 128 : i32
    %c0 = arith.constant 0 : index
    %c0_1 = arith.constant 0 : index
    %5 = vector.load %arg9[%c0, %c0_1] : memref<8x384xf32, #tpu.memory_space<vmem>>, vector<8x384xf32>
    %c0_2 = arith.constant 0 : index
    %6 = arith.index_cast %4 : i32 to index
    %7 = vector.load %arg8[%c0_2, %6] : memref<8x512xbf16, #tpu.memory_space<vmem>>, vector<8x512xbf16>
    %c0_3 = arith.constant 0 : index
    %c0_4 = arith.constant 0 : index
    %8 = vector.load %arg5[%c0_3, %c0_4] : memref<512x384xbf16, #tpu.memory_space<vmem>>, vector<512x384xbf16>
    %cst = arith.constant dense<0.000000e+00> : vector<8x384xf32>
    %9 = tpu.matmul %7, %8, %cst {dimension_numbers = #tpu.dot_dimension_numbers<[1], [0], [0], [1], [0, 0, 1, 1], [], []>} : vector<8x512xbf16>, vector<512x384xbf16>, vector<8x384xf32> -> vector<8x384xf32>
    %10 = arith.addf %5, %9 : vector<8x384xf32>
    %c0_5 = arith.constant 0 : index
    %c0_6 = arith.constant 0 : index
    %11 = vector.load %arg9[%c0_5, %c0_6] : memref<8x384xf32, #tpu.memory_space<vmem>>, vector<8x384xf32>
    tpu.vector_store %arg9[%c0_5, %c0_6], %10 {strides = array<i32>} : memref<8x384xf32, #tpu.memory_space<vmem>>, vector<8x384xf32>,
    %c0_i32_7 = arith.constant 0 : i32
    %12 = arith.cmpi eq, %arg1, %c0_i32_7 : i32
    %13 = arith.extui %12 : i1 to i32
    %c0_i32_8 = arith.constant 0 : i32
    %14 = arith.cmpi ne, %13, %c0_i32_8 : i32
    scf.if %14 {
      %c0_9 = arith.constant 0 : index
      %c0_10 = arith.constant 0 : index
      %15 = vector.load %arg9[%c0_9, %c0_10] : memref<8x384xf32, #tpu.memory_space<vmem>>, vector<8x384xf32>
      %c0_11 = arith.constant 0 : index
      %c0_12 = arith.constant 0 : index
      %16 = vector.load %arg6[%c0_11, %c0_12] : memref<1x384xf32, #tpu.memory_space<vmem>>, vector<1x384xf32>
      %17 = vector.broadcast %16 : vector<1x384xf32> to vector<8x384xf32>
      %18 = arith.addf %15, %17 : vector<8x384xf32>
      %cst_13 = arith.constant 0.000000e+00 : f32
      %19 = vector.broadcast %cst_13 : f32 to vector<8x384xf32>
      %20 = arith.maximumf %18, %19 : vector<8x384xf32>
      %c0_14 = arith.constant 0 : index
      %c0_15 = arith.constant 0 : index
      %21 = vector.load %arg7[%c0_14, %c0_15] : memref<8x384xf32, #tpu.memory_space<vmem>>, vector<8x384xf32>
      tpu.vector_store %arg7[%c0_14, %c0_15], %20 {strides = array<i32>} : memref<8x384xf32, #tpu.memory_space<vmem>>, vector<8x384xf32>,
    } else {
    }
    return
  }
  func.func @transform_0(%arg0: i32, %arg1: i32) -> (i32, i32) {
    %c0_i32 = arith.constant 0 : i32
    %c0_i32_0 = arith.constant 0 : i32
    %c0_i32_1 = arith.constant 0 : i32
    return %c0_i32, %c0_i32_0 : i32, i32
  }
  func.func @transform_1(%arg0: i32, %arg1: i32) -> (i32, i32) {
    %c0_i32 = arith.constant 0 : i32
    %c0_i32_0 = arith.constant 0 : i32
    %c0_i32_1 = arith.constant 0 : i32
    return %c0_i32, %c0_i32_0 : i32, i32
  }
  func.func @transform_2(%arg0: i32, %arg1: i32) -> (i32, i32) {
    %c0_i32 = arith.constant 0 : i32
    %c0_i32_0 = arith.constant 0 : i32
    %c0_i32_1 = arith.constant 0 : i32
    return %c0_i32, %c0_i32_0 : i32, i32
  }
  func.func @transform_3(%arg0: i32, %arg1: i32) -> (i32, i32) {
    %c0_i32 = arith.constant 0 : i32
    return %arg1, %arg0 : i32, i32
  }
  func.func @transform_4(%arg0: i32, %arg1: i32) -> (i32, i32) {
    %c0_i32 = arith.constant 0 : i32
    %c0_i32_0 = arith.constant 0 : i32
    return %c0_i32, %arg0 : i32, i32
  }
  func.func @transform_5(%arg0: i32, %arg1: i32) -> (i32, i32) {
    %c0_i32 = arith.constant 0 : i32
    %c0_i32_0 = arith.constant 0 : i32
    return %c0_i32, %arg0 : i32, i32
  }
}

module attributes {stable_mosaic.version = 11 : i64} {
  func.func @_fused_tail_kernel(%arg0: i32, %arg1: memref<8x384xf32, #tpu.memory_space<vmem>>, %arg2: memref<1x384xf32, #tpu.memory_space<vmem>>, %arg3: memref<1x384xf32, #tpu.memory_space<vmem>>, %arg4: memref<384x256xbf16, #tpu.memory_space<vmem>>, %arg5: memref<1x256xf32, #tpu.memory_space<vmem>>, %arg6: memref<1x256xf32, #tpu.memory_space<vmem>>, %arg7: memref<1x256xf32, #tpu.memory_space<vmem>>, %arg8: memref<256x128xbf16, #tpu.memory_space<vmem>>, %arg9: memref<1x128xf32, #tpu.memory_space<vmem>>, %arg10: memref<1x128xf32, #tpu.memory_space<vmem>>, %arg11: memref<1x128xf32, #tpu.memory_space<vmem>>, %arg12: memref<128x128xbf16, #tpu.memory_space<vmem>>, %arg13: memref<1x128xf32, #tpu.memory_space<vmem>>, %arg14: memref<8x128xf32, #tpu.memory_space<vmem>>, %arg15: memref<8x384xbf16, #tpu.memory_space<vmem>>, %arg16: memref<8x256xf32, #tpu.memory_space<vmem>>) attributes {dimension_semantics = [#tpu.dimension_semantics<arbitrary>], iteration_bounds = array<i64: 1>, scalar_prefetch = 0 : i64, scratch_operands = 2 : i64, tpu.core_type = #tpu.core_type<tc>, window_params = [{pipeline_mode = #tpu.pipeline_mode<synchronous>, transform_indices = @transform_0, window_bounds = array<i64: 8, 384>}, {pipeline_mode = #tpu.pipeline_mode<synchronous>, transform_indices = @transform_1, window_bounds = array<i64: 1, 384>}, {pipeline_mode = #tpu.pipeline_mode<synchronous>, transform_indices = @transform_2, window_bounds = array<i64: 1, 384>}, {transform_indices = @transform_3, window_bounds = array<i64: 384, 256>}, {pipeline_mode = #tpu.pipeline_mode<synchronous>, transform_indices = @transform_4, window_bounds = array<i64: 1, 256>}, {pipeline_mode = #tpu.pipeline_mode<synchronous>, transform_indices = @transform_5, window_bounds = array<i64: 1, 256>}, {pipeline_mode = #tpu.pipeline_mode<synchronous>, transform_indices = @transform_6, window_bounds = array<i64: 1, 256>}, {pipeline_mode = #tpu.pipeline_mode<synchronous>, transform_indices = @transform_7, window_bounds = array<i64: 256, 128>}, {pipeline_mode = #tpu.pipeline_mode<synchronous>, transform_indices = @transform_8, window_bounds = array<i64: 1, 128>}, {pipeline_mode = #tpu.pipeline_mode<synchronous>, transform_indices = @transform_9, window_bounds = array<i64: 1, 128>}, {pipeline_mode = #tpu.pipeline_mode<synchronous>, transform_indices = @transform_10, window_bounds = array<i64: 1, 128>}, {pipeline_mode = #tpu.pipeline_mode<synchronous>, transform_indices = @transform_11, window_bounds = array<i64: 128, 128>}, {pipeline_mode = #tpu.pipeline_mode<synchronous>, transform_indices = @transform_12, window_bounds = array<i64: 1, 128>}, {pipeline_mode = #tpu.pipeline_mode<synchronous>, transform_indices = @transform_13, window_bounds = array<i64: 8, 128>}]} {
    %c0_i32 = arith.constant 0 : i32
    %0 = arith.cmpi eq, %arg0, %c0_i32 : i32
    %1 = arith.extui %0 : i1 to i32
    %c0_i32_0 = arith.constant 0 : i32
    %2 = arith.cmpi ne, %1, %c0_i32_0 : i32
    scf.if %2 {
      %c0_9 = arith.constant 0 : index
      %c0_10 = arith.constant 0 : index
      %15 = vector.load %arg1[%c0_9, %c0_10] : memref<8x384xf32, #tpu.memory_space<vmem>>, vector<8x384xf32>
      %c0_11 = arith.constant 0 : index
      %c0_12 = arith.constant 0 : index
      %16 = vector.load %arg2[%c0_11, %c0_12] : memref<1x384xf32, #tpu.memory_space<vmem>>, vector<1x384xf32>
      %c0_13 = arith.constant 0 : index
      %c0_14 = arith.constant 0 : index
      %17 = vector.load %arg3[%c0_13, %c0_14] : memref<1x384xf32, #tpu.memory_space<vmem>>, vector<1x384xf32>
      %cst_15 = arith.constant dense<0.000000e+00> : vector<8xf32>
      %18 = vector.multi_reduction <add>, %15, %cst_15 [1] : vector<8x384xf32> to vector<8xf32>
      %19 = vector.shape_cast %18 : vector<8xf32> to vector<8x1xf32>
      %cst_16 = arith.constant 0.00260416674 : f32
      %20 = vector.broadcast %cst_16 : f32 to vector<8x1xf32>
      %21 = arith.mulf %19, %20 : vector<8x1xf32>
      %22 = arith.mulf %15, %15 : vector<8x384xf32>
      %cst_17 = arith.constant dense<0.000000e+00> : vector<8xf32>
      %23 = vector.multi_reduction <add>, %22, %cst_17 [1] : vector<8x384xf32> to vector<8xf32>
      %24 = vector.shape_cast %23 : vector<8xf32> to vector<8x1xf32>
      %cst_18 = arith.constant 0.00260416674 : f32
      %25 = vector.broadcast %cst_18 : f32 to vector<8x1xf32>
      %26 = arith.mulf %24, %25 : vector<8x1xf32>
      %27 = arith.mulf %21, %21 : vector<8x1xf32>
      %28 = arith.subf %26, %27 : vector<8x1xf32>
      %29 = vector.broadcast %21 : vector<8x1xf32> to vector<8x384xf32>
      %30 = arith.subf %15, %29 : vector<8x384xf32>
      %cst_19 = arith.constant 9.99999974E-6 : f32
      %31 = vector.broadcast %cst_19 : f32 to vector<8x1xf32>
      %32 = arith.addf %28, %31 : vector<8x1xf32>
      %33 = math.rsqrt %32 : vector<8x1xf32>
      %34 = vector.broadcast %33 : vector<8x1xf32> to vector<8x384xf32>
      %35 = arith.mulf %30, %34 : vector<8x384xf32>
      %36 = vector.broadcast %16 : vector<1x384xf32> to vector<8x384xf32>
      %37 = arith.mulf %35, %36 : vector<8x384xf32>
      %38 = vector.broadcast %17 : vector<1x384xf32> to vector<8x384xf32>
      %39 = arith.addf %37, %38 : vector<8x384xf32>
      %40 = arith.truncf %39 : vector<8x384xf32> to vector<8x384xbf16>
      %c0_20 = arith.constant 0 : index
      %c0_21 = arith.constant 0 : index
      %41 = vector.load %arg15[%c0_20, %c0_21] : memref<8x384xbf16, #tpu.memory_space<vmem>>, vector<8x384xbf16>
      tpu.vector_store %arg15[%c0_20, %c0_21], %40 {strides = array<i32>} : memref<8x384xbf16, #tpu.memory_space<vmem>>, vector<8x384xbf16>,
      %cst_22 = arith.constant 0.000000e+00 : f32
      %42 = vector.broadcast %cst_22 : f32 to vector<8x256xf32>
      %c0_23 = arith.constant 0 : index
      %c0_24 = arith.constant 0 : index
      %43 = vector.load %arg16[%c0_23, %c0_24] : memref<8x256xf32, #tpu.memory_space<vmem>>, vector<8x256xf32>
      tpu.vector_store %arg16[%c0_23, %c0_24], %42 {strides = array<i32>} : memref<8x256xf32, #tpu.memory_space<vmem>>, vector<8x256xf32>,
    } else {
    }
    %c384_i32 = arith.constant 384 : i32
    %3 = arith.muli %arg0, %c384_i32 : i32
    %4 = tpu.assume_multiple %3, 128 : i32
    %c0 = arith.constant 0 : index
    %c0_1 = arith.constant 0 : index
    %5 = vector.load %arg16[%c0, %c0_1] : memref<8x256xf32, #tpu.memory_space<vmem>>, vector<8x256xf32>
    %c0_2 = arith.constant 0 : index
    %6 = arith.index_cast %4 : i32 to index
    %7 = vector.load %arg15[%c0_2, %6] : memref<8x384xbf16, #tpu.memory_space<vmem>>, vector<8x384xbf16>
    %c0_3 = arith.constant 0 : index
    %c0_4 = arith.constant 0 : index
    %8 = vector.load %arg4[%c0_3, %c0_4] : memref<384x256xbf16, #tpu.memory_space<vmem>>, vector<384x256xbf16>
    %cst = arith.constant dense<0.000000e+00> : vector<8x256xf32>
    %9 = tpu.matmul %7, %8, %cst {dimension_numbers = #tpu.dot_dimension_numbers<[1], [0], [0], [1], [0, 0, 1, 1], [], []>} : vector<8x384xbf16>, vector<384x256xbf16>, vector<8x256xf32> -> vector<8x256xf32>
    %10 = arith.addf %5, %9 : vector<8x256xf32>
    %c0_5 = arith.constant 0 : index
    %c0_6 = arith.constant 0 : index
    %11 = vector.load %arg16[%c0_5, %c0_6] : memref<8x256xf32, #tpu.memory_space<vmem>>, vector<8x256xf32>
    tpu.vector_store %arg16[%c0_5, %c0_6], %10 {strides = array<i32>} : memref<8x256xf32, #tpu.memory_space<vmem>>, vector<8x256xf32>,
    %c0_i32_7 = arith.constant 0 : i32
    %12 = arith.cmpi eq, %arg0, %c0_i32_7 : i32
    %13 = arith.extui %12 : i1 to i32
    %c0_i32_8 = arith.constant 0 : i32
    %14 = arith.cmpi ne, %13, %c0_i32_8 : i32
    scf.if %14 {
      %c0_9 = arith.constant 0 : index
      %c0_10 = arith.constant 0 : index
      %15 = vector.load %arg16[%c0_9, %c0_10] : memref<8x256xf32, #tpu.memory_space<vmem>>, vector<8x256xf32>
      %c0_11 = arith.constant 0 : index
      %c0_12 = arith.constant 0 : index
      %16 = vector.load %arg5[%c0_11, %c0_12] : memref<1x256xf32, #tpu.memory_space<vmem>>, vector<1x256xf32>
      %17 = vector.broadcast %16 : vector<1x256xf32> to vector<8x256xf32>
      %18 = arith.addf %15, %17 : vector<8x256xf32>
      %cst_13 = arith.constant 0.000000e+00 : f32
      %19 = vector.broadcast %cst_13 : f32 to vector<8x256xf32>
      %20 = arith.maximumf %18, %19 : vector<8x256xf32>
      %c0_14 = arith.constant 0 : index
      %c0_15 = arith.constant 0 : index
      %21 = vector.load %arg6[%c0_14, %c0_15] : memref<1x256xf32, #tpu.memory_space<vmem>>, vector<1x256xf32>
      %c0_16 = arith.constant 0 : index
      %c0_17 = arith.constant 0 : index
      %22 = vector.load %arg7[%c0_16, %c0_17] : memref<1x256xf32, #tpu.memory_space<vmem>>, vector<1x256xf32>
      %cst_18 = arith.constant dense<0.000000e+00> : vector<8xf32>
      %23 = vector.multi_reduction <add>, %20, %cst_18 [1] : vector<8x256xf32> to vector<8xf32>
      %24 = vector.shape_cast %23 : vector<8xf32> to vector<8x1xf32>
      %cst_19 = arith.constant 4.000000e-03 : f32
      %25 = vector.broadcast %cst_19 : f32 to vector<8x1xf32>
      %26 = arith.mulf %24, %25 : vector<8x1xf32>
      %27 = arith.mulf %20, %20 : vector<8x256xf32>
      %cst_20 = arith.constant dense<0.000000e+00> : vector<8xf32>
      %28 = vector.multi_reduction <add>, %27, %cst_20 [1] : vector<8x256xf32> to vector<8xf32>
      %29 = vector.shape_cast %28 : vector<8xf32> to vector<8x1xf32>
      %cst_21 = arith.constant 4.000000e-03 : f32
      %30 = vector.broadcast %cst_21 : f32 to vector<8x1xf32>
      %31 = arith.mulf %29, %30 : vector<8x1xf32>
      %32 = arith.mulf %26, %26 : vector<8x1xf32>
      %33 = arith.subf %31, %32 : vector<8x1xf32>
      %34 = vector.broadcast %26 : vector<8x1xf32> to vector<8x256xf32>
      %35 = arith.subf %20, %34 : vector<8x256xf32>
      %cst_22 = arith.constant 9.99999974E-6 : f32
      %36 = vector.broadcast %cst_22 : f32 to vector<8x1xf32>
      %37 = arith.addf %33, %36 : vector<8x1xf32>
      %38 = math.rsqrt %37 : vector<8x1xf32>
      %39 = vector.broadcast %38 : vector<8x1xf32> to vector<8x256xf32>
      %40 = arith.mulf %35, %39 : vector<8x256xf32>
      %41 = vector.broadcast %21 : vector<1x256xf32> to vector<8x256xf32>
      %42 = arith.mulf %40, %41 : vector<8x256xf32>
      %43 = vector.broadcast %22 : vector<1x256xf32> to vector<8x256xf32>
      %44 = arith.addf %42, %43 : vector<8x256xf32>
      %45 = arith.truncf %44 : vector<8x256xf32> to vector<8x256xbf16>
      %c0_23 = arith.constant 0 : index
      %c0_24 = arith.constant 0 : index
      %46 = vector.load %arg8[%c0_23, %c0_24] : memref<256x128xbf16, #tpu.memory_space<vmem>>, vector<256x128xbf16>
      %cst_25 = arith.constant dense<0.000000e+00> : vector<8x128xf32>
      %47 = tpu.matmul %45, %46, %cst_25 {dimension_numbers = #tpu.dot_dimension_numbers<[1], [0], [0], [1], [0, 0, 1, 1], [], []>} : vector<8x256xbf16>, vector<256x128xbf16>, vector<8x128xf32> -> vector<8x128xf32>
      %c0_26 = arith.constant 0 : index
      %c0_27 = arith.constant 0 : index
      %48 = vector.load %arg9[%c0_26, %c0_27] : memref<1x128xf32, #tpu.memory_space<vmem>>, vector<1x128xf32>
      %49 = vector.broadcast %48 : vector<1x128xf32> to vector<8x128xf32>
      %50 = arith.addf %47, %49 : vector<8x128xf32>
      %cst_28 = arith.constant 0.000000e+00 : f32
      %51 = vector.broadcast %cst_28 : f32 to vector<8x128xf32>
      %52 = arith.maximumf %50, %51 : vector<8x128xf32>
      %c0_29 = arith.constant 0 : index
      %c0_30 = arith.constant 0 : index
      %53 = vector.load %arg10[%c0_29, %c0_30] : memref<1x128xf32, #tpu.memory_space<vmem>>, vector<1x128xf32>
      %c0_31 = arith.constant 0 : index
      %c0_32 = arith.constant 0 : index
      %54 = vector.load %arg11[%c0_31, %c0_32] : memref<1x128xf32, #tpu.memory_space<vmem>>, vector<1x128xf32>
      %cst_33 = arith.constant dense<0.000000e+00> : vector<8xf32>
      %55 = vector.multi_reduction <add>, %52, %cst_33 [1] : vector<8x128xf32> to vector<8xf32>
      %56 = vector.shape_cast %55 : vector<8xf32> to vector<8x1xf32>
      %cst_34 = arith.constant 0.00999999977 : f32
      %57 = vector.broadcast %cst_34 : f32 to vector<8x1xf32>
      %58 = arith.mulf %56, %57 : vector<8x1xf32>
      %59 = arith.mulf %52, %52 : vector<8x128xf32>
      %cst_35 = arith.constant dense<0.000000e+00> : vector<8xf32>
      %60 = vector.multi_reduction <add>, %59, %cst_35 [1] : vector<8x128xf32> to vector<8xf32>
      %61 = vector.shape_cast %60 : vector<8xf32> to vector<8x1xf32>
      %cst_36 = arith.constant 0.00999999977 : f32
      %62 = vector.broadcast %cst_36 : f32 to vector<8x1xf32>
      %63 = arith.mulf %61, %62 : vector<8x1xf32>
      %64 = arith.mulf %58, %58 : vector<8x1xf32>
      %65 = arith.subf %63, %64 : vector<8x1xf32>
      %66 = vector.broadcast %58 : vector<8x1xf32> to vector<8x128xf32>
      %67 = arith.subf %52, %66 : vector<8x128xf32>
      %cst_37 = arith.constant 9.99999974E-6 : f32
      %68 = vector.broadcast %cst_37 : f32 to vector<8x1xf32>
      %69 = arith.addf %65, %68 : vector<8x1xf32>
      %70 = math.rsqrt %69 : vector<8x1xf32>
      %71 = vector.broadcast %70 : vector<8x1xf32> to vector<8x128xf32>
      %72 = arith.mulf %67, %71 : vector<8x128xf32>
      %73 = vector.broadcast %53 : vector<1x128xf32> to vector<8x128xf32>
      %74 = arith.mulf %72, %73 : vector<8x128xf32>
      %75 = vector.broadcast %54 : vector<1x128xf32> to vector<8x128xf32>
      %76 = arith.addf %74, %75 : vector<8x128xf32>
      %77 = arith.truncf %76 : vector<8x128xf32> to vector<8x128xbf16>
      %c0_38 = arith.constant 0 : index
      %c0_39 = arith.constant 0 : index
      %78 = vector.load %arg12[%c0_38, %c0_39] : memref<128x128xbf16, #tpu.memory_space<vmem>>, vector<128x128xbf16>
      %cst_40 = arith.constant dense<0.000000e+00> : vector<8x128xf32>
      %79 = tpu.matmul %77, %78, %cst_40 {dimension_numbers = #tpu.dot_dimension_numbers<[1], [0], [0], [1], [0, 0, 1, 1], [], []>} : vector<8x128xbf16>, vector<128x128xbf16>, vector<8x128xf32> -> vector<8x128xf32>
      %c0_41 = arith.constant 0 : index
      %c0_42 = arith.constant 0 : index
      %80 = vector.load %arg13[%c0_41, %c0_42] : memref<1x128xf32, #tpu.memory_space<vmem>>, vector<1x128xf32>
      %81 = vector.broadcast %80 : vector<1x128xf32> to vector<8x128xf32>
      %82 = arith.addf %79, %81 : vector<8x128xf32>
      %c0_43 = arith.constant 0 : index
      %c0_44 = arith.constant 0 : index
      %83 = vector.load %arg14[%c0_43, %c0_44] : memref<8x128xf32, #tpu.memory_space<vmem>>, vector<8x128xf32>
      tpu.vector_store %arg14[%c0_43, %c0_44], %82 {strides = array<i32>} : memref<8x128xf32, #tpu.memory_space<vmem>>, vector<8x128xf32>,
    } else {
    }
    return
  }
  func.func @transform_0(%arg0: i32) -> (i32, i32) {
    %c0_i32 = arith.constant 0 : i32
    %c0_i32_0 = arith.constant 0 : i32
    %c0_i32_1 = arith.constant 0 : i32
    return %c0_i32, %c0_i32_0 : i32, i32
  }
  func.func @transform_1(%arg0: i32) -> (i32, i32) {
    %c0_i32 = arith.constant 0 : i32
    %c0_i32_0 = arith.constant 0 : i32
    %c0_i32_1 = arith.constant 0 : i32
    return %c0_i32, %c0_i32_0 : i32, i32
  }
  func.func @transform_2(%arg0: i32) -> (i32, i32) {
    %c0_i32 = arith.constant 0 : i32
    %c0_i32_0 = arith.constant 0 : i32
    %c0_i32_1 = arith.constant 0 : i32
    return %c0_i32, %c0_i32_0 : i32, i32
  }
  func.func @transform_3(%arg0: i32) -> (i32, i32) {
    %c0_i32 = arith.constant 0 : i32
    %c0_i32_0 = arith.constant 0 : i32
    return %arg0, %c0_i32 : i32, i32
  }
  func.func @transform_4(%arg0: i32) -> (i32, i32) {
    %c0_i32 = arith.constant 0 : i32
    %c0_i32_0 = arith.constant 0 : i32
    %c0_i32_1 = arith.constant 0 : i32
    return %c0_i32, %c0_i32_0 : i32, i32
  }
  func.func @transform_5(%arg0: i32) -> (i32, i32) {
    %c0_i32 = arith.constant 0 : i32
    %c0_i32_0 = arith.constant 0 : i32
    %c0_i32_1 = arith.constant 0 : i32
    return %c0_i32, %c0_i32_0 : i32, i32
  }
  func.func @transform_6(%arg0: i32) -> (i32, i32) {
    %c0_i32 = arith.constant 0 : i32
    %c0_i32_0 = arith.constant 0 : i32
    %c0_i32_1 = arith.constant 0 : i32
    return %c0_i32, %c0_i32_0 : i32, i32
  }
  func.func @transform_7(%arg0: i32) -> (i32, i32) {
    %c0_i32 = arith.constant 0 : i32
    %c0_i32_0 = arith.constant 0 : i32
    %c0_i32_1 = arith.constant 0 : i32
    return %c0_i32, %c0_i32_0 : i32, i32
  }
  func.func @transform_8(%arg0: i32) -> (i32, i32) {
    %c0_i32 = arith.constant 0 : i32
    %c0_i32_0 = arith.constant 0 : i32
    %c0_i32_1 = arith.constant 0 : i32
    return %c0_i32, %c0_i32_0 : i32, i32
  }
  func.func @transform_9(%arg0: i32) -> (i32, i32) {
    %c0_i32 = arith.constant 0 : i32
    %c0_i32_0 = arith.constant 0 : i32
    %c0_i32_1 = arith.constant 0 : i32
    return %c0_i32, %c0_i32_0 : i32, i32
  }
  func.func @transform_10(%arg0: i32) -> (i32, i32) {
    %c0_i32 = arith.constant 0 : i32
    %c0_i32_0 = arith.constant 0 : i32
    %c0_i32_1 = arith.constant 0 : i32
    return %c0_i32, %c0_i32_0 : i32, i32
  }
  func.func @transform_11(%arg0: i32) -> (i32, i32) {
    %c0_i32 = arith.constant 0 : i32
    %c0_i32_0 = arith.constant 0 : i32
    %c0_i32_1 = arith.constant 0 : i32
    return %c0_i32, %c0_i32_0 : i32, i32
  }
  func.func @transform_12(%arg0: i32) -> (i32, i32) {
    %c0_i32 = arith.constant 0 : i32
    %c0_i32_0 = arith.constant 0 : i32
    %c0_i32_1 = arith.constant 0 : i32
    return %c0_i32, %c0_i32_0 : i32, i32
  }
  func.func @transform_13(%arg0: i32) -> (i32, i32) {
    %c0_i32 = arith.constant 0 : i32
    %c0_i32_0 = arith.constant 0 : i32
    %c0_i32_1 = arith.constant 0 : i32
    return %c0_i32, %c0_i32_0 : i32, i32
  }
}

</mosaic_0001>

<bundles_post_ra>
// kernel: ffn_forward.7
= control target key start
LH: loop header
LB: loop body
LE: loop exit
PB: predicated region body
PF: predicated region fallthrough
CT: control target
= control target key end

     0   :  { %10 = vsyncpa [#allocation5], 0  ;;  %s2127_s0 = inlined_call_operand.vmem [shape: f32[8,640], index: 0, kind: input, shape index: {}]   ;;  %s2128_s1 = inlined_call_operand.vmem [shape: f32[1,640], index: 1, kind: input, shape index: {}]   ;;  %s2129_s2 = inlined_call_operand.vmem [shape: f32[1,640], index: 2, kind: input, shape index: {}]   ;;  %s2130_s3 = inlined_call_operand.hbm [shape: bf16[640,512], index: 3, kind: input, shape index: {}]   ;;  %s2131_s4 = inlined_call_operand.hbm [shape: f32[1,512], index: 4, kind: input, shape index: {}]   ;;  %s2132_s5 = inlined_call_operand.vmem [shape: f32[8,512], index: 5, kind: output, shape index: {}]  }
   0x1   :  { %12 = vsyncpa [#allocation5 + $0x1], 0 }
   0x2   :  { %13 = vsyncpa [#allocation7], 0 }
   0x3   :  { %15 = vsyncpa [#allocation7 + $0x1], 0  ;;  %s1794_s18 = smov 0   ;;  %s1796_s19 = smov 0  }
   0x4   :  { %s1798_s20 = smov 0   ;;  %s1800_s21 = smov 0  }
   0x5   :  { %s1802_s22 = smov 0   ;;  %s1804_s23 = smov 0  }
   0x6 LB: > { %s1163_s24 = sadd.s32 4294967295, %s1759_s23   ;;  %s33_s25 = sadd.s32 1, %s1755_s22  ;;  %s1759_s23 = sphi %s1804_s23, %s21_s23   ;;  %s1755_s22 = sphi %s1802_s22, %s2139_s22   ;;  %s1751_s21 = sphi %s1800_s21, %s2138_s21   ;;  %s1747_s20 = sphi %s1798_s20, %s2137_s20   ;;  %s1743_s19 = sphi %s1796_s19, %s2136_s19   ;;  %s1739_s18 = sphi %s1794_s18, %s2135_s18  }
   0x7   : > { %p35_p0 = scmp.ge.s32.totalorder %s33_s25, 2  ;;  %s105_s26 = sadd.s32 1, %s1747_s20 }
   0x8   : > { %p112_p1 = scmp.ne.s32.totalorder %s1747_s20, %s1743_s19  ;;  %p113_p2 = scmp.eq.s32.totalorder %s1759_s23, 0 }
   0x9   : > { %s2141_s25 = smov (%p35_p0, %s33_s25), 0  ;;  %p118_p4 = scmp.ne.s32.totalorder %s1743_s19, %s1739_s18 }
   0xa   : > { %p114_p3 = por %p113_p2, %p112_p1  ;;  %s101_s27 = ssub.s32 %s1755_s22, %s2141_s25 }
   0xb   : > { %p119_p5 = scmp.eq.s32.totalorder %s1163_s24, 0  ;;  %p103_p6 = scmp.eq.s32.totalorder %s101_s27, 0 }
   0xc   : > { %p1591_p8 = scmp.lt.s32.totalorder %s1759_s23, 2  ;;  %s1842_s30 = sand.u32 1, %s1747_s20  }
   0xd   : > { %p1833_p7 = por %p119_p5, %p118_p4  ;;  %s1497_s6 = sshll.u32 %s1755_s22, 3 }
   0xe   : > { %s1839_s29 = scalar_select %p103_p6, %s1747_s20, %s105_s26  }
   0xf   : > { %s1578_s7 = smul.u32 640, %s1842_s30  ;;  %s215_s10 = scalar_lea.hbm %s2130_s3, %s1497_s6 }
  0x10   : > { %p1849_p9 = pnand %p1591_p8, %p114_p3  ;;  %s216_s12 = sshll.u32 %s215_s10, 4  ;;  %s217_s12 = int_to_ptr.hbm [resolvable:$true] %s216_s12 }
  0x11   : > { %s207_s13 = scalar_lea.vmem [#allocation4], %s1578_s7  ;;  %p1171_p10 = scmp.ge.s32.totalorder %s1759_s23, 1 }
  0x12   : > { %s218_s14 = sshll.u32 %s207_s13, 4  ;;  %s204_s15 = scalar_lea.sflag [#allocation5], %s1842_s30  ;;  %s219_s14 = int_to_ptr.vmem [resolvable:$true] %s218_s14 }
  0x13   : > { %s1761_s16 = smov 256   ;;  %s1762_s17 = smov 128  }
  0x14   : > { %s1763_s18 = smov 8   ;;  %p245_p11 = scmp.lt.s32.totalorder %s1759_s23, 3 }
  0x15   : > { %1587 = dma.hbm_to_vmem [thread:$0]  (!%p1849_p9), %s217_s12, 10240, %s219_s14, %s204_s15, %s1761_s16, %s1762_s17, %s1763_s18  }
  0x16   : > { %s1169_s24 = sshll.u32 %s1842_s30, 1  ;;  %s1170_s26 = sshll.u32 %s1755_s22, 1 }
  0x17   : > { %p246_p12 = pnand %p1171_p10, %p245_p11  ;;  %s236_s8 = scalar_lea.hbm %s2131_s4, %s1170_s26 }
  0x18   : > { %s232_s7 = scalar_lea.vmem [#allocation6], %s1169_s24  ;;  %s238_s10 = sshll.u32 %s236_s8, 4  ;;  %s239_s10 = int_to_ptr.hbm [resolvable:$true] %s238_s10 }
  0x19   : > { %s240_s9 = sshll.u32 %s232_s7, 4  ;;  %s229_s13 = scalar_lea.sflag [#allocation7], %s1842_s30  ;;  %s241_s9 = int_to_ptr.vmem [resolvable:$true] %s240_s9 }
  0x1a   : > { %1590 = dma.hbm_to_vmem [thread:$0]  (!%p1849_p9), %s239_s10, 32, %s241_s9, %s229_s13  }
  0x1b   : > { %249 = sbr.rel (%p246_p12) target bundleno = 373 (0x175), region = 40  ;;  %s251_s12 = sand.u32 (!%p246_p12), 1, %s1743_s19  }
  0x1c   : > { %s1579_s14 = smul.u32 (!%p246_p12), 640, %s251_s12  ;;  %s252_s15 = scalar_lea.sflag (!%p246_p12), [#allocation5], %s251_s12 }
  0x1e   : > { %s1867_s16 = scalar_lea.vmem (!%p246_p12), [#allocation4], %s1579_s14 }
  0x20   : > { %1730 = dma.done.wait (%p1833_p7), %s252_s15, 10240  }
  0x21   : > { %1732 = vsyncadd (%p1833_p7), %s252_s15, 4294957056  ;;  %s1172_s17 = sshll.u32 %s251_s12, 1  ;;  %s262_s18 = scalar_lea.sflag [#allocation7], %s251_s12 }
  0x22   : > { %s1873_s24 = scalar_lea.vmem [#allocation6], %s1172_s17 }
  0x23   : > { %1734 = dma.done.wait (%p1833_p7), %s262_s18, 32  }
  0x24   : > { %1736 = vsyncadd (%p1833_p7), %s262_s18, 4294967264  ;;  %v1882_v0 = vld [vmem:[%s2127_s0] sm:$0xff]  ;;  %v1887_v1 = vld [vmem:[%s2127_s0 + $0x8] sm:$0xff]  ;;  %s1173_s17 = sshll.u32 %s1751_s21, 1 }
  0x25   : > { %v1892_v2 = vld [vmem:[%s2127_s0 + $0x10] sm:$0xff]  ;;  %v1897_v3 = vld [vmem:[%s2127_s0 + $0x18] sm:$0xff]  ;;  %v318_v4 = vadd.f32 %v1887_v1, %v1882_v0  ;;  %v325_v5 = vmul.f32 %v1882_v0, %v1882_v0  ;;  %v326_v6 = vmul.f32 %v1887_v1, %v1887_v1  ;;  %v1233_v8 = vld [vmem:[%s1867_s16 + $0x70] sm:$0xf]  ;;  %p302_p13 = scmp.lt.s32.totalorder %s1173_s17, 3 }
  0x26   : > { %v327_v7 = vmul.f32 %v1892_v2, %v1892_v2  ;;  %v1513_v9 = vld [vmem:[%s1867_s16 + $0x74] sm:$0xf0]  ;;  %v1297_v10 = vld [vmem:[%s1867_s16 + $0xf0] sm:$0xf]  ;;  %v1225_v16 = vld [vmem:[%s1867_s16 + $0x60] sm:$0xf]  ;;  %v328_v20 = vmul.f32 %v1897_v3, %v1897_v3 }
  0x27   : > { %v1529_v11 = vld [vmem:[%s1867_s16 + $0xf4] sm:$0xf0]  ;;  %v319_v12 = vadd.f32 %v318_v4, %v1892_v2  ;;  %v330_v13 = vadd.f32 %v326_v6, %v325_v5  ;;  %v1234_v14 = vor.u32 %v1513_v9, %v1233_v8  ;;  %v1511_v17 = vld [vmem:[%s1867_s16 + $0x64] sm:$0xf0]  ;;  %v1289_v18 = vld [vmem:[%s1867_s16 + $0xe0] sm:$0xf] }
  0x28   : > { %v1298_v15 = vor.u32 %v1529_v11, %v1297_v10  ;;  %v1918_v19 = vld [vmem:[%s2127_s0 + $0x20] sm:$0xff]  ;;  %v1527_v21 = vld [vmem:[%s1867_s16 + $0xe4] sm:$0xf0]  ;;  %v1226_v24 = vor.u32 %v1511_v17, %v1225_v16  ;;  %v1509_v31 = vld [vmem:[%s1867_s16 + $0x54] sm:$0xf0]  ;;  %s2143_s17 = smov (!%p302_p13, %s1173_s17), 3 }
  0x29   : > { %v320_v22 = vadd.f32 %v319_v12, %v1897_v3  ;;  %v331_v23 = vadd.f32 %v330_v13, %v327_v7  ;;  %908 = vmatpush.bf16.msra.mxu0 %v1234_v14  ;;  %v1290_v25 = vor.u32 %v1527_v21, %v1289_v18  ;;  %v329_v27 = vmul.f32 %v1918_v19, %v1918_v19  ;;  %v1217_v30 = vld [vmem:[%s1867_s16 + $0x50] sm:$0xf]  ;;  %v1525_v34 = vld [vmem:[%s1867_s16 + $0xd4] sm:$0xf0]  ;;  %v1209_v36 = vld [vmem:[%s1867_s16 + $0x40] sm:$0xf] }
  0x2a   : > { %921 = vmatpush.bf16.msra.mxu1 %v1298_v15  ;;  %v1281_v32 = vld [vmem:[%s1867_s16 + $0xd0] sm:$0xf]  ;;  %v1218_v33 = vor.u32 %v1509_v31, %v1217_v30  ;;  %v1507_v37 = vld [vmem:[%s1867_s16 + $0x44] sm:$0xf0]  ;;  %v1273_v38 = vld [vmem:[%s1867_s16 + $0xc0] sm:$0xf] }
  0x2b   : > { %v321_v26 = vadd.f32 %v320_v22, %v1918_v19  ;;  %v332_v28 = vadd.f32 %v331_v23, %v328_v20  ;;  %v1282_v35 = vor.u32 %v1525_v34, %v1281_v32  ;;  %v1210_v39 = vor.u32 %v1507_v37, %v1209_v36  ;;  %v1523_v40 = vld [vmem:[%s1867_s16 + $0xc4] sm:$0xf0]  ;;  %v1361_v42 = vld [vmem:[%s1867_s16 + $0x170] sm:$0xf]  ;;  %v1545_v43 = vld [vmem:[%s1867_s16 + $0x174] sm:$0xf0] }
  0x2c   : > { %v1274_v41 = vor.u32 %v1523_v40, %v1273_v38  ;;  %v1425_v44 = vld [vmem:[%s1867_s16 + $0x1f0] sm:$0xf]  ;;  %v1362_v45 = vor.u32 %v1545_v43, %v1361_v42  ;;  %v1561_v46 = vld [vmem:[%s1867_s16 + $0x1f4] sm:$0xf0]  ;;  %v1353_v52 = vld [vmem:[%s1867_s16 + $0x160] sm:$0xf] }
  0x2d   : > { %322 = vadd.xlane.f32.xlu0 %v321_v26  ;;  %909 = vmatpush.bf16.msra.mxu0 %v1226_v24  ;;  %v333_v29 = vadd.f32 %v332_v28, %v329_v27  ;;  %v1426_v47 = vor.u32 %v1561_v46, %v1425_v44  ;;  %v1201_v48 = vld [vmem:[%s1867_s16 + $0x30] sm:$0xf]  ;;  %v1505_v49 = vld [vmem:[%s1867_s16 + $0x34] sm:$0xf0]  ;;  %v1543_v55 = vld [vmem:[%s1867_s16 + $0x164] sm:$0xf0] }
  0x2e   : > { %922 = vmatpush.bf16.msra.mxu1 %v1290_v25  ;;  %934 = vmatpush.bf16.msra.mxu2 %v1362_v45  ;;  %v1265_v50 = vld [vmem:[%s1867_s16 + $0xb0] sm:$0xf]  ;;  %v1521_v51 = vld [vmem:[%s1867_s16 + $0xb4] sm:$0xf0]  ;;  %v1202_v53 = vor.u32 %v1505_v49, %v1201_v48  ;;  %v1417_v56 = vld [vmem:[%s1867_s16 + $0x1e0] sm:$0xf]  ;;  %v1354_v57 = vor.u32 %v1543_v55, %v1353_v52 }
  0x2f   : > { %947 = vmatpush.bf16.msra.mxu3 %v1426_v47  ;;  %v1266_v54 = vor.u32 %v1521_v51, %v1265_v50  ;;  %v1559_v58 = vld [vmem:[%s1867_s16 + $0x1e4] sm:$0xf0]  ;;  %v1193_v59 = vld [vmem:[%s1867_s16 + $0x20] sm:$0xf]  ;;  %v1345_v5 = vld [vmem:[%s1867_s16 + $0x150] sm:$0xf] }
  0x30   : > { %v1503_v60 = vld [vmem:[%s1867_s16 + $0x24] sm:$0xf0]  ;;  %v1418_v61 = vor.u32 %v1559_v58, %v1417_v56  ;;  %v1257_v63 = vld [vmem:[%s1867_s16 + $0xa0] sm:$0xf]  ;;  %v1541_v7 = vld [vmem:[%s1867_s16 + $0x154] sm:$0xf0] }
  0x31   : > { %910 = vmatpush.bf16.msra.mxu0 %v1218_v33  ;;  %v1194_v62 = vor.u32 %v1503_v60, %v1193_v59  ;;  %v1519_v4 = vld [vmem:[%s1867_s16 + $0xa4] sm:$0xf0]  ;;  %v1409_v8 = vld [vmem:[%s1867_s16 + $0x1d0] sm:$0xf]  ;;  %v1557_v9 = vld [vmem:[%s1867_s16 + $0x1d4] sm:$0xf0]  ;;  %v1346_v10 = vor.u32 %v1541_v7, %v1345_v5 }
  0x32   : > { %923 = vmatpush.bf16.msra.mxu1 %v1282_v35  ;;  %935 = vmatpush.bf16.msra.mxu2 %v1354_v57  ;;  %v1258_v6 = vor.u32 %v1519_v4, %v1257_v63  ;;  %v1410_v11 = vor.u32 %v1557_v9, %v1409_v8  ;;  %v1185_v12 = vld [vmem:[%s1867_s16 + $0x10] sm:$0xf]  ;;  %v1501_v13 = vld [vmem:[%s1867_s16 + $0x14] sm:$0xf0]  ;;  %v1337_v17 = vld [vmem:[%s1867_s16 + $0x140] sm:$0xf] }
  0x33   : > { %948 = vmatpush.bf16.msra.mxu3 %v1418_v61  ;;  %v1249_v14 = vld [vmem:[%s1867_s16 + $0x90] sm:$0xf]  ;;  %v1186_v15 = vor.u32 %v1501_v13, %v1185_v12  ;;  %v1517_v16 = vld [vmem:[%s1867_s16 + $0x94] sm:$0xf0]  ;;  %v1539_v18 = vld [vmem:[%s1867_s16 + $0x144] sm:$0xf0] }
  0x34   : > { %v1250_v20 = vor.u32 %v1517_v16, %v1249_v14  ;;  %v1338_v21 = vor.u32 %v1539_v18, %v1337_v17  ;;  %v1401_v22 = vld [vmem:[%s1867_s16 + $0x1c0] sm:$0xf]  ;;  %v1555_v23 = vld [vmem:[%s1867_s16 + $0x1c4] sm:$0xf0]  ;;  %v1329_v30 = vld [vmem:[%s1867_s16 + $0x130] sm:$0xf] }
  0x35   : > { %334 = vadd.xlane.f32.xlu0 %v333_v29  ;;  %911 = vmatpush.bf16.msra.mxu0 %v1210_v39  ;;  %v1402_v24 = vor.u32 %v1555_v23, %v1401_v22  ;;  %v1177_v25 = vld [vmem:[%s1867_s16] sm:$0xf]  ;;  %v1499_v26 = vld [vmem:[%s1867_s16 + $0x4] sm:$0xf0]  ;;  %v1537_v31 = vld [vmem:[%s1867_s16 + $0x134] sm:$0xf0] }
  0x36   : > { %924 = vmatpush.bf16.msra.mxu1 %v1274_v41  ;;  %936 = vmatpush.bf16.msra.mxu2 %v1346_v10  ;;  %v1241_v27 = vld [vmem:[%s1867_s16 + $0x80] sm:$0xf]  ;;  %v1178_v28 = vor.u32 %v1499_v26, %v1177_v25  ;;  %v1515_v29 = vld [vmem:[%s1867_s16 + $0x84] sm:$0xf0]  ;;  %v1330_v33 = vor.u32 %v1537_v31, %v1329_v30  ;;  %v1393_v34 = vld [vmem:[%s1867_s16 + $0x1b0] sm:$0xf] }
  0x37   : > { %949 = vmatpush.bf16.msra.mxu3 %v1410_v11  ;;  %v1242_v32 = vor.u32 %v1515_v29, %v1241_v27  ;;  %v1553_v35 = vld [vmem:[%s1867_s16 + $0x1b4] sm:$0xf0]  ;;  %v1489_v36 = vld [vmem:[%s1867_s16 + $0x270] sm:$0xf]  ;;  %v1512_v39 = vld [vmem:[%s1867_s16 + $0x74] sm:$0xf] }
  0x38   : > { %v1394_v37 = vor.u32 %v1553_v35, %v1393_v34  ;;  %v1577_v38 = vld [vmem:[%s1867_s16 + $0x274] sm:$0xf0]  ;;  %v1235_v40 = vld [vmem:[%s1867_s16 + $0x78] sm:$0xf0]  ;;  %v1321_v43 = vld [vmem:[%s1867_s16 + $0x120] sm:$0xf] }
  0x39   : > { %912 = vmatpush.bf16.msra.mxu0 %v1202_v53  ;;  %v1490_v41 = vor.u32 %v1577_v38, %v1489_v36  ;;  %v1238_v42 = vor.u32 %v1512_v39, %v1235_v40  ;;  %v1535_v44 = vld [vmem:[%s1867_s16 + $0x124] sm:$0xf0]  ;;  %v1385_v45 = vld [vmem:[%s1867_s16 + $0x1a0] sm:$0xf]  ;;  %v1510_v52 = vld [vmem:[%s1867_s16 + $0x64] sm:$0xf] }
  0x3a   : > { %925 = vmatpush.bf16.msra.mxu1 %v1266_v54  ;;  %937 = vmatpush.bf16.msra.mxu2 %v1338_v21  ;;  %v1322_v46 = vor.u32 %v1535_v44, %v1321_v43  ;;  %v1551_v47 = vld [vmem:[%s1867_s16 + $0x1a4] sm:$0xf0]  ;;  %v1481_v48 = vld [vmem:[%s1867_s16 + $0x260] sm:$0xf]  ;;  %v1227_v53 = vld [vmem:[%s1867_s16 + $0x68] sm:$0xf0] }
  0x3b   : > { %950 = vmatpush.bf16.msra.mxu3 %v1402_v24  ;;  %v1575_v49 = vld [vmem:[%s1867_s16 + $0x264] sm:$0xf0]  ;;  %v1386_v50 = vor.u32 %v1551_v47, %v1385_v45  ;;  %v1230_v54 = vor.u32 %v1510_v52, %v1227_v53  ;;  %v1313_v55 = vld [vmem:[%s1867_s16 + $0x110] sm:$0xf]  ;;  %v1533_v56 = vld [vmem:[%s1867_s16 + $0x114] sm:$0xf0] }
  0x3c   : > { %v1482_v51 = vor.u32 %v1575_v49, %v1481_v48  ;;  %v1377_v57 = vld [vmem:[%s1867_s16 + $0x190] sm:$0xf]  ;;  %v1314_v58 = vor.u32 %v1533_v56, %v1313_v55  ;;  %v1549_v59 = vld [vmem:[%s1867_s16 + $0x194] sm:$0xf0]  ;;  %v1508_v4 = vld [vmem:[%s1867_s16 + $0x54] sm:$0xf] }
  0x3d   : > { %913 = vmatpush.bf16.msra.mxu0 %v1194_v62  ;;  %v1473_v60 = vld [vmem:[%s1867_s16 + $0x250] sm:$0xf]  ;;  %v1573_v61 = vld [vmem:[%s1867_s16 + $0x254] sm:$0xf0]  ;;  %v1378_v62 = vor.u32 %v1549_v59, %v1377_v57  ;;  %v1219_v5 = vld [vmem:[%s1867_s16 + $0x58] sm:$0xf0] }
  0x3e   : > { %926 = vmatpush.bf16.msra.mxu1 %v1258_v6  ;;  %938 = vmatpush.bf16.msra.mxu2 %v1330_v33  ;;  %v1474_v63 = vor.u32 %v1573_v61, %v1473_v60  ;;  %v1222_v6 = vor.u32 %v1508_v4, %v1219_v5  ;;  %v1305_v7 = vld [vmem:[%s1867_s16 + $0x100] sm:$0xf]  ;;  %v1531_v8 = vld [vmem:[%s1867_s16 + $0x104] sm:$0xf0]  ;;  %v1506_v16 = vld [vmem:[%s1867_s16 + $0x44] sm:$0xf] }
  0x3f   : > { %951 = vmatpush.bf16.msra.mxu3 %v1394_v37  ;;  %v1369_v9 = vld [vmem:[%s1867_s16 + $0x180] sm:$0xf]  ;;  %v1306_v10 = vor.u32 %v1531_v8, %v1305_v7  ;;  %v1547_v11 = vld [vmem:[%s1867_s16 + $0x184] sm:$0xf0]  ;;  %v1211_v17 = vld [vmem:[%s1867_s16 + $0x48] sm:$0xf0] }
  0x40   : > { %v1465_v12 = vld [vmem:[%s1867_s16 + $0x240] sm:$0xf]  ;;  %v1571_v13 = vld [vmem:[%s1867_s16 + $0x244] sm:$0xf0]  ;;  %v1370_v14 = vor.u32 %v1547_v11, %v1369_v9  ;;  %v1528_v18 = vld [vmem:[%s1867_s16 + $0xf4] sm:$0xf] }
  0x41   : > { %914 = vmatpush.bf16.msra.mxu0 %v1186_v15  ;;  %v1466_v15 = vor.u32 %v1571_v13, %v1465_v12  ;;  %v1299_v21 = vld [vmem:[%s1867_s16 + $0xf8] sm:$0xf0]  ;;  %v1544_v22 = vld [vmem:[%s1867_s16 + $0x174] sm:$0xf]  ;;  %v1457_v27 = vld [vmem:[%s1867_s16 + $0x230] sm:$0xf] }
  0x42   : > { %927 = vmatpush.bf16.msra.mxu1 %v1250_v20  ;;  %939 = vmatpush.bf16.msra.mxu2 %v1322_v46  ;;  %v1214_v20 = vor.u32 %v1506_v16, %v1211_v17  ;;  %v1363_v23 = vld [vmem:[%s1867_s16 + $0x178] sm:$0xf0]  ;;  %v1302_v25 = vor.u32 %v1528_v18, %v1299_v21  ;;  %v1504_v29 = vld [vmem:[%s1867_s16 + $0x34] sm:$0xf]  ;;  %v1291_v34 = vld [vmem:[%s1867_s16 + $0xe8] sm:$0xf0] }
  0x43   : > { %952 = vmatpush.bf16.msra.mxu3 %v1386_v50  ;;  %v1366_v26 = vor.u32 %v1544_v22, %v1363_v23  ;;  %v1203_v31 = vld [vmem:[%s1867_s16 + $0x38] sm:$0xf0]  ;;  %v1542_v35 = vld [vmem:[%s1867_s16 + $0x164] sm:$0xf]  ;;  %v1355_v36 = vld [vmem:[%s1867_s16 + $0x168] sm:$0xf0] }
  0x44   : > { %v1206_v33 = vor.u32 %v1504_v29, %v1203_v31  ;;  %v1358_v39 = vor.u32 %v1542_v35, %v1355_v36  ;;  %v1449_v40 = vld [vmem:[%s1867_s16 + $0x220] sm:$0xf]  ;;  %v1195_v44 = vld [vmem:[%s1867_s16 + $0x28] sm:$0xf0]  ;;  %v1524_v45 = vld [vmem:[%s1867_s16 + $0xd4] sm:$0xf] }
  0x45   : > { %915 = vmatpush.bf16.msra.mxu0 %v1178_v28  ;;  %v1569_v28 = vld [vmem:[%s1867_s16 + $0x234] sm:$0xf0]  ;;  %v1283_v46 = vld [vmem:[%s1867_s16 + $0xd8] sm:$0xf0]  ;;  %v1540_v48 = vld [vmem:[%s1867_s16 + $0x154] sm:$0xf] }
  0x46   : > { %928 = vmatpush.bf16.msra.mxu1 %v1242_v32  ;;  %940 = vmatpush.bf16.msra.mxu2 %v1314_v58  ;;  %v1458_v30 = vor.u32 %v1569_v28, %v1457_v27  ;;  %v1526_v32 = vld [vmem:[%s1867_s16 + $0xe4] sm:$0xf]  ;;  %v1347_v49 = vld [vmem:[%s1867_s16 + $0x158] sm:$0xf0]  ;;  %v1286_v50 = vor.u32 %v1524_v45, %v1283_v46  ;;  %v1441_v53 = vld [vmem:[%s1867_s16 + $0x210] sm:$0xf] }
  0x47   : > { %953 = vmatpush.bf16.msra.mxu3 %v1378_v62  ;;  %v1294_v38 = vor.u32 %v1526_v32, %v1291_v34  ;;  %v1350_v52 = vor.u32 %v1540_v48, %v1347_v49  ;;  %v1500_v55 = vld [vmem:[%s1867_s16 + $0x14] sm:$0xf]  ;;  %v1187_v59 = vld [vmem:[%s1867_s16 + $0x18] sm:$0xf0]  ;;  %v1522_v60 = vld [vmem:[%s1867_s16 + $0xc4] sm:$0xf] }
  0x48   : > { %v1190_v61 = vor.u32 %v1500_v55, %v1187_v59  ;;  %v1275_v62 = vld [vmem:[%s1867_s16 + $0xc8] sm:$0xf0]  ;;  %v1433_v8 = vld [vmem:[%s1867_s16 + $0x200] sm:$0xf]  ;;  %v1563_v9 = vld [vmem:[%s1867_s16 + $0x204] sm:$0xf0] }
  0x49   : > { %960 = vmatpush.bf16.msrb.mxu0 %v1490_v41  ;;  %v1567_v41 = vld [vmem:[%s1867_s16 + $0x224] sm:$0xf0]  ;;  %v1339_v4 = vld [vmem:[%s1867_s16 + $0x148] sm:$0xf0]  ;;  %v1434_v12 = vor.u32 %v1563_v9, %v1433_v8  ;;  %v1267_v16 = vld [vmem:[%s1867_s16 + $0xb8] sm:$0xf0] }
  0x4a   : > { %973 = vmatpush.bf16.msrb.mxu1 %v1238_v42  ;;  %941 = vmatpush.bf16.msra.mxu2 %v1306_v10  ;;  %v1502_v42 = vld [vmem:[%s1867_s16 + $0x24] sm:$0xf]  ;;  %v1450_v43 = vor.u32 %v1567_v41, %v1449_v40  ;;  %v1179_v13 = vld [vmem:[%s1867_s16 + $0x8] sm:$0xf0]  ;;  %v1536_v17 = vld [vmem:[%s1867_s16 + $0x134] sm:$0xf] }
  0x4b   : > { %954 = vmatpush.bf16.msra.mxu3 %v1370_v14  ;;  %v1198_v47 = vor.u32 %v1502_v42, %v1195_v44  ;;  %v1498_v10 = vld [vmem:[%s1867_s16 + $0x4] sm:$0xf]  ;;  %v1520_v14 = vld [vmem:[%s1867_s16 + $0xb4] sm:$0xf]  ;;  %v1331_v18 = vld [vmem:[%s1867_s16 + $0x138] sm:$0xf0] }
  0x4c   : > { %v1334_v21 = vor.u32 %v1536_v17, %v1331_v18  ;;  %v1518_v22 = vld [vmem:[%s1867_s16 + $0xa4] sm:$0xf]  ;;  %v1259_v23 = vld [vmem:[%s1867_s16 + $0xa8] sm:$0xf0]  ;;  %v1516_v28 = vld [vmem:[%s1867_s16 + $0x94] sm:$0xf] }
  0x4d   : > { %961 = vmatpush.bf16.msrb.mxu0 %v1482_v51  ;;  %v1251_v29 = vld [vmem:[%s1867_s16 + $0x98] sm:$0xf0]  ;;  %v1532_v31 = vld [vmem:[%s1867_s16 + $0x114] sm:$0xf]  ;;  %v316_v40 = vld [vmem:[%s2128_s1] sm:$0x1f] }
  0x4e   : > { %974 = vmatpush.bf16.msrb.mxu1 %v1230_v54  ;;  %986 = vmatpush.bf16.msrb.mxu2 %v1302_v25  ;;  %v1565_v54 = vld [vmem:[%s1867_s16 + $0x214] sm:$0xf0]  ;;  %v1323_v25 = vld [vmem:[%s1867_s16 + $0x128] sm:$0xf0]  ;;  %v1315_v32 = vld [vmem:[%s1867_s16 + $0x118] sm:$0xf0]  ;;  %v1254_v34 = vor.u32 %v1516_v28, %v1251_v29 }
  0x4f   : > { %999 = vmatpush.bf16.msrb.mxu3 %v1366_v26  ;;  %v1442_v58 = vor.u32 %v1565_v54, %v1441_v53  ;;  %v1262_v26 = vor.u32 %v1518_v22, %v1259_v23  ;;  %v1318_v36 = vor.u32 %v1532_v31, %v1315_v32  ;;  %v1530_v41 = vld [vmem:[%s1867_s16 + $0x104] sm:$0xf]  ;;  %v1307_v42 = vld [vmem:[%s1867_s16 + $0x108] sm:$0xf0]  ;;  %v361_v46 = vperm.slane %v316_v40, 0 }
  0x50   : > { %v317_v44 = vld [vmem:[%s2129_s2] sm:$0x1f]  ;;  %v1310_v48 = vor.u32 %v1530_v41, %v1307_v42  ;;  %v362_v49 = vperm.slane %v316_v40, 1  ;;  %v1427_v17 = vld [vmem:[%s1867_s16 + $0x1f8] sm:$0xf0] }
  0x51   : > { %962 = vmatpush.bf16.msrb.mxu0 %v1474_v63  ;;  %v1538_v63 = vld [vmem:[%s1867_s16 + $0x144] sm:$0xf]  ;;  %v377_v53 = vperm.slane %v317_v44, 0  ;;  %v378_v54 = vperm.slane %v317_v44, 1  ;;  %v1576_v18 = vld [vmem:[%s1867_s16 + $0x274] sm:$0xf] }
  0x52   : > { %975 = vmatpush.bf16.msrb.mxu1 %v1222_v6  ;;  %987 = vmatpush.bf16.msrb.mxu2 %v1294_v38  ;;  %v1278_v6 = vor.u32 %v1522_v60, %v1275_v62  ;;  %v1342_v7 = vor.u32 %v1538_v63, %v1339_v4  ;;  %v1514_v38 = vld [vmem:[%s1867_s16 + $0x84] sm:$0xf]  ;;  %v380_v62 = vperm.slane %v317_v44, 3  ;;  %v1572_v41 = vld [vmem:[%s1867_s16 + $0x254] sm:$0xf] }
  0x53   : > { %1000 = vmatpush.bf16.msrb.mxu3 %v1358_v39  ;;  %v1243_v39 = vld [vmem:[%s1867_s16 + $0x88] sm:$0xf0]  ;;  %v1558_v32 = vld [vmem:[%s1867_s16 + $0x1e4] sm:$0xf]  ;;  %v1475_v42 = vld [vmem:[%s1867_s16 + $0x258] sm:$0xf0] }
  0x54   : > { %v1246_v45 = vor.u32 %v1514_v38, %v1243_v39  ;;  %v1556_v39 = vld [vmem:[%s1867_s16 + $0x1d4] sm:$0xf] }
  0x55   : > { %963 = vmatpush.bf16.msrb.mxu0 %v1466_v15  ;;  %v1182_v15 = vor.u32 %v1498_v10, %v1179_v13 }
  0x56   : > { %976 = vmatpush.bf16.msrb.mxu1 %v1214_v20  ;;  %988 = vmatpush.bf16.msrb.mxu2 %v1286_v50  ;;  %v1270_v20 = vor.u32 %v1520_v14, %v1267_v16  ;;  %v363_v50 = vperm.slane %v316_v40, 2  ;;  %v1560_v14 = vld [vmem:[%s1867_s16 + $0x1f4] sm:$0xf] }
  0x57   : > { %1001 = vmatpush.bf16.msrb.mxu3 %v1350_v52  ;;  %v365_v52 = vperm.slane %v316_v40, 4 }
  0x59   : > { %964 = vmatpush.bf16.msrb.mxu0 %v1458_v30 }
  0x5a   : > { %977 = vmatpush.bf16.msrb.mxu1 %v1206_v33  ;;  %989 = vmatpush.bf16.msrb.mxu2 %v1278_v6 }
  0x5b   : > { %1002 = vmatpush.bf16.msrb.mxu3 %v1342_v7 }
  0x5d   : > { %965 = vmatpush.bf16.msrb.mxu0 %v1450_v43 }
  0x5e   : > { %978 = vmatpush.bf16.msrb.mxu1 %v1198_v47  ;;  %990 = vmatpush.bf16.msrb.mxu2 %v1270_v20  ;;  %v1491_v20 = vld [vmem:[%s1867_s16 + $0x278] sm:$0xf0] }
  0x5f   : > { %1003 = vmatpush.bf16.msrb.mxu3 %v1334_v21 }
  0x61   : > { %966 = vmatpush.bf16.msrb.mxu0 %v1442_v58 }
  0x62   : > { %979 = vmatpush.bf16.msrb.mxu1 %v1190_v61  ;;  %991 = vmatpush.bf16.msrb.mxu2 %v1262_v26  ;;  %v379_v61 = vperm.slane %v317_v44, 2  ;;  %v1430_v26 = vor.u32 %v1560_v14, %v1427_v17 }
  0x65   : > { %967 = vmatpush.bf16.msrb.mxu0 %v1434_v12 }
  0x66   : > { %980 = vmatpush.bf16.msrb.mxu1 %v1182_v15  ;;  %992 = vmatpush.bf16.msrb.mxu2 %v1254_v34  ;;  %v1574_v34 = vld [vmem:[%s1867_s16 + $0x264] sm:$0xf] }
  0x6a   : > { %993 = vmatpush.bf16.msrb.mxu2 %v1246_v45  ;;  %v1554_v45 = vld [vmem:[%s1867_s16 + $0x1c4] sm:$0xf] }
  0xa0   : > { %v323_v24 = vpop.xlane.xlu0 %322 }
  0xa1   : > { %v2011_v37 = vmul.f32 0.0015625, %v323_v24  ;;  %v1534_v24 = vld [vmem:[%s1867_s16 + $0x124] sm:$0xf] }
  0xa2   : > { %v1326_v27 = vor.u32 %v1534_v24, %v1323_v25 }
  0xa3   : > { %v337_v56 = vmul.f32 %v2011_v37, %v2011_v37  ;;  %v341_v58 = vsub.f32 %v1892_v2, %v2011_v37  ;;  %v342_v59 = vsub.f32 %v1897_v3, %v2011_v37  ;;  %v343_v60 = vsub.f32 %v1918_v19, %v2011_v37 }
  0xa4   : > { %1004 = vmatpush.bf16.msrb.mxu3 %v1326_v27  ;;  %v381_v2 = vperm.slane %v317_v44, 4  ;;  %v1494_v27 = vor.u32 %v1576_v18, %v1491_v20  ;;  %v1478_v44 = vor.u32 %v1572_v41, %v1475_v42 }
  0xa8   : > { %v335_v51 = vpop.xlane.xlu0 %334  ;;  %1005 = vmatpush.bf16.msrb.mxu3 %v1318_v36 }
  0xa9   : > { %v336_v57 = vmul.f32 0.0015625, %v335_v51  ;;  %v364_v51 = vperm.slane %v316_v40, 3  ;;  %v1411_v40 = vld [vmem:[%s1867_s16 + $0x1d8] sm:$0xf0] }
  0xab   : > { %v338_v5 = vsub.f32 %v336_v57, %v337_v56  ;;  %v339_v56 = vsub.f32 %v1882_v0, %v2011_v37  ;;  %v340_v57 = vsub.f32 %v1887_v1, %v2011_v37 }
  0xac   : > { %1006 = vmatpush.bf16.msrb.mxu3 %v1310_v48  ;;  %v1467_v48 = vld [vmem:[%s1867_s16 + $0x248] sm:$0xf0] }
  0xad   : > { %v344_v11 = vadd.f32 1e-05, %v338_v5 }
  0xaf   : > { %1643 = vrsqrt.f32 %v344_v11  ;;  %vm351_vm1 = vweird.f32 %v344_v11 }
  0xb5   : > { %v1644_v30 = vpop.eup %1643 }
  0xb6   : > { %v346_v33 = vmul.f32 %v1644_v30, %v344_v11  ;;  %vm352_vm0 = vweird.f32 %v1644_v30 }
  0xb7   : > { %vm353_vm2 = vmor %vm351_vm1, %vm352_vm0 }
  0xb8   : > { %v347_v35 = vmul.f32 %v1644_v30, %v346_v33  ;;  %v1419_v33 = vld [vmem:[%s1867_s16 + $0x1e8] sm:$0xf0] }
  0xb9   : > { %v1422_v36 = vor.u32 %v1558_v32, %v1419_v33 }
  0xba   : > { %v348_v43 = vmul.f32 0.5, %v347_v35  ;;  %v1483_v35 = vld [vmem:[%s1867_s16 + $0x268] sm:$0xf0] }
  0xbb   : > { %v1486_v38 = vor.u32 %v1574_v34, %v1483_v35 }
  0xbc   : > { %v349_v47 = vsub.f32 1.5, %v348_v43  ;;  %v1414_v43 = vor.u32 %v1556_v39, %v1411_v40 }
  0xbe   : > { %v350_v55 = vmul.f32 %v1644_v30, %v349_v47  ;;  %v1570_v47 = vld [vmem:[%s1867_s16 + $0x244] sm:$0xf] }
  0xc0   : > { %v354_v63 = vsel %vm353_vm2, %v1644_v30, %v350_v55  ;;  %v1568_v55 = vld [vmem:[%s1867_s16 + $0x234] sm:$0xf] }
  0xc1   : > { %v355_v0 = vmul.f32 %v354_v63, %v339_v56  ;;  %v356_v4 = vmul.f32 %v354_v63, %v340_v57  ;;  %v357_v1 = vmul.f32 %v354_v63, %v341_v58  ;;  %v358_v5 = vmul.f32 %v354_v63, %v342_v59  ;;  %v1459_v56 = vld [vmem:[%s1867_s16 + $0x238] sm:$0xf0] }
  0xc2   : > { %v359_v6 = vmul.f32 %v354_v63, %v343_v60  ;;  %v1462_v59 = vor.u32 %v1568_v55, %v1459_v56  ;;  %v1550_v60 = vld [vmem:[%s1867_s16 + $0x1a4] sm:$0xf]  ;;  %v1451_v63 = vld [vmem:[%s1867_s16 + $0x228] sm:$0xf0] }
  0xc3   : > { %v371_v3 = vmul.f32 %v361_v46, %v355_v0  ;;  %v372_v7 = vmul.f32 %v362_v49, %v356_v4  ;;  %v373_v8 = vmul.f32 %v363_v50, %v357_v1  ;;  %v374_v9 = vmul.f32 %v364_v51, %v358_v5  ;;  %v1403_v46 = vld [vmem:[%s1867_s16 + $0x1c8] sm:$0xf0]  ;;  %v1548_v1 = vld [vmem:[%s1867_s16 + $0x194] sm:$0xf]  ;;  %v1379_v5 = vld [vmem:[%s1867_s16 + $0x198] sm:$0xf0] }
  0xc4   : > { %v375_v10 = vmul.f32 %v365_v52, %v359_v6  ;;  %v1406_v50 = vor.u32 %v1554_v45, %v1403_v46  ;;  %v1470_v51 = vor.u32 %v1570_v47, %v1467_v48  ;;  %v1443_v6 = vld [vmem:[%s1867_s16 + $0x218] sm:$0xf0] }
  0xc5   : > { %v387_v19 = vadd.f32 %v377_v53, %v371_v3  ;;  %v388_v37 = vadd.f32 %v378_v54, %v372_v7  ;;  %v389_v11 = vadd.f32 %v379_v61, %v373_v8  ;;  %v390_v12 = vadd.f32 %v380_v62, %v374_v9  ;;  %v1552_v53 = vld [vmem:[%s1867_s16 + $0x1b4] sm:$0xf]  ;;  %v1395_v54 = vld [vmem:[%s1867_s16 + $0x1b8] sm:$0xf0]  ;;  %v1387_v61 = vld [vmem:[%s1867_s16 + $0x1a8] sm:$0xf0] }
  0xc6   : > { %v391_v13 = vadd.f32 %v381_v2, %v375_v10  ;;  %v1398_v58 = vor.u32 %v1552_v53, %v1395_v54  ;;  %v1566_v62 = vld [vmem:[%s1867_s16 + $0x224] sm:$0xf]  ;;  %v1390_v0 = vor.u32 %v1550_v60, %v1387_v61  ;;  %v1564_v2 = vld [vmem:[%s1867_s16 + $0x214] sm:$0xf]  ;;  %v1382_v3 = vor.u32 %v1548_v1, %v1379_v5  ;;  %v1371_v9 = vld [vmem:[%s1867_s16 + $0x188] sm:$0xf0] }
  0xc7   : > { %v392_v15 = vpack.c.bf16 %v388_v37, %v387_v19  ;;  %v393_v16 = vpack.c.bf16 %v390_v12, %v389_v11  ;;  %v1454_v4 = vor.u32 %v1566_v62, %v1451_v63  ;;  %v1446_v7 = vor.u32 %v1564_v2, %v1443_v6  ;;  %v1546_v8 = vld [vmem:[%s1867_s16 + $0x184] sm:$0xf]  ;;  %v1435_v19 = vld [vmem:[%s1867_s16 + $0x208] sm:$0xf0] }
  0xc8   : > { %v394_v21 = vpack.c.bf16 %v391_v13, %v391_v13  ;;  %v1562_v10 = vld [vmem:[%s1867_s16 + $0x204] sm:$0xf]  ;;  %v1374_v37 = vor.u32 %v1546_v8, %v1371_v9  ;;  %s1174_s16 = sshll.u32 %s2143_s17, 3 }
  0xc9   : > { %v493_v22 = vunpack.c.l.b16 %v392_v15  ;;  %v494_v23 = vunpack.c.h.b16 %v392_v15  ;;  %v495_v24 = vunpack.c.l.b16 %v393_v16  ;;  %v496_v25 = vunpack.c.h.b16 %v393_v16  ;;  %s305_s30 = scalar_lea.vmem %s2132_s5, %s1174_s16 }
  0xca   : > { %397 = vst [vmem:[#allocation2 + $0x10] sm:$0xf] %v394_v21  ;;  %v1438_v11 = vor.u32 %v1562_v10, %v1435_v19  ;;  %v1047_v21 = vld [vmem:[%s1873_s24] sm:$0x3] }
  0xcb   : > { %v498_v28 = vpack.c.b16 %v493_v22, %v493_v22  ;;  %v499_v29 = vpack.c.b16 %v494_v23, %v494_v23  ;;  %v500_v30 = vpack.c.b16 %v495_v24, %v495_v24  ;;  %v2072_v31 = vpack.c.b16 %v496_v25, %v496_v25 }
  0xcc   : > { %v1049_v25 = vperm.slane %v1047_v21, 0 }
  0xcd   : > { %916 = vmatmul.bf16.vlgmr.msra.gmra.mxu0 %v498_v28  ;;  %929 = vmatmul.bf16.vlgmr.msra.gmra.mxu1 %v499_v29 }
  0xce   : > { %942 = vmatmul.bf16.vlgmr.msra.gmra.mxu2 %v500_v30  ;;  %955 = vmatmul.bf16.vlgmr.msra.gmra.mxu3 %v2072_v31 }
  0xcf   : > { %1012 = vmatpush.bf16.msra.mxu0 %v1430_v26  ;;  %1025 = vmatpush.bf16.msra.mxu1 %v1494_v27 }
  0xd1   : > { %v409_v49 = vld [vmem:[#allocation2 + $0x10] sm:$0xf] }
  0xd2   : > { %v497_v52 = vunpack.c.l.b16 %v409_v49 }
  0xd3   : > { %1013 = vmatpush.bf16.msra.mxu0 %v1422_v36  ;;  %1026 = vmatpush.bf16.msra.mxu1 %v1486_v38 }
  0xd4   : > { %v502_v57 = vpack.c.b16 %v497_v52, %v497_v52 }
  0xd7   : > { %1014 = vmatpush.bf16.msra.mxu0 %v1414_v43  ;;  %1027 = vmatpush.bf16.msra.mxu1 %v1478_v44  ;;  %v1050_v43 = vperm.slane %v1047_v21, 1 }
  0xdb   : > { %1015 = vmatpush.bf16.msra.mxu0 %v1406_v50  ;;  %1028 = vmatpush.bf16.msra.mxu1 %v1470_v51 }
  0xdd   : > { %968 = vmatmul.bf16.vlgmr.msrb.gmra.mxu0 %v502_v57  ;;  %981 = vmatmul.bf16.vlgmr.msrb.gmra.mxu1 %v498_v28 }
  0xde   : > { %994 = vmatmul.bf16.vlgmr.msrb.gmra.mxu2 %v499_v29  ;;  %1007 = vmatmul.bf16.vlgmr.msrb.gmra.mxu3 %v500_v30 }
  0xdf   : > { %1016 = vmatpush.bf16.msra.mxu0 %v1398_v58  ;;  %1029 = vmatpush.bf16.msra.mxu1 %v1462_v59 }
  0xe3   : > { %1017 = vmatpush.bf16.msra.mxu0 %v1390_v0  ;;  %1030 = vmatpush.bf16.msra.mxu1 %v1454_v4 }
  0xe7   : > { %1018 = vmatpush.bf16.msra.mxu0 %v1382_v3  ;;  %1031 = vmatpush.bf16.msra.mxu1 %v1446_v7 }
  0xeb   : > { %1019 = vmatpush.bf16.msra.mxu0 %v1374_v37  ;;  %1032 = vmatpush.bf16.msra.mxu1 %v1438_v11 }
  0xee   : > { %1020 = vmatmul.bf16.vlgmr.msra.gmra.mxu0 %v2072_v31  ;;  %1033 = vmatmul.bf16.vlgmr.msra.gmra.mxu1 %v502_v57 }
 0x14a   : > { %v917_v12 = vpop.f32.mrf.mxu0  ;;  %v930_v13 = vpop.f32.mrf.mxu1 }
 0x14b   : > { %v931_v18 = vadd.f32 %v930_v13, %v917_v12 }
 0x151   : > { %v943_v14 = vpop.f32.mrf.mxu2  ;;  %v956_v15 = vpop.f32.mrf.mxu3 }
 0x152   : > { %v919_v16 = vpop.f32.mrf.mxu0  ;;  %v932_v17 = vpop.f32.mrf.mxu1  ;;  %v944_v20 = vadd.f32 %v943_v14, %v931_v18 }
 0x154   : > { %v957_v22 = vadd.f32 %v956_v15, %v944_v20 }
 0x159   : > { %v945_v23 = vpop.f32.mrf.mxu2  ;;  %v958_v24 = vpop.f32.mrf.mxu3 }
 0x15a   : > { %v969_v26 = vpop.f32.mrf.mxu0  ;;  %v982_v27 = vpop.f32.mrf.mxu1 }
 0x15b   : > { %v970_v28 = vadd.f32 %v969_v26, %v957_v22 }
 0x15d   : > { %v1053_v29 = vadd.f32 %v1049_v25, %v970_v28 }
 0x15f   : > { %v1055_v30 = vmax.f32 %v1053_v29, 0.0 }
 0x161   : > { %1057 = vst [vmem:[%s305_s30] sm:$0xff] %v1055_v30  ;;  %v995_v31 = vpop.f32.mrf.mxu2  ;;  %v1008_v32 = vpop.f32.mrf.mxu3 }
 0x162   : > { %v971_v33 = vpop.f32.mrf.mxu0  ;;  %v984_v34 = vpop.f32.mrf.mxu1  ;;  %v996_v35 = vadd.f32 %v995_v31, %v982_v27 }
 0x164   : > { %v1009_v39 = vadd.f32 %v1008_v32, %v996_v35 }
 0x169   : > { %v997_v36 = vpop.f32.mrf.mxu2  ;;  %v1010_v38 = vpop.f32.mrf.mxu3 }
 0x16b   : > { %v1021_v40 = vpop.f32.mrf.mxu0  ;;  %v1034_v41 = vpop.f32.mrf.mxu1 }
 0x16c   : > { %v1022_v42 = vadd.f32 %v1021_v40, %v1009_v39 }
 0x16e   : > { %v1035_v44 = vadd.f32 %v1034_v41, %v1022_v42 }
 0x170   : > { %v1054_v45 = vadd.f32 %v1050_v43, %v1035_v44 }
 0x172   : > { %v1056_v46 = vmax.f32 %v1054_v45, 0.0 }
 0x173   : > { %v1023_v47 = vpop.f32.mrf.mxu0  ;;  %v1036_v48 = vpop.f32.mrf.mxu1 }
 0x174   : > { %1058 = vst [vmem:[%s305_s30 + $0x8] sm:$0xff] %v1056_v46 }
 0x175 PF: > { %s21_s23 = sadd.s32 1, %s1759_s23   ;;  %s2135_s18 = smov %s1743_s19 }
 0x176   : > { %p18_p0 = scmp.ge.s32.totalorder %s21_s23, 4   ;;  %s2136_s19 = smov %s1747_s20 }
 0x177   : > { %s2137_s20 = smov %s1839_s29  ;;  %s2138_s21 = smov %s1755_s22 }
 0x178   : > { %s2139_s22 = smov %s2141_s25  ;;  %20 = sbr.rel (!%p18_p0) target bundleno = 6 (0x6), region = 102 }
 0x17d   :  { %1081 = vsyncpa [#allocation5], 1 }
 0x17e   :  { %1083 = vsyncpa [#allocation5 + $0x1], 1 }
 0x17f   :  { %1084 = vsyncpa [#allocation7], 1 }
 0x180   :  { %1086 = vsyncpa [#allocation7 + $0x1], 1 }

// kernel: ffn_forward.5
= control target key start
LH: loop header
LB: loop body
LE: loop exit
PB: predicated region body
PF: predicated region fallthrough
CT: control target
= control target key end

     0   :  { %s5917_s0 = inlined_call_operand.vmem [shape: f32[8,2304], index: 0, kind: input, shape index: {}]   ;;  %s5918_s1 = inlined_call_operand.vmem [shape: f32[1,2304], index: 1, kind: input, shape index: {}]   ;;  %s5919_s2 = inlined_call_operand.vmem [shape: f32[1,2304], index: 2, kind: input, shape index: {}]   ;;  %s5920_s3 = inlined_call_operand.hbm [shape: bf16[2304,1024], index: 3, kind: input, shape index: {}]   ;;  %s5921_s4 = inlined_call_operand.hbm [shape: f32[1,1024], index: 4, kind: input, shape index: {}]   ;;  %s5922_s5 = inlined_call_operand.vmem [shape: f32[8,1024], index: 5, kind: output, shape index: {}]  }
   0x1   :  { %5927 = sst [smem:[#allocation12_spill]] %s5918_s1 }
   0x2   :  { %5928 = sst [smem:[#allocation13_spill]] %s5919_s2 }
   0x3   :  { %5929 = sst [smem:[#allocation14_spill]] %s5920_s3 }
   0x4   :  { %10 = vsyncpa [#allocation5], 0 }
   0x5   :  { %12 = vsyncpa [#allocation5 + $0x1], 0 }
   0x6   :  { %13 = vsyncpa [#allocation7], 0 }
   0x7   :  { %15 = vsyncpa [#allocation7 + $0x1], 0  ;;  %s4722_s18 = smov 0   ;;  %s4724_s19 = smov 0  }
   0x8   :  { %s4726_s20 = smov 0   ;;  %s4728_s21 = smov 0  }
   0x9   :  { %s4730_s22 = smov 0   ;;  %s4732_s23 = smov 0  }
   0xa   :  { %s4734_s24 = smov 0   ;;  %s4736_s25 = smov 0  }
   0xb   :  { %s4738_s26 = smov 0   ;;  %s4740_s27 = smov 0  }
   0xc   :  { %s4742_s28 = smov 0  }
   0xd LB: > { %s30_s29 = sadd.s32 1, %s4678_s26  ;;  %s33_s30 = sadd.s32 1, %s4682_s27  ;;  %s4686_s28 = sphi %s4742_s28, %s21_s28   ;;  %s4682_s27 = sphi %s4740_s27, %s5967_s27   ;;  %s4678_s26 = sphi %s4738_s26, %s5966_s26   ;;  %s4674_s25 = sphi %s4736_s25, %s5965_s25   ;;  %s4670_s24 = sphi %s4734_s24, %s5964_s24   ;;  %s4666_s23 = sphi %s4732_s23, %s5963_s23   ;;  %s4662_s22 = sphi %s4730_s22, %s5962_s22   ;;  %s4658_s21 = sphi %s4728_s21, %s5961_s21   ;;  %s4654_s20 = sphi %s4726_s20, %s5960_s20   ;;  %s4650_s19 = sphi %s4724_s19, %s5959_s19   ;;  %s4646_s18 = sphi %s4722_s18, %s5958_s18  }
   0xe   : > { %p31_p0 = scmp.ge.s32.totalorder %s30_s29, 2  ;;  %p112_p1 = scmp.ne.s32.totalorder %s4666_s23, %s4662_s22 }
   0xf   : > { %p113_p2 = scmp.eq.s32.totalorder %s4686_s28, 0  ;;  %p4437_p4 = scmp.lt.s32.totalorder %s4686_s28, 4 }
  0x10   : > { %s5969_s29 = smov (%p31_p0, %s30_s29), 0  ;;  %s5971_s30 = smov (!%p31_p0, %s33_s30), %s4682_s27 }
  0x11   : > { %5930 = sst [smem:[#allocation10_spill]] %s5969_s29  ;;  %p114_p3 = por %p113_p2, %p112_p1 }
  0x12   : > { %s203_s7 = sand.u32 1, %s4666_s23   ;;  %s2969_s8 = sshll.u32 %s4682_s27, 2 }
  0x13   : > { %s4424_s9 = smul.u32 2304, %s203_s7  ;;  %p4431_p5 = pnand %p4437_p4, %p114_p3 }
  0x14   : > { %s4135_s10 = smul.u32 1152, %s4678_s26  ;;  %s5931_s3 = sld [smem:[#allocation14_spill]] }
  0x15   : > { %s207_s12 = scalar_lea.vmem [#allocation4], %s4424_s9  ;;  %s204_s2 = scalar_lea.sflag [#allocation5], %s203_s7 }
  0x16   : > { %s213_s11 = sadd.s32 %s4135_s10, %s2969_s8  ;;  %s218_s13 = sshll.u32 %s207_s12, 4  ;;  %s219_s13 = int_to_ptr.vmem [resolvable:$true] %s218_s13 }
  0x17   : > { %s2971_s14 = sshll.u32 %s213_s11, 2  ;;  %s4688_s1 = smov 512  }
  0x18   : > { %s4689_s9 = smov 256   ;;  %s4690_s10 = smov 16  }
  0x19   : > { %p2974_p6 = scmp.ge.s32.totalorder %s4686_s28, 1  ;;  %p245_p7 = scmp.lt.s32.totalorder %s4686_s28, 5 }
  0x1a   : > { %s215_s17 = scalar_lea.hbm %s5931_s3, %s2971_s14  ;;  %s100_s11 = ssub.s32 %s4678_s26, %s5969_s29 }
  0x1b   : > { %s216_s6 = sshll.u32 %s215_s17, 4  ;;  %p4805_p8 = pnand %p2974_p6, %p245_p7  ;;  %s217_s6 = int_to_ptr.hbm [resolvable:$true] %s216_s6 }
  0x1c   : > { %4433 = dma.hbm_to_vmem [thread:$0]  (!%p4431_p5), %s217_s6, 36864, %s219_s13, %s204_s2, %s4688_s1, %s4689_s9, %s4690_s10  }
  0x1d   : > { %s2965_s7 = sadd.s32 4294967295, %s4686_s28   ;;  %p35_p9 = scmp.ge.s32.totalorder %s5971_s30, 2 }
  0x1e   : > { %p118_p10 = scmp.ne.s32.totalorder %s4662_s22, %s4658_s21  ;;  %p119_p11 = scmp.eq.s32.totalorder %s2965_s7, 0 }
  0x1f   : > { %s5973_s30 = smov (%p35_p9, %s5971_s30), 0  ;;  %s131_s2 = sadd.s32 1, %s4654_s20 }
  0x20   : > { %5933 = sst [smem:[#allocation11_spill]] %s5973_s30  ;;  %p4816_p12 = por %p119_p11, %p118_p10 }
  0x21   : > { %s101_s6 = ssub.s32 %s4682_s27, %s5973_s30  ;;  %p144_p13 = scmp.ne.s32.totalorder %s4650_s19, %s4646_s18 }
  0x22   : > { %s102_s13 = sor.u32 %s101_s6, %s100_s11  ;;  %p129_p0 = scmp.eq.s32.totalorder %s101_s6, 0 }
  0x23   : > { %p103_p1 = scmp.eq.s32.totalorder %s102_s13, 0  ;;  %p138_p3 = scmp.ne.s32.totalorder %s4654_s20, %s4650_s19 }
  0x24   : > { %s4828_s14 = scalar_select %p129_p0, %s4654_s20, %s131_s2  }
  0x25   : > { %s5935_s21 = sadd.s32 1, %s4666_s23  ;;  %p4835_p5 = por %p144_p13, %p119_p11 }
  0x26   : > { %s4833_s15 = scalar_select %p103_p1, %s4666_s23, %s5935_s21  }
  0x27   : > { %s228_s17 = sand.u32 1, %s4654_s20   ;;  %p140_p6 = por %p138_p3, %p113_p2 }
  0x28   : > { %s2972_s9 = sshll.u32 %s228_s17, 2  ;;  %s236_s11 = scalar_lea.hbm %s5921_s4, %s2969_s8 }
  0x29   : > { %s238_s7 = sshll.u32 %s236_s11, 4  ;;  %s232_s6 = scalar_lea.vmem [#allocation6], %s2972_s9  ;;  %s239_s7 = int_to_ptr.hbm [resolvable:$true] %s238_s7 }
  0x2a   : > { %s240_s2 = sshll.u32 %s232_s6, 4  ;;  %p4434_p7 = pnand %p4437_p4, %p140_p6  ;;  %s241_s2 = int_to_ptr.vmem [resolvable:$true] %s240_s2 }
  0x2b   : > { %s229_s13 = scalar_lea.sflag [#allocation7], %s228_s17  ;;  %249 = sbr.rel (%p4805_p8) target bundleno = 714 (0x2ca), region = 40 }
  0x2c   : > { %4436 = dma.hbm_to_vmem [thread:$0]  (!%p4434_p7), %s239_s7, 64, %s241_s2, %s229_s13  }
  0x2d   : > { %s251_s21 = sand.u32 (!%p4805_p8), 1, %s4662_s22  }
  0x2e   : > { %s4425_s3 = smul.u32 (!%p4805_p8), 2304, %s251_s21  ;;  %s252_s30 = scalar_lea.sflag (!%p4805_p8), [#allocation5], %s251_s21 }
  0x30   : > { %s4852_s29 = scalar_lea.vmem [#allocation4], %s4425_s3 }
  0x31   : > { %4637 = dma.done.wait (%p4816_p12), %s252_s30, 36864  }
  0x32   : > { %4639 = vsyncadd (%p4816_p12), %s252_s30, 4294930432  ;;  %s261_s8 = sand.u32 1, %s4650_s19  }
  0x33   : > { %s4859_s17 = sshll.u32 %s261_s8, 2  ;;  %s262_s12 = scalar_lea.sflag [#allocation7], %s261_s8 }
  0x34   : > { %s265_s9 = scalar_lea.vmem [#allocation6], %s4859_s17 }
  0x35   : > { %4641 = dma.done.wait (%p4835_p5), %s262_s12, 64  }
  0x36   : > { %4643 = vsyncadd (%p4835_p5), %s262_s12, 4294967232  ;;  %s2976_s3 = sshll.u32 %s4674_s25, 2  ;;  %p2978_p4 = scmp.ne.s32.totalorder %s4670_s24, 0 }
  0x37   : > { %p302_p2 = scmp.lt.s32.totalorder %s2976_s3, 7  ;;  %s5938_s6 = sld [smem:[#allocation13_spill]] (!%p2978_p4) }
  0x38   : > { %310 = sbr.rel (%p2978_p4) target bundleno = 269 (0x10d), region = 52 }
  0x39   : > { %s5975_s3 = smov (!%p302_p2, %s2976_s3), 7 }
  0x3a   : > { %s2977_s18 = sshll.u32 %s5975_s3, 3  ;;  %s5937_s3 = sld [smem:[#allocation12_spill]] (!%p2978_p4) }
  0x3b   : > { %s4870_s10 = scalar_lea.vmem %s5922_s5, %s2977_s18 }
  0x3d   : > { %v4876_v0 = vld [vmem:[%s5917_s0] sm:$0xff]  ;;  %v4881_v1 = vld [vmem:[%s5917_s0 + $0x8] sm:$0xff]  ;;  %v4886_v2 = vld [vmem:[%s5917_s0 + $0x10] sm:$0xff] }
  0x3e   : > { %v335_v3 = vadd.f32 %v4881_v1, %v4876_v0  ;;  %v355_v4 = vmul.f32 %v4876_v0, %v4876_v0  ;;  %v356_v5 = vmul.f32 %v4881_v1, %v4881_v1  ;;  %v4897_v6 = vld [vmem:[%s5917_s0 + $0x18] sm:$0xff]  ;;  %v357_v7 = vmul.f32 %v4886_v2, %v4886_v2  ;;  %v4905_v9 = vld [vmem:[%s5917_s0 + $0x20] sm:$0xff]  ;;  %v4913_v13 = vld [vmem:[%s5917_s0 + $0x28] sm:$0xff] }
  0x3f   : > { %v358_v10 = vmul.f32 %v4897_v6, %v4897_v6  ;;  %v359_v14 = vmul.f32 %v4905_v9, %v4905_v9  ;;  %v4921_v17 = vld [vmem:[%s5917_s0 + $0x30] sm:$0xff]  ;;  %v360_v18 = vmul.f32 %v4913_v13, %v4913_v13  ;;  %v4929_v21 = vld [vmem:[%s5917_s0 + $0x38] sm:$0xff]  ;;  %v4937_v25 = vld [vmem:[%s5917_s0 + $0x40] sm:$0xff] }
  0x40   : > { %v336_v8 = vadd.f32 %v335_v3, %v4886_v2  ;;  %v373_v11 = vadd.f32 %v356_v5, %v355_v4  ;;  %v361_v22 = vmul.f32 %v4921_v17, %v4921_v17  ;;  %v362_v26 = vmul.f32 %v4929_v21, %v4929_v21  ;;  %v4945_v29 = vld [vmem:[%s5917_s0 + $0x48] sm:$0xff]  ;;  %v4953_v33 = vld [vmem:[%s5917_s0 + $0x50] sm:$0xff]  ;;  %v4961_v37 = vld [vmem:[%s5917_s0 + $0x58] sm:$0xff] }
  0x41   : > { %v363_v30 = vmul.f32 %v4937_v25, %v4937_v25  ;;  %v364_v34 = vmul.f32 %v4945_v29, %v4945_v29  ;;  %v365_v38 = vmul.f32 %v4953_v33, %v4953_v33  ;;  %v4969_v41 = vld [vmem:[%s5917_s0 + $0x60] sm:$0xff]  ;;  %v366_v42 = vmul.f32 %v4961_v37, %v4961_v37  ;;  %v4977_v45 = vld [vmem:[%s5917_s0 + $0x68] sm:$0xff]  ;;  %v4985_v49 = vld [vmem:[%s5917_s0 + $0x70] sm:$0xff] }
  0x42   : > { %v337_v12 = vadd.f32 %v336_v8, %v4897_v6  ;;  %v374_v15 = vadd.f32 %v373_v11, %v357_v7  ;;  %v367_v46 = vmul.f32 %v4969_v41, %v4969_v41  ;;  %v368_v50 = vmul.f32 %v4977_v45, %v4977_v45  ;;  %v4993_v53 = vld [vmem:[%s5917_s0 + $0x78] sm:$0xff]  ;;  %v5001_v57 = vld [vmem:[%s5917_s0 + $0x80] sm:$0xff]  ;;  %v5009_v61 = vld [vmem:[%s5917_s0 + $0x88] sm:$0xff] }
  0x43   : > { %v369_v54 = vmul.f32 %v4985_v49, %v4985_v49  ;;  %v370_v58 = vmul.f32 %v4993_v53, %v4993_v53  ;;  %v371_v3 = vmul.f32 %v5001_v57, %v5001_v57  ;;  %v372_v7 = vmul.f32 %v5009_v61, %v5009_v61 }
  0x44   : > { %v338_v16 = vadd.f32 %v337_v12, %v4905_v9  ;;  %v375_v19 = vadd.f32 %v374_v15, %v358_v10 }
  0x46   : > { %v339_v20 = vadd.f32 %v338_v16, %v4913_v13  ;;  %v376_v23 = vadd.f32 %v375_v19, %v359_v14 }
  0x48   : > { %v340_v24 = vadd.f32 %v339_v20, %v4921_v17  ;;  %v377_v27 = vadd.f32 %v376_v23, %v360_v18  ;;  %v5026_v20 = vld [vmem:[%s5937_s3] sm:$0xff] }
  0x49   : > { %v445_v23 = vperm.slane %v5026_v20, 0 }
  0x4a   : > { %v341_v28 = vadd.f32 %v340_v24, %v4929_v21  ;;  %v378_v31 = vadd.f32 %v377_v27, %v361_v22  ;;  %v5032_v22 = vld [vmem:[%s5937_s3 + $0x8] sm:$0xff]  ;;  %v5038_v24 = vld [vmem:[%s5937_s3 + $0x10] sm:$0x3]  ;;  %v447_v27 = vperm.slane %v5026_v20, 2 }
  0x4c   : > { %v342_v32 = vadd.f32 %v341_v28, %v4937_v25  ;;  %v379_v35 = vadd.f32 %v378_v31, %v362_v26  ;;  %v446_v26 = vperm.slane %v5026_v20, 1  ;;  %v448_v28 = vperm.slane %v5026_v20, 3  ;;  %v5047_v31 = vld [vmem:[%s5938_s6] sm:$0xff] }
  0x4e   : > { %v343_v36 = vadd.f32 %v342_v32, %v4945_v29  ;;  %v380_v39 = vadd.f32 %v379_v35, %v363_v30  ;;  %v449_v30 = vperm.slane %v5026_v20, 4  ;;  %v450_v32 = vperm.slane %v5026_v20, 5 }
  0x4f   : > { %v452_v35 = vperm.slane %v5026_v20, 7 }
  0x50   : > { %v344_v40 = vadd.f32 %v343_v36, %v4953_v33  ;;  %v381_v43 = vadd.f32 %v380_v39, %v364_v34  ;;  %v451_v34 = vperm.slane %v5026_v20, 6  ;;  %v453_v36 = vperm.slane %v5032_v22, 0 }
  0x51   : > { %v455_v39 = vperm.slane %v5032_v22, 2 }
  0x52   : > { %v345_v44 = vadd.f32 %v344_v40, %v4961_v37  ;;  %v382_v47 = vadd.f32 %v381_v43, %v365_v38  ;;  %v454_v38 = vperm.slane %v5032_v22, 1  ;;  %v456_v40 = vperm.slane %v5032_v22, 3 }
  0x54   : > { %v346_v48 = vadd.f32 %v345_v44, %v4969_v41  ;;  %v383_v51 = vadd.f32 %v382_v47, %v366_v42  ;;  %v457_v42 = vperm.slane %v5032_v22, 4  ;;  %v458_v44 = vperm.slane %v5032_v22, 5 }
  0x55   : > { %v460_v47 = vperm.slane %v5032_v22, 7 }
  0x56   : > { %v347_v52 = vadd.f32 %v346_v48, %v4977_v45  ;;  %v384_v55 = vadd.f32 %v383_v51, %v367_v46  ;;  %v459_v46 = vperm.slane %v5032_v22, 6  ;;  %v5942_v22 = vperm.slane %v5047_v31, 6 }
  0x58   : > { %v348_v56 = vadd.f32 %v347_v52, %v4985_v49  ;;  %v385_v59 = vadd.f32 %v384_v55, %v368_v50  ;;  %v5064_v50 = vld [vmem:[%s5938_s6 + $0x8] sm:$0xff]  ;;  %v502_v52 = vperm.slane %v5047_v31, 0 }
  0x5a   : > { %v349_v60 = vadd.f32 %v348_v56, %v4993_v53  ;;  %v386_v62 = vadd.f32 %v385_v59, %v369_v54  ;;  %v503_v54 = vperm.slane %v5047_v31, 1  ;;  %v504_v56 = vperm.slane %v5047_v31, 2 }
  0x5c   : > { %v350_v63 = vadd.f32 %v349_v60, %v5001_v57  ;;  %v387_v4 = vadd.f32 %v386_v62, %v370_v58  ;;  %v5076_v60 = vld [vmem:[%s5938_s6 + $0x10] sm:$0x3] }
  0x5e   : > { %v351_v5 = vadd.f32 %v350_v63, %v5009_v61  ;;  %v388_v8 = vadd.f32 %v387_v4, %v371_v3 }
  0x60   : > { %352 = vadd.xlane.f32.xlu0 %v351_v5  ;;  %v389_v10 = vadd.f32 %v388_v8, %v372_v7  ;;  %v4691_v5 = vmov 0.0  }
  0x61   : > { %574 = vst [vmem:[#allocation3 + $0x10] sm:$0xff] %v4691_v5 }
  0x62   : > { %575 = vst [vmem:[#allocation3] sm:$0xff] %v4691_v5 }
  0x63   : > { %576 = vst [vmem:[#allocation3 + $0x18] sm:$0xff] %v4691_v5 }
  0x64   : > { %577 = vst [vmem:[#allocation3 + $0x8] sm:$0xff] %v4691_v5 }
  0x68   : > { %390 = vadd.xlane.f32.xlu0 %v389_v10 }
  0xd3   : > { %v353_v11 = vpop.xlane.xlu0 %352 }
  0xd4   : > { %v5017_v12 = vmul.f32 0.00045454546, %v353_v11 }
  0xd6   : > { %v393_v15 = vmul.f32 %v5017_v12, %v5017_v12  ;;  %v396_v11 = vsub.f32 %v4881_v1, %v5017_v12  ;;  %v400_v8 = vsub.f32 %v4913_v13, %v5017_v12  ;;  %v401_v5 = vsub.f32 %v4921_v17, %v5017_v12 }
  0xd7   : > { %v402_v1 = vsub.f32 %v4929_v21, %v5017_v12  ;;  %v406_v13 = vsub.f32 %v4961_v37, %v5017_v12  ;;  %v407_v17 = vsub.f32 %v4969_v41, %v5017_v12  ;;  %v408_v21 = vsub.f32 %v4977_v45, %v5017_v12 }
  0xd8   : > { %v412_v37 = vsub.f32 %v5009_v61, %v5017_v12 }
  0xdb   : > { %v391_v14 = vpop.xlane.xlu0 %390 }
  0xdc   : > { %v392_v16 = vmul.f32 0.00045454546, %v391_v14 }
  0xde   : > { %v394_v18 = vsub.f32 %v392_v16, %v393_v15  ;;  %v397_v15 = vsub.f32 %v4886_v2, %v5017_v12  ;;  %v403_v2 = vsub.f32 %v4937_v25, %v5017_v12  ;;  %v409_v25 = vsub.f32 %v4985_v49, %v5017_v12 }
  0xe0   : > { %v5021_v19 = vadd.f32 1e-05, %v394_v18 }
  0xe2   : > { %4530 = vrsqrt.f32 %v5021_v19  ;;  %vm420_vm1 = vweird.f32 %v5021_v19 }
  0xe8   : > { %v4531_v43 = vpop.eup %4530 }
  0xe9   : > { %v415_v55 = vmul.f32 %v4531_v43, %v5021_v19  ;;  %vm421_vm0 = vweird.f32 %v4531_v43  ;;  %v410_v19 = vsub.f32 %v4993_v53, %v5017_v12 }
  0xea   : > { %vm422_vm2 = vmor %vm420_vm1, %vm421_vm0 }
  0xeb   : > { %v416_v4 = vmul.f32 %v4531_v43, %v415_v55  ;;  %v395_v55 = vsub.f32 %v4876_v0, %v5017_v12  ;;  %v399_v0 = vsub.f32 %v4905_v9, %v5017_v12  ;;  %v405_v9 = vsub.f32 %v4953_v33, %v5017_v12 }
  0xec   : > { %v411_v33 = vsub.f32 %v5001_v57, %v5017_v12 }
  0xed   : > { %v417_v18 = vmul.f32 0.5, %v416_v4  ;;  %v398_v4 = vsub.f32 %v4897_v6, %v5017_v12  ;;  %v404_v6 = vsub.f32 %v4945_v29, %v5017_v12 }
  0xef   : > { %v418_v14 = vsub.f32 1.5, %v417_v18 }
  0xf1   : > { %v419_v18 = vmul.f32 %v4531_v43, %v418_v14 }
  0xf3   : > { %v423_v29 = vsel %vm422_vm2, %v4531_v43, %v419_v18 }
  0xf4   : > { %v424_v14 = vmul.f32 %v423_v29, %v395_v55  ;;  %v425_v10 = vmul.f32 %v423_v29, %v396_v11  ;;  %v426_v41 = vmul.f32 %v423_v29, %v397_v15  ;;  %v427_v7 = vmul.f32 %v423_v29, %v398_v4 }
  0xf5   : > { %v428_v16 = vmul.f32 %v423_v29, %v399_v0  ;;  %v429_v51 = vmul.f32 %v423_v29, %v400_v8  ;;  %v430_v45 = vmul.f32 %v423_v29, %v401_v5  ;;  %v431_v48 = vmul.f32 %v423_v29, %v402_v1 }
  0xf6   : > { %v432_v3 = vmul.f32 %v423_v29, %v403_v2  ;;  %v433_v49 = vmul.f32 %v423_v29, %v404_v6  ;;  %v434_v63 = vmul.f32 %v423_v29, %v405_v9  ;;  %v435_v62 = vmul.f32 %v423_v29, %v406_v13 }
  0xf7   : > { %v436_v53 = vmul.f32 %v423_v29, %v407_v17  ;;  %v437_v43 = vmul.f32 %v423_v29, %v408_v21  ;;  %v438_v18 = vmul.f32 %v423_v29, %v409_v25  ;;  %v439_v59 = vmul.f32 %v423_v29, %v410_v19 }
  0xf8   : > { %v440_v57 = vmul.f32 %v423_v29, %v411_v33  ;;  %v441_v58 = vmul.f32 %v423_v29, %v412_v37  ;;  %v481_v61 = vmul.f32 %v445_v23, %v424_v14  ;;  %v482_v12 = vmul.f32 %v446_v26, %v425_v10 }
  0xf9   : > { %v483_v8 = vmul.f32 %v447_v27, %v426_v41  ;;  %v484_v11 = vmul.f32 %v448_v28, %v427_v7  ;;  %v485_v15 = vmul.f32 %v449_v30, %v428_v16  ;;  %v486_v55 = vmul.f32 %v450_v32, %v429_v51 }
  0xfa   : > { %v487_v4 = vmul.f32 %v451_v34, %v430_v45  ;;  %v488_v23 = vmul.f32 %v452_v35, %v431_v48  ;;  %v489_v26 = vmul.f32 %v453_v36, %v432_v3  ;;  %v490_v27 = vmul.f32 %v454_v38, %v433_v49 }
  0xfb   : > { %v491_v28 = vmul.f32 %v455_v39, %v434_v63  ;;  %v492_v30 = vmul.f32 %v456_v40, %v435_v62  ;;  %v493_v32 = vmul.f32 %v457_v42, %v436_v53  ;;  %v494_v34 = vmul.f32 %v458_v44, %v437_v43 }
  0xfc   : > { %v495_v20 = vmul.f32 %v459_v46, %v438_v18  ;;  %v496_v35 = vmul.f32 %v460_v47, %v439_v59  ;;  %v538_v36 = vadd.f32 %v502_v52, %v481_v61  ;;  %v539_v38 = vadd.f32 %v503_v54, %v482_v12 }
  0xfd   : > { %v540_v39 = vadd.f32 %v504_v56, %v483_v8  ;;  %v5939_v40 = vperm.slane %v5047_v31, 3  ;;  %v5940_v44 = vperm.slane %v5047_v31, 4  ;;  %v5941_v46 = vperm.slane %v5047_v31, 5 }
  0xfe   : > { %v544_v47 = vadd.f32 %v5942_v22, %v487_v4  ;;  %v5943_v52 = vperm.slane %v5047_v31, 7  ;;  %v5944_v54 = vperm.slane %v5038_v24, 0  ;;  %v5945_v56 = vperm.slane %v5038_v24, 1 }
  0xff   : > { %v541_v42 = vadd.f32 %v5939_v40, %v484_v11  ;;  %v542_v48 = vadd.f32 %v5940_v44, %v485_v15  ;;  %v543_v51 = vadd.f32 %v5941_v46, %v486_v55  ;;  %v5946_v3 = vperm.slane %v5064_v50, 0 }
 0x100   : > { %v545_v59 = vadd.f32 %v5943_v52, %v488_v23  ;;  %v497_v62 = vmul.f32 %v5944_v54, %v440_v57  ;;  %v498_v63 = vmul.f32 %v5945_v56, %v441_v58  ;;  %v5947_v10 = vperm.slane %v5064_v50, 1 }
 0x101   : > { %v546_v7 = vadd.f32 %v5946_v3, %v489_v26  ;;  %v5948_v0 = vperm.slane %v5064_v50, 2  ;;  %v5949_v1 = vperm.slane %v5064_v50, 3  ;;  %v5950_v31 = vperm.slane %v5064_v50, 4 }
 0x102   : > { %v547_v16 = vadd.f32 %v5947_v10, %v490_v27  ;;  %v5951_v9 = vperm.slane %v5064_v50, 5  ;;  %v556_v24 = vpack.c.bf16 %v539_v38, %v538_v36  ;;  %v557_v58 = vpack.c.bf16 %v541_v42, %v540_v39 }
 0x103   : > { %v548_v5 = vadd.f32 %v5948_v0, %v491_v28  ;;  %v549_v2 = vadd.f32 %v5949_v1, %v492_v30  ;;  %v550_v6 = vadd.f32 %v5950_v31, %v493_v32  ;;  %v5952_v17 = vperm.slane %v5064_v50, 6 }
 0x104   : > { %v551_v13 = vadd.f32 %v5951_v9, %v494_v34  ;;  %v5953_v25 = vperm.slane %v5064_v50, 7  ;;  %v558_v29 = vpack.c.bf16 %v543_v51, %v542_v48  ;;  %v559_v33 = vpack.c.bf16 %v545_v59, %v544_v47  ;;  %565 = vst [vmem:[#allocation2] sm:$0xff] %v556_v24 }
 0x105   : > { %v552_v21 = vadd.f32 %v5952_v17, %v495_v20  ;;  %v5954_v37 = vperm.slane %v5076_v60, 0  ;;  %v5955_v41 = vperm.slane %v5076_v60, 1  ;;  %v560_v49 = vpack.c.bf16 %v547_v16, %v546_v7  ;;  %566 = vst [vmem:[#allocation2 + $0x8] sm:$0xff] %v557_v58 }
 0x106   : > { %v553_v19 = vadd.f32 %v5953_v25, %v496_v35  ;;  %v561_v53 = vpack.c.bf16 %v549_v2, %v548_v5  ;;  %v562_v43 = vpack.c.bf16 %v551_v13, %v550_v6  ;;  %567 = vst [vmem:[#allocation2 + $0x10] sm:$0xff] %v558_v29 }
 0x107   : > { %v554_v14 = vadd.f32 %v5954_v37, %v497_v62  ;;  %v555_v45 = vadd.f32 %v5955_v41, %v498_v63  ;;  %568 = vst [vmem:[#allocation2 + $0x18] sm:$0xff] %v559_v33 }
 0x108   : > { %v563_v18 = vpack.c.bf16 %v553_v19, %v552_v21  ;;  %569 = vst [vmem:[#allocation2 + $0x20] sm:$0xff] %v560_v49 }
 0x109   : > { %v564_v57 = vpack.c.bf16 %v555_v45, %v554_v14  ;;  %570 = vst [vmem:[#allocation2 + $0x28] sm:$0xff] %v561_v53 }
 0x10a   : > { %571 = vst [vmem:[#allocation2 + $0x30] sm:$0xff] %v562_v43 }
 0x10b   : > { %572 = vst [vmem:[#allocation2 + $0x38] sm:$0xff] %v563_v18 }
 0x10c   : > { %573 = vst [vmem:[#allocation2 + $0x40] sm:$0xff] %v564_v57 }
 0x10d PF: > { %v3094_v50 = vld [vmem:[%s4852_s29 + $0xe0] sm:$0xf]  ;;  %v4166_v60 = vld [vmem:[%s4852_s29 + $0xec] sm:$0xf0]  ;;  %s578_s8 = smul.u32 1152, %s4670_s24  ;;  %p4132_p8 = scmp.ne.s32.totalorder %s4670_s24, 1 }
 0x10e   : > { %v3222_v61 = vld [vmem:[%s4852_s29 + $0x1e0] sm:$0xf]  ;;  %v3095_v12 = vor.u32 %v4166_v60, %v3094_v50  ;;  %v4198_v8 = vld [vmem:[%s4852_s29 + $0x1ec] sm:$0xf0] }
 0x10f   : > { %v3350_v11 = vld [vmem:[%s4852_s29 + $0x2e0] sm:$0xf]  ;;  %v4230_v15 = vld [vmem:[%s4852_s29 + $0x2ec] sm:$0xf0]  ;;  %v3223_v55 = vor.u32 %v4198_v8, %v3222_v61  ;;  %s583_s12 = sshra.s32 %s578_s8, 7 }
 0x110   : > { %v3351_v4 = vor.u32 %v4230_v15, %v3350_v11  ;;  %v3478_v23 = vld [vmem:[%s4852_s29 + $0x3e0] sm:$0xf]  ;;  %v4262_v26 = vld [vmem:[%s4852_s29 + $0x3ec] sm:$0xf0]  ;;  %2352 = vmatpush.bf16.msra.mxu0 %v3095_v12  ;;  %s2979_s18 = sshll.u32 %s583_s12, 2 }
 0x111   : > { %v3078_v27 = vld [vmem:[%s4852_s29 + $0xc0] sm:$0xf]  ;;  %v3479_v28 = vor.u32 %v4262_v26, %v3478_v23  ;;  %v4162_v30 = vld [vmem:[%s4852_s29 + $0xcc] sm:$0xf0]  ;;  %2365 = vmatpush.bf16.msra.mxu1 %v3223_v55  ;;  %s5295_s1 = scalar_lea.vmem [#allocation2], %s2979_s18 }
 0x112   : > { %v3206_v32 = vld [vmem:[%s4852_s29 + $0x1c0] sm:$0xf]  ;;  %v4194_v34 = vld [vmem:[%s4852_s29 + $0x1cc] sm:$0xf0]  ;;  %2378 = vmatpush.bf16.msra.mxu2 %v3351_v4  ;;  %v3079_v20 = vor.u32 %v4162_v30, %v3078_v27 }
 0x113   : > { %v3207_v35 = vor.u32 %v4194_v34, %v3206_v32  ;;  %v3334_v36 = vld [vmem:[%s4852_s29 + $0x2c0] sm:$0xf]  ;;  %v4226_v38 = vld [vmem:[%s4852_s29 + $0x2cc] sm:$0xf0]  ;;  %2391 = vmatpush.bf16.msra.mxu3 %v3479_v28 }
 0x114   : > { %v3462_v39 = vld [vmem:[%s4852_s29 + $0x3c0] sm:$0xf]  ;;  %v3335_v40 = vor.u32 %v4226_v38, %v3334_v36  ;;  %v4258_v42 = vld [vmem:[%s4852_s29 + $0x3cc] sm:$0xf0]  ;;  %2353 = vmatpush.bf16.msra.mxu0 %v3079_v20 }
 0x115   : > { %v3062_v44 = vld [vmem:[%s4852_s29 + $0xa0] sm:$0xf]  ;;  %v4158_v48 = vld [vmem:[%s4852_s29 + $0xac] sm:$0xf0]  ;;  %v3463_v46 = vor.u32 %v4258_v42, %v3462_v39  ;;  %2366 = vmatpush.bf16.msra.mxu1 %v3207_v35 }
 0x116   : > { %v3190_v51 = vld [vmem:[%s4852_s29 + $0x1a0] sm:$0xf]  ;;  %v4190_v22 = vld [vmem:[%s4852_s29 + $0x1ac] sm:$0xf0]  ;;  %v3063_v52 = vor.u32 %v4158_v48, %v3062_v44  ;;  %2379 = vmatpush.bf16.msra.mxu2 %v3335_v40 }
 0x117   : > { %v3318_v47 = vld [vmem:[%s4852_s29 + $0x2a0] sm:$0xf]  ;;  %v4222_v59 = vld [vmem:[%s4852_s29 + $0x2ac] sm:$0xf0]  ;;  %v3191_v56 = vor.u32 %v4190_v22, %v3190_v51  ;;  %2392 = vmatpush.bf16.msra.mxu3 %v3463_v46 }
 0x118   : > { %v3446_v54 = vld [vmem:[%s4852_s29 + $0x3a0] sm:$0xf]  ;;  %v4254_v62 = vld [vmem:[%s4852_s29 + $0x3ac] sm:$0xf0]  ;;  %v3319_v63 = vor.u32 %v4222_v59, %v3318_v47  ;;  %2354 = vmatpush.bf16.msra.mxu0 %v3063_v52 }
 0x119   : > { %v3046_v3 = vld [vmem:[%s4852_s29 + $0x80] sm:$0xf]  ;;  %v4154_v7 = vld [vmem:[%s4852_s29 + $0x8c] sm:$0xf0]  ;;  %v3447_v16 = vor.u32 %v4254_v62, %v3446_v54  ;;  %2367 = vmatpush.bf16.msra.mxu1 %v3191_v56 }
 0x11a   : > { %v3174_v10 = vld [vmem:[%s4852_s29 + $0x180] sm:$0xf]  ;;  %v4186_v0 = vld [vmem:[%s4852_s29 + $0x18c] sm:$0xf0]  ;;  %v3047_v6 = vor.u32 %v4154_v7, %v3046_v3  ;;  %2380 = vmatpush.bf16.msra.mxu2 %v3319_v63 }
 0x11b   : > { %v3302_v5 = vld [vmem:[%s4852_s29 + $0x280] sm:$0xf]  ;;  %v4218_v1 = vld [vmem:[%s4852_s29 + $0x28c] sm:$0xf0]  ;;  %v3175_v9 = vor.u32 %v4186_v0, %v3174_v10  ;;  %2393 = vmatpush.bf16.msra.mxu3 %v3447_v16 }
 0x11c   : > { %v3430_v2 = vld [vmem:[%s4852_s29 + $0x380] sm:$0xf]  ;;  %v4250_v31 = vld [vmem:[%s4852_s29 + $0x38c] sm:$0xf0]  ;;  %v3303_v13 = vor.u32 %v4218_v1, %v3302_v5  ;;  %2355 = vmatpush.bf16.msra.mxu0 %v3047_v6 }
 0x11d   : > { %v3030_v24 = vld [vmem:[%s4852_s29 + $0x60] sm:$0xf]  ;;  %v4150_v58 = vld [vmem:[%s4852_s29 + $0x6c] sm:$0xf0]  ;;  %v3431_v21 = vor.u32 %v4250_v31, %v3430_v2  ;;  %2368 = vmatpush.bf16.msra.mxu1 %v3175_v9 }
 0x11e   : > { %v3158_v17 = vld [vmem:[%s4852_s29 + $0x160] sm:$0xf]  ;;  %v4182_v25 = vld [vmem:[%s4852_s29 + $0x16c] sm:$0xf0]  ;;  %v3031_v14 = vor.u32 %v4150_v58, %v3030_v24  ;;  %2381 = vmatpush.bf16.msra.mxu2 %v3303_v13 }
 0x11f   : > { %v3286_v19 = vld [vmem:[%s4852_s29 + $0x260] sm:$0xf]  ;;  %v4214_v29 = vld [vmem:[%s4852_s29 + $0x26c] sm:$0xf0]  ;;  %v3159_v41 = vor.u32 %v4182_v25, %v3158_v17  ;;  %2394 = vmatpush.bf16.msra.mxu3 %v3431_v21 }
 0x120   : > { %v3414_v33 = vld [vmem:[%s4852_s29 + $0x360] sm:$0xf]  ;;  %v4246_v37 = vld [vmem:[%s4852_s29 + $0x36c] sm:$0xf0]  ;;  %v3287_v45 = vor.u32 %v4214_v29, %v3286_v19  ;;  %2356 = vmatpush.bf16.msra.mxu0 %v3031_v14 }
 0x121   : > { %v3014_v49 = vld [vmem:[%s4852_s29 + $0x40] sm:$0xf]  ;;  %v4146_v53 = vld [vmem:[%s4852_s29 + $0x4c] sm:$0xf0]  ;;  %v3415_v18 = vor.u32 %v4246_v37, %v3414_v33  ;;  %2369 = vmatpush.bf16.msra.mxu1 %v3159_v41 }
 0x122   : > { %v3142_v43 = vld [vmem:[%s4852_s29 + $0x140] sm:$0xf]  ;;  %v4178_v57 = vld [vmem:[%s4852_s29 + $0x14c] sm:$0xf0]  ;;  %v3015_v8 = vor.u32 %v4146_v53, %v3014_v49  ;;  %2382 = vmatpush.bf16.msra.mxu2 %v3287_v45 }
 0x123   : > { %v3270_v50 = vld [vmem:[%s4852_s29 + $0x240] sm:$0xf]  ;;  %v4210_v60 = vld [vmem:[%s4852_s29 + $0x24c] sm:$0xf0]  ;;  %v3143_v11 = vor.u32 %v4178_v57, %v3142_v43  ;;  %2395 = vmatpush.bf16.msra.mxu3 %v3415_v18 }
 0x124   : > { %v3398_v61 = vld [vmem:[%s4852_s29 + $0x340] sm:$0xf]  ;;  %v4242_v12 = vld [vmem:[%s4852_s29 + $0x34c] sm:$0xf0]  ;;  %v3271_v15 = vor.u32 %v4210_v60, %v3270_v50  ;;  %2357 = vmatpush.bf16.msra.mxu0 %v3015_v8 }
 0x125   : > { %v2998_v55 = vld [vmem:[%s4852_s29 + $0x20] sm:$0xf]  ;;  %v4142_v4 = vld [vmem:[%s4852_s29 + $0x2c] sm:$0xf0]  ;;  %v3399_v26 = vor.u32 %v4242_v12, %v3398_v61  ;;  %2370 = vmatpush.bf16.msra.mxu1 %v3143_v11 }
 0x126   : > { %v3126_v23 = vld [vmem:[%s4852_s29 + $0x120] sm:$0xf]  ;;  %v4174_v27 = vld [vmem:[%s4852_s29 + $0x12c] sm:$0xf0]  ;;  %v2999_v20 = vor.u32 %v4142_v4, %v2998_v55  ;;  %2383 = vmatpush.bf16.msra.mxu2 %v3271_v15 }
 0x127   : > { %v3254_v28 = vld [vmem:[%s4852_s29 + $0x220] sm:$0xf]  ;;  %v4206_v30 = vld [vmem:[%s4852_s29 + $0x22c] sm:$0xf0]  ;;  %v3127_v38 = vor.u32 %v4174_v27, %v3126_v23  ;;  %2396 = vmatpush.bf16.msra.mxu3 %v3399_v26  ;;  %v587_v27 = vld [vmem:[%s5295_s1] sm:$0xff] }
 0x128   : > { %v3382_v32 = vld [vmem:[%s4852_s29 + $0x320] sm:$0xf]  ;;  %v4238_v34 = vld [vmem:[%s4852_s29 + $0x32c] sm:$0xf0]  ;;  %v3255_v39 = vor.u32 %v4206_v30, %v3254_v28  ;;  %2358 = vmatpush.bf16.msra.mxu0 %v2999_v20 }
 0x129   : > { %v2982_v35 = vld [vmem:[%s4852_s29] sm:$0xf]  ;;  %v4138_v36 = vld [vmem:[%s4852_s29 + $0xc] sm:$0xf0]  ;;  %v3383_v48 = vor.u32 %v4238_v34, %v3382_v32  ;;  %2371 = vmatpush.bf16.msra.mxu1 %v3127_v38  ;;  %v885_v34 = vunpack.c.l.b16 %v587_v27 }
 0x12a   : > { %v3110_v40 = vld [vmem:[%s4852_s29 + $0x100] sm:$0xf]  ;;  %v4170_v42 = vld [vmem:[%s4852_s29 + $0x10c] sm:$0xf0]  ;;  %v2983_v54 = vor.u32 %v4138_v36, %v2982_v35  ;;  %2384 = vmatpush.bf16.msra.mxu2 %v3255_v39  ;;  %v886_v35 = vunpack.c.h.b16 %v587_v27 }
 0x12b   : > { %v3238_v44 = vld [vmem:[%s4852_s29 + $0x200] sm:$0xf]  ;;  %v4202_v46 = vld [vmem:[%s4852_s29 + $0x20c] sm:$0xf0]  ;;  %v3111_v3 = vor.u32 %v4170_v42, %v3110_v40  ;;  %2397 = vmatpush.bf16.msra.mxu3 %v3383_v48 }
 0x12c   : > { %v3366_v51 = vld [vmem:[%s4852_s29 + $0x300] sm:$0xf]  ;;  %v4234_v22 = vld [vmem:[%s4852_s29 + $0x30c] sm:$0xf0]  ;;  %v3239_v7 = vor.u32 %v4202_v46, %v3238_v44  ;;  %2359 = vmatpush.bf16.msra.mxu0 %v2983_v54  ;;  %v5306_v46 = vpack.c.b16 %v885_v34, %v885_v34  ;;  %v5313_v54 = vpack.c.b16 %v886_v35, %v886_v35 }
 0x12d   : > { %v3606_v47 = vld [vmem:[%s4852_s29 + $0x4e0] sm:$0xf]  ;;  %v4294_v52 = vld [vmem:[%s4852_s29 + $0x4ec] sm:$0xf0]  ;;  %v3367_v0 = vor.u32 %v4234_v22, %v3366_v51  ;;  %2372 = vmatpush.bf16.msra.mxu1 %v3111_v3 }
 0x12e   : > { %v3734_v59 = vld [vmem:[%s4852_s29 + $0x5e0] sm:$0xf]  ;;  %v4326_v62 = vld [vmem:[%s4852_s29 + $0x5ec] sm:$0xf0]  ;;  %v3607_v5 = vor.u32 %v4294_v52, %v3606_v47  ;;  %2385 = vmatpush.bf16.msra.mxu2 %v3239_v7 }
 0x12f   : > { %v3862_v56 = vld [vmem:[%s4852_s29 + $0x6e0] sm:$0xf]  ;;  %v4358_v63 = vld [vmem:[%s4852_s29 + $0x6ec] sm:$0xf0]  ;;  %v3735_v1 = vor.u32 %v4326_v62, %v3734_v59  ;;  %2398 = vmatpush.bf16.msra.mxu3 %v3367_v0  ;;  %2360 = vmatmul.bf16.vlgmr.msra.gmra.mxu0 %v5306_v46 }
 0x130   : > { %v3990_v10 = vld [vmem:[%s4852_s29 + $0x7e0] sm:$0xf]  ;;  %v4390_v16 = vld [vmem:[%s4852_s29 + $0x7ec] sm:$0xf0]  ;;  %v3863_v2 = vor.u32 %v4358_v63, %v3862_v56  ;;  %2404 = vmatpush.bf16.msrb.mxu0 %v3607_v5  ;;  %2373 = vmatmul.bf16.vlgmr.msra.gmra.mxu1 %v5313_v54 }
 0x131   : > { %v3590_v31 = vld [vmem:[%s4852_s29 + $0x4c0] sm:$0xf]  ;;  %v4290_v6 = vld [vmem:[%s4852_s29 + $0x4cc] sm:$0xf0]  ;;  %v3991_v13 = vor.u32 %v4390_v16, %v3990_v10  ;;  %2417 = vmatpush.bf16.msrb.mxu1 %v3735_v1 }
 0x132   : > { %v3718_v9 = vld [vmem:[%s4852_s29 + $0x5c0] sm:$0xf]  ;;  %v4322_v24 = vld [vmem:[%s4852_s29 + $0x5cc] sm:$0xf0]  ;;  %v3591_v19 = vor.u32 %v4290_v6, %v3590_v31  ;;  %2430 = vmatpush.bf16.msrb.mxu2 %v3863_v2 }
 0x133   : > { %v3846_v58 = vld [vmem:[%s4852_s29 + $0x6c0] sm:$0xf]  ;;  %v4354_v17 = vld [vmem:[%s4852_s29 + $0x6cc] sm:$0xf0]  ;;  %v3719_v14 = vor.u32 %v4322_v24, %v3718_v9  ;;  %2443 = vmatpush.bf16.msrb.mxu3 %v3991_v13 }
 0x134   : > { %v3974_v21 = vld [vmem:[%s4852_s29 + $0x7c0] sm:$0xf]  ;;  %v4386_v25 = vld [vmem:[%s4852_s29 + $0x7cc] sm:$0xf0]  ;;  %v3847_v41 = vor.u32 %v4354_v17, %v3846_v58  ;;  %2405 = vmatpush.bf16.msrb.mxu0 %v3591_v19 }
 0x135   : > { %v3574_v29 = vld [vmem:[%s4852_s29 + $0x4a0] sm:$0xf]  ;;  %v4286_v33 = vld [vmem:[%s4852_s29 + $0x4ac] sm:$0xf0]  ;;  %v3975_v53 = vor.u32 %v4386_v25, %v3974_v21  ;;  %2418 = vmatpush.bf16.msrb.mxu1 %v3719_v14 }
 0x136   : > { %v3702_v37 = vld [vmem:[%s4852_s29 + $0x5a0] sm:$0xf]  ;;  %v4318_v45 = vld [vmem:[%s4852_s29 + $0x5ac] sm:$0xf0]  ;;  %v3575_v61 = vor.u32 %v4286_v33, %v3574_v29  ;;  %2431 = vmatpush.bf16.msrb.mxu2 %v3847_v41 }
 0x137   : > { %v3830_v49 = vld [vmem:[%s4852_s29 + $0x6a0] sm:$0xf]  ;;  %v4350_v43 = vld [vmem:[%s4852_s29 + $0x6ac] sm:$0xf0]  ;;  %v3703_v11 = vor.u32 %v4318_v45, %v3702_v37  ;;  %2444 = vmatpush.bf16.msrb.mxu3 %v3975_v53 }
 0x138   : > { %v3958_v18 = vld [vmem:[%s4852_s29 + $0x7a0] sm:$0xf]  ;;  %v4382_v57 = vld [vmem:[%s4852_s29 + $0x7ac] sm:$0xf0]  ;;  %v3831_v15 = vor.u32 %v4350_v43, %v3830_v49  ;;  %2406 = vmatpush.bf16.msrb.mxu0 %v3575_v61 }
 0x139   : > { %v3558_v50 = vld [vmem:[%s4852_s29 + $0x480] sm:$0xf]  ;;  %v4282_v60 = vld [vmem:[%s4852_s29 + $0x48c] sm:$0xf0]  ;;  %v3959_v23 = vor.u32 %v4382_v57, %v3958_v18  ;;  %2419 = vmatpush.bf16.msrb.mxu1 %v3703_v11 }
 0x13a   : > { %v3686_v12 = vld [vmem:[%s4852_s29 + $0x580] sm:$0xf]  ;;  %v4314_v8 = vld [vmem:[%s4852_s29 + $0x58c] sm:$0xf0]  ;;  %v3559_v36 = vor.u32 %v4282_v60, %v3558_v50  ;;  %2432 = vmatpush.bf16.msrb.mxu2 %v3831_v15 }
 0x13b   : > { %v3814_v55 = vld [vmem:[%s4852_s29 + $0x680] sm:$0xf]  ;;  %v4346_v4 = vld [vmem:[%s4852_s29 + $0x68c] sm:$0xf0]  ;;  %v3687_v38 = vor.u32 %v4314_v8, %v3686_v12  ;;  %2445 = vmatpush.bf16.msrb.mxu3 %v3959_v23 }
 0x13c   : > { %v588_v26 = vld [vmem:[%s5295_s1 + $0x8] sm:$0xff]  ;;  %v4378_v30 = vld [vmem:[%s4852_s29 + $0x78c] sm:$0xf0]  ;;  %v3815_v39 = vor.u32 %v4346_v4, %v3814_v55  ;;  %2407 = vmatpush.bf16.msrb.mxu0 %v3559_v36  ;;  %v589_v55 = vld [vmem:[%s5295_s1 + $0x10] sm:$0xff] }
 0x13d   : > { %v3942_v28 = vld [vmem:[%s4852_s29 + $0x780] sm:$0xf]  ;;  %v887_v32 = vunpack.c.l.b16 %v588_v26  ;;  %v888_v20 = vunpack.c.h.b16 %v588_v26  ;;  %v4278_v42 = vld [vmem:[%s4852_s29 + $0x46c] sm:$0xf0]  ;;  %2420 = vmatpush.bf16.msrb.mxu1 %v3687_v38  ;;  %v4164_v26 = vld [vmem:[%s4852_s29 + $0xe4] sm:$0xf] }
 0x13e   : > { %v3542_v40 = vld [vmem:[%s4852_s29 + $0x460] sm:$0xf]  ;;  %v3943_v22 = vor.u32 %v4378_v30, %v3942_v28  ;;  %v4310_v47 = vld [vmem:[%s4852_s29 + $0x56c] sm:$0xf0]  ;;  %2433 = vmatpush.bf16.msrb.mxu2 %v3815_v39  ;;  %v3096_v28 = vld [vmem:[%s4852_s29 + $0xf0] sm:$0xf0]  ;;  %v889_v39 = vunpack.c.l.b16 %v589_v55 }
 0x13f   : > { %v3670_v44 = vld [vmem:[%s4852_s29 + $0x560] sm:$0xf]  ;;  %v5304_v48 = vpack.c.b16 %v887_v32, %v887_v32  ;;  %v5308_v51 = vpack.c.b16 %v888_v20, %v888_v20  ;;  %v4342_v59 = vld [vmem:[%s4852_s29 + $0x66c] sm:$0xf0]  ;;  %v3543_v63 = vor.u32 %v4278_v42, %v3542_v40  ;;  %v4196_v30 = vld [vmem:[%s4852_s29 + $0x1e4] sm:$0xf] }
 0x140   : > { %v3798_v52 = vld [vmem:[%s4852_s29 + $0x660] sm:$0xf]  ;;  %v4374_v56 = vld [vmem:[%s4852_s29 + $0x76c] sm:$0xf0]  ;;  %v3671_v3 = vor.u32 %v4310_v47, %v3670_v44  ;;  %2446 = vmatpush.bf16.msrb.mxu3 %v3943_v22  ;;  %v3224_v32 = vld [vmem:[%s4852_s29 + $0x1f0] sm:$0xf0]  ;;  %v890_v22 = vunpack.c.h.b16 %v589_v55  ;;  %v3099_v47 = vor.u32 %v4164_v26, %v3096_v28 }
 0x141   : > { %v3926_v62 = vld [vmem:[%s4852_s29 + $0x760] sm:$0xf]  ;;  %2386 = vmatmul.bf16.vlgmr.msra.gmra.mxu2 %v5304_v48  ;;  %2399 = vmatmul.bf16.vlgmr.msra.gmra.mxu3 %v5308_v51  ;;  %v3799_v7 = vor.u32 %v4342_v59, %v3798_v52  ;;  %v4274_v16 = vld [vmem:[%s4852_s29 + $0x44c] sm:$0xf0]  ;;  %v4228_v36 = vld [vmem:[%s4852_s29 + $0x2e4] sm:$0xf]  ;;  %v3227_v52 = vor.u32 %v4196_v30, %v3224_v32 }
 0x142   : > { %v3526_v10 = vld [vmem:[%s4852_s29 + $0x440] sm:$0xf]  ;;  %v3927_v5 = vor.u32 %v4374_v56, %v3926_v62  ;;  %v4306_v1 = vld [vmem:[%s4852_s29 + $0x54c] sm:$0xf0]  ;;  %2408 = vmatpush.bf16.msrb.mxu0 %v3543_v63  ;;  %2421 = vmatpush.bf16.msrb.mxu1 %v3671_v3  ;;  %v3352_v38 = vld [vmem:[%s4852_s29 + $0x2f0] sm:$0xf0] }
 0x143   : > { %v3654_v0 = vld [vmem:[%s4852_s29 + $0x540] sm:$0xf]  ;;  %v4338_v31 = vld [vmem:[%s4852_s29 + $0x64c] sm:$0xf0]  ;;  %v3527_v13 = vor.u32 %v4274_v16, %v3526_v10  ;;  %2434 = vmatpush.bf16.msrb.mxu2 %v3799_v7  ;;  %v4160_v56 = vld [vmem:[%s4852_s29 + $0xc4] sm:$0xf]  ;;  %v3355_v63 = vor.u32 %v4228_v36, %v3352_v38 }
 0x144   : > { %v3782_v2 = vld [vmem:[%s4852_s29 + $0x640] sm:$0xf]  ;;  %v4370_v9 = vld [vmem:[%s4852_s29 + $0x74c] sm:$0xf0]  ;;  %v3655_v24 = vor.u32 %v4306_v1, %v3654_v0  ;;  %2447 = vmatpush.bf16.msrb.mxu3 %v3927_v5  ;;  %v3080_v3 = vld [vmem:[%s4852_s29 + $0xd0] sm:$0xf0]  ;;  %v5365_v1 = vpack.c.b16 %v889_v39, %v889_v39 }
 0x145   : > { %v3910_v6 = vld [vmem:[%s4852_s29 + $0x740] sm:$0xf]  ;;  %v3783_v58 = vor.u32 %v4338_v31, %v3782_v2  ;;  %v4270_v21 = vld [vmem:[%s4852_s29 + $0x42c] sm:$0xf0]  ;;  %v4192_v7 = vld [vmem:[%s4852_s29 + $0x1c4] sm:$0xf] }
 0x146   : > { %v3510_v17 = vld [vmem:[%s4852_s29 + $0x420] sm:$0xf]  ;;  %v3911_v19 = vor.u32 %v4370_v9, %v3910_v6  ;;  %v4302_v29 = vld [vmem:[%s4852_s29 + $0x52c] sm:$0xf0]  ;;  %2409 = vmatpush.bf16.msrb.mxu0 %v3527_v13  ;;  %2422 = vmatpush.bf16.msrb.mxu1 %v3655_v24  ;;  %v3208_v10 = vld [vmem:[%s4852_s29 + $0x1d0] sm:$0xf0]  ;;  %v5369_v6 = vpack.c.b16 %v890_v22, %v890_v22  ;;  %v3083_v9 = vor.u32 %v4160_v56, %v3080_v3 }
 0x147   : > { %v3638_v25 = vld [vmem:[%s4852_s29 + $0x520] sm:$0xf]  ;;  %v4334_v37 = vld [vmem:[%s4852_s29 + $0x62c] sm:$0xf0]  ;;  %v3511_v49 = vor.u32 %v4270_v21, %v3510_v17  ;;  %2435 = vmatpush.bf16.msrb.mxu2 %v3783_v58  ;;  %v4224_v0 = vld [vmem:[%s4852_s29 + $0x2c4] sm:$0xf]  ;;  %v3211_v13 = vor.u32 %v4192_v7, %v3208_v10 }
 0x148   : > { %v3766_v33 = vld [vmem:[%s4852_s29 + $0x620] sm:$0xf]  ;;  %v4366_v41 = vld [vmem:[%s4852_s29 + $0x72c] sm:$0xf0]  ;;  %v3639_v57 = vor.u32 %v4302_v29, %v3638_v25  ;;  %2448 = vmatpush.bf16.msrb.mxu3 %v3911_v19  ;;  %v3336_v5 = vld [vmem:[%s4852_s29 + $0x2d0] sm:$0xf0] }
 0x149   : > { %v3894_v14 = vld [vmem:[%s4852_s29 + $0x720] sm:$0xf]  ;;  %v4266_v53 = vld [vmem:[%s4852_s29 + $0x40c] sm:$0xf0]  ;;  %v3767_v50 = vor.u32 %v4334_v37, %v3766_v33  ;;  %v4156_v17 = vld [vmem:[%s4852_s29 + $0xa4] sm:$0xf]  ;;  %v3339_v21 = vor.u32 %v4224_v0, %v3336_v5 }
 0x14a   : > { %v3494_v45 = vld [vmem:[%s4852_s29 + $0x400] sm:$0xf]  ;;  %v4298_v18 = vld [vmem:[%s4852_s29 + $0x50c] sm:$0xf0]  ;;  %v3895_v8 = vor.u32 %v4366_v41, %v3894_v14  ;;  %2410 = vmatpush.bf16.msrb.mxu0 %v3511_v49  ;;  %2423 = vmatpush.bf16.msrb.mxu1 %v3639_v57  ;;  %v3064_v25 = vld [vmem:[%s4852_s29 + $0xb0] sm:$0xf0] }
 0x14b   : > { %v3622_v43 = vld [vmem:[%s4852_s29 + $0x500] sm:$0xf]  ;;  %v4330_v61 = vld [vmem:[%s4852_s29 + $0x60c] sm:$0xf0]  ;;  %v3495_v27 = vor.u32 %v4266_v53, %v3494_v45  ;;  %2436 = vmatpush.bf16.msrb.mxu2 %v3767_v50  ;;  %v4188_v19 = vld [vmem:[%s4852_s29 + $0x1a4] sm:$0xf]  ;;  %v3067_v41 = vor.u32 %v4156_v17, %v3064_v25 }
 0x14c   : > { %v3750_v60 = vld [vmem:[%s4852_s29 + $0x600] sm:$0xf]  ;;  %v590_v12 = vld [vmem:[%s5295_s1 + $0x18] sm:$0xff]  ;;  %v3623_v20 = vor.u32 %v4298_v18, %v3622_v43  ;;  %2449 = vmatpush.bf16.msrb.mxu3 %v3895_v8  ;;  %v4220_v33 = vld [vmem:[%s4852_s29 + $0x2a4] sm:$0xf] }
 0x14d   : > { %v3878_v11 = vld [vmem:[%s4852_s29 + $0x700] sm:$0xf]  ;;  %v4362_v15 = vld [vmem:[%s4852_s29 + $0x70c] sm:$0xf0]  ;;  %v891_v34 = vunpack.c.l.b16 %v590_v12  ;;  %v3751_v35 = vor.u32 %v4330_v61, %v3750_v60  ;;  %v892_v40 = vunpack.c.h.b16 %v590_v12  ;;  %v3192_v29 = vld [vmem:[%s4852_s29 + $0x1b0] sm:$0xf0] }
 0x14e   : > { %v4118_v4 = vld [vmem:[%s4852_s29 + $0x8e0] sm:$0xf]  ;;  %v4422_v23 = vld [vmem:[%s4852_s29 + $0x8ec] sm:$0xf0]  ;;  %v3879_v42 = vor.u32 %v4362_v15, %v3878_v11  ;;  %2411 = vmatpush.bf16.msrb.mxu0 %v3495_v27  ;;  %2424 = vmatpush.bf16.msrb.mxu1 %v3623_v20  ;;  %v3320_v37 = vld [vmem:[%s4852_s29 + $0x2b0] sm:$0xf0]  ;;  %v3195_v45 = vor.u32 %v4188_v19, %v3192_v29 }
 0x14f   : > { %v4119_v44 = vor.u32 %v4422_v23, %v4118_v4  ;;  %v4102_v59 = vld [vmem:[%s4852_s29 + $0x8c0] sm:$0xf]  ;;  %v4418_v62 = vld [vmem:[%s4852_s29 + $0x8cc] sm:$0xf0]  ;;  %v5361_v16 = vpack.c.b16 %v891_v34, %v891_v34  ;;  %2437 = vmatpush.bf16.msrb.mxu2 %v3751_v35  ;;  %v5367_v2 = vpack.c.b16 %v892_v40, %v892_v40  ;;  %v4152_v43 = vld [vmem:[%s4852_s29 + $0x84] sm:$0xf]  ;;  %v3323_v18 = vor.u32 %v4220_v33, %v3320_v37 }
 0x150   : > { %2450 = vmatpush.bf16.msrb.mxu3 %v3879_v42  ;;  %v4103_v31 = vor.u32 %v4418_v62, %v4102_v59  ;;  %v4086_v24 = vld [vmem:[%s4852_s29 + $0x8a0] sm:$0xf]  ;;  %v4414_v58 = vld [vmem:[%s4852_s29 + $0x8ac] sm:$0xf0]  ;;  %v3048_v57 = vld [vmem:[%s4852_s29 + $0x90] sm:$0xf0] }
 0x151   : > { %2412 = vmatmul.bf16.vlgmr.msrb.gmra.mxu0 %v5365_v1  ;;  %v4087_v14 = vor.u32 %v4414_v58, %v4086_v24  ;;  %2425 = vmatmul.bf16.vlgmr.msrb.gmra.mxu1 %v5369_v6  ;;  %v4070_v49 = vld [vmem:[%s4852_s29 + $0x880] sm:$0xf]  ;;  %v4410_v53 = vld [vmem:[%s4852_s29 + $0x88c] sm:$0xf0]  ;;  %v4184_v50 = vld [vmem:[%s4852_s29 + $0x184] sm:$0xf]  ;;  %v3051_v11 = vor.u32 %v4152_v43, %v3048_v57 }
 0x152   : > { %2456 = vmatpush.bf16.msra.mxu0 %v4119_v44  ;;  %2469 = vmatpush.bf16.msra.mxu1 %v3099_v47  ;;  %v3176_v60 = vld [vmem:[%s4852_s29 + $0x190] sm:$0xf0]  ;;  %v4216_v61 = vld [vmem:[%s4852_s29 + $0x284] sm:$0xf]  ;;  %v4071_v8 = vor.u32 %v4410_v53, %v4070_v49  ;;  %v4054_v55 = vld [vmem:[%s4852_s29 + $0x860] sm:$0xf] }
 0x153   : > { %2482 = vmatpush.bf16.msra.mxu2 %v3227_v52  ;;  %2451 = vmatmul.bf16.vlgmr.msrb.gmra.mxu3 %v5367_v2  ;;  %v3304_v12 = vld [vmem:[%s4852_s29 + $0x290] sm:$0xf0]  ;;  %v3179_v15 = vor.u32 %v4184_v50, %v3176_v60  ;;  %v4406_v4 = vld [vmem:[%s4852_s29 + $0x86c] sm:$0xf0]  ;;  %v4148_v23 = vld [vmem:[%s4852_s29 + $0x64] sm:$0xf] }
 0x154   : > { %2495 = vmatpush.bf16.msra.mxu3 %v3355_v63  ;;  %2438 = vmatmul.bf16.vlgmr.msrb.gmra.mxu2 %v5361_v16  ;;  %v3307_v26 = vor.u32 %v4216_v61, %v3304_v12  ;;  %v3032_v27 = vld [vmem:[%s4852_s29 + $0x70] sm:$0xf0]  ;;  %v4180_v28 = vld [vmem:[%s4852_s29 + $0x164] sm:$0xf]  ;;  %v4055_v20 = vor.u32 %v4406_v4, %v4054_v55  ;;  %v4038_v38 = vld [vmem:[%s4852_s29 + $0x840] sm:$0xf] }
 0x155   : > { %v3160_v30 = vld [vmem:[%s4852_s29 + $0x170] sm:$0xf0]  ;;  %v4212_v32 = vld [vmem:[%s4852_s29 + $0x264] sm:$0xf]  ;;  %v3035_v35 = vor.u32 %v4148_v23, %v3032_v27  ;;  %v4402_v39 = vld [vmem:[%s4852_s29 + $0x84c] sm:$0xf0] }
 0x156   : > { %2457 = vmatpush.bf16.msra.mxu0 %v4103_v31  ;;  %2470 = vmatpush.bf16.msra.mxu1 %v3083_v9  ;;  %v3288_v34 = vld [vmem:[%s4852_s29 + $0x270] sm:$0xf0]  ;;  %v3163_v36 = vor.u32 %v4180_v28, %v3160_v30  ;;  %v4144_v40 = vld [vmem:[%s4852_s29 + $0x44] sm:$0xf]  ;;  %v4039_v62 = vor.u32 %v4402_v39, %v4038_v38  ;;  %v4022_v3 = vld [vmem:[%s4852_s29 + $0x820] sm:$0xf] }
 0x157   : > { %2483 = vmatpush.bf16.msra.mxu2 %v3211_v13  ;;  %v3291_v42 = vor.u32 %v4212_v32, %v3288_v34  ;;  %v3016_v44 = vld [vmem:[%s4852_s29 + $0x50] sm:$0xf0]  ;;  %v4176_v22 = vld [vmem:[%s4852_s29 + $0x144] sm:$0xf]  ;;  %v4398_v7 = vld [vmem:[%s4852_s29 + $0x82c] sm:$0xf0] }
 0x158   : > { %2496 = vmatpush.bf16.msra.mxu3 %v3339_v21  ;;  %v3144_v47 = vld [vmem:[%s4852_s29 + $0x150] sm:$0xf0]  ;;  %v4208_v52 = vld [vmem:[%s4852_s29 + $0x244] sm:$0xf]  ;;  %v3019_v56 = vor.u32 %v4144_v40, %v3016_v44  ;;  %v4023_v58 = vor.u32 %v4398_v7, %v4022_v3  ;;  %v4006_v17 = vld [vmem:[%s4852_s29 + $0x800] sm:$0xf] }
 0x159   : > { %v3272_v59 = vld [vmem:[%s4852_s29 + $0x250] sm:$0xf0]  ;;  %v3147_v63 = vor.u32 %v4176_v22, %v3144_v47  ;;  %v4140_v10 = vld [vmem:[%s4852_s29 + $0x24] sm:$0xf]  ;;  %v4394_v21 = vld [vmem:[%s4852_s29 + $0x80c] sm:$0xf0] }
 0x15a   : > { %2458 = vmatpush.bf16.msra.mxu0 %v4087_v14  ;;  %2471 = vmatpush.bf16.msra.mxu1 %v3067_v41  ;;  %v3275_v0 = vor.u32 %v4208_v52, %v3272_v59  ;;  %v3000_v5 = vld [vmem:[%s4852_s29 + $0x30] sm:$0xf0]  ;;  %v4172_v31 = vld [vmem:[%s4852_s29 + $0x124] sm:$0xf]  ;;  %v591_v14 = vld [vmem:[%s5295_s1 + $0x20] sm:$0xf]  ;;  %v4007_v50 = vor.u32 %v4394_v21, %v4006_v17 }
 0x15b   : > { %2484 = vmatpush.bf16.msra.mxu2 %v3195_v45  ;;  %v3128_v9 = vld [vmem:[%s4852_s29 + $0x130] sm:$0xf0]  ;;  %v4204_v13 = vld [vmem:[%s4852_s29 + $0x224] sm:$0xf]  ;;  %v3003_v19 = vor.u32 %v4140_v10, %v3000_v5 }
 0x15c   : > { %2497 = vmatpush.bf16.msra.mxu3 %v3323_v18  ;;  %v3256_v24 = vld [vmem:[%s4852_s29 + $0x230] sm:$0xf0]  ;;  %v4136_v25 = vld [vmem:[%s4852_s29 + $0x4] sm:$0xf]  ;;  %v3131_v29 = vor.u32 %v4172_v31, %v3128_v9 }
 0x15d   : > { %v2984_v33 = vld [vmem:[%s4852_s29 + $0x10] sm:$0xf0]  ;;  %v4168_v37 = vld [vmem:[%s4852_s29 + $0x104] sm:$0xf]  ;;  %v3259_v41 = vor.u32 %v4204_v13, %v3256_v24 }
 0x15e   : > { %2459 = vmatpush.bf16.msra.mxu0 %v4071_v8  ;;  %2472 = vmatpush.bf16.msra.mxu1 %v3051_v11  ;;  %v3112_v45 = vld [vmem:[%s4852_s29 + $0x110] sm:$0xf0]  ;;  %v4200_v49 = vld [vmem:[%s4852_s29 + $0x204] sm:$0xf]  ;;  %v893_v8 = vunpack.c.l.b16 %v591_v14  ;;  %v2987_v11 = vor.u32 %v4136_v25, %v2984_v33 }
 0x15f   : > { %2485 = vmatpush.bf16.msra.mxu2 %v3179_v15  ;;  %v3240_v53 = vld [vmem:[%s4852_s29 + $0x210] sm:$0xf0]  ;;  %v4260_v43 = vld [vmem:[%s4852_s29 + $0x3e4] sm:$0xf]  ;;  %v3115_v15 = vor.u32 %v4168_v37, %v3112_v45 }
 0x160   : > { %2498 = vmatpush.bf16.msra.mxu3 %v3307_v26  ;;  %v3480_v18 = vld [vmem:[%s4852_s29 + $0x3f0] sm:$0xf0]  ;;  %v4292_v57 = vld [vmem:[%s4852_s29 + $0x4e4] sm:$0xf]  ;;  %v3243_v23 = vor.u32 %v4200_v49, %v3240_v53 }
 0x161   : > { %v3608_v60 = vld [vmem:[%s4852_s29 + $0x4f0] sm:$0xf0]  ;;  %v4324_v61 = vld [vmem:[%s4852_s29 + $0x5e4] sm:$0xf]  ;;  %v3483_v26 = vor.u32 %v4260_v43, %v3480_v18 }
 0x162   : > { %2460 = vmatpush.bf16.msra.mxu0 %v4055_v20  ;;  %2473 = vmatpush.bf16.msra.mxu1 %v3035_v35  ;;  %v3736_v12 = vld [vmem:[%s4852_s29 + $0x5f0] sm:$0xf0]  ;;  %v4356_v55 = vld [vmem:[%s4852_s29 + $0x6e4] sm:$0xf]  ;;  %v3611_v27 = vor.u32 %v4292_v57, %v3608_v60  ;;  %v5435_v35 = vpack.c.b16 %v893_v8, %v893_v8 }
 0x163   : > { %2486 = vmatpush.bf16.msra.mxu2 %v3163_v36  ;;  %v3864_v4 = vld [vmem:[%s4852_s29 + $0x6f0] sm:$0xf0]  ;;  %v3739_v28 = vor.u32 %v4324_v61, %v3736_v12  ;;  %v4256_v30 = vld [vmem:[%s4852_s29 + $0x3c4] sm:$0xf] }
 0x164   : > { %2499 = vmatpush.bf16.msra.mxu3 %v3291_v42  ;;  %v3464_v32 = vld [vmem:[%s4852_s29 + $0x3d0] sm:$0xf0]  ;;  %v4288_v34 = vld [vmem:[%s4852_s29 + $0x4c4] sm:$0xf]  ;;  %v3867_v20 = vor.u32 %v4356_v55, %v3864_v4 }
 0x165   : > { %v3592_v36 = vld [vmem:[%s4852_s29 + $0x4d0] sm:$0xf0]  ;;  %v4320_v38 = vld [vmem:[%s4852_s29 + $0x5c4] sm:$0xf]  ;;  %v3467_v44 = vor.u32 %v4256_v30, %v3464_v32 }
 0x166   : > { %2461 = vmatpush.bf16.msra.mxu0 %v4039_v62  ;;  %2474 = vmatpush.bf16.msra.mxu1 %v3019_v56  ;;  %v3720_v39 = vld [vmem:[%s4852_s29 + $0x5d0] sm:$0xf0]  ;;  %v4352_v40 = vld [vmem:[%s4852_s29 + $0x6c4] sm:$0xf]  ;;  %v3595_v22 = vor.u32 %v4288_v34, %v3592_v36 }
 0x167   : > { %2487 = vmatpush.bf16.msra.mxu2 %v3147_v63  ;;  %v3848_v42 = vld [vmem:[%s4852_s29 + $0x6d0] sm:$0xf0]  ;;  %v3723_v47 = vor.u32 %v4320_v38, %v3720_v39  ;;  %v4252_v52 = vld [vmem:[%s4852_s29 + $0x3a4] sm:$0xf] }
 0x168   : > { %2500 = vmatpush.bf16.msra.mxu3 %v3275_v0  ;;  %v3448_v59 = vld [vmem:[%s4852_s29 + $0x3b0] sm:$0xf0]  ;;  %v4284_v62 = vld [vmem:[%s4852_s29 + $0x4a4] sm:$0xf]  ;;  %v3851_v56 = vor.u32 %v4352_v40, %v3848_v42 }
 0x169   : > { %v3576_v63 = vld [vmem:[%s4852_s29 + $0x4b0] sm:$0xf0]  ;;  %v4316_v3 = vld [vmem:[%s4852_s29 + $0x5a4] sm:$0xf]  ;;  %v3451_v5 = vor.u32 %v4252_v52, %v3448_v59 }
 0x16a   : > { %2462 = vmatpush.bf16.msra.mxu0 %v4023_v58  ;;  %2475 = vmatpush.bf16.msra.mxu1 %v3003_v19  ;;  %v3704_v7 = vld [vmem:[%s4852_s29 + $0x5b0] sm:$0xf0]  ;;  %v4348_v10 = vld [vmem:[%s4852_s29 + $0x6a4] sm:$0xf]  ;;  %v3579_v31 = vor.u32 %v4284_v62, %v3576_v63 }
 0x16b   : > { %2488 = vmatpush.bf16.msra.mxu2 %v3131_v29  ;;  %v3832_v0 = vld [vmem:[%s4852_s29 + $0x6b0] sm:$0xf0]  ;;  %v3707_v9 = vor.u32 %v4316_v3, %v3704_v7  ;;  %v4248_v13 = vld [vmem:[%s4852_s29 + $0x384] sm:$0xf] }
 0x16c   : > { %2501 = vmatpush.bf16.msra.mxu3 %v3259_v41  ;;  %v3432_v24 = vld [vmem:[%s4852_s29 + $0x390] sm:$0xf0]  ;;  %v4280_v58 = vld [vmem:[%s4852_s29 + $0x484] sm:$0xf]  ;;  %v3835_v17 = vor.u32 %v4348_v10, %v3832_v0 }
 0x16d   : > { %v3560_v21 = vld [vmem:[%s4852_s29 + $0x490] sm:$0xf0]  ;;  %v4312_v25 = vld [vmem:[%s4852_s29 + $0x584] sm:$0xf]  ;;  %v3435_v37 = vor.u32 %v4248_v13, %v3432_v24 }
 0x16e   : > { %2463 = vmatpush.bf16.msra.mxu0 %v4007_v50  ;;  %2476 = vmatpush.bf16.msra.mxu1 %v2987_v11  ;;  %v3688_v19 = vld [vmem:[%s4852_s29 + $0x590] sm:$0xf0]  ;;  %v4344_v29 = vld [vmem:[%s4852_s29 + $0x684] sm:$0xf]  ;;  %v3563_v14 = vor.u32 %v4280_v58, %v3560_v21 }
 0x16f   : > { %2489 = vmatpush.bf16.msra.mxu2 %v3115_v15  ;;  %v3816_v33 = vld [vmem:[%s4852_s29 + $0x690] sm:$0xf0]  ;;  %v3691_v41 = vor.u32 %v4312_v25, %v3688_v19  ;;  %v4244_v45 = vld [vmem:[%s4852_s29 + $0x364] sm:$0xf] }
 0x170   : > { %2502 = vmatpush.bf16.msra.mxu3 %v3243_v23  ;;  %v3416_v49 = vld [vmem:[%s4852_s29 + $0x370] sm:$0xf0]  ;;  %v4276_v53 = vld [vmem:[%s4852_s29 + $0x464] sm:$0xf]  ;;  %v3819_v43 = vor.u32 %v4344_v29, %v3816_v33  ;;  %v3102_v29 = vld [vmem:[%s4852_s29 + $0xe8] sm:$0xf] }
 0x171   : > { %2464 = vmatmul.bf16.vlgmr.msra.gmra.mxu0 %v5435_v35  ;;  %2477 = vmatmul.bf16.vlgmr.msra.gmra.mxu1 %v5306_v46  ;;  %v3544_v18 = vld [vmem:[%s4852_s29 + $0x470] sm:$0xf0]  ;;  %v4308_v57 = vld [vmem:[%s4852_s29 + $0x564] sm:$0xf]  ;;  %v3419_v12 = vor.u32 %v4244_v45, %v3416_v49  ;;  %v4167_v33 = vld [vmem:[%s4852_s29 + $0xf4] sm:$0xf0] }
 0x172   : > { %2508 = vmatpush.bf16.msrb.mxu0 %v3483_v26  ;;  %2521 = vmatpush.bf16.msrb.mxu1 %v3611_v27  ;;  %v3672_v50 = vld [vmem:[%s4852_s29 + $0x570] sm:$0xf0]  ;;  %v4340_v60 = vld [vmem:[%s4852_s29 + $0x664] sm:$0xf]  ;;  %v3547_v8 = vor.u32 %v4276_v53, %v3544_v18  ;;  %v4199_v45 = vld [vmem:[%s4852_s29 + $0x1f4] sm:$0xf0]  ;;  %v3103_v18 = vor.u32 %v4167_v33, %v3102_v29 }
 0x173   : > { %2534 = vmatpush.bf16.msrb.mxu2 %v3739_v28  ;;  %2503 = vmatmul.bf16.vlgmr.msra.gmra.mxu3 %v5304_v48  ;;  %v3800_v61 = vld [vmem:[%s4852_s29 + $0x670] sm:$0xf0]  ;;  %v3675_v11 = vor.u32 %v4308_v57, %v3672_v50  ;;  %v4240_v15 = vld [vmem:[%s4852_s29 + $0x344] sm:$0xf] }
 0x174   : > { %2547 = vmatpush.bf16.msrb.mxu3 %v3867_v20  ;;  %2490 = vmatmul.bf16.vlgmr.msra.gmra.mxu2 %v5313_v54  ;;  %v3400_v55 = vld [vmem:[%s4852_s29 + $0x350] sm:$0xf0]  ;;  %v4272_v4 = vld [vmem:[%s4852_s29 + $0x444] sm:$0xf]  ;;  %v3803_v23 = vor.u32 %v4340_v60, %v3800_v61 }
 0x175   : > { %v3528_v26 = vld [vmem:[%s4852_s29 + $0x450] sm:$0xf0]  ;;  %v4304_v27 = vld [vmem:[%s4852_s29 + $0x544] sm:$0xf]  ;;  %v3403_v34 = vor.u32 %v4240_v15, %v3400_v55  ;;  %v3214_v15 = vld [vmem:[%s4852_s29 + $0x1c8] sm:$0xf] }
 0x176   : > { %2509 = vmatpush.bf16.msrb.mxu0 %v3467_v44  ;;  %2522 = vmatpush.bf16.msrb.mxu1 %v3595_v22  ;;  %v3656_v28 = vld [vmem:[%s4852_s29 + $0x550] sm:$0xf0]  ;;  %v4336_v30 = vld [vmem:[%s4852_s29 + $0x644] sm:$0xf]  ;;  %v3531_v20 = vor.u32 %v4272_v4, %v3528_v26  ;;  %v4195_v55 = vld [vmem:[%s4852_s29 + $0x1d4] sm:$0xf0] }
 0x177   : > { %2535 = vmatpush.bf16.msrb.mxu2 %v3723_v47  ;;  %v3784_v32 = vld [vmem:[%s4852_s29 + $0x650] sm:$0xf0]  ;;  %v3659_v36 = vor.u32 %v4304_v27, %v3656_v28  ;;  %v4236_v38 = vld [vmem:[%s4852_s29 + $0x324] sm:$0xf] }
 0x178   : > { %2548 = vmatpush.bf16.msrb.mxu3 %v3851_v56  ;;  %v3384_v39 = vld [vmem:[%s4852_s29 + $0x330] sm:$0xf0]  ;;  %v4268_v40 = vld [vmem:[%s4852_s29 + $0x424] sm:$0xf]  ;;  %v3787_v42 = vor.u32 %v4336_v30, %v3784_v32  ;;  %v3215_v32 = vor.u32 %v4195_v55, %v3214_v15 }
 0x179   : > { %v3512_v44 = vld [vmem:[%s4852_s29 + $0x430] sm:$0xf0]  ;;  %v4300_v22 = vld [vmem:[%s4852_s29 + $0x524] sm:$0xf]  ;;  %v3387_v62 = vor.u32 %v4236_v38, %v3384_v39  ;;  %v3198_v38 = vld [vmem:[%s4852_s29 + $0x1a8] sm:$0xf] }
 0x17a   : > { %2510 = vmatpush.bf16.msrb.mxu0 %v3451_v5  ;;  %2523 = vmatpush.bf16.msrb.mxu1 %v3579_v31  ;;  %v3640_v47 = vld [vmem:[%s4852_s29 + $0x530] sm:$0xf0]  ;;  %v4332_v52 = vld [vmem:[%s4852_s29 + $0x624] sm:$0xf]  ;;  %v3515_v3 = vor.u32 %v4268_v40, %v3512_v44  ;;  %v4191_v39 = vld [vmem:[%s4852_s29 + $0x1b4] sm:$0xf0] }
 0x17b   : > { %2536 = vmatpush.bf16.msrb.mxu2 %v3707_v9  ;;  %v3768_v59 = vld [vmem:[%s4852_s29 + $0x630] sm:$0xf0]  ;;  %v4232_v56 = vld [vmem:[%s4852_s29 + $0x304] sm:$0xf]  ;;  %v3643_v7 = vor.u32 %v4300_v22, %v3640_v47 }
 0x17c   : > { %2549 = vmatpush.bf16.msrb.mxu3 %v3835_v17  ;;  %v3368_v63 = vld [vmem:[%s4852_s29 + $0x310] sm:$0xf0]  ;;  %v4264_v10 = vld [vmem:[%s4852_s29 + $0x404] sm:$0xf]  ;;  %v3771_v31 = vor.u32 %v4332_v52, %v3768_v59  ;;  %v3199_v59 = vor.u32 %v4191_v39, %v3198_v38 }
 0x17d   : > { %v3496_v0 = vld [vmem:[%s4852_s29 + $0x410] sm:$0xf0]  ;;  %v4296_v5 = vld [vmem:[%s4852_s29 + $0x504] sm:$0xf]  ;;  %v3371_v25 = vor.u32 %v4232_v56, %v3368_v63  ;;  %v3054_v56 = vld [vmem:[%s4852_s29 + $0x88] sm:$0xf] }
 0x17e   : > { %2511 = vmatpush.bf16.msrb.mxu0 %v3435_v37  ;;  %2524 = vmatpush.bf16.msrb.mxu1 %v3563_v14  ;;  %v3624_v9 = vld [vmem:[%s4852_s29 + $0x510] sm:$0xf0]  ;;  %v4328_v13 = vld [vmem:[%s4852_s29 + $0x604] sm:$0xf]  ;;  %v3499_v37 = vor.u32 %v4264_v10, %v3496_v0  ;;  %v4155_v63 = vld [vmem:[%s4852_s29 + $0x94] sm:$0xf0] }
 0x17f   : > { %2537 = vmatpush.bf16.msrb.mxu2 %v3691_v41  ;;  %v3752_v24 = vld [vmem:[%s4852_s29 + $0x610] sm:$0xf0]  ;;  %v4388_v58 = vld [vmem:[%s4852_s29 + $0x7e4] sm:$0xf]  ;;  %v3627_v14 = vor.u32 %v4296_v5, %v3624_v9  ;;  %v3230_v41 = vld [vmem:[%s4852_s29 + $0x1e8] sm:$0xf]  ;;  %v3055_v5 = vor.u32 %v4155_v63, %v3054_v56 }
 0x180   : > { %2550 = vmatpush.bf16.msrb.mxu3 %v3819_v43  ;;  %v3992_v17 = vld [vmem:[%s4852_s29 + $0x7f0] sm:$0xf0]  ;;  %v4420_v21 = vld [vmem:[%s4852_s29 + $0x8e4] sm:$0xf]  ;;  %v3755_v49 = vor.u32 %v4328_v13, %v3752_v24  ;;  %v3231_v61 = vor.u32 %v4199_v45, %v3230_v41  ;;  %v4263_v63 = vld [vmem:[%s4852_s29 + $0x3f4] sm:$0xf0] }
 0x181   : > { %v4120_v19 = vld [vmem:[%s4852_s29 + $0x8f0] sm:$0xf0]  ;;  %v3995_v53 = vor.u32 %v4388_v58, %v3992_v17  ;;  %v4384_v57 = vld [vmem:[%s4852_s29 + $0x7c4] sm:$0xf]  ;;  %v3038_v17 = vld [vmem:[%s4852_s29 + $0x68] sm:$0xf] }
 0x182   : > { %2512 = vmatpush.bf16.msrb.mxu0 %v3419_v12  ;;  %2525 = vmatpush.bf16.msrb.mxu1 %v3547_v8  ;;  %v4123_v43 = vor.u32 %v4420_v21, %v4120_v19  ;;  %v3976_v50 = vld [vmem:[%s4852_s29 + $0x7d0] sm:$0xf0]  ;;  %v4416_v60 = vld [vmem:[%s4852_s29 + $0x8c4] sm:$0xf]  ;;  %v3086_v8 = vld [vmem:[%s4852_s29 + $0xc8] sm:$0xf] }
 0x183   : > { %2538 = vmatpush.bf16.msrb.mxu2 %v3675_v11  ;;  %v4104_v12 = vld [vmem:[%s4852_s29 + $0x8d0] sm:$0xf0]  ;;  %v4163_v11 = vld [vmem:[%s4852_s29 + $0xd4] sm:$0xf0]  ;;  %v3979_v4 = vor.u32 %v4384_v57, %v3976_v50  ;;  %v4380_v27 = vld [vmem:[%s4852_s29 + $0x7a4] sm:$0xf] }
 0x184   : > { %2551 = vmatpush.bf16.msrb.mxu3 %v3803_v23  ;;  %v4107_v23 = vor.u32 %v4416_v60, %v4104_v12  ;;  %v3087_v26 = vor.u32 %v4163_v11, %v3086_v8  ;;  %v3960_v28 = vld [vmem:[%s4852_s29 + $0x7b0] sm:$0xf0]  ;;  %v4412_v30 = vld [vmem:[%s4852_s29 + $0x8a4] sm:$0xf]  ;;  %v4151_v21 = vld [vmem:[%s4852_s29 + $0x74] sm:$0xf0] }
 0x185   : > { %v3963_v40 = vor.u32 %v4380_v27, %v3960_v28  ;;  %v4376_v22 = vld [vmem:[%s4852_s29 + $0x784] sm:$0xf]  ;;  %v3944_v47 = vld [vmem:[%s4852_s29 + $0x790] sm:$0xf0]  ;;  %v4183_v19 = vld [vmem:[%s4852_s29 + $0x174] sm:$0xf0] }
 0x186   : > { %2513 = vmatpush.bf16.msrb.mxu0 %v3403_v34  ;;  %2526 = vmatpush.bf16.msrb.mxu1 %v3531_v20  ;;  %v4088_v34 = vld [vmem:[%s4852_s29 + $0x8b0] sm:$0xf0]  ;;  %v3070_v20 = vld [vmem:[%s4852_s29 + $0xa8] sm:$0xf]  ;;  %v4408_v52 = vld [vmem:[%s4852_s29 + $0x884] sm:$0xf]  ;;  %v3947_v10 = vor.u32 %v4376_v22, %v3944_v47 }
 0x187   : > { %2539 = vmatpush.bf16.msrb.mxu2 %v3659_v36  ;;  %v4159_v36 = vld [vmem:[%s4852_s29 + $0xb4] sm:$0xf0]  ;;  %v3928_v9 = vld [vmem:[%s4852_s29 + $0x770] sm:$0xf0]  ;;  %v4404_v13 = vld [vmem:[%s4852_s29 + $0x864] sm:$0xf] }
 0x188   : > { %2552 = vmatpush.bf16.msrb.mxu3 %v3787_v42  ;;  %v4091_v42 = vor.u32 %v4412_v30, %v4088_v34  ;;  %v3071_v44 = vor.u32 %v4159_v36, %v3070_v20  ;;  %v4056_v58 = vld [vmem:[%s4852_s29 + $0x870] sm:$0xf0]  ;;  %v4400_v45 = vld [vmem:[%s4852_s29 + $0x844] sm:$0xf]  ;;  %v3150_v57 = vld [vmem:[%s4852_s29 + $0x148] sm:$0xf] }
 0x189   : > { %v4059_v33 = vor.u32 %v4404_v13, %v4056_v58  ;;  %v3912_v41 = vld [vmem:[%s4852_s29 + $0x750] sm:$0xf0]  ;;  %v4179_v50 = vld [vmem:[%s4852_s29 + $0x154] sm:$0xf0]  ;;  %v4364_v8 = vld [vmem:[%s4852_s29 + $0x724] sm:$0xf] }
 0x18a   : > { %2514 = vmatpush.bf16.msrb.mxu0 %v3387_v62  ;;  %2527 = vmatpush.bf16.msrb.mxu1 %v3515_v3  ;;  %v4072_v62 = vld [vmem:[%s4852_s29 + $0x890] sm:$0xf0]  ;;  %v3182_v3 = vld [vmem:[%s4852_s29 + $0x188] sm:$0xf]  ;;  %v4396_v15 = vld [vmem:[%s4852_s29 + $0x824] sm:$0xf]  ;;  %v3151_v55 = vor.u32 %v4179_v50, %v3150_v57 }
 0x18b   : > { %2540 = vmatpush.bf16.msrb.mxu2 %v3643_v7  ;;  %v4187_v7 = vld [vmem:[%s4852_s29 + $0x194] sm:$0xf0]  ;;  %v4075_v0 = vor.u32 %v4408_v52, %v4072_v62  ;;  %v3896_v11 = vld [vmem:[%s4852_s29 + $0x730] sm:$0xf0]  ;;  %v3134_v27 = vld [vmem:[%s4852_s29 + $0x128] sm:$0xf] }
 0x18c   : > { %2553 = vmatpush.bf16.msrb.mxu3 %v3771_v31  ;;  %v4372_v31 = vld [vmem:[%s4852_s29 + $0x764] sm:$0xf]  ;;  %v3183_v24 = vor.u32 %v4187_v7, %v3182_v3  ;;  %v4175_v28 = vld [vmem:[%s4852_s29 + $0x134] sm:$0xf0]  ;;  %v3899_v30 = vor.u32 %v4364_v8, %v3896_v11  ;;  %v3880_v34 = vld [vmem:[%s4852_s29 + $0x710] sm:$0xf0] }
 0x18d   : > { %v3931_v29 = vor.u32 %v4372_v31, %v3928_v9  ;;  %v4392_v38 = vld [vmem:[%s4852_s29 + $0x804] sm:$0xf]  ;;  %v4008_v39 = vld [vmem:[%s4852_s29 + $0x810] sm:$0xf0]  ;;  %v3118_v22 = vld [vmem:[%s4852_s29 + $0x108] sm:$0xf] }
 0x18e   : > { %2515 = vmatpush.bf16.msrb.mxu0 %v3371_v25  ;;  %2528 = vmatpush.bf16.msrb.mxu1 %v3499_v37  ;;  %v3166_v25 = vld [vmem:[%s4852_s29 + $0x168] sm:$0xf]  ;;  %v3039_v37 = vor.u32 %v4151_v21, %v3038_v17  ;;  %v4171_v47 = vld [vmem:[%s4852_s29 + $0x114] sm:$0xf0] }
 0x18f   : > { %2541 = vmatpush.bf16.msrb.mxu2 %v3627_v14  ;;  %v4368_v14 = vld [vmem:[%s4852_s29 + $0x744] sm:$0xf]  ;;  %v3358_v52 = vld [vmem:[%s4852_s29 + $0x2e8] sm:$0xf]  ;;  %v4295_v7 = vld [vmem:[%s4852_s29 + $0x4f4] sm:$0xf0]  ;;  %v3119_v9 = vor.u32 %v4171_v47, %v3118_v22 }
 0x190   : > { %2554 = vmatpush.bf16.msrb.mxu3 %v3755_v49  ;;  %v3167_v49 = vor.u32 %v4183_v19, %v3166_v25  ;;  %v3915_v60 = vor.u32 %v4368_v14, %v3912_v41  ;;  %v3486_v62 = vld [vmem:[%s4852_s29 + $0x3e8] sm:$0xf]  ;;  %v4327_v31 = vld [vmem:[%s4852_s29 + $0x5f4] sm:$0xf0] }
 0x191   : > { %2516 = vmatmul.bf16.vlgmr.msrb.gmra.mxu0 %v5308_v51  ;;  %2529 = vmatmul.bf16.vlgmr.msrb.gmra.mxu1 %v5365_v1  ;;  %v3614_v3 = vld [vmem:[%s4852_s29 + $0x4e8] sm:$0xf]  ;;  %v4227_v21 = vld [vmem:[%s4852_s29 + $0x2d4] sm:$0xf0] }
 0x192   : > { %2560 = vmatpush.bf16.msra.mxu0 %v3995_v53  ;;  %2573 = vmatpush.bf16.msra.mxu1 %v4123_v43  ;;  %v4040_v53 = vld [vmem:[%s4852_s29 + $0x850] sm:$0xf0]  ;;  %v3022_v43 = vld [vmem:[%s4852_s29 + $0x48] sm:$0xf]  ;;  %v3615_v58 = vor.u32 %v4295_v7, %v3614_v3  ;;  %v4323_v41 = vld [vmem:[%s4852_s29 + $0x5d4] sm:$0xf0] }
 0x193   : > { %2586 = vmatpush.bf16.msra.mxu2 %v3103_v18  ;;  %2555 = vmatmul.bf16.vlgmr.msrb.gmra.mxu3 %v5361_v16  ;;  %v4147_v18 = vld [vmem:[%s4852_s29 + $0x54] sm:$0xf0]  ;;  %v3342_v17 = vld [vmem:[%s4852_s29 + $0x2c8] sm:$0xf] }
 0x194   : > { %2599 = vmatpush.bf16.msra.mxu3 %v3231_v61  ;;  %2542 = vmatmul.bf16.vlgmr.msrb.gmra.mxu2 %v5369_v6  ;;  %v4043_v61 = vor.u32 %v4400_v45, %v4040_v53  ;;  %v3023_v12 = vor.u32 %v4147_v18, %v3022_v43  ;;  %v3470_v25 = vld [vmem:[%s4852_s29 + $0x3c8] sm:$0xf]  ;;  %v3343_v45 = vor.u32 %v4227_v21, %v3342_v17  ;;  %v4223_v18 = vld [vmem:[%s4852_s29 + $0x2b4] sm:$0xf0] }
 0x195   : > { %v3726_v14 = vld [vmem:[%s4852_s29 + $0x5c8] sm:$0xf]  ;;  %v4319_v11 = vld [vmem:[%s4852_s29 + $0x5b4] sm:$0xf0] }
 0x196   : > { %2561 = vmatpush.bf16.msra.mxu0 %v3979_v4  ;;  %2574 = vmatpush.bf16.msra.mxu1 %v4107_v23  ;;  %v4024_v4 = vld [vmem:[%s4852_s29 + $0x830] sm:$0xf0]  ;;  %v3006_v23 = vld [vmem:[%s4852_s29 + $0x28] sm:$0xf]  ;;  %v3727_v50 = vor.u32 %v4323_v41, %v3726_v14  ;;  %v4307_v21 = vld [vmem:[%s4852_s29 + $0x554] sm:$0xf0] }
 0x197   : > { %2587 = vmatpush.bf16.msra.mxu2 %v3087_v26  ;;  %v4143_v26 = vld [vmem:[%s4852_s29 + $0x34] sm:$0xf0]  ;;  %v4027_v20 = vor.u32 %v4396_v15, %v4024_v4  ;;  %v3326_v43 = vld [vmem:[%s4852_s29 + $0x2a8] sm:$0xf] }
 0x198   : > { %2600 = vmatpush.bf16.msra.mxu3 %v3215_v32  ;;  %v4360_v32 = vld [vmem:[%s4852_s29 + $0x704] sm:$0xf]  ;;  %v3007_v36 = vor.u32 %v4143_v26, %v3006_v23  ;;  %v3454_v57 = vld [vmem:[%s4852_s29 + $0x3a8] sm:$0xf]  ;;  %v3327_v15 = vor.u32 %v4223_v18, %v3326_v43  ;;  %v4219_v26 = vld [vmem:[%s4852_s29 + $0x294] sm:$0xf0] }
 0x199   : > { %v3883_v56 = vor.u32 %v4360_v32, %v3880_v34  ;;  %v3710_v8 = vld [vmem:[%s4852_s29 + $0x5a8] sm:$0xf]  ;;  %v4283_v34 = vld [vmem:[%s4852_s29 + $0x494] sm:$0xf0] }
 0x19a   : > { %2562 = vmatpush.bf16.msra.mxu0 %v3963_v40  ;;  %2575 = vmatpush.bf16.msra.mxu1 %v4091_v42  ;;  %v2990_v40 = vld [vmem:[%s4852_s29 + $0x8] sm:$0xf]  ;;  %v3135_v42 = vor.u32 %v4175_v28, %v3134_v27  ;;  %v3711_v28 = vor.u32 %v4319_v11, %v3710_v8  ;;  %v4207_v14 = vld [vmem:[%s4852_s29 + $0x234] sm:$0xf0] }
 0x19b   : > { %2588 = vmatpush.bf16.msra.mxu2 %v3071_v44  ;;  %v4139_v44 = vld [vmem:[%s4852_s29 + $0x14] sm:$0xf0]  ;;  %v3310_v23 = vld [vmem:[%s4852_s29 + $0x288] sm:$0xf] }
 0x19c   : > { %2601 = vmatpush.bf16.msra.mxu3 %v3199_v59  ;;  %v4231_v59 = vld [vmem:[%s4852_s29 + $0x2f4] sm:$0xf0]  ;;  %v3438_v27 = vld [vmem:[%s4852_s29 + $0x388] sm:$0xf] }
 0x19d   : > { %v3359_v13 = vor.u32 %v4231_v59, %v3358_v52  ;;  %v3566_v32 = vld [vmem:[%s4852_s29 + $0x488] sm:$0xf]  ;;  %v4247_v52 = vld [vmem:[%s4852_s29 + $0x374] sm:$0xf0] }
 0x19e   : > { %2563 = vmatpush.bf16.msra.mxu0 %v3947_v10  ;;  %2576 = vmatpush.bf16.msra.mxu1 %v4075_v0  ;;  %v4011_v10 = vor.u32 %v4392_v38, %v4008_v39  ;;  %v2991_v0 = vor.u32 %v4139_v44, %v2990_v40  ;;  %v3311_v38 = vor.u32 %v4219_v26, %v3310_v23  ;;  %v4215_v44 = vld [vmem:[%s4852_s29 + $0x274] sm:$0xf0]  ;;  %v3422_v22 = vld [vmem:[%s4852_s29 + $0x368] sm:$0xf] }
 0x19f   : > { %2589 = vmatpush.bf16.msra.mxu2 %v3055_v5  ;;  %v3742_v5 = vld [vmem:[%s4852_s29 + $0x5e8] sm:$0xf]  ;;  %v3567_v40 = vor.u32 %v4283_v34, %v3566_v32  ;;  %v3423_v7 = vor.u32 %v4247_v52, %v3422_v22  ;;  %v4271_v43 = vld [vmem:[%s4852_s29 + $0x434] sm:$0xf0]  ;;  %v4165_v52 = vld [vmem:[%s4852_s29 + $0xec] sm:$0xf] }
 0x1a0   : > { %2602 = vmatpush.bf16.msra.mxu3 %v3183_v24  ;;  %v3487_v24 = vor.u32 %v4263_v63, %v3486_v62  ;;  %v3743_v19 = vor.u32 %v4327_v31, %v3742_v5  ;;  %v3550_v59 = vld [vmem:[%s4852_s29 + $0x468] sm:$0xf]  ;;  %v4279_v62 = vld [vmem:[%s4852_s29 + $0x474] sm:$0xf0] }
 0x1a1   : > { %v4311_v63 = vld [vmem:[%s4852_s29 + $0x574] sm:$0xf0]  ;;  %v3406_v31 = vld [vmem:[%s4852_s29 + $0x348] sm:$0xf] }
 0x1a2   : > { %2564 = vmatpush.bf16.msra.mxu0 %v3931_v29  ;;  %2577 = vmatpush.bf16.msra.mxu1 %v4059_v33  ;;  %v4259_v29 = vld [vmem:[%s4852_s29 + $0x3d4] sm:$0xf0]  ;;  %v3598_v33 = vld [vmem:[%s4852_s29 + $0x4c8] sm:$0xf] }
 0x1a3   : > { %2590 = vmatpush.bf16.msra.mxu2 %v3039_v37  ;;  %v4291_v37 = vld [vmem:[%s4852_s29 + $0x4d4] sm:$0xf0]  ;;  %v3662_v17 = vld [vmem:[%s4852_s29 + $0x548] sm:$0xf] }
 0x1a4   : > { %2603 = vmatpush.bf16.msra.mxu3 %v3167_v49  ;;  %v3471_v49 = vor.u32 %v4259_v29, %v3470_v25  ;;  %v3599_v53 = vor.u32 %v4291_v37, %v3598_v33  ;;  %v4211_v5 = vld [vmem:[%s4852_s29 + $0x254] sm:$0xf0]  ;;  %v3262_v37 = vld [vmem:[%s4852_s29 + $0x228] sm:$0xf] }
 0x1a5   : > { %v3390_v41 = vld [vmem:[%s4852_s29 + $0x328] sm:$0xf]  ;;  %v4267_v26 = vld [vmem:[%s4852_s29 + $0x414] sm:$0xf0] }
 0x1a6   : > { %2565 = vmatpush.bf16.msra.mxu0 %v3915_v60  ;;  %2578 = vmatpush.bf16.msra.mxu1 %v4043_v61  ;;  %v4255_v60 = vld [vmem:[%s4852_s29 + $0x3b4] sm:$0xf0]  ;;  %v3582_v61 = vld [vmem:[%s4852_s29 + $0x4a8] sm:$0xf] }
 0x1a7   : > { %2591 = vmatpush.bf16.msra.mxu2 %v3023_v12  ;;  %v4287_v12 = vld [vmem:[%s4852_s29 + $0x4b4] sm:$0xf0]  ;;  %v3646_v18 = vld [vmem:[%s4852_s29 + $0x528] sm:$0xf] }
 0x1a8   : > { %2604 = vmatpush.bf16.msra.mxu3 %v3151_v55  ;;  %v3455_v55 = vor.u32 %v4255_v60, %v3454_v57  ;;  %v3583_v4 = vor.u32 %v4287_v12, %v3582_v61  ;;  %v4303_v57 = vld [vmem:[%s4852_s29 + $0x534] sm:$0xf0]  ;;  %v3263_v60 = vor.u32 %v4207_v14, %v3262_v37  ;;  %v3246_v61 = vld [vmem:[%s4852_s29 + $0x208] sm:$0xf] }
 0x1a9   : > { %v4203_v12 = vld [vmem:[%s4852_s29 + $0x214] sm:$0xf0]  ;;  %v3647_v23 = vor.u32 %v4303_v57, %v3646_v18  ;;  %v3870_v32 = vld [vmem:[%s4852_s29 + $0x6e8] sm:$0xf]  ;;  %v4157_v57 = vld [vmem:[%s4852_s29 + $0xac] sm:$0xf] }
 0x1aa   : > { %2566 = vmatpush.bf16.msra.mxu0 %v3899_v30  ;;  %2579 = vmatpush.bf16.msra.mxu1 %v4027_v20  ;;  %v4251_v30 = vld [vmem:[%s4852_s29 + $0x394] sm:$0xf0]  ;;  %v3694_v20 = vld [vmem:[%s4852_s29 + $0x588] sm:$0xf] }
 0x1ab   : > { %2592 = vmatpush.bf16.msra.mxu2 %v3007_v36  ;;  %v4315_v36 = vld [vmem:[%s4852_s29 + $0x594] sm:$0xf0]  ;;  %v3439_v39 = vor.u32 %v4251_v30, %v3438_v27  ;;  %v3630_v27 = vld [vmem:[%s4852_s29 + $0x508] sm:$0xf] }
 0x1ac   : > { %2605 = vmatpush.bf16.msra.mxu3 %v3135_v42  ;;  %v3294_v42 = vld [vmem:[%s4852_s29 + $0x268] sm:$0xf]  ;;  %v3695_v47 = vor.u32 %v4315_v36, %v3694_v20  ;;  %v4359_v34 = vld [vmem:[%s4852_s29 + $0x6f4] sm:$0xf0] }
 0x1ad   : > { %v3295_v3 = vor.u32 %v4215_v44, %v3294_v42  ;;  %v3998_v20 = vld [vmem:[%s4852_s29 + $0x7e8] sm:$0xf]  ;;  %v4423_v42 = vld [vmem:[%s4852_s29 + $0x8f4] sm:$0xf0] }
 0x1ae   : > { %2567 = vmatpush.bf16.msra.mxu0 %v3883_v56  ;;  %2580 = vmatpush.bf16.msra.mxu1 %v4011_v10  ;;  %v3678_v56 = vld [vmem:[%s4852_s29 + $0x568] sm:$0xf]  ;;  %v3551_v10 = vor.u32 %v4279_v62, %v3550_v59  ;;  %v3104_v59 = vld [vmem:[%s4852_s29 + $0xf8] sm:$0xf0]  ;;  %v4351_v14 = vld [vmem:[%s4852_s29 + $0x6b4] sm:$0xf0] }
 0x1af   : > { %2593 = vmatpush.bf16.msra.mxu2 %v2991_v0  ;;  %v3278_v0 = vld [vmem:[%s4852_s29 + $0x248] sm:$0xf]  ;;  %v4415_v18 = vld [vmem:[%s4852_s29 + $0x8b4] sm:$0xf0] }
 0x1b0   : > { %2606 = vmatpush.bf16.msra.mxu3 %v3119_v9  ;;  %v3679_v9 = vor.u32 %v4311_v63, %v3678_v56  ;;  %v3279_v25 = vor.u32 %v4211_v5, %v3278_v0  ;;  %v3871_v56 = vor.u32 %v4359_v34, %v3870_v32  ;;  %v3982_v0 = vld [vmem:[%s4852_s29 + $0x7c8] sm:$0xf]  ;;  %v3056_v32 = vld [vmem:[%s4852_s29 + $0x98] sm:$0xf0] }
 0x1b1   : > { %2568 = vmatmul.bf16.vlgmr.msra.gmra.mxu0 %v5367_v2  ;;  %2581 = vmatmul.bf16.vlgmr.msra.gmra.mxu1 %v5435_v35  ;;  %v3838_v37 = vld [vmem:[%s4852_s29 + $0x6a8] sm:$0xf] }
 0x1b2   : > { %2612 = vmatpush.bf16.msrb.mxu0 %v3359_v13  ;;  %2625 = vmatpush.bf16.msrb.mxu1 %v3487_v24  ;;  %v4243_v13 = vld [vmem:[%s4852_s29 + $0x354] sm:$0xf0]  ;;  %v3534_v24 = vld [vmem:[%s4852_s29 + $0x448] sm:$0xf] }
 0x1b3   : > { %2638 = vmatpush.bf16.msrb.mxu2 %v3615_v58  ;;  %2607 = vmatmul.bf16.vlgmr.msra.gmra.mxu3 %v5313_v54  ;;  %v4275_v58 = vld [vmem:[%s4852_s29 + $0x454] sm:$0xf0]  ;;  %v3407_v29 = vor.u32 %v4243_v13, %v3406_v31  ;;  %v3107_v31 = vor.u32 %v4165_v52, %v3104_v59  ;;  %v4110_v13 = vld [vmem:[%s4852_s29 + $0x8c8] sm:$0xf] }
 0x1b4   : > { %2651 = vmatpush.bf16.msrb.mxu3 %v3743_v19  ;;  %2594 = vmatmul.bf16.vlgmr.msra.gmra.mxu2 %v5306_v46  ;;  %v5614_v19 = vpop.f32.mrf.mxu0  ;;  %v3535_v33 = vor.u32 %v4275_v58, %v3534_v24  ;;  %v4419_v24 = vld [vmem:[%s4852_s29 + $0x8d4] sm:$0xf0]  ;;  %v4161_v58 = vld [vmem:[%s4852_s29 + $0xcc] sm:$0xf]  ;;  %v4062_v59 = vld [vmem:[%s4852_s29 + $0x868] sm:$0xf] }
 0x1b5   : > { %v4375_v52 = vld [vmem:[%s4852_s29 + $0x774] sm:$0xf0] }
 0x1b6   : > { %2613 = vmatpush.bf16.msrb.mxu0 %v3343_v45  ;;  %2626 = vmatpush.bf16.msrb.mxu1 %v3471_v49  ;;  %v3663_v45 = vor.u32 %v4307_v21, %v3662_v17  ;;  %v4239_v49 = vld [vmem:[%s4852_s29 + $0x334] sm:$0xf0]  ;;  %v3088_v17 = vld [vmem:[%s4852_s29 + $0xd8] sm:$0xf0] }
 0x1b7   : > { %2639 = vmatpush.bf16.msrb.mxu2 %v3599_v53  ;;  %v3518_v53 = vld [vmem:[%s4852_s29 + $0x428] sm:$0xf]  ;;  %v3391_v8 = vor.u32 %v4239_v49, %v3390_v41  ;;  %v3091_v49 = vor.u32 %v4161_v58, %v3088_v17  ;;  %v4371_v58 = vld [vmem:[%s4852_s29 + $0x754] sm:$0xf0] }
 0x1b8   : > { %2652 = vmatpush.bf16.msrb.mxu3 %v3727_v50  ;;  %v5624_v50 = vpop.f32.mrf.mxu1  ;;  %v3519_v11 = vor.u32 %v4271_v43, %v3518_v53  ;;  %v3966_v41 = vld [vmem:[%s4852_s29 + $0x7a8] sm:$0xf]  ;;  %v4383_v53 = vld [vmem:[%s4852_s29 + $0x7b4] sm:$0xf0] }
 0x1b9   : > { %v4094_v43 = vld [vmem:[%s4852_s29 + $0x8a8] sm:$0xf] }
 0x1ba   : > { %2614 = vmatpush.bf16.msrb.mxu0 %v3327_v15  ;;  %2627 = vmatpush.bf16.msrb.mxu1 %v3455_v55  ;;  %v3374_v15 = vld [vmem:[%s4852_s29 + $0x308] sm:$0xf]  ;;  %v4235_v55 = vld [vmem:[%s4852_s29 + $0x314] sm:$0xf0] }
 0x1bb   : > { %2640 = vmatpush.bf16.msrb.mxu2 %v3583_v4  ;;  %v3502_v4 = vld [vmem:[%s4852_s29 + $0x408] sm:$0xf]  ;;  %v3375_v22 = vor.u32 %v4235_v55, %v3374_v15  ;;  %v4347_v15 = vld [vmem:[%s4852_s29 + $0x694] sm:$0xf0] }
 0x1bc   : > { %2653 = vmatpush.bf16.msrb.mxu3 %v3711_v28  ;;  %v4299_v28 = vld [vmem:[%s4852_s29 + $0x514] sm:$0xf0]  ;;  %v2363_v44 = vpop.f32.mrf.mxu0  ;;  %v3950_v55 = vld [vmem:[%s4852_s29 + $0x788] sm:$0xf] }
 0x1bd   : > { %v3631_v62 = vor.u32 %v4299_v28, %v3630_v27  ;;  %v4411_v27 = vld [vmem:[%s4852_s29 + $0x894] sm:$0xf0]  ;;  %v4153_v28 = vld [vmem:[%s4852_s29 + $0x8c] sm:$0xf]  ;;  %v3934_v44 = vld [vmem:[%s4852_s29 + $0x768] sm:$0xf] }
 0x1be   : > { %2615 = vmatpush.bf16.msrb.mxu0 %v3311_v38  ;;  %2628 = vmatpush.bf16.msrb.mxu1 %v3439_v39  ;;  %v3247_v38 = vor.u32 %v4203_v12, %v3246_v61  ;;  %v4391_v39 = vld [vmem:[%s4852_s29 + $0x7f4] sm:$0xf0]  ;;  %v3839_v61 = vor.u32 %v4351_v14, %v3838_v37  ;;  %v3967_v12 = vor.u32 %v4383_v53, %v3966_v41  ;;  %v3902_v53 = vld [vmem:[%s4852_s29 + $0x728] sm:$0xf] }
 0x1bf   : > { %2641 = vmatpush.bf16.msrb.mxu2 %v3567_v40  ;;  %v4126_v40 = vld [vmem:[%s4852_s29 + $0x8e8] sm:$0xf]  ;;  %v3999_v63 = vor.u32 %v4391_v39, %v3998_v20 }
 0x1c0   : > { %2654 = vmatpush.bf16.msrb.mxu3 %v3695_v47  ;;  %v3503_v47 = vor.u32 %v4267_v26, %v3502_v4  ;;  %v2376_v5 = vpop.f32.mrf.mxu1  ;;  %v4078_v26 = vld [vmem:[%s4852_s29 + $0x888] sm:$0xf] }
 0x1c1   : > { %v4079_v39 = vor.u32 %v4411_v27, %v4078_v26  ;;  %v3790_v5 = vld [vmem:[%s4852_s29 + $0x648] sm:$0xf]  ;;  %v4363_v27 = vld [vmem:[%s4852_s29 + $0x714] sm:$0xf0] }
 0x1c2   : > { %2616 = vmatpush.bf16.msrb.mxu0 %v3295_v3  ;;  %2629 = vmatpush.bf16.msrb.mxu1 %v3423_v7  ;;  %v4127_v3 = vor.u32 %v4423_v42, %v4126_v40  ;;  %v3854_v7 = vld [vmem:[%s4852_s29 + $0x6c8] sm:$0xf]  ;;  %v4343_v42 = vld [vmem:[%s4852_s29 + $0x674] sm:$0xf0] }
 0x1c3   : > { %2642 = vmatpush.bf16.msrb.mxu2 %v3551_v10  ;;  %v4355_v10 = vld [vmem:[%s4852_s29 + $0x6d4] sm:$0xf0]  ;;  %v3806_v40 = vld [vmem:[%s4852_s29 + $0x668] sm:$0xf] }
 0x1c4   : > { %2655 = vmatpush.bf16.msrb.mxu3 %v3679_v9  ;;  %v5634_v30 = vpop.f32.mrf.mxu2  ;;  %v5639_v36 = vpop.f32.mrf.mxu3  ;;  %v4387_v9 = vld [vmem:[%s4852_s29 + $0x7d4] sm:$0xf0]  ;;  %v3855_v21 = vor.u32 %v4355_v10, %v3854_v7  ;;  %v3807_v7 = vor.u32 %v4343_v42, %v3806_v40  ;;  %v3935_v10 = vor.u32 %v4375_v52, %v3934_v44  ;;  %v3886_v26 = vld [vmem:[%s4852_s29 + $0x708] sm:$0xf]  ;;  %v4197_v42 = vld [vmem:[%s4852_s29 + $0x1ec] sm:$0xf] }
 0x1c5   : > { %v3232_v44 = vld [vmem:[%s4852_s29 + $0x1f8] sm:$0xf0] }
 0x1c6   : > { %2617 = vmatpush.bf16.msrb.mxu0 %v3279_v25  ;;  %2630 = vmatpush.bf16.msrb.mxu1 %v3407_v29  ;;  %v3983_v29 = vor.u32 %v4387_v9, %v3982_v0  ;;  %v3918_v9 = vld [vmem:[%s4852_s29 + $0x748] sm:$0xf] }
 0x1c7   : > { %2643 = vmatpush.bf16.msrb.mxu2 %v3535_v33  ;;  %v4111_v33 = vor.u32 %v4419_v24, %v4110_v13  ;;  %v3919_v14 = vor.u32 %v4371_v58, %v3918_v9  ;;  %v3216_v58 = vld [vmem:[%s4852_s29 + $0x1d8] sm:$0xf0] }
 0x1c8   : > { %2656 = vmatpush.bf16.msrb.mxu3 %v3663_v45 }
 0x1ca   : > { %2618 = vmatpush.bf16.msrb.mxu0 %v3263_v60  ;;  %2631 = vmatpush.bf16.msrb.mxu1 %v3391_v8  ;;  %v3072_v60 = vld [vmem:[%s4852_s29 + $0xb8] sm:$0xf0]  ;;  %v4095_v8 = vor.u32 %v4415_v18, %v4094_v43 }
 0x1cb   : > { %2644 = vmatpush.bf16.msrb.mxu2 %v3519_v11  ;;  %v3822_v11 = vld [vmem:[%s4852_s29 + $0x688] sm:$0xf]  ;;  %v3075_v4 = vor.u32 %v4157_v57, %v3072_v60  ;;  %v4399_v60 = vld [vmem:[%s4852_s29 + $0x834] sm:$0xf0] }
 0x1cc   : > { %2657 = vmatpush.bf16.msrb.mxu3 %v3647_v23  ;;  %v2389_v25 = vpop.f32.mrf.mxu2  ;;  %v2402_v45 = vpop.f32.mrf.mxu3  ;;  %v4379_v23 = vld [vmem:[%s4852_s29 + $0x794] sm:$0xf0]  ;;  %v3823_v34 = vor.u32 %v4347_v15, %v3822_v11  ;;  %v4030_v57 = vld [vmem:[%s4852_s29 + $0x828] sm:$0xf] }
 0x1cd   : > { %v3024_v25 = vld [vmem:[%s4852_s29 + $0x58] sm:$0xf0]  ;;  %v3774_v45 = vld [vmem:[%s4852_s29 + $0x628] sm:$0xf] }
 0x1ce   : > { %2619 = vmatpush.bf16.msrb.mxu0 %v3247_v38  ;;  %2632 = vmatpush.bf16.msrb.mxu1 %v3375_v22  ;;  %v5674_v20 = vpop.f32.mrf.mxu0  ;;  %v3951_v38 = vor.u32 %v4379_v23, %v3950_v55  ;;  %v5679_v22 = vpop.f32.mrf.mxu1  ;;  %v3758_v15 = vld [vmem:[%s4852_s29 + $0x608] sm:$0xf]  ;;  %v4331_v55 = vld [vmem:[%s4852_s29 + $0x614] sm:$0xf0]  ;;  %v4031_v23 = vor.u32 %v4399_v60, %v4030_v57  ;;  %v3328_v57 = vld [vmem:[%s4852_s29 + $0x2b8] sm:$0xf0] }
 0x1cf   : > { %2645 = vmatpush.bf16.msrb.mxu2 %v3503_v47  ;;  %v3059_v47 = vor.u32 %v4153_v28, %v3056_v32  ;;  %v4014_v28 = vld [vmem:[%s4852_s29 + $0x808] sm:$0xf]  ;;  %v4253_v60 = vld [vmem:[%s4852_s29 + $0x3ac] sm:$0xf] }
 0x1d0   : > { %2658 = vmatpush.bf16.msrb.mxu3 %v3631_v62  ;;  %v4407_v62 = vld [vmem:[%s4852_s29 + $0x874] sm:$0xf0] }
 0x1d1   : > { %2620 = vmatmul.bf16.vlgmr.msrb.gmra.mxu0 %v5304_v48  ;;  %2633 = vmatmul.bf16.vlgmr.msrb.gmra.mxu1 %v5308_v51  ;;  %v4063_v0 = vor.u32 %v4407_v62, %v4062_v59  ;;  %v3759_v59 = vor.u32 %v4331_v55, %v3758_v15  ;;  %v3360_v62 = vld [vmem:[%s4852_s29 + $0x2f8] sm:$0xf0]  ;;  %v4185_v55 = vld [vmem:[%s4852_s29 + $0x18c] sm:$0xf] }
 0x1d2   : > { %2664 = vmatpush.bf16.msra.mxu0 %v3871_v56  ;;  %2677 = vmatpush.bf16.msra.mxu1 %v3999_v63  ;;  %v4149_v56 = vld [vmem:[%s4852_s29 + $0x6c] sm:$0xf]  ;;  %v3040_v63 = vld [vmem:[%s4852_s29 + $0x78] sm:$0xf0] }
 0x1d3   : > { %2690 = vmatpush.bf16.msra.mxu2 %v4127_v3  ;;  %2659 = vmatmul.bf16.vlgmr.msrb.gmra.mxu3 %v5369_v6  ;;  %v2375_v3 = vadd.f32 %v5624_v50, %v5614_v19  ;;  %v3043_v24 = vor.u32 %v4149_v56, %v3040_v63  ;;  %v4046_v19 = vld [vmem:[%s4852_s29 + $0x848] sm:$0xf]  ;;  %v4403_v50 = vld [vmem:[%s4852_s29 + $0x854] sm:$0xf0]  ;;  %v4261_v56 = vld [vmem:[%s4852_s29 + $0x3ec] sm:$0xf] }
 0x1d4   : > { %2703 = vmatpush.bf16.msra.mxu3 %v3107_v31  ;;  %2646 = vmatmul.bf16.vlgmr.msrb.gmra.mxu2 %v5365_v1  ;;  %v4339_v31 = vld [vmem:[%s4852_s29 + $0x654] sm:$0xf0]  ;;  %v4047_v41 = vor.u32 %v4403_v50, %v4046_v19  ;;  %v3488_v63 = vld [vmem:[%s4852_s29 + $0x3f8] sm:$0xf0]  ;;  %v4225_v19 = vld [vmem:[%s4852_s29 + $0x2cc] sm:$0xf] }
 0x1d5   : > { %v3491_v9 = vor.u32 %v4261_v56, %v3488_v63 }
 0x1d6   : > { %2665 = vmatpush.bf16.msra.mxu0 %v3855_v21  ;;  %2678 = vmatpush.bf16.msra.mxu1 %v3983_v29  ;;  %v5696_v17 = vpop.f32.mrf.mxu3  ;;  %v4145_v21 = vld [vmem:[%s4852_s29 + $0x4c] sm:$0xf]  ;;  %v2388_v29 = vadd.f32 %v5634_v30, %v2375_v3  ;;  %v2415_v37 = vpop.f32.mrf.mxu0  ;;  %v4367_v30 = vld [vmem:[%s4852_s29 + $0x734] sm:$0xf0]  ;;  %v3887_v3 = vor.u32 %v4363_v27, %v3886_v26 }
 0x1d7   : > { %2691 = vmatpush.bf16.msra.mxu2 %v4111_v33  ;;  %v5691_v13 = vpop.f32.mrf.mxu2  ;;  %v3791_v33 = vor.u32 %v4339_v31, %v3790_v5  ;;  %v2428_v43 = vpop.f32.mrf.mxu1  ;;  %v3027_v18 = vor.u32 %v4145_v21, %v3024_v25  ;;  %v3235_v5 = vor.u32 %v4197_v42, %v3232_v44  ;;  %v3344_v25 = vld [vmem:[%s4852_s29 + $0x2d8] sm:$0xf0]  ;;  %v4289_v37 = vld [vmem:[%s4852_s29 + $0x4cc] sm:$0xf] }
 0x1d8   : > { %2704 = vmatpush.bf16.msra.mxu3 %v3091_v49  ;;  %v4335_v49 = vld [vmem:[%s4852_s29 + $0x634] sm:$0xf0]  ;;  %v4221_v43 = vld [vmem:[%s4852_s29 + $0x2ac] sm:$0xf] }
 0x1d9   : > { %v3775_v11 = vor.u32 %v4335_v49, %v3774_v45  ;;  %v4189_v49 = vld [vmem:[%s4852_s29 + $0x1ac] sm:$0xf] }
 0x1da   : > { %2666 = vmatpush.bf16.msra.mxu0 %v3839_v61  ;;  %2679 = vmatpush.bf16.msra.mxu1 %v3967_v12  ;;  %v4141_v61 = vld [vmem:[%s4852_s29 + $0x2c] sm:$0xf]  ;;  %v3008_v12 = vld [vmem:[%s4852_s29 + $0x38] sm:$0xf0] }
 0x1db   : > { %2692 = vmatpush.bf16.msra.mxu2 %v4095_v8  ;;  %v2401_v8 = vadd.f32 %v5639_v36, %v2388_v29  ;;  %v3011_v32 = vor.u32 %v4141_v61, %v3008_v12  ;;  %v4257_v29 = vld [vmem:[%s4852_s29 + $0x3cc] sm:$0xf]  ;;  %v3456_v61 = vld [vmem:[%s4852_s29 + $0x3b8] sm:$0xf0] }
 0x1dc   : > { %2705 = vmatpush.bf16.msra.mxu3 %v3075_v4  ;;  %v3903_v4 = vor.u32 %v4367_v30, %v3902_v53  ;;  %v3200_v53 = vld [vmem:[%s4852_s29 + $0x1b8] sm:$0xf0]  ;;  %v4285_v12 = vld [vmem:[%s4852_s29 + $0x4ac] sm:$0xf]  ;;  %v3459_v15 = vor.u32 %v4253_v60, %v3456_v61 }
 0x1dd   : > { %v2414_v52 = vadd.f32 %v5674_v20, %v2401_v8  ;;  %v3584_v8 = vld [vmem:[%s4852_s29 + $0x4b8] sm:$0xf0] }
 0x1de   : > { %2667 = vmatpush.bf16.msra.mxu0 %v3823_v34  ;;  %2680 = vmatpush.bf16.msra.mxu1 %v3951_v38  ;;  %v4395_v34 = vld [vmem:[%s4852_s29 + $0x814] sm:$0xf0]  ;;  %v4137_v38 = vld [vmem:[%s4852_s29 + $0xc] sm:$0xf]  ;;  %v2454_v40 = vpop.f32.mrf.mxu3  ;;  %v3587_v27 = vor.u32 %v4285_v12, %v3584_v8  ;;  %v3264_v61 = vld [vmem:[%s4852_s29 + $0x238] sm:$0xf0] }
 0x1df   : > { %2693 = vmatpush.bf16.msra.mxu2 %v4079_v39  ;;  %v2441_v36 = vpop.f32.mrf.mxu2  ;;  %v2992_v39 = vld [vmem:[%s4852_s29 + $0x18] sm:$0xf0]  ;;  %v2427_v50 = vadd.f32 %v5679_v22, %v2414_v52  ;;  %v3347_v22 = vor.u32 %v4225_v19, %v3344_v25  ;;  %v4209_v19 = vld [vmem:[%s4852_s29 + $0x24c] sm:$0xf] }
 0x1e0   : > { %2706 = vmatpush.bf16.msra.mxu3 %v3059_v47  ;;  %v4229_v47 = vld [vmem:[%s4852_s29 + $0x2ec] sm:$0xf]  ;;  %v2995_v20 = vor.u32 %v4137_v38, %v2992_v39  ;;  %v3568_v39 = vld [vmem:[%s4852_s29 + $0x498] sm:$0xf0] }
 0x1e1   : > { %v3363_v31 = vor.u32 %v4229_v47, %v3360_v62  ;;  %v4249_v36 = vld [vmem:[%s4852_s29 + $0x38c] sm:$0xf]  ;;  %v3168_v52 = vld [vmem:[%s4852_s29 + $0x178] sm:$0xf0] }
 0x1e2   : > { %2668 = vmatpush.bf16.msra.mxu0 %v3807_v7  ;;  %2681 = vmatpush.bf16.msra.mxu1 %v3935_v10  ;;  %v4015_v7 = vor.u32 %v4395_v34, %v4014_v28  ;;  %v4293_v10 = vld [vmem:[%s4852_s29 + $0x4ec] sm:$0xf]  ;;  %v3312_v28 = vld [vmem:[%s4852_s29 + $0x298] sm:$0xf0] }
 0x1e3   : > { %2694 = vmatpush.bf16.msra.mxu2 %v4063_v0  ;;  %v3616_v0 = vld [vmem:[%s4852_s29 + $0x4f8] sm:$0xf0]  ;;  %v4281_v38 = vld [vmem:[%s4852_s29 + $0x48c] sm:$0xf] }
 0x1e4   : > { %2707 = vmatpush.bf16.msra.mxu3 %v3043_v24  ;;  %v4193_v24 = vld [vmem:[%s4852_s29 + $0x1cc] sm:$0xf]  ;;  %v3619_v21 = vor.u32 %v4293_v10, %v3616_v0  ;;  %v3571_v63 = vor.u32 %v4281_v38, %v3568_v39  ;;  %v3424_v10 = vld [vmem:[%s4852_s29 + $0x378] sm:$0xf0] }
 0x1e5   : > { %v4181_v47 = vld [vmem:[%s4852_s29 + $0x16c] sm:$0xf]  ;;  %v3392_v8 = vld [vmem:[%s4852_s29 + $0x338] sm:$0xf0] }
 0x1e6   : > { %2669 = vmatpush.bf16.msra.mxu0 %v3791_v33  ;;  %2682 = vmatpush.bf16.msra.mxu1 %v3919_v14  ;;  %v3472_v33 = vld [vmem:[%s4852_s29 + $0x3d8] sm:$0xf0]  ;;  %v4277_v0 = vld [vmem:[%s4852_s29 + $0x46c] sm:$0xf] }
 0x1e7   : > { %2695 = vmatpush.bf16.msra.mxu2 %v4047_v41  ;;  %v3600_v14 = vld [vmem:[%s4852_s29 + $0x4d8] sm:$0xf0]  ;;  %v3219_v41 = vor.u32 %v4193_v24, %v3216_v58  ;;  %v3475_v45 = vor.u32 %v4257_v29, %v3472_v33  ;;  %v4177_v24 = vld [vmem:[%s4852_s29 + $0x14c] sm:$0xf] }
 0x1e8   : > { %2708 = vmatpush.bf16.msra.mxu3 %v3027_v18  ;;  %v2440_v18 = vadd.f32 %v5691_v13, %v2427_v50  ;;  %v3603_v30 = vor.u32 %v4289_v37, %v3600_v14  ;;  %v3203_v13 = vor.u32 %v4189_v49, %v3200_v53  ;;  %v3152_v58 = vld [vmem:[%s4852_s29 + $0x158] sm:$0xf0]  ;;  %v4241_v25 = vld [vmem:[%s4852_s29 + $0x34c] sm:$0xf] }
 0x1e9   : > { %v3408_v29 = vld [vmem:[%s4852_s29 + $0x358] sm:$0xf0]  ;;  %v4273_v14 = vld [vmem:[%s4852_s29 + $0x44c] sm:$0xf] }
 0x1ea   : > { %2670 = vmatpush.bf16.msra.mxu0 %v3775_v11  ;;  %2683 = vmatpush.bf16.msra.mxu1 %v3903_v4  ;;  %v3331_v11 = vor.u32 %v4221_v43, %v3328_v57  ;;  %v3184_v4 = vld [vmem:[%s4852_s29 + $0x198] sm:$0xf0]  ;;  %v2453_v26 = vadd.f32 %v5696_v17, %v2440_v18  ;;  %v3411_v53 = vor.u32 %v4241_v25, %v3408_v29  ;;  %v4173_v43 = vld [vmem:[%s4852_s29 + $0x12c] sm:$0xf] }
 0x1eb   : > { %2696 = vmatpush.bf16.msra.mxu2 %v4031_v23  ;;  %v4217_v23 = vld [vmem:[%s4852_s29 + $0x28c] sm:$0xf]  ;;  %v3187_v42 = vor.u32 %v4185_v55, %v3184_v4  ;;  %v3136_v18 = vld [vmem:[%s4852_s29 + $0x138] sm:$0xf0] }
 0x1ec   : > { %2709 = vmatpush.bf16.msra.mxu3 %v3011_v32  ;;  %v3440_v32 = vld [vmem:[%s4852_s29 + $0x398] sm:$0xf0]  ;;  %v3315_v17 = vor.u32 %v4217_v23, %v3312_v28  ;;  %v4237_v12 = vld [vmem:[%s4852_s29 + $0x32c] sm:$0xf] }
 0x1ed   : > { %v3443_v44 = vor.u32 %v4249_v36, %v3440_v32  ;;  %v4169_v55 = vld [vmem:[%s4852_s29 + $0x10c] sm:$0xf]  ;;  %v3120_v4 = vld [vmem:[%s4852_s29 + $0x118] sm:$0xf0] }
 0x1ee   : > { %2671 = vmatpush.bf16.msra.mxu0 %v3759_v59  ;;  %2684 = vmatpush.bf16.msra.mxu1 %v3887_v3  ;;  %v2465_v34 = vpop.f32.mrf.mxu0  ;;  %v4213_v59 = vld [vmem:[%s4852_s29 + $0x26c] sm:$0xf]  ;;  %v5761_v62 = vpop.f32.mrf.mxu1  ;;  %v3296_v3 = vld [vmem:[%s4852_s29 + $0x278] sm:$0xf0] }
 0x1ef   : > { %2697 = vmatpush.bf16.msra.mxu2 %v4015_v7  ;;  %v2466_v40 = vadd.f32 %v2465_v34, %v2453_v26  ;;  %v4245_v7 = vld [vmem:[%s4852_s29 + $0x36c] sm:$0xf]  ;;  %v3395_v26 = vor.u32 %v4237_v12, %v3392_v8  ;;  %v3248_v28 = vld [vmem:[%s4852_s29 + $0x218] sm:$0xf0] }
 0x1f0   : > { %2710 = vmatpush.bf16.msra.mxu3 %v2995_v20  ;;  %v3552_v20 = vld [vmem:[%s4852_s29 + $0x478] sm:$0xf0]  ;;  %v4233_v36 = vld [vmem:[%s4852_s29 + $0x30c] sm:$0xf] }
 0x1f1   : > { %2672 = vmatmul.bf16.vlgmr.msra.gmra.mxu0 %v5361_v16  ;;  %2685 = vmatmul.bf16.vlgmr.msra.gmra.mxu1 %v5367_v2  ;;  %v3555_v50 = vor.u32 %v4277_v0, %v3552_v20  ;;  %v4265_v34 = vld [vmem:[%s4852_s29 + $0x40c] sm:$0xf]  ;;  %v3504_v38 = vld [vmem:[%s4852_s29 + $0x418] sm:$0xf0] }
 0x1f2   : > { %2716 = vmatpush.bf16.msrb.mxu0 %v3235_v5  ;;  %2729 = vmatpush.bf16.msrb.mxu1 %v3363_v31  ;;  %v3171_v5 = vor.u32 %v4181_v47, %v3168_v52  ;;  %v3299_v31 = vor.u32 %v4213_v59, %v3296_v3  ;;  %v3123_v47 = vor.u32 %v4169_v55, %v3120_v4  ;;  %v3872_v52 = vld [vmem:[%s4852_s29 + $0x6f8] sm:$0xf0]  ;;  %v4389_v59 = vld [vmem:[%s4852_s29 + $0x7ec] sm:$0xf] }
 0x1f3   : > { %2742 = vmatpush.bf16.msrb.mxu2 %v3491_v9  ;;  %2711 = vmatmul.bf16.vlgmr.msra.gmra.mxu3 %v5306_v46  ;;  %v579_v46 = vld [vmem:[#allocation3 + $0x10] sm:$0xff]  ;;  %v3427_v9 = vor.u32 %v4245_v7, %v3424_v10  ;;  %v4421_v7 = vld [vmem:[%s4852_s29 + $0x8ec] sm:$0xf]  ;;  %v4128_v10 = vld [vmem:[%s4852_s29 + $0x8f8] sm:$0xf0]  ;;  %v3507_v0 = vor.u32 %v4265_v34, %v3504_v38 }
 0x1f4   : > { %2755 = vmatpush.bf16.msrb.mxu3 %v3619_v21  ;;  %2698 = vmatmul.bf16.vlgmr.msra.gmra.mxu2 %v5435_v35  ;;  %v2820_v56 = vadd.f32 %v2466_v40, %v579_v46  ;;  %v3280_v21 = vld [vmem:[%s4852_s29 + $0x258] sm:$0xf0]  ;;  %v4417_v29 = vld [vmem:[%s4852_s29 + $0x8cc] sm:$0xf] }
 0x1f5   : > { %v3283_v49 = vor.u32 %v4209_v19, %v3280_v21  ;;  %v3376_v46 = vld [vmem:[%s4852_s29 + $0x318] sm:$0xf0]  ;;  %v4131_v19 = vor.u32 %v4421_v7, %v4128_v10  ;;  %v4385_v21 = vld [vmem:[%s4852_s29 + $0x7cc] sm:$0xf] }
 0x1f6   : > { %2717 = vmatpush.bf16.msrb.mxu0 %v3219_v41  ;;  %2730 = vmatpush.bf16.msrb.mxu1 %v3347_v22  ;;  %2824 = vst [vmem:[#allocation3 + $0x10] sm:$0xff] %v2820_v56  ;;  %v5776_v37 = vpop.f32.mrf.mxu3  ;;  %v3536_v41 = vld [vmem:[%s4852_s29 + $0x458] sm:$0xf0]  ;;  %v2467_v22 = vpop.f32.mrf.mxu0  ;;  %v3379_v3 = vor.u32 %v4233_v36, %v3376_v46  ;;  %v4377_v4 = vld [vmem:[%s4852_s29 + $0x78c] sm:$0xf] }
 0x1f7   : > { %2743 = vmatpush.bf16.msrb.mxu2 %v3475_v45  ;;  %v5774_v33 = vpop.f32.mrf.mxu2  ;;  %v3155_v45 = vor.u32 %v4177_v24, %v3152_v58  ;;  %v2480_v57 = vpop.f32.mrf.mxu1  ;;  %v3539_v60 = vor.u32 %v4273_v14, %v3536_v41  ;;  %v4000_v56 = vld [vmem:[%s4852_s29 + $0x7f8] sm:$0xf0]  ;;  %v4353_v58 = vld [vmem:[%s4852_s29 + $0x6cc] sm:$0xf] }
 0x1f8   : > { %2756 = vmatpush.bf16.msrb.mxu3 %v3603_v30  ;;  %v4205_v30 = vld [vmem:[%s4852_s29 + $0x22c] sm:$0xf]  ;;  %v3728_v24 = vld [vmem:[%s4852_s29 + $0x5d8] sm:$0xf0] }
 0x1f9   : > { %v3267_v23 = vor.u32 %v4205_v30, %v3264_v61  ;;  %v3984_v25 = vld [vmem:[%s4852_s29 + $0x7d8] sm:$0xf0]  ;;  %v4381_v57 = vld [vmem:[%s4852_s29 + $0x7ac] sm:$0xf] }
 0x1fa   : > { %2718 = vmatpush.bf16.msrb.mxu0 %v3203_v13  ;;  %2731 = vmatpush.bf16.msrb.mxu1 %v3331_v11  ;;  %v4269_v13 = vld [vmem:[%s4852_s29 + $0x42c] sm:$0xf]  ;;  %v3520_v11 = vld [vmem:[%s4852_s29 + $0x438] sm:$0xf0] }
 0x1fb   : > { %2744 = vmatpush.bf16.msrb.mxu2 %v3459_v15  ;;  %v3139_v15 = vor.u32 %v4173_v43, %v3136_v18  ;;  %v3523_v32 = vor.u32 %v4269_v13, %v3520_v11  ;;  %v4112_v14 = vld [vmem:[%s4852_s29 + $0x8d8] sm:$0xf0]  ;;  %v4349_v43 = vld [vmem:[%s4852_s29 + $0x6ac] sm:$0xf] }
 0x1fc   : > { %2757 = vmatpush.bf16.msrb.mxu3 %v3587_v27  ;;  %v4201_v27 = vld [vmem:[%s4852_s29 + $0x20c] sm:$0xf]  ;;  %v4115_v18 = vor.u32 %v4417_v29, %v4112_v14  ;;  %v3840_v30 = vld [vmem:[%s4852_s29 + $0x6b8] sm:$0xf0] }
 0x1fd   : > { %v4413_v61 = vld [vmem:[%s4852_s29 + $0x8ac] sm:$0xf]  ;;  %v4096_v12 = vld [vmem:[%s4852_s29 + $0x8b8] sm:$0xf0]  ;;  %v3843_v8 = vor.u32 %v4349_v43, %v3840_v30 }
 0x1fe   : > { %2719 = vmatpush.bf16.msrb.mxu0 %v3187_v42  ;;  %2732 = vmatpush.bf16.msrb.mxu1 %v3315_v17  ;;  %v2506_v40 = vpop.f32.mrf.mxu3  ;;  %v4325_v42 = vld [vmem:[%s4852_s29 + $0x5ec] sm:$0xf]  ;;  %v3744_v17 = vld [vmem:[%s4852_s29 + $0x5f8] sm:$0xf0] }
 0x1ff   : > { %2745 = vmatpush.bf16.msrb.mxu2 %v3443_v44  ;;  %v2493_v39 = vpop.f32.mrf.mxu2  ;;  %v4357_v44 = vld [vmem:[%s4852_s29 + $0x6ec] sm:$0xf]  ;;  %v3747_v20 = vor.u32 %v4325_v42, %v3744_v17  ;;  %v3824_v55 = vld [vmem:[%s4852_s29 + $0x698] sm:$0xf0] }
 0x200   : > { %2758 = vmatpush.bf16.msrb.mxu3 %v3571_v63  ;;  %v3251_v63 = vor.u32 %v4201_v27, %v3248_v28  ;;  %v4313_v11 = vld [vmem:[%s4852_s29 + $0x58c] sm:$0xf]  ;;  %v3680_v34 = vld [vmem:[%s4852_s29 + $0x578] sm:$0xf0] }
 0x201   : > { %v4309_v46 = vld [vmem:[%s4852_s29 + $0x56c] sm:$0xf]  ;;  %v3808_v42 = vld [vmem:[%s4852_s29 + $0x678] sm:$0xf0] }
 0x202   : > { %2720 = vmatpush.bf16.msrb.mxu0 %v3171_v5  ;;  %2733 = vmatpush.bf16.msrb.mxu1 %v3299_v31  ;;  %v3875_v5 = vor.u32 %v4357_v44, %v3872_v52  ;;  %v4003_v31 = vor.u32 %v4389_v59, %v4000_v56  ;;  %v4341_v38 = vld [vmem:[%s4852_s29 + $0x66c] sm:$0xf]  ;;  %v3936_v44 = vld [vmem:[%s4852_s29 + $0x778] sm:$0xf0]  ;;  %v3683_v59 = vor.u32 %v4309_v46, %v3680_v34 }
 0x203   : > { %2746 = vmatpush.bf16.msrb.mxu2 %v3427_v9  ;;  %v4321_v9 = vld [vmem:[%s4852_s29 + $0x5cc] sm:$0xf]  ;;  %v4064_v52 = vld [vmem:[%s4852_s29 + $0x878] sm:$0xf0]  ;;  %v3811_v56 = vor.u32 %v4341_v38, %v3808_v42 }
 0x204   : > { %2759 = vmatpush.bf16.msrb.mxu3 %v3555_v50  ;;  %v3856_v50 = vld [vmem:[%s4852_s29 + $0x6d8] sm:$0xf0]  ;;  %v3731_v41 = vor.u32 %v4321_v9, %v3728_v24  ;;  %v4373_v17 = vld [vmem:[%s4852_s29 + $0x76c] sm:$0xf] }
 0x205   : > { %v3859_v22 = vor.u32 %v4353_v58, %v3856_v50  ;;  %v3664_v7 = vld [vmem:[%s4852_s29 + $0x558] sm:$0xf0]  ;;  %v4337_v10 = vld [vmem:[%s4852_s29 + $0x64c] sm:$0xf]  ;;  %v2492_v50 = vadd.f32 %v5774_v33, %v5761_v62 }
 0x206   : > { %2721 = vmatpush.bf16.msrb.mxu0 %v3155_v45  ;;  %2734 = vmatpush.bf16.msrb.mxu1 %v3283_v49  ;;  %v3987_v45 = vor.u32 %v4385_v21, %v3984_v25  ;;  %v4317_v49 = vld [vmem:[%s4852_s29 + $0x5ac] sm:$0xf]  ;;  %v3920_v9 = vld [vmem:[%s4852_s29 + $0x758] sm:$0xf0] }
 0x207   : > { %2747 = vmatpush.bf16.msrb.mxu2 %v3411_v53  ;;  %v3712_v53 = vld [vmem:[%s4852_s29 + $0x5b8] sm:$0xf0]  ;;  %v4401_v58 = vld [vmem:[%s4852_s29 + $0x84c] sm:$0xf] }
 0x208   : > { %2760 = vmatpush.bf16.msrb.mxu3 %v3539_v60  ;;  %v3968_v60 = vld [vmem:[%s4852_s29 + $0x7b8] sm:$0xf0]  ;;  %v4365_v33 = vld [vmem:[%s4852_s29 + $0x72c] sm:$0xf] }
 0x209   : > { %v3971_v13 = vor.u32 %v4381_v57, %v3968_v60  ;;  %v3776_v62 = vld [vmem:[%s4852_s29 + $0x638] sm:$0xf0]  ;;  %v2505_v57 = vadd.f32 %v5776_v37, %v2492_v50 }
 0x20a   : > { %2722 = vmatpush.bf16.msrb.mxu0 %v3139_v15  ;;  %2735 = vmatpush.bf16.msrb.mxu1 %v3267_v23  ;;  %v3696_v15 = vld [vmem:[%s4852_s29 + $0x598] sm:$0xf0] }
 0x20b   : > { %2748 = vmatpush.bf16.msrb.mxu2 %v3395_v26  ;;  %v3952_v23 = vld [vmem:[%s4852_s29 + $0x798] sm:$0xf0]  ;;  %v4409_v26 = vld [vmem:[%s4852_s29 + $0x88c] sm:$0xf]  ;;  %v3699_v27 = vor.u32 %v4313_v11, %v3696_v15 }
 0x20c   : > { %2761 = vmatpush.bf16.msrb.mxu3 %v3523_v32  ;;  %v3955_v32 = vor.u32 %v4377_v4, %v3952_v23  ;;  %v3904_v43 = vld [vmem:[%s4852_s29 + $0x738] sm:$0xf0]  ;;  %v4393_v23 = vld [vmem:[%s4852_s29 + $0x80c] sm:$0xf] }
 0x20d   : > { %v4032_v30 = vld [vmem:[%s4852_s29 + $0x838] sm:$0xf0] }
 0x20e   : > { %2723 = vmatpush.bf16.msrb.mxu0 %v3123_v47  ;;  %2736 = vmatpush.bf16.msrb.mxu1 %v3251_v63  ;;  %v5832_v28 = vpop.f32.mrf.mxu0  ;;  %v5837_v39 = vpop.f32.mrf.mxu1  ;;  %v4405_v47 = vld [vmem:[%s4852_s29 + $0x86c] sm:$0xf]  ;;  %v3939_v63 = vor.u32 %v4373_v17, %v3936_v44  ;;  %v4016_v37 = vld [vmem:[%s4852_s29 + $0x818] sm:$0xf0]  ;;  %v580_v17 = vld [vmem:[#allocation3] sm:$0xff] }
 0x20f   : > { %2749 = vmatpush.bf16.msrb.mxu2 %v3379_v3  ;;  %v4305_v3 = vld [vmem:[%s4852_s29 + $0x54c] sm:$0xf] }
 0x210   : > { %2762 = vmatpush.bf16.msrb.mxu3 %v3507_v0  ;;  %v3667_v21 = vor.u32 %v4305_v3, %v3664_v7 }
 0x211   : > { %2724 = vmatmul.bf16.vlgmr.msrb.gmra.mxu0 %v5313_v54  ;;  %2737 = vmatmul.bf16.vlgmr.msrb.gmra.mxu1 %v5304_v48  ;;  %v4345_v54 = vld [vmem:[%s4852_s29 + $0x68c] sm:$0xf]  ;;  %v4080_v48 = vld [vmem:[%s4852_s29 + $0x898] sm:$0xf0] }
 0x212   : > { %2768 = vmatpush.bf16.msra.mxu0 %v3747_v20  ;;  %2781 = vmatpush.bf16.msra.mxu1 %v3875_v5  ;;  %v3827_v36 = vor.u32 %v4345_v54, %v3824_v55  ;;  %v4083_v40 = vor.u32 %v4409_v26, %v4080_v48  ;;  %v4067_v20 = vor.u32 %v4405_v47, %v4064_v52  ;;  %v3792_v5 = vld [vmem:[%s4852_s29 + $0x658] sm:$0xf0] }
 0x213   : > { %2794 = vmatpush.bf16.msra.mxu2 %v4003_v31  ;;  %2763 = vmatmul.bf16.vlgmr.msrb.gmra.mxu3 %v5365_v1  ;;  %v4099_v1 = vor.u32 %v4413_v61, %v4096_v12  ;;  %v4369_v31 = vld [vmem:[%s4852_s29 + $0x74c] sm:$0xf]  ;;  %v3795_v29 = vor.u32 %v4337_v10, %v3792_v5  ;;  %v3907_v12 = vor.u32 %v4365_v33, %v3904_v43  ;;  %v3760_v54 = vld [vmem:[%s4852_s29 + $0x618] sm:$0xf0] }
 0x214   : > { %2807 = vmatpush.bf16.msra.mxu3 %v4131_v19  ;;  %2750 = vmatmul.bf16.vlgmr.msrb.gmra.mxu2 %v5308_v51  ;;  %v3715_v51 = vor.u32 %v4317_v49, %v3712_v53  ;;  %v4048_v19 = vld [vmem:[%s4852_s29 + $0x858] sm:$0xf0]  ;;  %v3923_v14 = vor.u32 %v4369_v31, %v3920_v9  ;;  %v2518_v26 = vadd.f32 %v5832_v28, %v2505_v57 }
 0x215   : > { %v4051_v53 = vor.u32 %v4401_v58, %v4048_v19  ;;  %v3888_v55 = vld [vmem:[%s4852_s29 + $0x718] sm:$0xf0] }
 0x216   : > { %2769 = vmatpush.bf16.msra.mxu0 %v3731_v41  ;;  %2782 = vmatpush.bf16.msra.mxu1 %v3859_v22  ;;  %v2556_v24 = vpop.f32.mrf.mxu3  ;;  %v2519_v25 = vpop.f32.mrf.mxu0  ;;  %v4301_v41 = vld [vmem:[%s4852_s29 + $0x52c] sm:$0xf]  ;;  %v3648_v22 = vld [vmem:[%s4852_s29 + $0x538] sm:$0xf0]  ;;  %v2531_v46 = vadd.f32 %v5837_v39, %v2518_v26 }
 0x217   : > { %2795 = vmatpush.bf16.msra.mxu2 %v3987_v45  ;;  %v2543_v0 = vpop.f32.mrf.mxu2  ;;  %v4333_v45 = vld [vmem:[%s4852_s29 + $0x62c] sm:$0xf]  ;;  %v2532_v49 = vpop.f32.mrf.mxu1  ;;  %v3651_v60 = vor.u32 %v4301_v41, %v3648_v22 }
 0x218   : > { %2808 = vmatpush.bf16.msra.mxu3 %v4115_v18  ;;  %v4397_v18 = vld [vmem:[%s4852_s29 + $0x82c] sm:$0xf]  ;;  %v3779_v61 = vor.u32 %v4333_v45, %v3776_v62  ;;  %v2544_v34 = vadd.f32 %v2543_v0, %v2531_v46 }
 0x219   : > { %v4035_v15 = vor.u32 %v4397_v18, %v4032_v30 }
 0x21a   : > { %2770 = vmatpush.bf16.msra.mxu0 %v3715_v51  ;;  %2783 = vmatpush.bf16.msra.mxu1 %v3843_v8  ;;  %v4297_v51 = vld [vmem:[%s4852_s29 + $0x50c] sm:$0xf]  ;;  %v3632_v8 = vld [vmem:[%s4852_s29 + $0x518] sm:$0xf0]  ;;  %v2557_v28 = vadd.f32 %v2556_v24, %v2544_v34 }
 0x21b   : > { %2796 = vmatpush.bf16.msra.mxu2 %v3971_v13  ;;  %v4329_v13 = vld [vmem:[%s4852_s29 + $0x60c] sm:$0xf]  ;;  %v3635_v48 = vor.u32 %v4297_v51, %v3632_v8 }
 0x21c   : > { %2809 = vmatpush.bf16.msra.mxu3 %v4099_v1  ;;  %v4361_v1 = vld [vmem:[%s4852_s29 + $0x70c] sm:$0xf] }
 0x21e   : > { %2771 = vmatpush.bf16.msra.mxu0 %v3699_v27  ;;  %2784 = vmatpush.bf16.msra.mxu1 %v3827_v36  ;;  %v2558_v4 = vpop.f32.mrf.mxu3  ;;  %v3763_v27 = vor.u32 %v4329_v13, %v3760_v54  ;;  %v3891_v36 = vor.u32 %v4361_v1, %v3888_v55 }
 0x21f   : > { %2797 = vmatpush.bf16.msra.mxu2 %v3955_v32  ;;  %v2545_v11 = vpop.f32.mrf.mxu2  ;;  %v4019_v32 = vor.u32 %v4393_v23, %v4016_v37 }
 0x220   : > { %2810 = vmatpush.bf16.msra.mxu3 %v4083_v40 }
 0x222   : > { %2772 = vmatpush.bf16.msra.mxu0 %v3683_v59  ;;  %2785 = vmatpush.bf16.msra.mxu1 %v3811_v56 }
 0x223   : > { %2798 = vmatpush.bf16.msra.mxu2 %v3939_v63 }
 0x224   : > { %2811 = vmatpush.bf16.msra.mxu3 %v4067_v20 }
 0x226   : > { %2773 = vmatpush.bf16.msra.mxu0 %v3667_v21  ;;  %2786 = vmatpush.bf16.msra.mxu1 %v3795_v29  ;;  %v581_v29 = vld [vmem:[#allocation3 + $0x18] sm:$0xff] }
 0x227   : > { %2799 = vmatpush.bf16.msra.mxu2 %v3923_v14 }
 0x228   : > { %2812 = vmatpush.bf16.msra.mxu3 %v4051_v53 }
 0x22a   : > { %2774 = vmatpush.bf16.msra.mxu0 %v3651_v60  ;;  %2787 = vmatpush.bf16.msra.mxu1 %v3779_v61 }
 0x22b   : > { %2800 = vmatpush.bf16.msra.mxu2 %v3907_v12 }
 0x22c   : > { %2813 = vmatpush.bf16.msra.mxu3 %v4035_v15 }
 0x22e   : > { %2775 = vmatpush.bf16.msra.mxu0 %v3635_v48  ;;  %2788 = vmatpush.bf16.msra.mxu1 %v3763_v27  ;;  %v2569_v38 = vpop.f32.mrf.mxu0  ;;  %v2582_v42 = vpop.f32.mrf.mxu1  ;;  %v582_v27 = vld [vmem:[#allocation3 + $0x8] sm:$0xff] }
 0x22f   : > { %2801 = vmatpush.bf16.msra.mxu2 %v3891_v36  ;;  %v2570_v40 = vadd.f32 %v2569_v38, %v2557_v28 }
 0x230   : > { %2814 = vmatpush.bf16.msra.mxu3 %v4019_v32 }
 0x231   : > { %2776 = vmatmul.bf16.vlgmr.msra.gmra.mxu0 %v5369_v6  ;;  %2789 = vmatmul.bf16.vlgmr.msra.gmra.mxu1 %v5361_v16  ;;  %v2583_v44 = vadd.f32 %v2582_v42, %v2570_v40 }
 0x232   : > { %2802 = vmatmul.bf16.vlgmr.msra.gmra.mxu2 %v5367_v2 }
 0x233   : > { %2815 = vmatmul.bf16.vlgmr.msra.gmra.mxu3 %v5435_v35  ;;  %v2821_v39 = vadd.f32 %v2583_v44, %v580_v17 }
 0x235   : > { %2825 = vst [vmem:[#allocation3] sm:$0xff] %v2821_v39 }
 0x236   : > { %v2608_v52 = vpop.f32.mrf.mxu3  ;;  %v2571_v59 = vpop.f32.mrf.mxu0 }
 0x237   : > { %v2595_v47 = vpop.f32.mrf.mxu2  ;;  %v2584_v56 = vpop.f32.mrf.mxu1 }
 0x238   : > { %v2609_v0 = vadd.f32 %v2608_v52, %v2595_v47 }
 0x23e   : > { %v2610_v63 = vpop.f32.mrf.mxu3 }
 0x23f   : > { %v2597_v6 = vpop.f32.mrf.mxu2 }
 0x24e   : > { %v2621_v3 = vpop.f32.mrf.mxu0  ;;  %v2634_v16 = vpop.f32.mrf.mxu1 }
 0x24f   : > { %v2622_v31 = vadd.f32 %v2621_v3, %v2609_v0 }
 0x251   : > { %v2635_v9 = vadd.f32 %v2634_v16, %v2622_v31 }
 0x256   : > { %v2660_v2 = vpop.f32.mrf.mxu3  ;;  %v2623_v10 = vpop.f32.mrf.mxu0 }
 0x257   : > { %v2647_v7 = vpop.f32.mrf.mxu2  ;;  %v2636_v35 = vpop.f32.mrf.mxu1 }
 0x258   : > { %v2648_v24 = vadd.f32 %v2647_v7, %v2635_v9 }
 0x25a   : > { %v2661_v58 = vadd.f32 %v2660_v2, %v2648_v24 }
 0x25e   : > { %v2662_v5 = vpop.f32.mrf.mxu3 }
 0x25f   : > { %v2649_v20 = vpop.f32.mrf.mxu2 }
 0x26e   : > { %v2673_v19 = vpop.f32.mrf.mxu0  ;;  %v2686_v50 = vpop.f32.mrf.mxu1 }
 0x26f   : > { %v2674_v21 = vadd.f32 %v2673_v19, %v2661_v58 }
 0x271   : > { %v2687_v25 = vadd.f32 %v2686_v50, %v2674_v21 }
 0x276   : > { %v2712_v22 = vpop.f32.mrf.mxu3  ;;  %v2675_v45 = vpop.f32.mrf.mxu0 }
 0x277   : > { %v2699_v14 = vpop.f32.mrf.mxu2  ;;  %v2688_v49 = vpop.f32.mrf.mxu1 }
 0x278   : > { %v2700_v41 = vadd.f32 %v2699_v14, %v2687_v25 }
 0x27a   : > { %v2822_v53 = vadd.f32 %v2700_v41, %v581_v29 }
 0x27c   : > { %2826 = vst [vmem:[#allocation3 + $0x18] sm:$0xff] %v2822_v53 }
 0x27e   : > { %v2714_v33 = vpop.f32.mrf.mxu3 }
 0x27f   : > { %v2701_v62 = vpop.f32.mrf.mxu2 }
 0x28e   : > { %v2725_v43 = vpop.f32.mrf.mxu0  ;;  %v2738_v18 = vpop.f32.mrf.mxu1 }
 0x28f   : > { %v2726_v8 = vadd.f32 %v2725_v43, %v2712_v22 }
 0x291   : > { %v2739_v13 = vadd.f32 %v2738_v18, %v2726_v8 }
 0x296   : > { %v2764_v57 = vpop.f32.mrf.mxu3  ;;  %v2727_v60 = vpop.f32.mrf.mxu0 }
 0x297   : > { %v2751_v30 = vpop.f32.mrf.mxu2  ;;  %v2740_v61 = vpop.f32.mrf.mxu1 }
 0x298   : > { %v2752_v11 = vadd.f32 %v2751_v30, %v2739_v13 }
 0x29a   : > { %v2765_v15 = vadd.f32 %v2764_v57, %v2752_v11 }
 0x29e   : > { %v2766_v51 = vpop.f32.mrf.mxu3 }
 0x29f   : > { %v2753_v12 = vpop.f32.mrf.mxu2 }
 0x2ae   : > { %v2777_v54 = vpop.f32.mrf.mxu0  ;;  %v2790_v1 = vpop.f32.mrf.mxu1 }
 0x2af   : > { %v2778_v55 = vadd.f32 %v2777_v54, %v2765_v15 }
 0x2b1   : > { %v2791_v4 = vadd.f32 %v2790_v1, %v2778_v55 }
 0x2b5   : > { %v2803_v23 = vpop.f32.mrf.mxu2 }
 0x2b6   : > { %v2804_v37 = vadd.f32 %v2803_v23, %v2791_v4  ;;  %v2816_v26 = vpop.f32.mrf.mxu3  ;;  %v2779_v48 = vpop.f32.mrf.mxu0 }
 0x2b7   : > { %v2792_v36 = vpop.f32.mrf.mxu1 }
 0x2b8   : > { %v2817_v32 = vadd.f32 %v2816_v26, %v2804_v37 }
 0x2ba   : > { %v2823_v46 = vadd.f32 %v2817_v32, %v582_v27  ;;  %2831 = sbr.rel (%p4132_p8) target bundleno = 714 (0x2ca), region = 56 }
 0x2bc   : > { %2827 = vst [vmem:[#allocation3 + $0x8] sm:$0xff] %v2823_v46 }
 0x2bd   : > { %v2805_v34 = vpop.f32.mrf.mxu2 }
 0x2be   : > { %v2818_v28 = vpop.f32.mrf.mxu3 }
 0x2bf   : > { %v2832_v38 = vld [vmem:[#allocation3 + $0x10] sm:$0xff]  ;;  %v2836_v40 = vld [vmem:[%s265_s9] sm:$0xf]  ;;  %v2834_v39 = vld [vmem:[#allocation3 + $0x18] sm:$0xff] }
 0x2c0   : > { %v2833_v42 = vld [vmem:[#allocation3] sm:$0xff]  ;;  %v2838_v17 = vperm.slane %v2836_v40, 0  ;;  %v2839_v44 = vperm.slane %v2836_v40, 1  ;;  %v2840_v47 = vperm.slane %v2836_v40, 2  ;;  %v2841_v59 = vperm.slane %v2836_v40, 3 }
 0x2c2   : > { %v2846_v56 = vadd.f32 %v2838_v17, %v2832_v38  ;;  %v2847_v6 = vadd.f32 %v2839_v44, %v2833_v42  ;;  %v2848_v63 = vadd.f32 %v2840_v47, %v2834_v39 }
 0x2c3   : > { %v2835_v52 = vld [vmem:[#allocation3 + $0x8] sm:$0xff] }
 0x2c4   : > { %v2849_v3 = vadd.f32 %v2841_v59, %v2835_v52  ;;  %v2850_v16 = vmax.f32 %v2846_v56, 0.0  ;;  %v2851_v7 = vmax.f32 %v2847_v6, 0.0  ;;  %v2852_v2 = vmax.f32 %v2848_v63, 0.0 }
 0x2c6   : > { %v2853_v10 = vmax.f32 %v2849_v3, 0.0  ;;  %2854 = vst [vmem:[%s4870_s10] sm:$0xff] %v2850_v16 }
 0x2c7   : > { %2855 = vst [vmem:[%s4870_s10 + $0x8] sm:$0xff] %v2851_v7 }
 0x2c8   : > { %2856 = vst [vmem:[%s4870_s10 + $0x10] sm:$0xff] %v2852_v2 }
 0x2c9   : > { %2857 = vst [vmem:[%s4870_s10 + $0x18] sm:$0xff] %v2853_v10 }
 0x2ca PF: > { %s21_s28 = sadd.s32 1, %s4686_s28   ;;  %s5956_s29 = sld [smem:[#allocation10_spill]] }
 0x2cb   : > { %p18_p9 = scmp.ge.s32.totalorder %s21_s28, 6   ;;  %s5957_s17 = sld [smem:[#allocation11_spill]] }
 0x2cc   : > { %s5958_s18 = smov %s4650_s19  ;;  %s5959_s19 = smov %s4654_s20 }
 0x2cd   : > { %s5960_s20 = smov %s4828_s14  ;;  %s5961_s21 = smov %s4662_s22 }
 0x2ce   : > { %s5962_s22 = smov %s4666_s23  ;;  %s5963_s23 = smov %s4833_s15 }
 0x2cf   : > { %s5964_s24 = smov %s4678_s26  ;;  %s5965_s25 = smov %s4682_s27 }
 0x2d0   : > { %s5966_s26 = smov %s5956_s29  ;;  %20 = sbr.rel (!%p18_p9) target bundleno = 13 (0xd), region = 102 }
 0x2d1   : > { %s5967_s27 = smov %s5957_s17 }
 0x2d5   :  { %2880 = vsyncpa [#allocation5], 1 }
 0x2d6   :  { %2882 = vsyncpa [#allocation5 + $0x1], 1 }
 0x2d7   :  { %2883 = vsyncpa [#allocation7], 1 }
 0x2d8   :  { %2885 = vsyncpa [#allocation7 + $0x1], 1 }

// kernel: ffn_forward.8
= control target key start
LH: loop header
LB: loop body
LE: loop exit
PB: predicated region body
PF: predicated region fallthrough
CT: control target
= control target key end

     0   :  { %10 = vsyncpa [#allocation5], 0  ;;  %s1683_s0 = inlined_call_operand.vmem [shape: f32[8,512], index: 0, kind: input, shape index: {}]   ;;  %s1684_s1 = inlined_call_operand.hbm [shape: f32[1,512], index: 1, kind: input, shape index: {}]   ;;  %s1685_s2 = inlined_call_operand.hbm [shape: f32[1,512], index: 2, kind: input, shape index: {}]   ;;  %s1686_s3 = inlined_call_operand.hbm [shape: bf16[512,384], index: 3, kind: input, shape index: {}]   ;;  %s1687_s4 = inlined_call_operand.vmem [shape: f32[1,384], index: 4, kind: input, shape index: {}]   ;;  %s1688_s5 = inlined_call_operand.vmem [shape: f32[8,384], index: 5, kind: output, shape index: {}]  }
   0x1   :  { %11 = vsyncpa [#allocation7], 0  ;;  %s30_s20 = sshll.u32 %s1685_s2, 4  ;;  %s1563_s21 = smov [#allocation6]   ;;  %s31_s20 = int_to_ptr.hbm [resolvable:$true] %s30_s20 }
   0x2   :  { %s32_s22 = sshll.u32 %s1563_s21, 4  ;;  %s19_s25 = sshll.u32 %s1684_s1, 4  ;;  %s33_s22 = int_to_ptr.vmem [resolvable:$true] %s32_s22  ;;  %s20_s25 = int_to_ptr.hbm [resolvable:$true] %s19_s25 }
   0x3   :  { %35 = dma.hbm_to_vmem [thread:$0]  %s31_s20, 64, %s33_s22, [#allocation7]  }
   0x4   :  { %s1564_s26 = smov [#allocation4]   ;;  %s40_s30 = sshll.u32 %s1686_s3, 4  ;;  %s41_s30 = int_to_ptr.hbm [resolvable:$true] %s40_s30 }
   0x5   :  { %s21_s27 = sshll.u32 %s1564_s26, 4  ;;  %s1565_s2 = smov [#allocation8]   ;;  %s22_s27 = int_to_ptr.vmem [resolvable:$true] %s21_s27 }
   0x6   :  { %24 = dma.hbm_to_vmem [thread:$0]  %s20_s25, 64, %s22_s27, [#allocation5]  }
   0x7   :  { %s42_s6 = sshll.u32 %s1565_s2, 4  ;;  %s1566_s7 = smov 192   ;;  %s43_s6 = int_to_ptr.vmem [resolvable:$true] %s42_s6 }
   0x8   :  { %s1567_s8 = smov 12  }
   0x9   :  { %48 = dma.hbm_to_vmem [thread:$0]  %s41_s30, 12288, %s43_s6, [#allocation7], %s1566_s7, %s1566_s7, %s1567_s8  }
   0xa   :  { %1559 = dma.done.wait [#allocation5], 64  }
   0xb   :  { %1560 = vsyncadd [#allocation5], 4294967232 }
   0xc   :  { %1561 = dma.done.wait [#allocation7], 12352  }
   0xd   :  { %1562 = vsyncadd [#allocation7], 4294954944  ;;  %v1610_v0 = vld [vmem:[%s1683_s0] sm:$0xff]  ;;  %v1615_v1 = vld [vmem:[%s1683_s0 + $0x8] sm:$0xff] }
   0xe   :  { %v1620_v2 = vld [vmem:[%s1683_s0 + $0x10] sm:$0xff]  ;;  %v1625_v3 = vld [vmem:[%s1683_s0 + $0x18] sm:$0xff]  ;;  %v73_v4 = vadd.f32 %v1615_v1, %v1610_v0  ;;  %v79_v5 = vmul.f32 %v1610_v0, %v1610_v0  ;;  %v80_v6 = vmul.f32 %v1615_v1, %v1615_v1  ;;  %v1403_v23 = vld [vmem:[#allocation8 + $0x98] sm:$0xf0] }
   0xf   :  { %v1086_v7 = vld [vmem:[#allocation8 + $0xa8] sm:$0xf]  ;;  %v1406_v8 = vld [vmem:[#allocation8 + $0xb0] sm:$0xf0]  ;;  %v81_v14 = vmul.f32 %v1620_v2, %v1620_v2  ;;  %v1074_v22 = vld [vmem:[#allocation8 + $0x90] sm:$0xf]  ;;  %v82_v35 = vmul.f32 %v1625_v3, %v1625_v3 }
  0x10   :  { %v1087_v9 = vor.u32 %v1406_v8, %v1086_v7  ;;  %v1182_v10 = vld [vmem:[#allocation8 + $0x168] sm:$0xf]  ;;  %v1430_v11 = vld [vmem:[#allocation8 + $0x170] sm:$0xf0]  ;;  %v74_v13 = vadd.f32 %v73_v4, %v1620_v2  ;;  %v83_v15 = vadd.f32 %v80_v6, %v79_v5  ;;  %v1170_v24 = vld [vmem:[#allocation8 + $0x150] sm:$0xf]  ;;  %v1075_v26 = vor.u32 %v1403_v23, %v1074_v22 }
  0x11   :  { %v1278_v12 = vld [vmem:[#allocation8 + $0x228] sm:$0xf]  ;;  %v1183_v16 = vor.u32 %v1430_v11, %v1182_v10  ;;  %v1454_v17 = vld [vmem:[#allocation8 + $0x230] sm:$0xf0]  ;;  %v1427_v27 = vld [vmem:[#allocation8 + $0x158] sm:$0xf0] }
  0x12   :  { %v1374_v18 = vld [vmem:[#allocation8 + $0x2e8] sm:$0xf]  ;;  %v1478_v19 = vld [vmem:[#allocation8 + $0x2f0] sm:$0xf0]  ;;  %807 = vmatpush.bf16.msra.mxu0 %v1087_v9  ;;  %v1279_v20 = vor.u32 %v1454_v17, %v1278_v12  ;;  %v75_v25 = vadd.f32 %v74_v13, %v1625_v3  ;;  %v1266_v28 = vld [vmem:[#allocation8 + $0x210] sm:$0xf]  ;;  %v1171_v30 = vor.u32 %v1427_v27, %v1170_v24  ;;  %v84_v36 = vadd.f32 %v83_v15, %v81_v14 }
  0x13   :  { %v1375_v21 = vor.u32 %v1478_v19, %v1374_v18  ;;  %820 = vmatpush.bf16.msra.mxu1 %v1183_v16  ;;  %v1451_v29 = vld [vmem:[#allocation8 + $0x218] sm:$0xf0]  ;;  %v1362_v32 = vld [vmem:[#allocation8 + $0x2d0] sm:$0xf]  ;;  %v1062_v34 = vld [vmem:[#allocation8 + $0x78] sm:$0xf] }
  0x14   :  { %833 = vmatpush.bf16.msra.mxu2 %v1279_v20  ;;  %v1267_v31 = vor.u32 %v1451_v29, %v1266_v28  ;;  %v1475_v33 = vld [vmem:[#allocation8 + $0x2d8] sm:$0xf0]  ;;  %76 = vadd.xlane.f32.xlu0 %v75_v25  ;;  %v1400_v38 = vld [vmem:[#allocation8 + $0x80] sm:$0xf0]  ;;  %v1158_v39 = vld [vmem:[#allocation8 + $0x138] sm:$0xf]  ;;  %v85_v54 = vadd.f32 %v84_v36, %v82_v35 }
  0x15   :  { %846 = vmatpush.bf16.msra.mxu3 %v1375_v21  ;;  %v1363_v37 = vor.u32 %v1475_v33, %v1362_v32  ;;  %v1424_v40 = vld [vmem:[#allocation8 + $0x140] sm:$0xf0]  ;;  %v1063_v41 = vor.u32 %v1400_v38, %v1062_v34  ;;  %v1254_v42 = vld [vmem:[#allocation8 + $0x1f8] sm:$0xf]  ;;  %v1050_v47 = vld [vmem:[#allocation8 + $0x60] sm:$0xf] }
  0x16   :  { %808 = vmatpush.bf16.msra.mxu0 %v1075_v26  ;;  %v1448_v43 = vld [vmem:[#allocation8 + $0x200] sm:$0xf0]  ;;  %v1350_v44 = vld [vmem:[#allocation8 + $0x2b8] sm:$0xf]  ;;  %v1159_v45 = vor.u32 %v1424_v40, %v1158_v39  ;;  %v1397_v48 = vld [vmem:[#allocation8 + $0x68] sm:$0xf0] }
  0x17   :  { %821 = vmatpush.bf16.msra.mxu1 %v1171_v30  ;;  %v1472_v46 = vld [vmem:[#allocation8 + $0x2c0] sm:$0xf0]  ;;  %v1255_v49 = vor.u32 %v1448_v43, %v1254_v42  ;;  %v1146_v51 = vld [vmem:[#allocation8 + $0x120] sm:$0xf]  ;;  %v1421_v52 = vld [vmem:[#allocation8 + $0x128] sm:$0xf0]  ;;  %v1051_v58 = vor.u32 %v1397_v48, %v1050_v47 }
  0x18   :  { %834 = vmatpush.bf16.msra.mxu2 %v1267_v31  ;;  %v1351_v50 = vor.u32 %v1472_v46, %v1350_v44  ;;  %v1242_v53 = vld [vmem:[#allocation8 + $0x1e0] sm:$0xf]  ;;  %v1445_v55 = vld [vmem:[#allocation8 + $0x1e8] sm:$0xf0]  ;;  %v1147_v59 = vor.u32 %v1421_v52, %v1146_v51  ;;  %v1038_v62 = vld [vmem:[#allocation8 + $0x48] sm:$0xf] }
  0x19   :  { %847 = vmatpush.bf16.msra.mxu3 %v1363_v37  ;;  %v1338_v56 = vld [vmem:[#allocation8 + $0x2a0] sm:$0xf]  ;;  %v1469_v57 = vld [vmem:[#allocation8 + $0x2a8] sm:$0xf0]  ;;  %v1243_v60 = vor.u32 %v1445_v55, %v1242_v53  ;;  %v1394_v63 = vld [vmem:[#allocation8 + $0x50] sm:$0xf0] }
  0x1a   :  { %809 = vmatpush.bf16.msra.mxu0 %v1063_v41  ;;  %v1339_v61 = vor.u32 %v1469_v57, %v1338_v56  ;;  %v1134_v4 = vld [vmem:[#allocation8 + $0x108] sm:$0xf]  ;;  %v1039_v5 = vor.u32 %v1394_v63, %v1038_v62  ;;  %v1418_v6 = vld [vmem:[#allocation8 + $0x110] sm:$0xf0]  ;;  %v1026_v13 = vld [vmem:[#allocation8 + $0x30] sm:$0xf] }
  0x1b   :  { %822 = vmatpush.bf16.msra.mxu1 %v1159_v45  ;;  %v1230_v7 = vld [vmem:[#allocation8 + $0x1c8] sm:$0xf]  ;;  %v1442_v8 = vld [vmem:[#allocation8 + $0x1d0] sm:$0xf0]  ;;  %v1135_v9 = vor.u32 %v1418_v6, %v1134_v4  ;;  %v1391_v15 = vld [vmem:[#allocation8 + $0x38] sm:$0xf0] }
  0x1c   :  { %835 = vmatpush.bf16.msra.mxu2 %v1255_v49  ;;  %86 = vadd.xlane.f32.xlu0 %v85_v54  ;;  %v1231_v10 = vor.u32 %v1442_v8, %v1230_v7  ;;  %v1326_v11 = vld [vmem:[#allocation8 + $0x288] sm:$0xf]  ;;  %v1466_v12 = vld [vmem:[#allocation8 + $0x290] sm:$0xf0]  ;;  %v1122_v16 = vld [vmem:[#allocation8 + $0xf0] sm:$0xf]  ;;  %v1027_v18 = vor.u32 %v1391_v15, %v1026_v13 }
  0x1d   :  { %848 = vmatpush.bf16.msra.mxu3 %v1351_v50  ;;  %v1327_v14 = vor.u32 %v1466_v12, %v1326_v11  ;;  %v1415_v17 = vld [vmem:[#allocation8 + $0xf8] sm:$0xf0]  ;;  %v1218_v20 = vld [vmem:[#allocation8 + $0x1b0] sm:$0xf]  ;;  %v1014_v26 = vld [vmem:[#allocation8 + $0x18] sm:$0xf] }
  0x1e   :  { %810 = vmatpush.bf16.msra.mxu0 %v1051_v58  ;;  %v1123_v19 = vor.u32 %v1415_v17, %v1122_v16  ;;  %v1439_v21 = vld [vmem:[#allocation8 + $0x1b8] sm:$0xf0]  ;;  %v1314_v22 = vld [vmem:[#allocation8 + $0x270] sm:$0xf]  ;;  %v1388_v27 = vld [vmem:[#allocation8 + $0x20] sm:$0xf0] }
  0x1f   :  { %823 = vmatpush.bf16.msra.mxu1 %v1147_v59  ;;  %v1219_v23 = vor.u32 %v1439_v21, %v1218_v20  ;;  %v1463_v24 = vld [vmem:[#allocation8 + $0x278] sm:$0xf0]  ;;  %v1110_v28 = vld [vmem:[#allocation8 + $0xd8] sm:$0xf]  ;;  %v1015_v29 = vor.u32 %v1388_v27, %v1014_v26  ;;  %v1412_v30 = vld [vmem:[#allocation8 + $0xe0] sm:$0xf0] }
  0x20   :  { %836 = vmatpush.bf16.msra.mxu2 %v1243_v60  ;;  %v1315_v25 = vor.u32 %v1463_v24, %v1314_v22  ;;  %v1206_v31 = vld [vmem:[#allocation8 + $0x198] sm:$0xf]  ;;  %v1436_v32 = vld [vmem:[#allocation8 + $0x1a0] sm:$0xf0]  ;;  %v1111_v33 = vor.u32 %v1412_v30, %v1110_v28  ;;  %v1002_v38 = vld [vmem:[#allocation8] sm:$0xf] }
  0x21   :  { %849 = vmatpush.bf16.msra.mxu3 %v1339_v61  ;;  %v1207_v34 = vor.u32 %v1436_v32, %v1206_v31  ;;  %v1302_v35 = vld [vmem:[#allocation8 + $0x258] sm:$0xf]  ;;  %v1460_v36 = vld [vmem:[#allocation8 + $0x260] sm:$0xf0]  ;;  %v1385_v39 = vld [vmem:[#allocation8 + $0x8] sm:$0xf0] }
  0x22   :  { %811 = vmatpush.bf16.msra.mxu0 %v1039_v5  ;;  %v1303_v37 = vor.u32 %v1460_v36, %v1302_v35  ;;  %v1098_v40 = vld [vmem:[#allocation8 + $0xc0] sm:$0xf]  ;;  %v1003_v41 = vor.u32 %v1385_v39, %v1002_v38  ;;  %v1409_v42 = vld [vmem:[#allocation8 + $0xc8] sm:$0xf0]  ;;  %v1088_v51 = vld [vmem:[#allocation8 + $0xb4] sm:$0xf0] }
  0x23   :  { %824 = vmatpush.bf16.msra.mxu1 %v1135_v9  ;;  %v1194_v43 = vld [vmem:[#allocation8 + $0x180] sm:$0xf]  ;;  %v1433_v44 = vld [vmem:[#allocation8 + $0x188] sm:$0xf0]  ;;  %v1099_v45 = vor.u32 %v1409_v42, %v1098_v40  ;;  %v1184_v53 = vld [vmem:[#allocation8 + $0x174] sm:$0xf0] }
  0x24   :  { %837 = vmatpush.bf16.msra.mxu2 %v1231_v10  ;;  %v1195_v46 = vor.u32 %v1433_v44, %v1194_v43  ;;  %v1290_v47 = vld [vmem:[#allocation8 + $0x240] sm:$0xf]  ;;  %v1457_v48 = vld [vmem:[#allocation8 + $0x248] sm:$0xf0]  ;;  %v1280_v57 = vld [vmem:[#allocation8 + $0x234] sm:$0xf0] }
  0x25   :  { %850 = vmatpush.bf16.msra.mxu3 %v1327_v14  ;;  %v1405_v49 = vld [vmem:[#allocation8 + $0xac] sm:$0xf]  ;;  %v1291_v50 = vor.u32 %v1457_v48, %v1290_v47  ;;  %v1376_v60 = vld [vmem:[#allocation8 + $0x2f4] sm:$0xf0]  ;;  %v1402_v61 = vld [vmem:[#allocation8 + $0x94] sm:$0xf] }
  0x26   :  { %812 = vmatpush.bf16.msra.mxu0 %v1027_v18  ;;  %v1429_v52 = vld [vmem:[#allocation8 + $0x16c] sm:$0xf]  ;;  %v1091_v54 = vor.u32 %v1405_v49, %v1088_v51  ;;  %v1076_v62 = vld [vmem:[#allocation8 + $0x9c] sm:$0xf0]  ;;  %v1426_v5 = vld [vmem:[#allocation8 + $0x154] sm:$0xf] }
  0x27   :  { %825 = vmatpush.bf16.msra.mxu1 %v1123_v19  ;;  %v1187_v55 = vor.u32 %v1429_v52, %v1184_v53  ;;  %v1453_v56 = vld [vmem:[#allocation8 + $0x22c] sm:$0xf]  ;;  %v1079_v4 = vor.u32 %v1402_v61, %v1076_v62  ;;  %v1172_v6 = vld [vmem:[#allocation8 + $0x15c] sm:$0xf0]  ;;  %v1450_v7 = vld [vmem:[#allocation8 + $0x214] sm:$0xf] }
  0x28   :  { %838 = vmatpush.bf16.msra.mxu2 %v1219_v23  ;;  %v1477_v58 = vld [vmem:[#allocation8 + $0x2ec] sm:$0xf]  ;;  %v1283_v59 = vor.u32 %v1453_v56, %v1280_v57  ;;  %v1175_v8 = vor.u32 %v1426_v5, %v1172_v6  ;;  %v1268_v9 = vld [vmem:[#allocation8 + $0x21c] sm:$0xf0]  ;;  %v1474_v10 = vld [vmem:[#allocation8 + $0x2d4] sm:$0xf] }
  0x29   :  { %851 = vmatpush.bf16.msra.mxu3 %v1315_v25  ;;  %v1379_v63 = vor.u32 %v1477_v58, %v1376_v60  ;;  %v1364_v11 = vld [vmem:[#allocation8 + $0x2dc] sm:$0xf0]  ;;  %v1271_v12 = vor.u32 %v1450_v7, %v1268_v9  ;;  %v1399_v14 = vld [vmem:[#allocation8 + $0x7c] sm:$0xf]  ;;  %v1064_v15 = vld [vmem:[#allocation8 + $0x84] sm:$0xf0] }
  0x2a   :  { %813 = vmatpush.bf16.msra.mxu0 %v1015_v29  ;;  %v1367_v13 = vor.u32 %v1474_v10, %v1364_v11  ;;  %v1423_v16 = vld [vmem:[#allocation8 + $0x13c] sm:$0xf]  ;;  %v1067_v17 = vor.u32 %v1399_v14, %v1064_v15  ;;  %v1160_v18 = vld [vmem:[#allocation8 + $0x144] sm:$0xf0]  ;;  %v1396_v26 = vld [vmem:[#allocation8 + $0x64] sm:$0xf] }
  0x2b   :  { %826 = vmatpush.bf16.msra.mxu1 %v1111_v33  ;;  %v1447_v19 = vld [vmem:[#allocation8 + $0x1fc] sm:$0xf]  ;;  %v1256_v20 = vld [vmem:[#allocation8 + $0x204] sm:$0xf0]  ;;  %v1163_v21 = vor.u32 %v1423_v16, %v1160_v18  ;;  %v1052_v27 = vld [vmem:[#allocation8 + $0x6c] sm:$0xf0] }
  0x2c   :  { %839 = vmatpush.bf16.msra.mxu2 %v1207_v34  ;;  %v1259_v22 = vor.u32 %v1447_v19, %v1256_v20  ;;  %v1471_v23 = vld [vmem:[#allocation8 + $0x2bc] sm:$0xf]  ;;  %v1352_v24 = vld [vmem:[#allocation8 + $0x2c4] sm:$0xf0]  ;;  %v1420_v28 = vld [vmem:[#allocation8 + $0x124] sm:$0xf]  ;;  %v1055_v29 = vor.u32 %v1396_v26, %v1052_v27 }
  0x2d   :  { %852 = vmatpush.bf16.msra.mxu3 %v1303_v37  ;;  %v1355_v25 = vor.u32 %v1471_v23, %v1352_v24  ;;  %v1148_v30 = vld [vmem:[#allocation8 + $0x12c] sm:$0xf0]  ;;  %v1444_v31 = vld [vmem:[#allocation8 + $0x1e4] sm:$0xf]  ;;  %v1393_v38 = vld [vmem:[#allocation8 + $0x4c] sm:$0xf] }
  0x2e   :  { %814 = vmatpush.bf16.msra.mxu0 %v1003_v41  ;;  %v1244_v32 = vld [vmem:[#allocation8 + $0x1ec] sm:$0xf0]  ;;  %v1151_v33 = vor.u32 %v1420_v28, %v1148_v30  ;;  %v1468_v35 = vld [vmem:[#allocation8 + $0x2a4] sm:$0xf]  ;;  %v1040_v39 = vld [vmem:[#allocation8 + $0x54] sm:$0xf0] }
  0x2f   :  { %827 = vmatpush.bf16.msra.mxu1 %v1099_v45  ;;  %v1247_v34 = vor.u32 %v1444_v31, %v1244_v32  ;;  %v1340_v36 = vld [vmem:[#allocation8 + $0x2ac] sm:$0xf0]  ;;  %v1417_v40 = vld [vmem:[#allocation8 + $0x10c] sm:$0xf]  ;;  %v1043_v42 = vor.u32 %v1393_v38, %v1040_v39  ;;  %v1136_v43 = vld [vmem:[#allocation8 + $0x114] sm:$0xf0] }
  0x30   :  { %840 = vmatpush.bf16.msra.mxu2 %v1195_v46  ;;  %v1343_v37 = vor.u32 %v1468_v35, %v1340_v36  ;;  %v1441_v44 = vld [vmem:[#allocation8 + $0x1cc] sm:$0xf]  ;;  %v1232_v45 = vld [vmem:[#allocation8 + $0x1d4] sm:$0xf0]  ;;  %v1139_v47 = vor.u32 %v1417_v40, %v1136_v43  ;;  %v1390_v52 = vld [vmem:[#allocation8 + $0x34] sm:$0xf] }
  0x31   :  { %853 = vmatpush.bf16.msra.mxu3 %v1291_v50  ;;  %v1235_v48 = vor.u32 %v1441_v44, %v1232_v45  ;;  %v1465_v49 = vld [vmem:[#allocation8 + $0x28c] sm:$0xf]  ;;  %v1328_v50 = vld [vmem:[#allocation8 + $0x294] sm:$0xf0]  ;;  %v1028_v53 = vld [vmem:[#allocation8 + $0x3c] sm:$0xf0] }
  0x32   :  { %859 = vmatpush.bf16.msrb.mxu0 %v1091_v54  ;;  %v1331_v51 = vor.u32 %v1465_v49, %v1328_v50  ;;  %v1414_v54 = vld [vmem:[#allocation8 + $0xf4] sm:$0xf]  ;;  %v1220_v57 = vld [vmem:[#allocation8 + $0x1bc] sm:$0xf0]  ;;  %v1031_v58 = vor.u32 %v1390_v52, %v1028_v53  ;;  %v1387_v62 = vld [vmem:[#allocation8 + $0x1c] sm:$0xf] }
  0x33   :  { %872 = vmatpush.bf16.msrb.mxu1 %v1187_v55  ;;  %v1124_v55 = vld [vmem:[#allocation8 + $0xfc] sm:$0xf0]  ;;  %v1438_v56 = vld [vmem:[#allocation8 + $0x1b4] sm:$0xf]  ;;  %v1411_v5 = vld [vmem:[#allocation8 + $0xdc] sm:$0xf] }
  0x34   :  { %885 = vmatpush.bf16.msrb.mxu2 %v1283_v59  ;;  %v1127_v59 = vor.u32 %v1414_v54, %v1124_v55  ;;  %v1462_v60 = vld [vmem:[#allocation8 + $0x274] sm:$0xf]  ;;  %v1316_v61 = vld [vmem:[#allocation8 + $0x27c] sm:$0xf0]  ;;  %v1112_v6 = vld [vmem:[#allocation8 + $0xe4] sm:$0xf0] }
  0x35   :  { %898 = vmatpush.bf16.msrb.mxu3 %v1379_v63  ;;  %v1223_v63 = vor.u32 %v1438_v56, %v1220_v57  ;;  %v1319_v7 = vor.u32 %v1462_v60, %v1316_v61  ;;  %v1208_v9 = vld [vmem:[#allocation8 + $0x1a4] sm:$0xf0]  ;;  %v1459_v10 = vld [vmem:[#allocation8 + $0x25c] sm:$0xf]  ;;  %v1115_v14 = vor.u32 %v1411_v5, %v1112_v6  ;;  %v1384_v20 = vld [vmem:[#allocation8 + $0x4] sm:$0xf] }
  0x36   :  { %860 = vmatpush.bf16.msrb.mxu0 %v1079_v4  ;;  %v1016_v4 = vld [vmem:[#allocation8 + $0x24] sm:$0xf0]  ;;  %v1100_v24 = vld [vmem:[#allocation8 + $0xcc] sm:$0xf0]  ;;  %v1456_v30 = vld [vmem:[#allocation8 + $0x244] sm:$0xf] }
  0x37   :  { %873 = vmatpush.bf16.msrb.mxu1 %v1175_v8  ;;  %v1435_v8 = vld [vmem:[#allocation8 + $0x19c] sm:$0xf]  ;;  %v1304_v11 = vld [vmem:[#allocation8 + $0x264] sm:$0xf0]  ;;  %v1196_v26 = vld [vmem:[#allocation8 + $0x18c] sm:$0xf0] }
  0x38   :  { %886 = vmatpush.bf16.msrb.mxu2 %v1271_v12  ;;  %v1307_v18 = vor.u32 %v1459_v10, %v1304_v11  ;;  %v1292_v31 = vld [vmem:[#allocation8 + $0x24c] sm:$0xf0]  ;;  %v72_v39 = vld [vmem:[#allocation6] sm:$0xf] }
  0x39   :  { %899 = vmatpush.bf16.msrb.mxu3 %v1367_v13  ;;  %v1019_v13 = vor.u32 %v1387_v62, %v1016_v4  ;;  %v1295_v32 = vor.u32 %v1456_v30, %v1292_v31  ;;  %v125_v52 = vperm.slane %v72_v39, 1  ;;  %v127_v53 = vperm.slane %v72_v39, 3  ;;  %v1094_v62 = vld [vmem:[#allocation8 + $0xb0] sm:$0xf]  ;;  %v1407_v5 = vld [vmem:[#allocation8 + $0xb8] sm:$0xf0] }
  0x3a   :  { %861 = vmatpush.bf16.msrb.mxu0 %v1067_v17  ;;  %v1211_v17 = vor.u32 %v1435_v8, %v1208_v9  ;;  %v1190_v6 = vld [vmem:[#allocation8 + $0x170] sm:$0xf]  ;;  %v1370_v30 = vld [vmem:[#allocation8 + $0x2d8] sm:$0xf]  ;;  %v1476_v31 = vld [vmem:[#allocation8 + $0x2e0] sm:$0xf0] }
  0x3b   :  { %874 = vmatpush.bf16.msrb.mxu1 %v1163_v21  ;;  %v1004_v21 = vld [vmem:[#allocation8 + $0xc] sm:$0xf0] }
  0x3c   :  { %887 = vmatpush.bf16.msrb.mxu2 %v1259_v22  ;;  %v1408_v22 = vld [vmem:[#allocation8 + $0xc4] sm:$0xf]  ;;  %v1007_v23 = vor.u32 %v1384_v20, %v1004_v21  ;;  %v1286_v8 = vld [vmem:[#allocation8 + $0x230] sm:$0xf] }
  0x3d   :  { %900 = vmatpush.bf16.msrb.mxu3 %v1355_v25  ;;  %v1432_v25 = vld [vmem:[#allocation8 + $0x184] sm:$0xf]  ;;  %v1103_v28 = vor.u32 %v1408_v22, %v1100_v24  ;;  %v1082_v22 = vld [vmem:[#allocation8 + $0x98] sm:$0xf] }
  0x3e   :  { %862 = vmatpush.bf16.msrb.mxu0 %v1055_v29  ;;  %v1199_v29 = vor.u32 %v1432_v25, %v1196_v26  ;;  %v1178_v26 = vld [vmem:[#allocation8 + $0x158] sm:$0xf] }
  0x3f   :  { %875 = vmatpush.bf16.msrb.mxu1 %v1151_v33 }
  0x40   :  { %888 = vmatpush.bf16.msrb.mxu2 %v1247_v34 }
  0x41   :  { %901 = vmatpush.bf16.msrb.mxu3 %v1343_v37  ;;  %v71_v37 = vld [vmem:[#allocation4] sm:$0xf] }
  0x42   :  { %863 = vmatpush.bf16.msrb.mxu0 %v1043_v42  ;;  %v111_v45 = vperm.slane %v71_v37, 0  ;;  %v113_v49 = vperm.slane %v71_v37, 2  ;;  %v114_v50 = vperm.slane %v71_v37, 3 }
  0x43   :  { %876 = vmatpush.bf16.msrb.mxu1 %v1139_v47  ;;  %v112_v47 = vperm.slane %v71_v37, 1  ;;  %v1371_v37 = vor.u32 %v1476_v31, %v1370_v30  ;;  %v1310_v30 = vld [vmem:[#allocation8 + $0x260] sm:$0xf]  ;;  %v1461_v31 = vld [vmem:[#allocation8 + $0x268] sm:$0xf0] }
  0x44   :  { %889 = vmatpush.bf16.msrb.mxu2 %v1235_v48  ;;  %v124_v48 = vperm.slane %v72_v39, 0 }
  0x45   :  { %902 = vmatpush.bf16.msrb.mxu3 %v1331_v51 }
  0x46   :  { %864 = vmatpush.bf16.msrb.mxu0 %v1031_v58 }
  0x47   :  { %877 = vmatpush.bf16.msrb.mxu1 %v1127_v59 }
  0x48   :  { %890 = vmatpush.bf16.msrb.mxu2 %v1223_v63 }
  0x49   :  { %903 = vmatpush.bf16.msrb.mxu3 %v1319_v7  ;;  %v1431_v7 = vld [vmem:[#allocation8 + $0x178] sm:$0xf0] }
  0x4a   :  { %865 = vmatpush.bf16.msrb.mxu0 %v1019_v13  ;;  %v1455_v13 = vld [vmem:[#allocation8 + $0x238] sm:$0xf0] }
  0x4b   :  { %878 = vmatpush.bf16.msrb.mxu1 %v1115_v14  ;;  %v1382_v14 = vld [vmem:[#allocation8 + $0x2f0] sm:$0xf]  ;;  %v1287_v24 = vor.u32 %v1455_v13, %v1286_v8  ;;  %v1440_v13 = vld [vmem:[#allocation8 + $0x1c0] sm:$0xf0] }
  0x4c   :  { %891 = vmatpush.bf16.msrb.mxu2 %v1211_v17  ;;  %v1191_v17 = vor.u32 %v1431_v7, %v1190_v6  ;;  %v1034_v6 = vld [vmem:[#allocation8 + $0x38] sm:$0xf]  ;;  %v1392_v7 = vld [vmem:[#allocation8 + $0x40] sm:$0xf0] }
  0x4d   :  { %904 = vmatpush.bf16.msrb.mxu3 %v1307_v18 }
  0x4e   :  { %866 = vmatpush.bf16.msrb.mxu0 %v1007_v23  ;;  %v1404_v23 = vld [vmem:[#allocation8 + $0xa0] sm:$0xf0] }
  0x4f   :  { %879 = vmatpush.bf16.msrb.mxu1 %v1103_v28  ;;  %v1274_v28 = vld [vmem:[#allocation8 + $0x218] sm:$0xf] }
  0x50   :  { %892 = vmatpush.bf16.msrb.mxu2 %v1199_v29  ;;  %v1452_v29 = vld [vmem:[#allocation8 + $0x220] sm:$0xf0] }
  0x51   :  { %905 = vmatpush.bf16.msrb.mxu3 %v1295_v32  ;;  %v1083_v32 = vor.u32 %v1404_v23, %v1082_v22  ;;  %v1022_v22 = vld [vmem:[#allocation8 + $0x20] sm:$0xf]  ;;  %v1389_v23 = vld [vmem:[#allocation8 + $0x28] sm:$0xf0] }
  0x87   :  { %v77_v41 = vpop.xlane.xlu0 %76 }
  0x88   :  { %v1639_v46 = vmul.f32 0.001953125, %v77_v41 }
  0x8a   :  { %v89_v15 = vmul.f32 %v1639_v46, %v1639_v46  ;;  %v91_v40 = vsub.f32 %v1610_v0, %v1639_v46  ;;  %v92_v41 = vsub.f32 %v1615_v1, %v1639_v46  ;;  %v93_v42 = vsub.f32 %v1620_v2, %v1639_v46 }
  0x8b   :  { %v94_v43 = vsub.f32 %v1625_v3, %v1639_v46  ;;  %v126_v0 = vperm.slane %v72_v39, 2  ;;  %v1425_v39 = vld [vmem:[#allocation8 + $0x148] sm:$0xf0] }
  0x8f   :  { %v87_v12 = vpop.xlane.xlu0 %86 }
  0x90   :  { %v88_v16 = vmul.f32 0.001953125, %v87_v12 }
  0x92   :  { %v90_v19 = vsub.f32 %v88_v16, %v89_v15  ;;  %v1479_v15 = vld [vmem:[#allocation8 + $0x2f8] sm:$0xf0]  ;;  %v1095_v16 = vor.u32 %v1407_v5, %v1094_v62  ;;  %v1334_v62 = vld [vmem:[#allocation8 + $0x290] sm:$0xf] }
  0x93   :  { %v1383_v25 = vor.u32 %v1479_v15, %v1382_v14  ;;  %v1322_v14 = vld [vmem:[#allocation8 + $0x278] sm:$0xf]  ;;  %v1464_v15 = vld [vmem:[#allocation8 + $0x280] sm:$0xf0] }
  0x94   :  { %v95_v27 = vadd.f32 1e-05, %v90_v19 }
  0x96   :  { %1485 = vrsqrt.f32 %v95_v27  ;;  %vm102_vm1 = vweird.f32 %v95_v27 }
  0x9c   :  { %v1486_v33 = vpop.eup %1485 }
  0x9d   :  { %v97_v34 = vmul.f32 %v1486_v33, %v95_v27  ;;  %vm103_vm0 = vweird.f32 %v1486_v33  ;;  %v1428_v27 = vld [vmem:[#allocation8 + $0x160] sm:$0xf0] }
  0x9e   :  { %vm104_vm2 = vmor %vm102_vm1, %vm103_vm0 }
  0x9f   :  { %v98_v35 = vmul.f32 %v1486_v33, %v97_v34  ;;  %v1070_v34 = vld [vmem:[#allocation8 + $0x80] sm:$0xf] }
  0xa1   :  { %v99_v36 = vmul.f32 0.5, %v98_v35  ;;  %v1401_v35 = vld [vmem:[#allocation8 + $0x88] sm:$0xf0] }
  0xa3   :  { %v100_v38 = vsub.f32 1.5, %v99_v36  ;;  %v1275_v36 = vor.u32 %v1452_v29, %v1274_v28  ;;  %v1214_v28 = vld [vmem:[#allocation8 + $0x1a0] sm:$0xf]  ;;  %v1437_v29 = vld [vmem:[#allocation8 + $0x1a8] sm:$0xf0] }
  0xa5   :  { %v101_v44 = vmul.f32 %v1486_v33, %v100_v38  ;;  %v1166_v38 = vld [vmem:[#allocation8 + $0x140] sm:$0xf] }
  0xa7   :  { %v105_v51 = vsel %vm104_vm2, %v1486_v33, %v101_v44  ;;  %v1179_v33 = vor.u32 %v1428_v27, %v1178_v26  ;;  %v1071_v44 = vor.u32 %v1401_v35, %v1070_v34  ;;  %v1118_v26 = vld [vmem:[#allocation8 + $0xe0] sm:$0xf]  ;;  %v1413_v27 = vld [vmem:[#allocation8 + $0xe8] sm:$0xf0]  ;;  %v1010_v34 = vld [vmem:[#allocation8 + $0x8] sm:$0xf] }
  0xa8   :  { %v106_v54 = vmul.f32 %v105_v51, %v91_v40  ;;  %v107_v1 = vmul.f32 %v105_v51, %v92_v41  ;;  %v108_v55 = vmul.f32 %v105_v51, %v93_v42  ;;  %v109_v56 = vmul.f32 %v105_v51, %v94_v43  ;;  %v1262_v40 = vld [vmem:[#allocation8 + $0x200] sm:$0xf]  ;;  %v1449_v41 = vld [vmem:[#allocation8 + $0x208] sm:$0xf0]  ;;  %v1154_v51 = vld [vmem:[#allocation8 + $0x128] sm:$0xf] }
  0xa9   :  { %v1358_v42 = vld [vmem:[#allocation8 + $0x2c0] sm:$0xf]  ;;  %v1473_v43 = vld [vmem:[#allocation8 + $0x2c8] sm:$0xf0]  ;;  %v1386_v35 = vld [vmem:[#allocation8 + $0x10] sm:$0xf0] }
  0xaa   :  { %v119_v2 = vmul.f32 %v111_v45, %v106_v54  ;;  %v120_v57 = vmul.f32 %v112_v47, %v107_v1  ;;  %v121_v58 = vmul.f32 %v113_v49, %v108_v55  ;;  %v122_v3 = vmul.f32 %v114_v50, %v109_v56  ;;  %v1058_v47 = vld [vmem:[#allocation8 + $0x68] sm:$0xf]  ;;  %v1470_v1 = vld [vmem:[#allocation8 + $0x2b0] sm:$0xf0] }
  0xab   :  { %v1167_v45 = vor.u32 %v1425_v39, %v1166_v38  ;;  %v1263_v49 = vor.u32 %v1449_v41, %v1262_v40  ;;  %v1359_v50 = vor.u32 %v1473_v43, %v1358_v42  ;;  %v1346_v54 = vld [vmem:[#allocation8 + $0x2a8] sm:$0xf]  ;;  %v1410_v39 = vld [vmem:[#allocation8 + $0xd0] sm:$0xf0] }
  0xac   :  { %v132_v46 = vadd.f32 %v124_v48, %v119_v2  ;;  %v133_v59 = vadd.f32 %v125_v52, %v120_v57  ;;  %v134_v60 = vadd.f32 %v126_v0, %v121_v58  ;;  %v135_v61 = vadd.f32 %v127_v53, %v122_v3  ;;  %v1398_v48 = vld [vmem:[#allocation8 + $0x70] sm:$0xf0]  ;;  %v1250_v0 = vld [vmem:[#allocation8 + $0x1e8] sm:$0xf]  ;;  %v1046_v2 = vld [vmem:[#allocation8 + $0x50] sm:$0xf] }
  0xad   :  { %v1422_v52 = vld [vmem:[#allocation8 + $0x130] sm:$0xf0]  ;;  %v1059_v55 = vor.u32 %v1398_v48, %v1058_v47  ;;  %v1395_v57 = vld [vmem:[#allocation8 + $0x58] sm:$0xf0]  ;;  %v1347_v3 = vor.u32 %v1470_v1, %v1346_v54  ;;  %v1106_v38 = vld [vmem:[#allocation8 + $0xc8] sm:$0xf] }
  0xae   :  { %v136_v63 = vpack.c.bf16 %v133_v59, %v132_v46  ;;  %v137_v4 = vpack.c.bf16 %v135_v61, %v134_v60  ;;  %v1446_v53 = vld [vmem:[#allocation8 + $0x1f0] sm:$0xf0]  ;;  %v1155_v56 = vor.u32 %v1422_v52, %v1154_v51  ;;  %v1142_v46 = vld [vmem:[#allocation8 + $0x110] sm:$0xf]  ;;  %v1419_v59 = vld [vmem:[#allocation8 + $0x118] sm:$0xf0] }
  0xaf   :  { %v1251_v58 = vor.u32 %v1446_v53, %v1250_v0  ;;  %v1238_v60 = vld [vmem:[#allocation8 + $0x1d0] sm:$0xf]  ;;  %v1443_v61 = vld [vmem:[#allocation8 + $0x1d8] sm:$0xf0]  ;;  %v1143_v5 = vor.u32 %v1419_v59, %v1142_v46  ;;  %v1202_v40 = vld [vmem:[#allocation8 + $0x188] sm:$0xf] }
  0xb0   :  { %v283_v9 = vunpack.c.l.b16 %v136_v63  ;;  %v284_v10 = vunpack.c.h.b16 %v136_v63  ;;  %v285_v11 = vunpack.c.l.b16 %v137_v4  ;;  %v286_v12 = vunpack.c.h.b16 %v137_v4  ;;  %v1467_v63 = vld [vmem:[#allocation8 + $0x298] sm:$0xf0]  ;;  %v1434_v41 = vld [vmem:[#allocation8 + $0x190] sm:$0xf0]  ;;  %v1298_v42 = vld [vmem:[#allocation8 + $0x248] sm:$0xf] }
  0xb1   :  { %v1047_v4 = vor.u32 %v1395_v57, %v1046_v2  ;;  %v1239_v8 = vor.u32 %v1443_v61, %v1238_v60  ;;  %v1458_v43 = vld [vmem:[#allocation8 + $0x250] sm:$0xf0]  ;;  %v1203_v47 = vor.u32 %v1434_v41, %v1202_v40  ;;  %v975_v51 = vld [vmem:[%s1687_s4] sm:$0x7] }
  0xb2   :  { %v1651_v18 = vpack.c.b16 %v283_v9, %v283_v9  ;;  %v1653_v19 = vpack.c.b16 %v284_v10, %v284_v10  ;;  %v1655_v20 = vpack.c.b16 %v285_v11, %v285_v11  ;;  %v1657_v21 = vpack.c.b16 %v286_v12, %v286_v12  ;;  %v1130_v10 = vld [vmem:[#allocation8 + $0xf8] sm:$0xf]  ;;  %v1416_v11 = vld [vmem:[#allocation8 + $0x100] sm:$0xf0] }
  0xb3   :  { %v1335_v9 = vor.u32 %v1467_v63, %v1334_v62  ;;  %v1226_v12 = vld [vmem:[#allocation8 + $0x1b8] sm:$0xf]  ;;  %v1299_v48 = vor.u32 %v1458_v43, %v1298_v42  ;;  %v977_v1 = vperm.slane %v975_v51, 0  ;;  %v978_v61 = vperm.slane %v975_v51, 1 }
  0xb4   :  { %815 = vmatmul.bf16.vlgmr.msra.gmra.mxu0 %v1651_v18  ;;  %828 = vmatmul.bf16.vlgmr.msra.gmra.mxu1 %v1653_v19 }
  0xb5   :  { %841 = vmatmul.bf16.vlgmr.msra.gmra.mxu2 %v1655_v20  ;;  %854 = vmatmul.bf16.vlgmr.msra.gmra.mxu3 %v1657_v21 }
  0xb6   :  { %911 = vmatpush.bf16.msra.mxu0 %v1095_v16  ;;  %924 = vmatpush.bf16.msra.mxu1 %v1191_v17  ;;  %v1035_v16 = vor.u32 %v1392_v7, %v1034_v6  ;;  %v1131_v17 = vor.u32 %v1416_v11, %v1130_v10 }
  0xb7   :  { %937 = vmatpush.bf16.msra.mxu2 %v1287_v24  ;;  %950 = vmatpush.bf16.msra.mxu3 %v1383_v25  ;;  %v1227_v24 = vor.u32 %v1440_v13, %v1226_v12  ;;  %v1323_v25 = vor.u32 %v1464_v15, %v1322_v14  ;;  %v979_v15 = vperm.slane %v975_v51, 2 }
  0xba   :  { %912 = vmatpush.bf16.msra.mxu0 %v1083_v32  ;;  %925 = vmatpush.bf16.msra.mxu1 %v1179_v33  ;;  %v1023_v32 = vor.u32 %v1389_v23, %v1022_v22  ;;  %v1119_v33 = vor.u32 %v1413_v27, %v1118_v26 }
  0xbb   :  { %938 = vmatpush.bf16.msra.mxu2 %v1275_v36  ;;  %951 = vmatpush.bf16.msra.mxu3 %v1371_v37  ;;  %v1215_v36 = vor.u32 %v1437_v29, %v1214_v28  ;;  %v1311_v37 = vor.u32 %v1461_v31, %v1310_v30 }
  0xbe   :  { %913 = vmatpush.bf16.msra.mxu0 %v1071_v44  ;;  %926 = vmatpush.bf16.msra.mxu1 %v1167_v45  ;;  %v1011_v44 = vor.u32 %v1386_v35, %v1010_v34  ;;  %v1107_v45 = vor.u32 %v1410_v39, %v1106_v38 }
  0xbf   :  { %939 = vmatpush.bf16.msra.mxu2 %v1263_v49  ;;  %952 = vmatpush.bf16.msra.mxu3 %v1359_v50 }
  0xc2   :  { %914 = vmatpush.bf16.msra.mxu0 %v1059_v55  ;;  %927 = vmatpush.bf16.msra.mxu1 %v1155_v56 }
  0xc3   :  { %940 = vmatpush.bf16.msra.mxu2 %v1251_v58  ;;  %953 = vmatpush.bf16.msra.mxu3 %v1347_v3 }
  0xc4   :  { %867 = vmatmul.bf16.vlgmr.msrb.gmra.mxu0 %v1651_v18  ;;  %880 = vmatmul.bf16.vlgmr.msrb.gmra.mxu1 %v1653_v19 }
  0xc5   :  { %893 = vmatmul.bf16.vlgmr.msrb.gmra.mxu2 %v1655_v20  ;;  %906 = vmatmul.bf16.vlgmr.msrb.gmra.mxu3 %v1657_v21 }
  0xc6   :  { %915 = vmatpush.bf16.msra.mxu0 %v1047_v4  ;;  %928 = vmatpush.bf16.msra.mxu1 %v1143_v5 }
  0xc7   :  { %941 = vmatpush.bf16.msra.mxu2 %v1239_v8  ;;  %954 = vmatpush.bf16.msra.mxu3 %v1335_v9 }
  0xca   :  { %916 = vmatpush.bf16.msra.mxu0 %v1035_v16  ;;  %929 = vmatpush.bf16.msra.mxu1 %v1131_v17 }
  0xcb   :  { %942 = vmatpush.bf16.msra.mxu2 %v1227_v24  ;;  %955 = vmatpush.bf16.msra.mxu3 %v1323_v25 }
  0xce   :  { %917 = vmatpush.bf16.msra.mxu0 %v1023_v32  ;;  %930 = vmatpush.bf16.msra.mxu1 %v1119_v33 }
  0xcf   :  { %943 = vmatpush.bf16.msra.mxu2 %v1215_v36  ;;  %956 = vmatpush.bf16.msra.mxu3 %v1311_v37 }
  0xd2   :  { %918 = vmatpush.bf16.msra.mxu0 %v1011_v44  ;;  %931 = vmatpush.bf16.msra.mxu1 %v1107_v45 }
  0xd3   :  { %944 = vmatpush.bf16.msra.mxu2 %v1203_v47  ;;  %957 = vmatpush.bf16.msra.mxu3 %v1299_v48 }
  0xd5   :  { %919 = vmatmul.bf16.vlgmr.msra.gmra.mxu0 %v1651_v18  ;;  %932 = vmatmul.bf16.vlgmr.msra.gmra.mxu1 %v1653_v19 }
  0xd6   :  { %945 = vmatmul.bf16.vlgmr.msra.gmra.mxu2 %v1655_v20  ;;  %958 = vmatmul.bf16.vlgmr.msra.gmra.mxu3 %v1657_v21 }
 0x131   :  { %v816_v49 = vpop.f32.mrf.mxu0  ;;  %v829_v50 = vpop.f32.mrf.mxu1 }
 0x132   :  { %v830_v52 = vadd.f32 %v829_v50, %v816_v49 }
 0x138   :  { %v842_v0 = vpop.f32.mrf.mxu2  ;;  %v855_v53 = vpop.f32.mrf.mxu3 }
 0x139   :  { %v843_v54 = vadd.f32 %v842_v0, %v830_v52  ;;  %v818_v55 = vpop.f32.mrf.mxu0  ;;  %v831_v56 = vpop.f32.mrf.mxu1 }
 0x13b   :  { %v856_v18 = vadd.f32 %v855_v53, %v843_v54 }
 0x13d   :  { %v983_v2 = vadd.f32 %v977_v1, %v856_v18 }
 0x13f   :  { %v986_v19 = vmax.f32 %v983_v2, 0.0 }
 0x140   :  { %v844_v57 = vpop.f32.mrf.mxu2  ;;  %v857_v20 = vpop.f32.mrf.mxu3 }
 0x141   :  { %989 = vst [vmem:[%s1688_s5] sm:$0xff] %v986_v19  ;;  %v868_v21 = vpop.f32.mrf.mxu0  ;;  %v881_v58 = vpop.f32.mrf.mxu1 }
 0x142   :  { %v882_v3 = vadd.f32 %v881_v58, %v868_v21 }
 0x148   :  { %v894_v46 = vpop.f32.mrf.mxu2  ;;  %v907_v59 = vpop.f32.mrf.mxu3 }
 0x149   :  { %v895_v60 = vadd.f32 %v894_v46, %v882_v3  ;;  %v870_v62 = vpop.f32.mrf.mxu0  ;;  %v883_v63 = vpop.f32.mrf.mxu1 }
 0x14b   :  { %v908_v4 = vadd.f32 %v907_v59, %v895_v60 }
 0x14d   :  { %v984_v5 = vadd.f32 %v978_v61, %v908_v4 }
 0x14f   :  { %v987_v6 = vmax.f32 %v984_v5, 0.0 }
 0x150   :  { %v896_v7 = vpop.f32.mrf.mxu2  ;;  %v909_v8 = vpop.f32.mrf.mxu3 }
 0x151   :  { %990 = vst [vmem:[%s1688_s5 + $0x8] sm:$0xff] %v987_v6 }
 0x152   :  { %v920_v9 = vpop.f32.mrf.mxu0  ;;  %v933_v10 = vpop.f32.mrf.mxu1 }
 0x153   :  { %v934_v11 = vadd.f32 %v933_v10, %v920_v9 }
 0x159   :  { %v946_v12 = vpop.f32.mrf.mxu2  ;;  %v959_v13 = vpop.f32.mrf.mxu3 }
 0x15a   :  { %v947_v14 = vadd.f32 %v946_v12, %v934_v11  ;;  %v922_v16 = vpop.f32.mrf.mxu0  ;;  %v935_v17 = vpop.f32.mrf.mxu1 }
 0x15c   :  { %v960_v22 = vadd.f32 %v959_v13, %v947_v14 }
 0x15e   :  { %v985_v23 = vadd.f32 %v979_v15, %v960_v22 }
 0x160   :  { %v988_v24 = vmax.f32 %v985_v23, 0.0 }
 0x161   :  { %v948_v25 = vpop.f32.mrf.mxu2  ;;  %v961_v26 = vpop.f32.mrf.mxu3 }
 0x162   :  { %991 = vst [vmem:[%s1688_s5 + $0x10] sm:$0xff] %v988_v24 }
 0x163   :  { %996 = vsyncpa [#allocation5], 1 }
 0x164   :  { %997 = vsyncpa [#allocation7], 1 }

// kernel: ffn_forward.9
= control target key start
LH: loop header
LB: loop body
LE: loop exit
PB: predicated region body
PF: predicated region fallthrough
CT: control target
= control target key end

     0   :  { %18 = vsyncpa [#allocation5], 0  ;;  %s1794_s0 = inlined_call_operand.vmem [shape: f32[8,384], index: 0, kind: input, shape index: {}]   ;;  %s1795_s1 = inlined_call_operand.vmem [shape: f32[1,384], index: 1, kind: input, shape index: {}]   ;;  %s1796_s2 = inlined_call_operand.vmem [shape: f32[1,384], index: 2, kind: input, shape index: {}]   ;;  %s1797_s3 = inlined_call_operand.hbm [shape: bf16[384,256], index: 3, kind: input, shape index: {}]   ;;  %s1798_s4 = inlined_call_operand.hbm [shape: f32[1,256], index: 4, kind: input, shape index: {}]   ;;  %s1799_s5 = inlined_call_operand.hbm [shape: f32[1,256], index: 5, kind: input, shape index: {}]   ;;  %s1800_s6 = inlined_call_operand.hbm [shape: f32[1,256], index: 6, kind: input, shape index: {}]   ;;  %s1801_s7 = inlined_call_operand.hbm [shape: bf16[256,128], index: 7, kind: input, shape index: {}]   ;;  %s1802_s8 = inlined_call_operand.hbm [shape: f32[1,128], index: 8, kind: input, shape index: {}]   ;;  %s1803_s9 = inlined_call_operand.hbm [shape: f32[1,128], index: 9, kind: input, shape index: {}]   ;;  %s1804_s10 = inlined_call_operand.hbm [shape: f32[1,128], index: 10, kind: input, shape index: {}]   ;;  %s1805_s11 = inlined_call_operand.hbm [shape: bf16[128,128], index: 11, kind: input, shape index: {}]   ;;  %s1806_s12 = inlined_call_operand.hbm [shape: f32[1,128], index: 12, kind: input, shape index: {}]   ;;  %s1807_s13 = inlined_call_operand.vmem [shape: f32[8,128], index: 13, kind: output, shape index: {}]  }
   0x1   :  { %19 = vsyncpa [#allocation7], 0 }
   0x2   :  { %20 = vsyncpa [#allocation10], 0 }
   0x3   :  { %21 = vsyncpa [#allocation13], 0 }
   0x4   :  { %22 = vsyncpa [#allocation16], 0  ;;  %s48_s27 = sshll.u32 %s1798_s4, 4  ;;  %s49_s27 = int_to_ptr.hbm [resolvable:$true] %s48_s27 }
   0x5   :  { %23 = vsyncpa [#allocation19], 0  ;;  %s1625_s28 = smov [#allocation6]   ;;  %s70_s15 = sshll.u32 %s1800_s6, 4  ;;  %s71_s15 = int_to_ptr.hbm [resolvable:$true] %s70_s15 }
   0x6   :  { %s50_s29 = sshll.u32 %s1625_s28, 4  ;;  %s1626_s16 = smov [#allocation9]   ;;  %s51_s29 = int_to_ptr.vmem [resolvable:$true] %s50_s29 }
   0x7   :  { %53 = dma.hbm_to_vmem [thread:$0]  %s49_s27, 32, %s51_s29, [#allocation7]  }
   0x8   :  { %s72_s17 = sshll.u32 %s1626_s16, 4  ;;  %s94_s20 = sshll.u32 %s1802_s8, 4  ;;  %s73_s17 = int_to_ptr.vmem [resolvable:$true] %s72_s17  ;;  %s95_s20 = int_to_ptr.hbm [resolvable:$true] %s94_s20 }
   0x9   :  { %75 = dma.hbm_to_vmem [thread:$0]  %s71_s15, 32, %s73_s17, [#allocation10]  }
   0xa   :  { %s116_s22 = sshll.u32 %s1804_s10, 4  ;;  %s1627_s23 = smov [#allocation12]   ;;  %s117_s22 = int_to_ptr.hbm [resolvable:$true] %s116_s22 }
   0xb   :  { %s96_s24 = sshll.u32 %s1627_s23, 4  ;;  %s1628_s6 = smov [#allocation15]   ;;  %s97_s24 = int_to_ptr.vmem [resolvable:$true] %s96_s24 }
   0xc   :  { %99 = dma.hbm_to_vmem [thread:$0]  %s95_s20, 16, %s97_s24, [#allocation13]  }
   0xd   :  { %s118_s25 = sshll.u32 %s1628_s6, 4  ;;  %s34_s28 = sshll.u32 %s1797_s3, 4  ;;  %s119_s25 = int_to_ptr.vmem [resolvable:$true] %s118_s25  ;;  %s35_s28 = int_to_ptr.hbm [resolvable:$true] %s34_s28 }
   0xe   :  { %121 = dma.hbm_to_vmem [thread:$0]  %s117_s22, 16, %s119_s25, [#allocation16]  }
   0xf   :  { %s1629_s8 = smov [#allocation4]   ;;  %s59_s10 = sshll.u32 %s1799_s5, 4  ;;  %s60_s10 = int_to_ptr.hbm [resolvable:$true] %s59_s10 }
  0x10   :  { %s36_s29 = sshll.u32 %s1629_s8, 4  ;;  %s1630_s15 = smov 128   ;;  %s37_s29 = int_to_ptr.vmem [resolvable:$true] %s36_s29 }
  0x11   :  { %s1631_s16 = smov 8   ;;  %s1632_s17 = smov [#allocation8]  }
  0x12   :  { %42 = dma.hbm_to_vmem [thread:$0]  %s35_s28, 6144, %s37_s29, [#allocation5], %s1630_s15, %s1630_s15, %s1631_s16  }
  0x13   :  { %s61_s18 = sshll.u32 %s1632_s17, 4  ;;  %s80_s3 = sshll.u32 %s1801_s7, 4  ;;  %s62_s18 = int_to_ptr.vmem [resolvable:$true] %s61_s18  ;;  %s81_s3 = int_to_ptr.hbm [resolvable:$true] %s80_s3 }
  0x14   :  { %64 = dma.hbm_to_vmem [thread:$0]  %s60_s10, 32, %s62_s18, [#allocation7]  }
  0x15   :  { %s1633_s4 = smov [#allocation11]   ;;  %s105_s5 = sshll.u32 %s1803_s9, 4  ;;  %s106_s5 = int_to_ptr.hbm [resolvable:$true] %s105_s5 }
  0x16   :  { %s82_s21 = sshll.u32 %s1633_s4, 4  ;;  %s1634_s24 = smov 64   ;;  %s83_s21 = int_to_ptr.vmem [resolvable:$true] %s82_s21 }
  0x17   :  { %s1635_s6 = smov 4   ;;  %s1636_s25 = smov [#allocation14]  }
  0x18   :  { %88 = dma.hbm_to_vmem [thread:$0]  %s81_s3, 2048, %s83_s21, [#allocation10], %s1634_s24, %s1634_s24, %s1635_s6  }
  0x19   :  { %s107_s26 = sshll.u32 %s1636_s25, 4  ;;  %s126_s7 = sshll.u32 %s1805_s11, 4  ;;  %s108_s26 = int_to_ptr.vmem [resolvable:$true] %s107_s26  ;;  %s127_s7 = int_to_ptr.hbm [resolvable:$true] %s126_s7 }
  0x1a   :  { %110 = dma.hbm_to_vmem [thread:$0]  %s106_s5, 16, %s108_s26, [#allocation13]  }
  0x1b   :  { %s140_s30 = sshll.u32 %s1806_s12, 4  ;;  %s1637_s14 = smov [#allocation17]   ;;  %s141_s30 = int_to_ptr.hbm [resolvable:$true] %s140_s30 }
  0x1c   :  { %s128_s10 = sshll.u32 %s1637_s14, 4  ;;  %s1638_s9 = smov [#allocation18]   ;;  %s129_s10 = int_to_ptr.vmem [resolvable:$true] %s128_s10 }
  0x1d   :  { %134 = dma.hbm_to_vmem [thread:$0]  %s127_s7, 1024, %s129_s10, [#allocation16], %s1634_s24, %s1634_s24, %s1635_s6  }
  0x1e   :  { %s142_s15 = sshll.u32 %s1638_s9, 4  ;;  %s143_s15 = int_to_ptr.vmem [resolvable:$true] %s142_s15 }
  0x1f   :  { %145 = dma.hbm_to_vmem [thread:$0]  %s141_s30, 16, %s143_s15, [#allocation19]  }
  0x20   :  { %1613 = dma.done.wait [#allocation5], 6144  }
  0x21   :  { %1614 = vsyncadd [#allocation5], 4294961152 }
  0x22   :  { %1615 = dma.done.wait [#allocation7], 64  }
  0x23   :  { %1616 = vsyncadd [#allocation7], 4294967232 }
  0x24   :  { %1617 = dma.done.wait [#allocation10], 2080  }
  0x25   :  { %1618 = vsyncadd [#allocation10], 4294965216 }
  0x26   :  { %1619 = dma.done.wait [#allocation13], 32  }
  0x27   :  { %1620 = vsyncadd [#allocation13], 4294967264 }
  0x28   :  { %1621 = dma.done.wait [#allocation16], 1040  }
  0x29   :  { %1622 = vsyncadd [#allocation16], 4294966256 }
  0x2a   :  { %1623 = dma.done.wait [#allocation19], 16  }
  0x2b   :  { %1624 = vsyncadd [#allocation19], 4294967280  ;;  %v1742_v0 = vld [vmem:[%s1794_s0] sm:$0xff]  ;;  %v1747_v1 = vld [vmem:[%s1794_s0 + $0x8] sm:$0xff] }
  0x2c   :  { %v1752_v2 = vld [vmem:[%s1794_s0 + $0x10] sm:$0xff]  ;;  %v195_v3 = vadd.f32 %v1747_v1, %v1742_v0  ;;  %v200_v4 = vmul.f32 %v1742_v0, %v1742_v0  ;;  %v201_v5 = vmul.f32 %v1747_v1, %v1747_v1  ;;  %v1047_v10 = vld [vmem:[#allocation4 + $0x70] sm:$0xf]  ;;  %v1292_v11 = vld [vmem:[#allocation4 + $0x74] sm:$0xf0] }
  0x2d   :  { %v202_v7 = vmul.f32 %v1752_v2, %v1752_v2  ;;  %v1111_v12 = vld [vmem:[#allocation4 + $0xf0] sm:$0xf]  ;;  %v1048_v13 = vor.u32 %v1292_v11, %v1047_v10  ;;  %v1308_v14 = vld [vmem:[#allocation4 + $0xf4] sm:$0xf0]  ;;  %v1039_v16 = vld [vmem:[#allocation4 + $0x60] sm:$0xf] }
  0x2e   :  { %v196_v6 = vadd.f32 %v195_v3, %v1752_v2  ;;  %v203_v8 = vadd.f32 %v201_v5, %v200_v4  ;;  %v1112_v15 = vor.u32 %v1308_v14, %v1111_v12  ;;  %v1290_v17 = vld [vmem:[#allocation4 + $0x64] sm:$0xf0]  ;;  %v1103_v19 = vld [vmem:[#allocation4 + $0xe0] sm:$0xf]  ;;  %v1031_v22 = vld [vmem:[#allocation4 + $0x50] sm:$0xf] }
  0x2f   :  { %561 = vmatpush.bf16.msra.mxu0 %v1048_v13  ;;  %v1040_v18 = vor.u32 %v1290_v17, %v1039_v16  ;;  %v1306_v20 = vld [vmem:[#allocation4 + $0xe4] sm:$0xf0]  ;;  %v1288_v23 = vld [vmem:[#allocation4 + $0x54] sm:$0xf0]  ;;  %v1095_v24 = vld [vmem:[#allocation4 + $0xd0] sm:$0xf] }
  0x30   :  { %197 = vadd.xlane.f32.xlu0 %v196_v6  ;;  %v204_v9 = vadd.f32 %v203_v8, %v202_v7  ;;  %574 = vmatpush.bf16.msra.mxu1 %v1112_v15  ;;  %v1104_v21 = vor.u32 %v1306_v20, %v1103_v19  ;;  %v1032_v25 = vor.u32 %v1288_v23, %v1031_v22  ;;  %v1304_v26 = vld [vmem:[#allocation4 + $0xd4] sm:$0xf0]  ;;  %v1023_v28 = vld [vmem:[#allocation4 + $0x40] sm:$0xf]  ;;  %v1286_v29 = vld [vmem:[#allocation4 + $0x44] sm:$0xf0] }
  0x31   :  { %v1096_v27 = vor.u32 %v1304_v26, %v1095_v24  ;;  %v1087_v30 = vld [vmem:[#allocation4 + $0xc0] sm:$0xf]  ;;  %v1024_v31 = vor.u32 %v1286_v29, %v1023_v28  ;;  %v1302_v32 = vld [vmem:[#allocation4 + $0xc4] sm:$0xf0]  ;;  %v1291_v33 = vld [vmem:[#allocation4 + $0x74] sm:$0xf] }
  0x32   :  { %v1049_v34 = vld [vmem:[#allocation4 + $0x78] sm:$0xf0]  ;;  %v1088_v35 = vor.u32 %v1302_v32, %v1087_v30  ;;  %v1015_v37 = vld [vmem:[#allocation4 + $0x30] sm:$0xf]  ;;  %v1284_v38 = vld [vmem:[#allocation4 + $0x34] sm:$0xf0] }
  0x33   :  { %562 = vmatpush.bf16.msra.mxu0 %v1040_v18  ;;  %v1052_v36 = vor.u32 %v1291_v33, %v1049_v34  ;;  %v1079_v39 = vld [vmem:[#allocation4 + $0xb0] sm:$0xf]  ;;  %v1016_v40 = vor.u32 %v1284_v38, %v1015_v37  ;;  %v1300_v41 = vld [vmem:[#allocation4 + $0xb4] sm:$0xf0]  ;;  %v1289_v42 = vld [vmem:[#allocation4 + $0x64] sm:$0xf] }
  0x34   :  { %575 = vmatpush.bf16.msra.mxu1 %v1104_v21  ;;  %v1041_v43 = vld [vmem:[#allocation4 + $0x68] sm:$0xf0]  ;;  %v1080_v44 = vor.u32 %v1300_v41, %v1079_v39  ;;  %v1007_v46 = vld [vmem:[#allocation4 + $0x20] sm:$0xf]  ;;  %v1282_v47 = vld [vmem:[#allocation4 + $0x24] sm:$0xf0] }
  0x35   :  { %600 = vmatpush.bf16.msra.mxu3 %v1052_v36  ;;  %v1044_v45 = vor.u32 %v1289_v42, %v1041_v43  ;;  %v1071_v48 = vld [vmem:[#allocation4 + $0xa0] sm:$0xf]  ;;  %v1175_v49 = vld [vmem:[#allocation4 + $0x170] sm:$0xf]  ;;  %v1324_v50 = vld [vmem:[#allocation4 + $0x174] sm:$0xf0]  ;;  %v1008_v51 = vor.u32 %v1282_v47, %v1007_v46 }
  0x36   :  { %v1298_v52 = vld [vmem:[#allocation4 + $0xa4] sm:$0xf0]  ;;  %v1176_v53 = vor.u32 %v1324_v50, %v1175_v49  ;;  %v1287_v55 = vld [vmem:[#allocation4 + $0x54] sm:$0xf]  ;;  %v1033_v56 = vld [vmem:[#allocation4 + $0x58] sm:$0xf0] }
  0x37   :  { %563 = vmatpush.bf16.msra.mxu0 %v1032_v25  ;;  %v1072_v54 = vor.u32 %v1298_v52, %v1071_v48  ;;  %v1036_v57 = vor.u32 %v1287_v55, %v1033_v56  ;;  %v999_v58 = vld [vmem:[#allocation4 + $0x10] sm:$0xf]  ;;  %v1280_v59 = vld [vmem:[#allocation4 + $0x14] sm:$0xf0]  ;;  %v1167_v61 = vld [vmem:[#allocation4 + $0x160] sm:$0xf] }
  0x38   :  { %205 = vadd.xlane.f32.xlu0 %v204_v9  ;;  %576 = vmatpush.bf16.msra.mxu1 %v1096_v27  ;;  %v1063_v60 = vld [vmem:[#allocation4 + $0x90] sm:$0xf]  ;;  %v1322_v62 = vld [vmem:[#allocation4 + $0x164] sm:$0xf0]  ;;  %v1000_v63 = vor.u32 %v1280_v59, %v999_v58  ;;  %v1296_v3 = vld [vmem:[#allocation4 + $0x94] sm:$0xf0] }
  0x39   :  { %601 = vmatpush.bf16.msra.mxu3 %v1044_v45  ;;  %587 = vmatpush.bf16.msra.mxu2 %v1176_v53  ;;  %v1168_v4 = vor.u32 %v1322_v62, %v1167_v61  ;;  %v1064_v5 = vor.u32 %v1296_v3, %v1063_v60  ;;  %v1285_v6 = vld [vmem:[#allocation4 + $0x44] sm:$0xf]  ;;  %v1025_v7 = vld [vmem:[#allocation4 + $0x48] sm:$0xf0]  ;;  %v991_v9 = vld [vmem:[#allocation4] sm:$0xf] }
  0x3a   :  { %v1028_v8 = vor.u32 %v1285_v6, %v1025_v7  ;;  %v1278_v10 = vld [vmem:[#allocation4 + $0x4] sm:$0xf0]  ;;  %v1055_v11 = vld [vmem:[#allocation4 + $0x80] sm:$0xf]  ;;  %v1159_v12 = vld [vmem:[#allocation4 + $0x150] sm:$0xf] }
  0x3b   :  { %564 = vmatpush.bf16.msra.mxu0 %v1024_v31  ;;  %v1320_v13 = vld [vmem:[#allocation4 + $0x154] sm:$0xf0]  ;;  %v992_v14 = vor.u32 %v1278_v10, %v991_v9  ;;  %v1294_v15 = vld [vmem:[#allocation4 + $0x84] sm:$0xf0]  ;;  %v1283_v18 = vld [vmem:[#allocation4 + $0x34] sm:$0xf] }
  0x3c   :  { %577 = vmatpush.bf16.msra.mxu1 %v1088_v35  ;;  %v1160_v16 = vor.u32 %v1320_v13, %v1159_v12  ;;  %v1056_v17 = vor.u32 %v1294_v15, %v1055_v11  ;;  %v1017_v19 = vld [vmem:[#allocation4 + $0x38] sm:$0xf0]  ;;  %v1307_v20 = vld [vmem:[#allocation4 + $0xf4] sm:$0xf]  ;;  %v1151_v28 = vld [vmem:[#allocation4 + $0x140] sm:$0xf] }
  0x3d   :  { %602 = vmatpush.bf16.msra.mxu3 %v1036_v57  ;;  %588 = vmatpush.bf16.msra.mxu2 %v1168_v4  ;;  %v1020_v21 = vor.u32 %v1283_v18, %v1017_v19  ;;  %v1113_v22 = vld [vmem:[#allocation4 + $0xf8] sm:$0xf0]  ;;  %v1323_v23 = vld [vmem:[#allocation4 + $0x174] sm:$0xf]  ;;  %v1318_v29 = vld [vmem:[#allocation4 + $0x144] sm:$0xf0] }
  0x3e   :  { %v1177_v24 = vld [vmem:[#allocation4 + $0x178] sm:$0xf0]  ;;  %v1116_v25 = vor.u32 %v1307_v20, %v1113_v22  ;;  %v1281_v30 = vld [vmem:[#allocation4 + $0x24] sm:$0xf]  ;;  %v1152_v31 = vor.u32 %v1318_v29, %v1151_v28  ;;  %v1009_v32 = vld [vmem:[#allocation4 + $0x28] sm:$0xf0] }
  0x3f   :  { %565 = vmatpush.bf16.msra.mxu0 %v1016_v40  ;;  %v1180_v26 = vor.u32 %v1323_v23, %v1177_v24  ;;  %v1305_v33 = vld [vmem:[#allocation4 + $0xe4] sm:$0xf]  ;;  %v1012_v34 = vor.u32 %v1281_v30, %v1009_v32  ;;  %v1105_v35 = vld [vmem:[#allocation4 + $0xe8] sm:$0xf0]  ;;  %v1143_v39 = vld [vmem:[#allocation4 + $0x130] sm:$0xf] }
  0x40   :  { %578 = vmatpush.bf16.msra.mxu1 %v1080_v44  ;;  %v1321_v36 = vld [vmem:[#allocation4 + $0x164] sm:$0xf]  ;;  %v1169_v37 = vld [vmem:[#allocation4 + $0x168] sm:$0xf0]  ;;  %v1316_v40 = vld [vmem:[#allocation4 + $0x134] sm:$0xf0]  ;;  %v1108_v41 = vor.u32 %v1305_v33, %v1105_v35 }
  0x41   :  { %603 = vmatpush.bf16.msra.mxu3 %v1028_v8  ;;  %589 = vmatpush.bf16.msra.mxu2 %v1160_v16  ;;  %v1172_v42 = vor.u32 %v1321_v36, %v1169_v37  ;;  %v1279_v43 = vld [vmem:[#allocation4 + $0x14] sm:$0xf]  ;;  %v1144_v44 = vor.u32 %v1316_v40, %v1143_v39  ;;  %v1001_v45 = vld [vmem:[#allocation4 + $0x18] sm:$0xf0]  ;;  %v1314_v55 = vld [vmem:[#allocation4 + $0x124] sm:$0xf0] }
  0x42   :  { %v1303_v46 = vld [vmem:[#allocation4 + $0xd4] sm:$0xf]  ;;  %v1097_v47 = vld [vmem:[#allocation4 + $0xd8] sm:$0xf0]  ;;  %v1004_v48 = vor.u32 %v1279_v43, %v1001_v45  ;;  %v1277_v56 = vld [vmem:[#allocation4 + $0x4] sm:$0xf] }
  0x43   :  { %566 = vmatpush.bf16.msra.mxu0 %v1008_v51  ;;  %v1100_v49 = vor.u32 %v1303_v46, %v1097_v47  ;;  %v1319_v50 = vld [vmem:[#allocation4 + $0x154] sm:$0xf]  ;;  %v1161_v51 = vld [vmem:[#allocation4 + $0x158] sm:$0xf0]  ;;  %v993_v60 = vld [vmem:[#allocation4 + $0x8] sm:$0xf0] }
  0x44   :  { %579 = vmatpush.bf16.msra.mxu1 %v1072_v54  ;;  %v1164_v52 = vor.u32 %v1319_v50, %v1161_v51  ;;  %v1135_v54 = vld [vmem:[#allocation4 + $0x120] sm:$0xf]  ;;  %v1301_v61 = vld [vmem:[#allocation4 + $0xc4] sm:$0xf]  ;;  %v1127_v62 = vld [vmem:[#allocation4 + $0x110] sm:$0xf]  ;;  %v996_v4 = vor.u32 %v1277_v56, %v993_v60 }
  0x45   :  { %604 = vmatpush.bf16.msra.mxu3 %v1020_v21  ;;  %590 = vmatpush.bf16.msra.mxu2 %v1152_v31  ;;  %v1136_v59 = vor.u32 %v1314_v55, %v1135_v54  ;;  %v1119_v3 = vld [vmem:[#allocation4 + $0x100] sm:$0xf]  ;;  %v1310_v7 = vld [vmem:[#allocation4 + $0x104] sm:$0xf0]  ;;  %v1089_v8 = vld [vmem:[#allocation4 + $0xc8] sm:$0xf0] }
  0x46   :  { %v1317_v9 = vld [vmem:[#allocation4 + $0x144] sm:$0xf]  ;;  %v1092_v10 = vor.u32 %v1301_v61, %v1089_v8  ;;  %v1153_v11 = vld [vmem:[#allocation4 + $0x148] sm:$0xf0]  ;;  %v1299_v12 = vld [vmem:[#allocation4 + $0xb4] sm:$0xf]  ;;  %v1120_v19 = vor.u32 %v1310_v7, %v1119_v3 }
  0x47   :  { %567 = vmatpush.bf16.msra.mxu0 %v1000_v63  ;;  %v1312_v63 = vld [vmem:[#allocation4 + $0x114] sm:$0xf0]  ;;  %v1081_v13 = vld [vmem:[#allocation4 + $0xb8] sm:$0xf0]  ;;  %v1156_v15 = vor.u32 %v1317_v9, %v1153_v11  ;;  %v1315_v16 = vld [vmem:[#allocation4 + $0x134] sm:$0xf] }
  0x48   :  { %580 = vmatpush.bf16.msra.mxu1 %v1064_v5  ;;  %v1128_v6 = vor.u32 %v1312_v63, %v1127_v62  ;;  %v1084_v18 = vor.u32 %v1299_v12, %v1081_v13  ;;  %v1297_v21 = vld [vmem:[#allocation4 + $0xa4] sm:$0xf]  ;;  %v1073_v22 = vld [vmem:[#allocation4 + $0xa8] sm:$0xf0]  ;;  %v1065_v28 = vld [vmem:[#allocation4 + $0x98] sm:$0xf0] }
  0x49   :  { %605 = vmatpush.bf16.msra.mxu3 %v1012_v34  ;;  %591 = vmatpush.bf16.msra.mxu2 %v1144_v44  ;;  %v1313_v23 = vld [vmem:[#allocation4 + $0x124] sm:$0xf]  ;;  %v1137_v24 = vld [vmem:[#allocation4 + $0x128] sm:$0xf0]  ;;  %v1311_v29 = vld [vmem:[#allocation4 + $0x114] sm:$0xf] }
  0x4a   :  { %v1129_v31 = vld [vmem:[#allocation4 + $0x118] sm:$0xf0]  ;;  %v1293_v35 = vld [vmem:[#allocation4 + $0x84] sm:$0xf]  ;;  %v1057_v36 = vld [vmem:[#allocation4 + $0x88] sm:$0xf0] }
  0x4b   :  { %568 = vmatpush.bf16.msra.mxu0 %v992_v14  ;;  %v1132_v34 = vor.u32 %v1311_v29, %v1129_v31  ;;  %v1309_v39 = vld [vmem:[#allocation4 + $0x104] sm:$0xf]  ;;  %v1121_v40 = vld [vmem:[#allocation4 + $0x108] sm:$0xf0]  ;;  %v193_v43 = vld [vmem:[%s1795_s1] sm:$0x7] }
  0x4c   :  { %581 = vmatpush.bf16.msra.mxu1 %v1056_v17  ;;  %v1145_v17 = vld [vmem:[#allocation4 + $0x138] sm:$0xf0]  ;;  %v1124_v44 = vor.u32 %v1309_v39, %v1121_v40  ;;  %v194_v46 = vld [vmem:[%s1796_s2] sm:$0x7]  ;;  %v228_v47 = vperm.slane %v193_v43, 0 }
  0x4d   :  { %606 = vmatpush.bf16.msra.mxu3 %v1004_v48  ;;  %592 = vmatpush.bf16.msra.mxu2 %v1136_v59  ;;  %v1148_v20 = vor.u32 %v1315_v16, %v1145_v17  ;;  %v229_v48 = vperm.slane %v193_v43, 1  ;;  %v238_v54 = vperm.slane %v194_v46, 0  ;;  %v239_v55 = vperm.slane %v194_v46, 1  ;;  %v648_v16 = vld [vmem:[#allocation6] sm:$0x3] }
  0x4e   :  { %v1332_v39 = vld [vmem:[#allocation11 + $0x38] sm:$0xff] }
  0x4f   :  { %613 = vmatpush.bf16.msrb.mxu0 %v1116_v25  ;;  %v1076_v25 = vor.u32 %v1297_v21, %v1073_v22  ;;  %v1340_v40 = vld [vmem:[#allocation11 + $0x78] sm:$0xff] }
  0x50   :  { %626 = vmatpush.bf16.msrb.mxu1 %v1180_v26  ;;  %v1140_v26 = vor.u32 %v1313_v23, %v1137_v24 }
  0x51   :  { %607 = vmatpush.bf16.msra.mxu3 %v996_v4  ;;  %593 = vmatpush.bf16.msra.mxu2 %v1128_v6 }
  0x53   :  { %614 = vmatpush.bf16.msrb.mxu0 %v1108_v41 }
  0x54   :  { %627 = vmatpush.bf16.msrb.mxu1 %v1172_v42  ;;  %v1060_v42 = vor.u32 %v1293_v35, %v1057_v36 }
  0x55   :  { %594 = vmatpush.bf16.msra.mxu2 %v1120_v19  ;;  %v650_v19 = vperm.slane %v648_v16, 0  ;;  %848 = vmatpush.bf16.msrb.mxu3 %v1340_v40 }
  0x57   :  { %615 = vmatpush.bf16.msrb.mxu0 %v1100_v49 }
  0x58   :  { %628 = vmatpush.bf16.msrb.mxu1 %v1164_v52 }
  0x59   :  { %835 = vmatpush.bf16.msrb.mxu2 %v1332_v39 }
  0x5b   :  { %616 = vmatpush.bf16.msrb.mxu0 %v1092_v10 }
  0x5c   :  { %629 = vmatpush.bf16.msrb.mxu1 %v1156_v15 }
  0x5f   :  { %617 = vmatpush.bf16.msrb.mxu0 %v1084_v18 }
  0x60   :  { %630 = vmatpush.bf16.msrb.mxu1 %v1148_v20 }
  0x63   :  { %618 = vmatpush.bf16.msrb.mxu0 %v1076_v25  ;;  %v651_v25 = vperm.slane %v648_v16, 1 }
  0x64   :  { %631 = vmatpush.bf16.msrb.mxu1 %v1140_v26 }
  0x68   :  { %632 = vmatpush.bf16.msrb.mxu1 %v1132_v34 }
  0x6c   :  { %633 = vmatpush.bf16.msrb.mxu1 %v1124_v44  ;;  %v1338_v44 = vld [vmem:[#allocation11 + $0x68] sm:$0xff] }
  0xa3   :  { %v198_v27 = vpop.xlane.xlu0 %197 }
  0xa4   :  { %v1763_v38 = vmul.f32 0.0026041667, %v198_v27  ;;  %v1295_v27 = vld [vmem:[#allocation4 + $0x94] sm:$0xf] }
  0xa5   :  { %v1068_v33 = vor.u32 %v1295_v27, %v1065_v28 }
  0xa6   :  { %v208_v57 = vmul.f32 %v1763_v38, %v1763_v38  ;;  %v210_v50 = vsub.f32 %v1742_v0, %v1763_v38  ;;  %v211_v51 = vsub.f32 %v1747_v1, %v1763_v38  ;;  %v212_v52 = vsub.f32 %v1752_v2, %v1763_v38 }
  0xa7   :  { %619 = vmatpush.bf16.msrb.mxu0 %v1068_v33 }
  0xab   :  { %v206_v53 = vpop.xlane.xlu0 %205  ;;  %620 = vmatpush.bf16.msrb.mxu0 %v1060_v42  ;;  %v1339_v42 = vld [vmem:[#allocation11 + $0x70] sm:$0xff] }
  0xac   :  { %v207_v58 = vmul.f32 0.0026041667, %v206_v53  ;;  %v230_v53 = vperm.slane %v193_v43, 2  ;;  %849 = vmatpush.bf16.msrb.mxu3 %v1339_v42  ;;  %v1330_v43 = vld [vmem:[#allocation11 + $0x28] sm:$0xff] }
  0xae   :  { %v209_v5 = vsub.f32 %v207_v58, %v208_v57  ;;  %v240_v57 = vperm.slane %v194_v46, 2  ;;  %v1337_v46 = vld [vmem:[#allocation11 + $0x60] sm:$0xff] }
  0xb0   :  { %v213_v14 = vadd.f32 1e-05, %v209_v5  ;;  %850 = vmatpush.bf16.msrb.mxu3 %v1338_v44 }
  0xb2   :  { %1367 = vrsqrt.f32 %v213_v14  ;;  %vm220_vm1 = vweird.f32 %v213_v14 }
  0xb4   :  { %851 = vmatpush.bf16.msrb.mxu3 %v1337_v46 }
  0xb8   :  { %v1368_v30 = vpop.eup %1367 }
  0xb9   :  { %v215_v32 = vmul.f32 %v1368_v30, %v213_v14  ;;  %vm221_vm0 = vweird.f32 %v1368_v30 }
  0xba   :  { %vm222_vm2 = vmor %vm220_vm1, %vm221_vm0 }
  0xbb   :  { %v216_v37 = vmul.f32 %v1368_v30, %v215_v32 }
  0xbd   :  { %v217_v41 = vmul.f32 0.5, %v216_v37 }
  0xbf   :  { %v218_v45 = vsub.f32 1.5, %v217_v41  ;;  %v1331_v41 = vld [vmem:[#allocation11 + $0x30] sm:$0xff] }
  0xc0   :  { %836 = vmatpush.bf16.msrb.mxu2 %v1331_v41 }
  0xc1   :  { %v219_v49 = vmul.f32 %v1368_v30, %v218_v45  ;;  %v1329_v45 = vld [vmem:[#allocation11 + $0x20] sm:$0xff] }
  0xc3   :  { %v223_v56 = vsel %vm222_vm2, %v1368_v30, %v219_v49  ;;  %v1327_v49 = vld [vmem:[#allocation11 + $0x10] sm:$0xff] }
  0xc4   :  { %v224_v58 = vmul.f32 %v223_v56, %v210_v50  ;;  %v225_v59 = vmul.f32 %v223_v56, %v211_v51  ;;  %v226_v60 = vmul.f32 %v223_v56, %v212_v52  ;;  %837 = vmatpush.bf16.msrb.mxu2 %v1330_v43  ;;  %v1335_v50 = vld [vmem:[#allocation11 + $0x50] sm:$0xff]  ;;  %v1326_v51 = vld [vmem:[#allocation11 + $0x8] sm:$0xff] }
  0xc5   :  { %v1334_v52 = vld [vmem:[#allocation11 + $0x48] sm:$0xff] }
  0xc6   :  { %v234_v61 = vmul.f32 %v228_v47, %v224_v58  ;;  %v235_v62 = vmul.f32 %v229_v48, %v225_v59  ;;  %v236_v63 = vmul.f32 %v230_v53, %v226_v60  ;;  %v1328_v47 = vld [vmem:[#allocation11 + $0x18] sm:$0xff] }
  0xc7   :  { %v1336_v48 = vld [vmem:[#allocation11 + $0x58] sm:$0xff] }
  0xc8   :  { %v244_v0 = vadd.f32 %v238_v54, %v234_v61  ;;  %v245_v3 = vadd.f32 %v239_v55, %v235_v62  ;;  %v246_v4 = vadd.f32 %v240_v57, %v236_v63  ;;  %838 = vmatpush.bf16.msrb.mxu2 %v1329_v45  ;;  %852 = vmatpush.bf16.msrb.mxu3 %v1336_v48  ;;  %v1325_v54 = vld [vmem:[#allocation11] sm:$0xff] }
  0xc9   :  { %v1333_v55 = vld [vmem:[#allocation11 + $0x40] sm:$0xff] }
  0xca   :  { %v247_v1 = vpack.c.bf16 %v245_v3, %v244_v0  ;;  %v248_v5 = vpack.c.bf16 %v246_v4, %v246_v4 }
  0xcc   :  { %v312_v6 = vunpack.c.l.b16 %v247_v1  ;;  %v313_v2 = vunpack.c.h.b16 %v247_v1  ;;  %250 = vst [vmem:[#allocation2 + $0x8] sm:$0xf] %v248_v5  ;;  %839 = vmatpush.bf16.msrb.mxu2 %v1328_v47  ;;  %853 = vmatpush.bf16.msrb.mxu3 %v1335_v50  ;;  %v658_v1 = vld [vmem:[#allocation8] sm:$0x3] }
  0xce   :  { %v315_v38 = vpack.c.b16 %v312_v6, %v312_v6  ;;  %v316_v7 = vpack.c.b16 %v313_v2, %v313_v2  ;;  %v659_v6 = vld [vmem:[#allocation9] sm:$0x3] }
  0xd0   :  { %569 = vmatmul.bf16.vlgmr.msra.gmra.mxu0 %v315_v38  ;;  %582 = vmatmul.bf16.vlgmr.msra.gmra.mxu1 %v316_v7 }
  0xd1   :  { %608 = vmatmul.bf16.vlgmr.msra.gmra.mxu3 %v315_v38  ;;  %840 = vmatpush.bf16.msrb.mxu2 %v1327_v49 }
  0xd2   :  { %854 = vmatpush.bf16.msrb.mxu3 %v1334_v52  ;;  %v1364_v52 = vld [vmem:[#allocation14] ss:$0 sm:$0xff] }
  0xd3   :  { %v261_v8 = vld [vmem:[#allocation2 + $0x8] sm:$0xf] }
  0xd4   :  { %v314_v9 = vunpack.c.l.b16 %v261_v8  ;;  %v689_v8 = vperm.slane %v658_v1, 1 }
  0xd5   :  { %841 = vmatpush.bf16.msrb.mxu2 %v1326_v51 }
  0xd6   :  { %v317_v10 = vpack.c.b16 %v314_v9, %v314_v9  ;;  %855 = vmatpush.bf16.msrb.mxu3 %v1333_v55  ;;  %v1365_v55 = vld [vmem:[#allocation15] ss:$0 sm:$0xff] }
  0xd8   :  { %595 = vmatmul.bf16.vlgmr.msra.gmra.mxu2 %v317_v10 }
  0xd9   :  { %842 = vmatpush.bf16.msrb.mxu2 %v1325_v54 }
  0xe0   :  { %621 = vmatmul.bf16.vlgmr.msrb.gmra.mxu0 %v316_v7  ;;  %634 = vmatmul.bf16.vlgmr.msrb.gmra.mxu1 %v317_v10  ;;  %v688_v7 = vperm.slane %v658_v1, 0 }
 0x14d   :  { %v570_v11 = vpop.f32.mrf.mxu0  ;;  %v583_v12 = vpop.f32.mrf.mxu1 }
 0x14e   :  { %v584_v17 = vadd.f32 %v583_v12, %v570_v11  ;;  %v695_v11 = vperm.slane %v659_v6, 0 }
 0x154   :  { %v609_v13 = vpop.f32.mrf.mxu3 }
 0x155   :  { %v572_v14 = vpop.f32.mrf.mxu0  ;;  %v585_v15 = vpop.f32.mrf.mxu1 }
 0x15b   :  { %v596_v18 = vpop.f32.mrf.mxu2 }
 0x15c   :  { %v611_v20 = vpop.f32.mrf.mxu3  ;;  %v597_v21 = vadd.f32 %v596_v18, %v584_v17 }
 0x15d   :  { %v622_v22 = vpop.f32.mrf.mxu0  ;;  %v635_v23 = vpop.f32.mrf.mxu1  ;;  %v1363_v20 = vld [vmem:[#allocation12] ss:$0 sm:$0xff] }
 0x15e   :  { %v623_v24 = vadd.f32 %v622_v22, %v609_v13  ;;  %v654_v26 = vadd.f32 %v650_v19, %v597_v21  ;;  %v696_v13 = vperm.slane %v659_v6, 1 }
 0x160   :  { %v636_v27 = vadd.f32 %v635_v23, %v623_v24  ;;  %v1779_v29 = vmax.f32 %v654_v26, 0.0 }
 0x162   :  { %v655_v28 = vadd.f32 %v651_v25, %v636_v27  ;;  %v664_v36 = vmul.f32 %v1779_v29, %v1779_v29 }
 0x163   :  { %v598_v30 = vpop.f32.mrf.mxu2 }
 0x164   :  { %v1781_v31 = vmax.f32 %v655_v28, 0.0  ;;  %v1347_v30 = vld [vmem:[#allocation17 + $0x30] sm:$0xff] }
 0x165   :  { %v624_v32 = vpop.f32.mrf.mxu0  ;;  %v637_v33 = vpop.f32.mrf.mxu1 }
 0x166   :  { %v660_v34 = vadd.f32 %v1781_v31, %v1779_v29  ;;  %v665_v35 = vmul.f32 %v1781_v31, %v1781_v31  ;;  %v1345_v32 = vld [vmem:[#allocation17 + $0x20] sm:$0xff]  ;;  %v1344_v33 = vld [vmem:[#allocation17 + $0x18] sm:$0xff] }
 0x168   :  { %661 = vadd.xlane.f32.xlu1 %v660_v34  ;;  %v666_v37 = vadd.f32 %v665_v35, %v664_v36  ;;  %v1343_v34 = vld [vmem:[#allocation17 + $0x10] sm:$0xff]  ;;  %v1342_v36 = vld [vmem:[#allocation17 + $0x8] sm:$0xff] }
 0x170   :  { %667 = vadd.xlane.f32.xlu1 %v666_v37  ;;  %v1341_v37 = vld [vmem:[#allocation17] sm:$0xff] }
 0x1db   :  { %v662_v53 = vpop.xlane.xlu1 %661 }
 0x1dc   :  { %v663_v56 = vmul.f32 0.004, %v662_v53 }
 0x1de   :  { %v670_v58 = vmul.f32 %v663_v56, %v663_v56  ;;  %v672_v2 = vsub.f32 %v1779_v29, %v663_v56  ;;  %v673_v38 = vsub.f32 %v1781_v31, %v663_v56  ;;  %v1348_v29 = vld [vmem:[#allocation17 + $0x38] sm:$0xff]  ;;  %v1346_v31 = vld [vmem:[#allocation17 + $0x28] sm:$0xff] }
 0x1df   :  { %963 = vmatpush.bf16.msra.mxu0 %v1348_v29 }
 0x1e3   :  { %v668_v57 = vpop.xlane.xlu1 %667  ;;  %964 = vmatpush.bf16.msra.mxu0 %v1347_v30 }
 0x1e4   :  { %v669_v59 = vmul.f32 0.004, %v668_v57 }
 0x1e6   :  { %v671_v60 = vsub.f32 %v669_v59, %v670_v58  ;;  %v1366_v59 = vld [vmem:[#allocation18] ss:$0 sm:$0xff] }
 0x1e7   :  { %965 = vmatpush.bf16.msra.mxu0 %v1346_v31 }
 0x1e8   :  { %v674_v61 = vadd.f32 1e-05, %v671_v60 }
 0x1ea   :  { %1369 = vrsqrt.f32 %v674_v61  ;;  %vm681_vm4 = vweird.f32 %v674_v61 }
 0x1eb   :  { %966 = vmatpush.bf16.msra.mxu0 %v1345_v32 }
 0x1ef   :  { %967 = vmatpush.bf16.msra.mxu0 %v1344_v33 }
 0x1f0   :  { %v1370_v62 = vpop.eup %1369 }
 0x1f1   :  { %v676_v63 = vmul.f32 %v1370_v62, %v674_v61  ;;  %vm682_vm3 = vweird.f32 %v1370_v62 }
 0x1f2   :  { %vm683_vm5 = vmor %vm681_vm4, %vm682_vm3 }
 0x1f3   :  { %v677_v0 = vmul.f32 %v1370_v62, %v676_v63  ;;  %968 = vmatpush.bf16.msra.mxu0 %v1343_v34 }
 0x1f5   :  { %v678_v3 = vmul.f32 0.5, %v677_v0 }
 0x1f7   :  { %v679_v4 = vsub.f32 1.5, %v678_v3  ;;  %969 = vmatpush.bf16.msra.mxu0 %v1342_v36 }
 0x1f9   :  { %v680_v5 = vmul.f32 %v1370_v62, %v679_v4 }
 0x1fb   :  { %v684_v9 = vsel %vm683_vm5, %v1370_v62, %v680_v5  ;;  %970 = vmatpush.bf16.msra.mxu0 %v1341_v37 }
 0x1fc   :  { %v685_v10 = vmul.f32 %v684_v9, %v672_v2  ;;  %v686_v12 = vmul.f32 %v684_v9, %v673_v38 }
 0x1fe   :  { %v692_v14 = vmul.f32 %v688_v7, %v685_v10  ;;  %v693_v15 = vmul.f32 %v689_v8, %v686_v12 }
 0x200   :  { %v699_v16 = vadd.f32 %v695_v11, %v692_v14  ;;  %v700_v17 = vadd.f32 %v696_v13, %v693_v15 }
 0x202   :  { %v701_v18 = vpack.c.bf16 %v699_v16, %v699_v16  ;;  %v702_v19 = vpack.c.bf16 %v700_v17, %v700_v17 }
 0x204   :  { %843 = vmatmul.bf16.vlgmr.msrb.gmra.mxu2 %v701_v18  ;;  %856 = vmatmul.bf16.vlgmr.msrb.gmra.mxu3 %v702_v19 }
 0x287   :  { %v844_v21 = vpop.f32.mrf.mxu2  ;;  %v857_v22 = vpop.f32.mrf.mxu3 }
 0x288   :  { %v845_v23 = vadd.f32 %v1363_v20, %v844_v21 }
 0x28a   :  { %v858_v24 = vadd.f32 %v857_v22, %v845_v23 }
 0x28c   :  { %v861_v25 = vmax.f32 %v858_v24, 0.0 }
 0x28e   :  { %864 = vadd.xlane.f32.xlu2 %v861_v25  ;;  %v867_v28 = vmul.f32 %v861_v25, %v861_v25 }
 0x28f   :  { %v846_v26 = vpop.f32.mrf.mxu2  ;;  %v859_v27 = vpop.f32.mrf.mxu3 }
 0x296   :  { %868 = vadd.xlane.f32.xlu2 %v867_v28 }
 0x301   :  { %v865_v35 = vpop.xlane.xlu2 %864 }
 0x302   :  { %v866_v39 = vmul.f32 0.01, %v865_v35 }
 0x304   :  { %v871_v41 = vmul.f32 %v866_v39, %v866_v39  ;;  %v873_v51 = vsub.f32 %v861_v25, %v866_v39 }
 0x309   :  { %v869_v40 = vpop.xlane.xlu2 %868 }
 0x30a   :  { %v870_v42 = vmul.f32 0.01, %v869_v40 }
 0x30c   :  { %v872_v43 = vsub.f32 %v870_v42, %v871_v41 }
 0x30e   :  { %v874_v44 = vadd.f32 1e-05, %v872_v43 }
 0x310   :  { %1371 = vrsqrt.f32 %v874_v44  ;;  %vm881_vm7 = vweird.f32 %v874_v44 }
 0x316   :  { %v1372_v45 = vpop.eup %1371 }
 0x317   :  { %v876_v46 = vmul.f32 %v1372_v45, %v874_v44  ;;  %vm882_vm6 = vweird.f32 %v1372_v45 }
 0x318   :  { %vm883_vm8 = vmor %vm881_vm7, %vm882_vm6 }
 0x319   :  { %v877_v47 = vmul.f32 %v1372_v45, %v876_v46 }
 0x31b   :  { %v878_v48 = vmul.f32 0.5, %v877_v47 }
 0x31d   :  { %v879_v49 = vsub.f32 1.5, %v878_v48 }
 0x31f   :  { %v880_v50 = vmul.f32 %v1372_v45, %v879_v49 }
 0x321   :  { %v884_v53 = vsel %vm883_vm8, %v1372_v45, %v880_v50 }
 0x322   :  { %v885_v54 = vmul.f32 %v884_v53, %v873_v51 }
 0x324   :  { %v889_v56 = vmul.f32 %v1364_v52, %v885_v54 }
 0x326   :  { %v893_v57 = vadd.f32 %v1365_v55, %v889_v56 }
 0x328   :  { %v894_v58 = vpack.c.bf16 %v893_v57, %v893_v57 }
 0x32a   :  { %971 = vmatmul.bf16.vlgmr.msra.gmra.mxu0 %v894_v58 }
 0x3a7   :  { %v972_v60 = vpop.f32.mrf.mxu0 }
 0x3a8   :  { %v973_v61 = vadd.f32 %v1366_v59, %v972_v60 }
 0x3aa   :  { %976 = vst [vmem:[%s1807_s13] sm:$0xff] %v973_v61 }
 0x3af   :  { %v974_v62 = vpop.f32.mrf.mxu0 }
 0x3b0   :  { %981 = vsyncpa [#allocation5], 1 }
 0x3b1   :  { %982 = vsyncpa [#allocation7], 1 }
 0x3b2   :  { %983 = vsyncpa [#allocation10], 1 }
 0x3b3   :  { %984 = vsyncpa [#allocation13], 1 }
 0x3b4   :  { %985 = vsyncpa [#allocation16], 1 }
 0x3b5   :  { %986 = vsyncpa [#allocation19], 1 }

// kernel: ffn_forward.6
= control target key start
LH: loop header
LB: loop body
LE: loop exit
PB: predicated region body
PF: predicated region fallthrough
CT: control target
= control target key end

     0   :  { %10 = vsyncpa [#allocation5], 0  ;;  %s4793_s0 = inlined_call_operand.vmem [shape: f32[8,1024], index: 0, kind: input, shape index: {}]   ;;  %s4794_s1 = inlined_call_operand.hbm [shape: f32[1,1024], index: 1, kind: input, shape index: {}]   ;;  %s4795_s2 = inlined_call_operand.hbm [shape: f32[1,1024], index: 2, kind: input, shape index: {}]   ;;  %s4796_s3 = inlined_call_operand.hbm [shape: bf16[1024,640], index: 3, kind: input, shape index: {}]   ;;  %s4797_s4 = inlined_call_operand.vmem [shape: f32[1,640], index: 4, kind: input, shape index: {}]   ;;  %s4798_s5 = inlined_call_operand.vmem [shape: f32[8,640], index: 5, kind: output, shape index: {}]  }
   0x1   :  { %11 = vsyncpa [#allocation7], 0  ;;  %s30_s20 = sshll.u32 %s4795_s2, 4  ;;  %s4544_s21 = smov [#allocation6]   ;;  %s31_s20 = int_to_ptr.hbm [resolvable:$true] %s30_s20 }
   0x2   :  { %s32_s22 = sshll.u32 %s4544_s21, 4  ;;  %s19_s25 = sshll.u32 %s4794_s1, 4  ;;  %s33_s22 = int_to_ptr.vmem [resolvable:$true] %s32_s22  ;;  %s20_s25 = int_to_ptr.hbm [resolvable:$true] %s19_s25 }
   0x3   :  { %35 = dma.hbm_to_vmem [thread:$0]  %s31_s20, 128, %s33_s22, [#allocation7]  }
   0x4   :  { %s4545_s26 = smov [#allocation4]   ;;  %s40_s30 = sshll.u32 %s4796_s3, 4  ;;  %s41_s30 = int_to_ptr.hbm [resolvable:$true] %s40_s30 }
   0x5   :  { %s21_s27 = sshll.u32 %s4545_s26, 4  ;;  %s4546_s2 = smov [#allocation8]   ;;  %s22_s27 = int_to_ptr.vmem [resolvable:$true] %s21_s27 }
   0x6   :  { %24 = dma.hbm_to_vmem [thread:$0]  %s20_s25, 128, %s22_s27, [#allocation5]  }
   0x7   :  { %s42_s6 = sshll.u32 %s4546_s2, 4  ;;  %s4547_s7 = smov 320   ;;  %s43_s6 = int_to_ptr.vmem [resolvable:$true] %s42_s6 }
   0x8   :  { %s4548_s8 = smov 20  }
   0x9   :  { %48 = dma.hbm_to_vmem [thread:$0]  %s41_s30, 40960, %s43_s6, [#allocation7], %s4547_s7, %s4547_s7, %s4548_s8  }
   0xa   :  { %4540 = dma.done.wait [#allocation5], 128  }
   0xb   :  { %4541 = vsyncadd [#allocation5], 4294967168 }
   0xc   :  { %4542 = dma.done.wait [#allocation7], 41088  }
   0xd   :  { %4543 = vsyncadd [#allocation7], 4294926208  ;;  %v4591_v0 = vld [vmem:[%s4793_s0] sm:$0xff]  ;;  %v4596_v1 = vld [vmem:[%s4793_s0 + $0x8] sm:$0xff] }
   0xe   :  { %v4601_v2 = vld [vmem:[%s4793_s0 + $0x10] sm:$0xff]  ;;  %v77_v3 = vadd.f32 %v4596_v1, %v4591_v0  ;;  %v87_v4 = vmul.f32 %v4591_v0, %v4591_v0  ;;  %v88_v5 = vmul.f32 %v4596_v1, %v4596_v1  ;;  %v4614_v7 = vld [vmem:[%s4793_s0 + $0x18] sm:$0xff]  ;;  %v4619_v8 = vld [vmem:[%s4793_s0 + $0x20] sm:$0xff] }
   0xf   :  { %v89_v6 = vmul.f32 %v4601_v2, %v4601_v2  ;;  %v3002_v9 = vld [vmem:[#allocation8 + $0x118] sm:$0xf]  ;;  %v90_v11 = vmul.f32 %v4614_v7, %v4614_v7  ;;  %v4177_v13 = vld [vmem:[#allocation8 + $0x128] sm:$0xf0]  ;;  %v91_v23 = vmul.f32 %v4619_v8, %v4619_v8  ;;  %v2982_v27 = vld [vmem:[#allocation8 + $0xf0] sm:$0xf] }
  0x10   :  { %v78_v10 = vadd.f32 %v77_v3, %v4601_v2  ;;  %v95_v12 = vadd.f32 %v88_v5, %v87_v4  ;;  %v3162_v14 = vld [vmem:[#allocation8 + $0x258] sm:$0xf]  ;;  %v4217_v15 = vld [vmem:[#allocation8 + $0x268] sm:$0xf0]  ;;  %v3003_v17 = vor.u32 %v4177_v13, %v3002_v9  ;;  %v4172_v28 = vld [vmem:[#allocation8 + $0x100] sm:$0xf0] }
  0x11   :  { %v4627_v16 = vld [vmem:[%s4793_s0 + $0x28] sm:$0xff]  ;;  %v3163_v18 = vor.u32 %v4217_v15, %v3162_v14  ;;  %v4257_v20 = vld [vmem:[#allocation8 + $0x3a8] sm:$0xf0]  ;;  %v4635_v29 = vld [vmem:[%s4793_s0 + $0x30] sm:$0xff]  ;;  %v2983_v31 = vor.u32 %v4172_v28, %v2982_v27 }
  0x12   :  { %v3322_v19 = vld [vmem:[#allocation8 + $0x398] sm:$0xf]  ;;  %v79_v22 = vadd.f32 %v78_v10, %v4614_v7  ;;  %v96_v24 = vadd.f32 %v95_v12, %v89_v6  ;;  %v4297_v26 = vld [vmem:[#allocation8 + $0x4e8] sm:$0xf0]  ;;  %2287 = vmatpush.bf16.msra.mxu0 %v3003_v17  ;;  %v3142_v32 = vld [vmem:[#allocation8 + $0x230] sm:$0xf]  ;;  %v92_v36 = vmul.f32 %v4627_v16, %v4627_v16  ;;  %v93_v59 = vmul.f32 %v4635_v29, %v4635_v29 }
  0x13   :  { %v3482_v21 = vld [vmem:[#allocation8 + $0x4d8] sm:$0xf]  ;;  %v3323_v25 = vor.u32 %v4257_v20, %v3322_v19  ;;  %2300 = vmatpush.bf16.msra.mxu1 %v3163_v18  ;;  %v4212_v33 = vld [vmem:[#allocation8 + $0x240] sm:$0xf0]  ;;  %v3302_v34 = vld [vmem:[#allocation8 + $0x370] sm:$0xf] }
  0x14   :  { %v3483_v30 = vor.u32 %v4297_v26, %v3482_v21  ;;  %v80_v35 = vadd.f32 %v79_v22, %v4619_v8  ;;  %v97_v37 = vadd.f32 %v96_v24, %v90_v11  ;;  %v3143_v38 = vor.u32 %v4212_v33, %v3142_v32  ;;  %v4252_v39 = vld [vmem:[#allocation8 + $0x380] sm:$0xf0]  ;;  %v3462_v40 = vld [vmem:[#allocation8 + $0x4b0] sm:$0xf]  ;;  %v4643_v42 = vld [vmem:[%s4793_s0 + $0x38] sm:$0xff] }
  0x15   :  { %2313 = vmatpush.bf16.msra.mxu2 %v3323_v25  ;;  %v4292_v41 = vld [vmem:[#allocation8 + $0x4c0] sm:$0xf0]  ;;  %v3303_v43 = vor.u32 %v4252_v39, %v3302_v34  ;;  %v2962_v45 = vld [vmem:[#allocation8 + $0xc8] sm:$0xf]  ;;  %v4167_v46 = vld [vmem:[#allocation8 + $0xd8] sm:$0xf0]  ;;  %v94_v14 = vmul.f32 %v4643_v42, %v4643_v42 }
  0x16   :  { %2326 = vmatpush.bf16.msra.mxu3 %v3483_v30  ;;  %v3463_v44 = vor.u32 %v4292_v41, %v3462_v40  ;;  %v3122_v47 = vld [vmem:[#allocation8 + $0x208] sm:$0xf]  ;;  %v81_v48 = vadd.f32 %v80_v35, %v4627_v16  ;;  %v98_v49 = vadd.f32 %v97_v37, %v91_v23  ;;  %v4207_v50 = vld [vmem:[#allocation8 + $0x218] sm:$0xf0]  ;;  %2288 = vmatpush.bf16.msra.mxu0 %v2983_v31  ;;  %v2942_v57 = vld [vmem:[#allocation8 + $0xa0] sm:$0xf] }
  0x17   :  { %v3282_v51 = vld [vmem:[#allocation8 + $0x348] sm:$0xf]  ;;  %v4247_v52 = vld [vmem:[#allocation8 + $0x358] sm:$0xf0]  ;;  %2301 = vmatpush.bf16.msra.mxu1 %v3143_v38  ;;  %v2963_v53 = vor.u32 %v4167_v46, %v2962_v45  ;;  %v3123_v54 = vor.u32 %v4207_v50, %v3122_v47  ;;  %v4162_v62 = vld [vmem:[#allocation8 + $0xb0] sm:$0xf0] }
  0x18   :  { %v3442_v55 = vld [vmem:[#allocation8 + $0x488] sm:$0xf]  ;;  %v4287_v56 = vld [vmem:[#allocation8 + $0x498] sm:$0xf0]  ;;  %v82_v58 = vadd.f32 %v81_v48, %v4635_v29  ;;  %v99_v60 = vadd.f32 %v98_v49, %v92_v36  ;;  %v3283_v61 = vor.u32 %v4247_v52, %v3282_v51  ;;  %v3102_v63 = vld [vmem:[#allocation8 + $0x1e0] sm:$0xf]  ;;  %v2943_v12 = vor.u32 %v4162_v62, %v2942_v57 }
  0x19   :  { %2314 = vmatpush.bf16.msra.mxu2 %v3303_v43  ;;  %v4202_v3 = vld [vmem:[#allocation8 + $0x1f0] sm:$0xf0]  ;;  %v3443_v4 = vor.u32 %v4287_v56, %v3442_v55  ;;  %v3262_v5 = vld [vmem:[#allocation8 + $0x320] sm:$0xf]  ;;  %v2922_v20 = vld [vmem:[#allocation8 + $0x78] sm:$0xf] }
  0x1a   :  { %2327 = vmatpush.bf16.msra.mxu3 %v3463_v44  ;;  %v4242_v6 = vld [vmem:[#allocation8 + $0x330] sm:$0xf0]  ;;  %v83_v9 = vadd.f32 %v82_v58, %v4643_v42  ;;  %v3422_v10 = vld [vmem:[#allocation8 + $0x460] sm:$0xf]  ;;  %2289 = vmatpush.bf16.msra.mxu0 %v2963_v53  ;;  %v3103_v13 = vor.u32 %v4202_v3, %v3102_v63  ;;  %v100_v15 = vadd.f32 %v99_v60, %v93_v59  ;;  %v4157_v21 = vld [vmem:[#allocation8 + $0x88] sm:$0xf0] }
  0x1b   :  { %v4282_v11 = vld [vmem:[#allocation8 + $0x470] sm:$0xf0]  ;;  %2302 = vmatpush.bf16.msra.mxu1 %v3123_v54  ;;  %v3263_v17 = vor.u32 %v4242_v6, %v3262_v5  ;;  %v3082_v22 = vld [vmem:[#allocation8 + $0x1b8] sm:$0xf]  ;;  %v2923_v23 = vor.u32 %v4157_v21, %v2922_v20  ;;  %v4197_v24 = vld [vmem:[#allocation8 + $0x1c8] sm:$0xf0] }
  0x1c   :  { %84 = vadd.xlane.f32.xlu0 %v83_v9  ;;  %v3423_v18 = vor.u32 %v4282_v11, %v3422_v10  ;;  %v101_v19 = vadd.f32 %v100_v15, %v94_v14  ;;  %v3242_v25 = vld [vmem:[#allocation8 + $0x2f8] sm:$0xf]  ;;  %v4237_v26 = vld [vmem:[#allocation8 + $0x308] sm:$0xf0]  ;;  %v3083_v27 = vor.u32 %v4197_v24, %v3082_v22  ;;  %v2902_v32 = vld [vmem:[#allocation8 + $0x50] sm:$0xf] }
  0x1d   :  { %2315 = vmatpush.bf16.msra.mxu2 %v3283_v61  ;;  %v3243_v28 = vor.u32 %v4237_v26, %v3242_v25  ;;  %v3402_v30 = vld [vmem:[#allocation8 + $0x438] sm:$0xf]  ;;  %v4277_v31 = vld [vmem:[#allocation8 + $0x448] sm:$0xf0]  ;;  %v4152_v34 = vld [vmem:[#allocation8 + $0x60] sm:$0xf0] }
  0x1e   :  { %2328 = vmatpush.bf16.msra.mxu3 %v3443_v4  ;;  %2290 = vmatpush.bf16.msra.mxu0 %v2943_v12  ;;  %v3403_v33 = vor.u32 %v4277_v31, %v3402_v30  ;;  %v3062_v35 = vld [vmem:[#allocation8 + $0x190] sm:$0xf]  ;;  %v4192_v36 = vld [vmem:[#allocation8 + $0x1a0] sm:$0xf0]  ;;  %v2903_v37 = vor.u32 %v4152_v34, %v2902_v32  ;;  %v2882_v46 = vld [vmem:[#allocation8 + $0x28] sm:$0xf] }
  0x1f   :  { %2303 = vmatpush.bf16.msra.mxu1 %v3103_v13  ;;  %v3063_v38 = vor.u32 %v4192_v36, %v3062_v35  ;;  %v3222_v39 = vld [vmem:[#allocation8 + $0x2d0] sm:$0xf]  ;;  %v4232_v40 = vld [vmem:[#allocation8 + $0x2e0] sm:$0xf0]  ;;  %v4147_v47 = vld [vmem:[#allocation8 + $0x38] sm:$0xf0] }
  0x20   :  { %v3382_v41 = vld [vmem:[#allocation8 + $0x410] sm:$0xf]  ;;  %v3223_v43 = vor.u32 %v4232_v40, %v3222_v39  ;;  %v4272_v44 = vld [vmem:[#allocation8 + $0x420] sm:$0xf0]  ;;  %v3042_v48 = vld [vmem:[#allocation8 + $0x168] sm:$0xf]  ;;  %v2883_v49 = vor.u32 %v4147_v47, %v2882_v46 }
  0x21   :  { %2316 = vmatpush.bf16.msra.mxu2 %v3263_v17  ;;  %v3383_v45 = vor.u32 %v4272_v44, %v3382_v41  ;;  %v4187_v50 = vld [vmem:[#allocation8 + $0x178] sm:$0xf0]  ;;  %v3202_v51 = vld [vmem:[#allocation8 + $0x2a8] sm:$0xf]  ;;  %v2862_v58 = vld [vmem:[#allocation8] sm:$0xf] }
  0x22   :  { %2329 = vmatpush.bf16.msra.mxu3 %v3423_v18  ;;  %2291 = vmatpush.bf16.msra.mxu0 %v2923_v23  ;;  %v4227_v52 = vld [vmem:[#allocation8 + $0x2b8] sm:$0xf0]  ;;  %v3043_v53 = vor.u32 %v4187_v50, %v3042_v48  ;;  %v3362_v55 = vld [vmem:[#allocation8 + $0x3e8] sm:$0xf]  ;;  %v4142_v59 = vld [vmem:[#allocation8 + $0x10] sm:$0xf0] }
  0x23   :  { %2304 = vmatpush.bf16.msra.mxu1 %v3083_v27  ;;  %v3203_v54 = vor.u32 %v4227_v52, %v3202_v51  ;;  %v4267_v56 = vld [vmem:[#allocation8 + $0x3f8] sm:$0xf0]  ;;  %v3022_v60 = vld [vmem:[#allocation8 + $0x140] sm:$0xf]  ;;  %v2863_v61 = vor.u32 %v4142_v59, %v2862_v58  ;;  %v4182_v62 = vld [vmem:[#allocation8 + $0x150] sm:$0xf0] }
  0x24   :  { %102 = vadd.xlane.f32.xlu0 %v101_v19  ;;  %v3363_v57 = vor.u32 %v4267_v56, %v3362_v55  ;;  %v3182_v63 = vld [vmem:[#allocation8 + $0x280] sm:$0xf]  ;;  %v4222_v3 = vld [vmem:[#allocation8 + $0x290] sm:$0xf0]  ;;  %v3023_v4 = vor.u32 %v4182_v62, %v3022_v60  ;;  %v3642_v10 = vld [vmem:[#allocation8 + $0x618] sm:$0xf] }
  0x25   :  { %2317 = vmatpush.bf16.msra.mxu2 %v3243_v28  ;;  %v3183_v5 = vor.u32 %v4222_v3, %v3182_v63  ;;  %v3342_v6 = vld [vmem:[#allocation8 + $0x3c0] sm:$0xf]  ;;  %v4262_v9 = vld [vmem:[#allocation8 + $0x3d0] sm:$0xf0]  ;;  %v4337_v12 = vld [vmem:[#allocation8 + $0x628] sm:$0xf0] }
  0x26   :  { %2330 = vmatpush.bf16.msra.mxu3 %v3403_v33  ;;  %2292 = vmatpush.bf16.msra.mxu0 %v2903_v37  ;;  %v3343_v11 = vor.u32 %v4262_v9, %v3342_v6  ;;  %v3802_v13 = vld [vmem:[#allocation8 + $0x758] sm:$0xf]  ;;  %v4377_v14 = vld [vmem:[#allocation8 + $0x768] sm:$0xf0]  ;;  %v3643_v15 = vor.u32 %v4337_v12, %v3642_v10  ;;  %v3622_v23 = vld [vmem:[#allocation8 + $0x5f0] sm:$0xf] }
  0x27   :  { %2305 = vmatpush.bf16.msra.mxu1 %v3063_v38  ;;  %v3803_v17 = vor.u32 %v4377_v14, %v3802_v13  ;;  %v3962_v18 = vld [vmem:[#allocation8 + $0x898] sm:$0xf]  ;;  %v4417_v19 = vld [vmem:[#allocation8 + $0x8a8] sm:$0xf0]  ;;  %v4332_v24 = vld [vmem:[#allocation8 + $0x600] sm:$0xf0] }
  0x28   :  { %v4122_v20 = vld [vmem:[#allocation8 + $0x9d8] sm:$0xf]  ;;  %v3963_v21 = vor.u32 %v4417_v19, %v3962_v18  ;;  %v4457_v22 = vld [vmem:[#allocation8 + $0x9e8] sm:$0xf0]  ;;  %v3623_v26 = vor.u32 %v4332_v24, %v3622_v23  ;;  %v3782_v27 = vld [vmem:[#allocation8 + $0x730] sm:$0xf] }
  0x29   :  { %2318 = vmatpush.bf16.msra.mxu2 %v3223_v43  ;;  %v4123_v25 = vor.u32 %v4457_v22, %v4122_v20  ;;  %v4372_v28 = vld [vmem:[#allocation8 + $0x740] sm:$0xf0]  ;;  %v3942_v30 = vld [vmem:[#allocation8 + $0x870] sm:$0xf]  ;;  %v3602_v37 = vld [vmem:[#allocation8 + $0x5c8] sm:$0xf] }
  0x2a   :  { %2331 = vmatpush.bf16.msra.mxu3 %v3383_v45  ;;  %2293 = vmatpush.bf16.msra.mxu0 %v2883_v49  ;;  %v3783_v31 = vor.u32 %v4372_v28, %v3782_v27  ;;  %v4412_v32 = vld [vmem:[#allocation8 + $0x880] sm:$0xf0]  ;;  %v4102_v33 = vld [vmem:[#allocation8 + $0x9b0] sm:$0xf]  ;;  %v4327_v38 = vld [vmem:[#allocation8 + $0x5d8] sm:$0xf0] }
  0x2b   :  { %2306 = vmatpush.bf16.msra.mxu1 %v3043_v53  ;;  %v4452_v34 = vld [vmem:[#allocation8 + $0x9c0] sm:$0xf0]  ;;  %v3943_v35 = vor.u32 %v4412_v32, %v3942_v30  ;;  %v3762_v39 = vld [vmem:[#allocation8 + $0x708] sm:$0xf]  ;;  %v3603_v40 = vor.u32 %v4327_v38, %v3602_v37  ;;  %v4367_v41 = vld [vmem:[#allocation8 + $0x718] sm:$0xf0] }
  0x2c   :  { %v4103_v36 = vor.u32 %v4452_v34, %v4102_v33  ;;  %v3922_v43 = vld [vmem:[#allocation8 + $0x848] sm:$0xf]  ;;  %v4407_v44 = vld [vmem:[#allocation8 + $0x858] sm:$0xf0]  ;;  %v3763_v45 = vor.u32 %v4367_v41, %v3762_v39  ;;  %v3582_v50 = vld [vmem:[#allocation8 + $0x5a0] sm:$0xf] }
  0x2d   :  { %2319 = vmatpush.bf16.msra.mxu2 %v3203_v54  ;;  %v3923_v46 = vor.u32 %v4407_v44, %v3922_v43  ;;  %v4082_v47 = vld [vmem:[#allocation8 + $0x988] sm:$0xf]  ;;  %v4447_v48 = vld [vmem:[#allocation8 + $0x998] sm:$0xf0]  ;;  %v4322_v51 = vld [vmem:[#allocation8 + $0x5b0] sm:$0xf0] }
  0x2e   :  { %2332 = vmatpush.bf16.msra.mxu3 %v3363_v57  ;;  %2294 = vmatpush.bf16.msra.mxu0 %v2863_v61  ;;  %v4083_v49 = vor.u32 %v4447_v48, %v4082_v47  ;;  %v3742_v52 = vld [vmem:[#allocation8 + $0x6e0] sm:$0xf]  ;;  %v3583_v53 = vor.u32 %v4322_v51, %v3582_v50  ;;  %v4362_v54 = vld [vmem:[#allocation8 + $0x6f0] sm:$0xf0]  ;;  %v3562_v62 = vld [vmem:[#allocation8 + $0x578] sm:$0xf] }
  0x2f   :  { %2307 = vmatpush.bf16.msra.mxu1 %v3023_v4  ;;  %v3902_v55 = vld [vmem:[#allocation8 + $0x820] sm:$0xf]  ;;  %v4402_v56 = vld [vmem:[#allocation8 + $0x830] sm:$0xf0]  ;;  %v3743_v57 = vor.u32 %v4362_v54, %v3742_v52  ;;  %v4317_v63 = vld [vmem:[#allocation8 + $0x588] sm:$0xf0] }
  0x30   :  { %v3903_v58 = vor.u32 %v4402_v56, %v3902_v55  ;;  %v4062_v59 = vld [vmem:[#allocation8 + $0x960] sm:$0xf]  ;;  %v4442_v60 = vld [vmem:[#allocation8 + $0x970] sm:$0xf0]  ;;  %v3722_v3 = vld [vmem:[#allocation8 + $0x6b8] sm:$0xf]  ;;  %v3563_v4 = vor.u32 %v4317_v63, %v3562_v62 }
  0x31   :  { %2320 = vmatpush.bf16.msra.mxu2 %v3183_v5  ;;  %v4063_v61 = vor.u32 %v4442_v60, %v4062_v59  ;;  %v4357_v5 = vld [vmem:[#allocation8 + $0x6c8] sm:$0xf0]  ;;  %v3882_v6 = vld [vmem:[#allocation8 + $0x7f8] sm:$0xf]  ;;  %v4312_v18 = vld [vmem:[#allocation8 + $0x560] sm:$0xf0] }
  0x32   :  { %2333 = vmatpush.bf16.msra.mxu3 %v3343_v11  ;;  %2339 = vmatpush.bf16.msrb.mxu0 %v3643_v15  ;;  %v4397_v9 = vld [vmem:[#allocation8 + $0x808] sm:$0xf0]  ;;  %v3723_v10 = vor.u32 %v4357_v5, %v3722_v3  ;;  %v4042_v12 = vld [vmem:[#allocation8 + $0x938] sm:$0xf]  ;;  %v3702_v19 = vld [vmem:[#allocation8 + $0x690] sm:$0xf] }
  0x33   :  { %2352 = vmatpush.bf16.msrb.mxu1 %v3803_v17  ;;  %v3883_v11 = vor.u32 %v4397_v9, %v3882_v6  ;;  %v4437_v13 = vld [vmem:[#allocation8 + $0x948] sm:$0xf0]  ;;  %v3542_v17 = vld [vmem:[#allocation8 + $0x550] sm:$0xf]  ;;  %v4352_v20 = vld [vmem:[#allocation8 + $0x6a0] sm:$0xf0] }
  0x34   :  { %v4043_v15 = vor.u32 %v4437_v13, %v4042_v12  ;;  %v3543_v22 = vor.u32 %v4312_v18, %v3542_v17  ;;  %v3703_v23 = vor.u32 %v4352_v20, %v3702_v19  ;;  %v4392_v24 = vld [vmem:[#allocation8 + $0x7e0] sm:$0xf0]  ;;  %v3522_v28 = vld [vmem:[#allocation8 + $0x528] sm:$0xf]  ;;  %v4307_v30 = vld [vmem:[#allocation8 + $0x538] sm:$0xf0] }
  0x35   :  { %2365 = vmatpush.bf16.msrb.mxu2 %v3963_v21  ;;  %v3862_v21 = vld [vmem:[#allocation8 + $0x7d0] sm:$0xf]  ;;  %v4347_v33 = vld [vmem:[#allocation8 + $0x678] sm:$0xf0]  ;;  %v3842_v34 = vld [vmem:[#allocation8 + $0x7a8] sm:$0xf]  ;;  %v3523_v39 = vor.u32 %v4307_v30, %v3522_v28 }
  0x36   :  { %2378 = vmatpush.bf16.msrb.mxu3 %v4123_v25  ;;  %2340 = vmatpush.bf16.msrb.mxu0 %v3623_v26  ;;  %v4022_v25 = vld [vmem:[#allocation8 + $0x910] sm:$0xf]  ;;  %v4432_v26 = vld [vmem:[#allocation8 + $0x920] sm:$0xf0]  ;;  %v3863_v27 = vor.u32 %v4392_v24, %v3862_v21  ;;  %v4002_v37 = vld [vmem:[#allocation8 + $0x8e8] sm:$0xf] }
  0x37   :  { %2353 = vmatpush.bf16.msrb.mxu1 %v3783_v31  ;;  %v3682_v31 = vld [vmem:[#allocation8 + $0x668] sm:$0xf]  ;;  %v4023_v32 = vor.u32 %v4432_v26, %v4022_v25  ;;  %v4427_v38 = vld [vmem:[#allocation8 + $0x8f8] sm:$0xf0]  ;;  %v3502_v41 = vld [vmem:[#allocation8 + $0x500] sm:$0xf] }
  0x38   :  { %v4302_v44 = vld [vmem:[#allocation8 + $0x510] sm:$0xf0]  ;;  %v4003_v48 = vor.u32 %v4427_v38, %v4002_v37  ;;  %v4658_v6 = vld [vmem:[#allocation6] sm:$0xff]  ;;  %v3324_v37 = vld [vmem:[#allocation8 + $0x3ac] sm:$0xf0] }
  0x39   :  { %2366 = vmatpush.bf16.msrb.mxu2 %v3943_v35  ;;  %v4387_v35 = vld [vmem:[#allocation8 + $0x7b8] sm:$0xf0]  ;;  %v4382_v50 = vld [vmem:[#allocation8 + $0x790] sm:$0xf0]  ;;  %v3503_v55 = vor.u32 %v4302_v44, %v3502_v41  ;;  %v160_v17 = vperm.slane %v4658_v6, 0  ;;  %v161_v19 = vperm.slane %v4658_v6, 1 }
  0x3a   :  { %2379 = vmatpush.bf16.msrb.mxu3 %v4103_v36  ;;  %2341 = vmatpush.bf16.msrb.mxu0 %v3603_v40  ;;  %v3683_v40 = vor.u32 %v4347_v33, %v3682_v31  ;;  %v3843_v43 = vor.u32 %v4387_v35, %v3842_v34  ;;  %v4422_v54 = vld [vmem:[#allocation8 + $0x8d0] sm:$0xf0]  ;;  %v163_v20 = vperm.slane %v4658_v6, 3  ;;  %v4175_v31 = vld [vmem:[#allocation8 + $0x11c] sm:$0xf] }
  0x3b   :  { %2354 = vmatpush.bf16.msrb.mxu1 %v3763_v45  ;;  %v3662_v45 = vld [vmem:[#allocation8 + $0x640] sm:$0xf]  ;;  %v4215_v33 = vld [vmem:[#allocation8 + $0x25c] sm:$0xf]  ;;  %v3164_v34 = vld [vmem:[#allocation8 + $0x26c] sm:$0xf0] }
  0x3c   :  { %v4255_v35 = vld [vmem:[#allocation8 + $0x39c] sm:$0xf] }
  0x3d   :  { %2367 = vmatpush.bf16.msrb.mxu2 %v3923_v46  ;;  %v4342_v46 = vld [vmem:[#allocation8 + $0x650] sm:$0xf0] }
  0x3e   :  { %2380 = vmatpush.bf16.msrb.mxu3 %v4083_v49  ;;  %2342 = vmatpush.bf16.msrb.mxu0 %v3583_v53  ;;  %v3822_v49 = vld [vmem:[#allocation8 + $0x780] sm:$0xf]  ;;  %v3663_v56 = vor.u32 %v4342_v46, %v3662_v45 }
  0x3f   :  { %2355 = vmatpush.bf16.msrb.mxu1 %v3743_v57  ;;  %v3982_v53 = vld [vmem:[#allocation8 + $0x8c0] sm:$0xf] }
  0x40   :  { %v3983_v59 = vor.u32 %v4422_v54, %v3982_v53  ;;  %v3327_v53 = vor.u32 %v4255_v35, %v3324_v37  ;;  %v3484_v54 = vld [vmem:[#allocation8 + $0x4ec] sm:$0xf0] }
  0x41   :  { %2368 = vmatpush.bf16.msrb.mxu2 %v3903_v58  ;;  %v3823_v58 = vor.u32 %v4382_v50, %v3822_v49  ;;  %v164_v50 = vperm.slane %v4658_v6, 4 }
  0x42   :  { %2381 = vmatpush.bf16.msrb.mxu3 %v4063_v61  ;;  %2343 = vmatpush.bf16.msrb.mxu0 %v3563_v4  ;;  %v4656_v4 = vld [vmem:[#allocation4] sm:$0xff] }
  0x43   :  { %2356 = vmatpush.bf16.msrb.mxu1 %v3723_v10  ;;  %v135_v13 = vperm.slane %v4656_v4, 0  ;;  %v138_v18 = vperm.slane %v4656_v4, 3  ;;  %v139_v24 = vperm.slane %v4656_v4, 4  ;;  %v140_v25 = vperm.slane %v4656_v4, 5 }
  0x45   :  { %2369 = vmatpush.bf16.msrb.mxu2 %v3883_v11 }
  0x46   :  { %2382 = vmatpush.bf16.msrb.mxu3 %v4043_v15  ;;  %2344 = vmatpush.bf16.msrb.mxu0 %v3543_v22  ;;  %v136_v15 = vperm.slane %v4656_v4, 1 }
  0x47   :  { %2357 = vmatpush.bf16.msrb.mxu1 %v3703_v23 }
  0x49   :  { %2370 = vmatpush.bf16.msrb.mxu2 %v3863_v27 }
  0x4a   :  { %2383 = vmatpush.bf16.msrb.mxu3 %v4023_v32  ;;  %2345 = vmatpush.bf16.msrb.mxu0 %v3523_v39  ;;  %v3004_v32 = vld [vmem:[#allocation8 + $0x12c] sm:$0xf0] }
  0x4b   :  { %2358 = vmatpush.bf16.msrb.mxu1 %v3683_v40 }
  0x4d   :  { %2371 = vmatpush.bf16.msrb.mxu2 %v3843_v43 }
  0x4e   :  { %2384 = vmatpush.bf16.msrb.mxu3 %v4003_v48  ;;  %2346 = vmatpush.bf16.msrb.mxu0 %v3503_v55 }
  0x4f   :  { %2359 = vmatpush.bf16.msrb.mxu1 %v3663_v56  ;;  %v141_v56 = vperm.slane %v4656_v4, 6 }
  0x51   :  { %2372 = vmatpush.bf16.msrb.mxu2 %v3823_v58 }
  0x52   :  { %2385 = vmatpush.bf16.msrb.mxu3 %v3983_v59 }
  0x8f   :  { %v85_v14 = vpop.xlane.xlu0 %84 }
  0x90   :  { %v4652_v36 = vmul.f32 0.0009765625, %v85_v14 }
  0x92   :  { %v105_v51 = vmul.f32 %v4652_v36, %v4652_v36  ;;  %v107_v9 = vsub.f32 %v4591_v0, %v4652_v36  ;;  %v108_v10 = vsub.f32 %v4596_v1, %v4652_v36  ;;  %v109_v11 = vsub.f32 %v4601_v2, %v4652_v36 }
  0x93   :  { %v110_v14 = vsub.f32 %v4614_v7, %v4652_v36  ;;  %v137_v0 = vperm.slane %v4656_v4, 2  ;;  %v162_v2 = vperm.slane %v4658_v6, 2  ;;  %v111_v38 = vsub.f32 %v4619_v8, %v4652_v36 }
  0x94   :  { %v112_v39 = vsub.f32 %v4627_v16, %v4652_v36  ;;  %v113_v40 = vsub.f32 %v4635_v29, %v4652_v36  ;;  %v114_v41 = vsub.f32 %v4643_v42, %v4652_v36  ;;  %v4295_v16 = vld [vmem:[#allocation8 + $0x4dc] sm:$0xf]  ;;  %v142_v42 = vperm.slane %v4656_v4, 7  ;;  %v4210_v4 = vld [vmem:[#allocation8 + $0x234] sm:$0xf] }
  0x97   :  { %v103_v47 = vpop.xlane.xlu0 %102 }
  0x98   :  { %v104_v52 = vmul.f32 0.0009765625, %v103_v47  ;;  %v3007_v47 = vor.u32 %v4175_v31, %v3004_v32  ;;  %v3284_v32 = vld [vmem:[#allocation8 + $0x35c] sm:$0xf0] }
  0x9a   :  { %v106_v57 = vsub.f32 %v104_v52, %v105_v51  ;;  %v3167_v52 = vor.u32 %v4215_v33, %v3164_v34  ;;  %v4285_v33 = vld [vmem:[#allocation8 + $0x48c] sm:$0xf]  ;;  %v3444_v34 = vld [vmem:[#allocation8 + $0x49c] sm:$0xf0] }
  0x9c   :  { %v115_v60 = vadd.f32 1e-05, %v106_v57 }
  0x9e   :  { %4465 = vrsqrt.f32 %v115_v60  ;;  %vm122_vm1 = vweird.f32 %v115_v60 }
  0xa4   :  { %v4466_v61 = vpop.eup %4465 }
  0xa5   :  { %v117_v62 = vmul.f32 %v4466_v61, %v115_v60  ;;  %vm123_vm0 = vweird.f32 %v4466_v61  ;;  %v3487_v60 = vor.u32 %v4295_v16, %v3484_v54  ;;  %v2924_v54 = vld [vmem:[#allocation8 + $0x8c] sm:$0xf0] }
  0xa6   :  { %vm124_vm2 = vmor %vm122_vm1, %vm123_vm0 }
  0xa7   :  { %v118_v63 = vmul.f32 %v4466_v61, %v117_v62 }
  0xa9   :  { %v119_v3 = vmul.f32 0.5, %v118_v63 }
  0xab   :  { %v120_v5 = vsub.f32 1.5, %v119_v3  ;;  %v165_v3 = vperm.slane %v4658_v6, 5 }
  0xad   :  { %v121_v12 = vmul.f32 %v4466_v61, %v120_v5 }
  0xaf   :  { %v125_v1 = vsel %vm124_vm2, %v4466_v61, %v121_v12  ;;  %v4170_v61 = vld [vmem:[#allocation8 + $0xf4] sm:$0xf]  ;;  %v2984_v12 = vld [vmem:[#allocation8 + $0x104] sm:$0xf0] }
  0xb0   :  { %v126_v21 = vmul.f32 %v125_v1, %v107_v9  ;;  %v127_v22 = vmul.f32 %v125_v1, %v108_v10  ;;  %v128_v23 = vmul.f32 %v125_v1, %v109_v11  ;;  %v129_v7 = vmul.f32 %v125_v1, %v110_v14  ;;  %v4250_v14 = vld [vmem:[#allocation8 + $0x374] sm:$0xf] }
  0xb1   :  { %v130_v48 = vmul.f32 %v125_v1, %v111_v38  ;;  %v131_v49 = vmul.f32 %v125_v1, %v112_v39  ;;  %v132_v55 = vmul.f32 %v125_v1, %v113_v40  ;;  %v133_v29 = vmul.f32 %v125_v1, %v114_v41  ;;  %v4160_v38 = vld [vmem:[#allocation8 + $0xa4] sm:$0xf]  ;;  %v2944_v39 = vld [vmem:[#allocation8 + $0xb4] sm:$0xf0] }
  0xb2   :  { %v151_v26 = vmul.f32 %v135_v13, %v126_v21  ;;  %v152_v27 = vmul.f32 %v136_v15, %v127_v22  ;;  %v153_v28 = vmul.f32 %v137_v0, %v128_v23  ;;  %v154_v30 = vmul.f32 %v138_v18, %v129_v7  ;;  %v3144_v13 = vld [vmem:[#allocation8 + $0x244] sm:$0xf0]  ;;  %v4165_v23 = vld [vmem:[#allocation8 + $0xcc] sm:$0xf]  ;;  %v2964_v7 = vld [vmem:[#allocation8 + $0xdc] sm:$0xf0] }
  0xb3   :  { %v155_v62 = vmul.f32 %v139_v24, %v130_v48  ;;  %v156_v63 = vmul.f32 %v140_v25, %v131_v49  ;;  %v3304_v15 = vld [vmem:[#allocation8 + $0x384] sm:$0xf0]  ;;  %v158_v0 = vmul.f32 %v142_v42, %v133_v29  ;;  %v166_v18 = vperm.slane %v4658_v6, 6  ;;  %v3264_v48 = vld [vmem:[#allocation8 + $0x334] sm:$0xf0] }
  0xb4   :  { %v176_v43 = vadd.f32 %v160_v17, %v151_v26  ;;  %v177_v44 = vadd.f32 %v161_v19, %v152_v27  ;;  %v178_v45 = vadd.f32 %v162_v2, %v153_v28  ;;  %v179_v46 = vadd.f32 %v163_v20, %v154_v30  ;;  %v4290_v19 = vld [vmem:[#allocation8 + $0x4b4] sm:$0xf]  ;;  %v3464_v2 = vld [vmem:[#allocation8 + $0x4c4] sm:$0xf0]  ;;  %v4205_v26 = vld [vmem:[#allocation8 + $0x20c] sm:$0xf] }
  0xb5   :  { %v157_v17 = vmul.f32 %v141_v56, %v132_v55  ;;  %v167_v1 = vperm.slane %v4658_v6, 7  ;;  %v2987_v20 = vor.u32 %v4170_v61, %v2984_v12  ;;  %v3147_v21 = vor.u32 %v4210_v4, %v3144_v13  ;;  %v3124_v27 = vld [vmem:[#allocation8 + $0x21c] sm:$0xf0]  ;;  %v4245_v28 = vld [vmem:[#allocation8 + $0x34c] sm:$0xf] }
  0xb6   :  { %v184_v51 = vpack.c.bf16 %v177_v44, %v176_v43  ;;  %v185_v8 = vpack.c.bf16 %v179_v46, %v178_v45  ;;  %v3307_v22 = vor.u32 %v4250_v14, %v3304_v15  ;;  %v180_v24 = vadd.f32 %v164_v50, %v155_v62  ;;  %v4200_v44 = vld [vmem:[#allocation8 + $0x1e4] sm:$0xf]  ;;  %v3104_v45 = vld [vmem:[#allocation8 + $0x1f4] sm:$0xf0]  ;;  %v4195_v55 = vld [vmem:[#allocation8 + $0x1bc] sm:$0xf] }
  0xb7   :  { %v181_v25 = vadd.f32 %v165_v3, %v156_v63  ;;  %v3467_v6 = vor.u32 %v4290_v19, %v3464_v2  ;;  %v182_v30 = vadd.f32 %v166_v18, %v157_v17  ;;  %v183_v31 = vadd.f32 %v167_v1, %v158_v0  ;;  %v4240_v46 = vld [vmem:[#allocation8 + $0x324] sm:$0xf]  ;;  %v3424_v50 = vld [vmem:[#allocation8 + $0x474] sm:$0xf0]  ;;  %v3084_v29 = vld [vmem:[#allocation8 + $0x1cc] sm:$0xf0] }
  0xb8   :  { %v599_v36 = vunpack.c.l.b16 %v184_v51  ;;  %v600_v57 = vunpack.c.h.b16 %v184_v51  ;;  %v601_v58 = vunpack.c.l.b16 %v185_v8  ;;  %v602_v59 = vunpack.c.h.b16 %v185_v8  ;;  %v4280_v49 = vld [vmem:[#allocation8 + $0x464] sm:$0xf]  ;;  %v4155_v51 = vld [vmem:[#allocation8 + $0x7c] sm:$0xf]  ;;  %v3404_v61 = vld [vmem:[#allocation8 + $0x44c] sm:$0xf0] }
  0xb9   :  { %v2967_v35 = vor.u32 %v4165_v23, %v2964_v7  ;;  %v3127_v37 = vor.u32 %v4205_v26, %v3124_v27  ;;  %v186_v40 = vpack.c.bf16 %v181_v25, %v180_v24  ;;  %v3287_v41 = vor.u32 %v4245_v28, %v3284_v32  ;;  %v4150_v13 = vld [vmem:[#allocation8 + $0x54] sm:$0xf]  ;;  %v2904_v14 = vld [vmem:[#allocation8 + $0x64] sm:$0xf0]  ;;  %v4145_v7 = vld [vmem:[#allocation8 + $0x2c] sm:$0xf] }
  0xba   :  { %v4690_v5 = vpack.c.b16 %v599_v36, %v599_v36  ;;  %v4692_v9 = vpack.c.b16 %v600_v57, %v600_v57  ;;  %v4694_v10 = vpack.c.b16 %v601_v58, %v601_v58  ;;  %v4696_v11 = vpack.c.b16 %v602_v59, %v602_v59  ;;  %v4235_v58 = vld [vmem:[#allocation8 + $0x2fc] sm:$0xf]  ;;  %v3244_v59 = vld [vmem:[#allocation8 + $0x30c] sm:$0xf0]  ;;  %v4190_v18 = vld [vmem:[#allocation8 + $0x194] sm:$0xf] }
  0xbb   :  { %v3447_v43 = vor.u32 %v4285_v33, %v3444_v34  ;;  %v2947_v8 = vor.u32 %v4160_v38, %v2944_v39  ;;  %v604_v16 = vunpack.c.h.b16 %v186_v40  ;;  %v3267_v56 = vor.u32 %v4240_v46, %v3264_v48  ;;  %v3064_v1 = vld [vmem:[#allocation8 + $0x1a4] sm:$0xf0]  ;;  %v4230_v19 = vld [vmem:[#allocation8 + $0x2d4] sm:$0xf]  ;;  %v2884_v24 = vld [vmem:[#allocation8 + $0x3c] sm:$0xf0] }
  0xbc   :  { %2295 = vmatmul.bf16.vlgmr.msra.gmra.mxu0 %v4690_v5  ;;  %2308 = vmatmul.bf16.vlgmr.msra.gmra.mxu1 %v4692_v9  ;;  %v3427_v42 = vor.u32 %v4280_v49, %v3424_v50  ;;  %v2927_v62 = vor.u32 %v4155_v51, %v2924_v54  ;;  %v3087_v63 = vor.u32 %v4195_v55, %v3084_v29  ;;  %v3224_v2 = vld [vmem:[#allocation8 + $0x2e4] sm:$0xf0]  ;;  %v4185_v26 = vld [vmem:[#allocation8 + $0x16c] sm:$0xf]  ;;  %v3044_v27 = vld [vmem:[#allocation8 + $0x17c] sm:$0xf0] }
  0xbd   :  { %2321 = vmatmul.bf16.vlgmr.msra.gmra.mxu2 %v4694_v10  ;;  %2334 = vmatmul.bf16.vlgmr.msra.gmra.mxu3 %v4696_v11  ;;  %v4706_v12 = vpack.c.b16 %v604_v16, %v604_v16  ;;  %v3247_v4 = vor.u32 %v4235_v58, %v3244_v59  ;;  %v3067_v23 = vor.u32 %v4190_v18, %v3064_v1  ;;  %v4225_v28 = vld [vmem:[#allocation8 + $0x2ac] sm:$0xf]  ;;  %v3364_v32 = vld [vmem:[#allocation8 + $0x3fc] sm:$0xf0]  ;;  %v4140_v33 = vld [vmem:[#allocation8 + $0x4] sm:$0xf] }
  0xbe   :  { %2391 = vmatpush.bf16.msra.mxu0 %v3007_v47  ;;  %2404 = vmatpush.bf16.msra.mxu1 %v3167_v52  ;;  %v187_v47 = vpack.c.bf16 %v183_v31, %v182_v30  ;;  %v3107_v52 = vor.u32 %v4200_v44, %v3104_v45  ;;  %v3227_v25 = vor.u32 %v4230_v19, %v3224_v2  ;;  %v3204_v30 = vld [vmem:[#allocation8 + $0x2bc] sm:$0xf0]  ;;  %v4265_v31 = vld [vmem:[#allocation8 + $0x3ec] sm:$0xf]  ;;  %v4180_v38 = vld [vmem:[#allocation8 + $0x144] sm:$0xf] }
  0xbf   :  { %2417 = vmatpush.bf16.msra.mxu2 %v3327_v53  ;;  %2430 = vmatpush.bf16.msra.mxu3 %v3487_v60  ;;  %v603_v53 = vunpack.c.l.b16 %v186_v40  ;;  %v4275_v60 = vld [vmem:[#allocation8 + $0x43c] sm:$0xf]  ;;  %v2887_v34 = vor.u32 %v4145_v7, %v2884_v24  ;;  %v3024_v39 = vld [vmem:[#allocation8 + $0x154] sm:$0xf0]  ;;  %v3207_v40 = vor.u32 %v4225_v28, %v3204_v30  ;;  %v4260_v45 = vld [vmem:[#allocation8 + $0x3c4] sm:$0xf] }
  0xc0   :  { %v605_v36 = vunpack.c.l.b16 %v187_v47  ;;  %v606_v57 = vunpack.c.h.b16 %v187_v47  ;;  %v3407_v0 = vor.u32 %v4275_v60, %v3404_v61  ;;  %v3184_v44 = vld [vmem:[#allocation8 + $0x294] sm:$0xf0]  ;;  %v4335_v47 = vld [vmem:[#allocation8 + $0x61c] sm:$0xf]  ;;  %v3644_v48 = vld [vmem:[#allocation8 + $0x62c] sm:$0xf0] }
  0xc1   :  { %v4704_v3 = vpack.c.b16 %v603_v53, %v603_v53  ;;  %v3344_v46 = vld [vmem:[#allocation8 + $0x3d4] sm:$0xf0]  ;;  %v4375_v49 = vld [vmem:[#allocation8 + $0x75c] sm:$0xf]  ;;  %v3804_v50 = vld [vmem:[#allocation8 + $0x76c] sm:$0xf0] }
  0xc2   :  { %2392 = vmatpush.bf16.msra.mxu0 %v2987_v20  ;;  %2405 = vmatpush.bf16.msra.mxu1 %v3147_v21  ;;  %v4708_v15 = vpack.c.b16 %v605_v36, %v605_v36  ;;  %v4710_v17 = vpack.c.b16 %v606_v57, %v606_v57  ;;  %v4270_v20 = vld [vmem:[#allocation8 + $0x414] sm:$0xf]  ;;  %v3384_v21 = vld [vmem:[#allocation8 + $0x424] sm:$0xf0]  ;;  %v4415_v51 = vld [vmem:[#allocation8 + $0x89c] sm:$0xf]  ;;  %v3347_v29 = vor.u32 %v4260_v45, %v3344_v46 }
  0xc3   :  { %2418 = vmatpush.bf16.msra.mxu2 %v3307_v22  ;;  %2431 = vmatpush.bf16.msra.mxu3 %v3467_v6  ;;  %v2907_v22 = vor.u32 %v4150_v13, %v2904_v14  ;;  %v3387_v6 = vor.u32 %v4270_v20, %v3384_v21  ;;  %v3964_v53 = vld [vmem:[#allocation8 + $0x8ac] sm:$0xf0]  ;;  %v4455_v16 = vld [vmem:[#allocation8 + $0x9dc] sm:$0xf]  ;;  %v4330_v36 = vld [vmem:[#allocation8 + $0x5f4] sm:$0xf] }
  0xc4   :  { %v4124_v54 = vld [vmem:[#allocation8 + $0x9ec] sm:$0xf0]  ;;  %v3624_v57 = vld [vmem:[#allocation8 + $0x604] sm:$0xf0]  ;;  %v3967_v58 = vor.u32 %v4415_v51, %v3964_v53  ;;  %v4370_v60 = vld [vmem:[#allocation8 + $0x734] sm:$0xf] }
  0xc5   :  { %v4127_v59 = vor.u32 %v4455_v16, %v4124_v54  ;;  %v3784_v61 = vld [vmem:[#allocation8 + $0x744] sm:$0xf0]  ;;  %v3627_v14 = vor.u32 %v4330_v36, %v3624_v57  ;;  %v4325_v18 = vld [vmem:[#allocation8 + $0x5cc] sm:$0xf]  ;;  %v3604_v1 = vld [vmem:[#allocation8 + $0x5dc] sm:$0xf0] }
  0xc6   :  { %2393 = vmatpush.bf16.msra.mxu0 %v2967_v35  ;;  %2406 = vmatpush.bf16.msra.mxu1 %v3127_v37  ;;  %v3047_v35 = vor.u32 %v4185_v26, %v3044_v27  ;;  %v2864_v37 = vld [vmem:[#allocation8 + $0x14] sm:$0xf0]  ;;  %v4104_v13 = vld [vmem:[#allocation8 + $0x9c4] sm:$0xf0]  ;;  %v4365_v20 = vld [vmem:[#allocation8 + $0x70c] sm:$0xf] }
  0xc7   :  { %2419 = vmatpush.bf16.msra.mxu2 %v3287_v41  ;;  %2432 = vmatpush.bf16.msra.mxu3 %v3447_v43  ;;  %v3367_v41 = vor.u32 %v4265_v31, %v3364_v32  ;;  %v4220_v43 = vld [vmem:[#allocation8 + $0x284] sm:$0xf]  ;;  %v3764_v21 = vld [vmem:[#allocation8 + $0x71c] sm:$0xf0]  ;;  %v4445_v7 = vld [vmem:[#allocation8 + $0x98c] sm:$0xf] }
  0xc8   :  { %v3187_v55 = vor.u32 %v4220_v43, %v3184_v44  ;;  %v4084_v24 = vld [vmem:[#allocation8 + $0x99c] sm:$0xf0]  ;;  %v4320_v26 = vld [vmem:[#allocation8 + $0x5a4] sm:$0xf]  ;;  %v3584_v27 = vld [vmem:[#allocation8 + $0x5b4] sm:$0xf0] }
  0xc9   :  { %v4087_v30 = vor.u32 %v4445_v7, %v4084_v24  ;;  %v4360_v31 = vld [vmem:[#allocation8 + $0x6e4] sm:$0xf]  ;;  %v3744_v32 = vld [vmem:[#allocation8 + $0x6f4] sm:$0xf0]  ;;  %v4355_v45 = vld [vmem:[#allocation8 + $0x6bc] sm:$0xf] }
  0xca   :  { %2394 = vmatpush.bf16.msra.mxu0 %v2947_v8  ;;  %2407 = vmatpush.bf16.msra.mxu1 %v3107_v52  ;;  %v2867_v8 = vor.u32 %v4140_v33, %v2864_v37  ;;  %v3027_v52 = vor.u32 %v4180_v38, %v3024_v39  ;;  %v4400_v33 = vld [vmem:[#allocation8 + $0x824] sm:$0xf]  ;;  %v4064_v37 = vld [vmem:[#allocation8 + $0x974] sm:$0xf0]  ;;  %v3587_v38 = vor.u32 %v4320_v26, %v3584_v27  ;;  %v3724_v46 = vld [vmem:[#allocation8 + $0x6cc] sm:$0xf0] }
  0xcb   :  { %2420 = vmatpush.bf16.msra.mxu2 %v3267_v56  ;;  %2433 = vmatpush.bf16.msra.mxu3 %v3427_v42  ;;  %v3647_v56 = vor.u32 %v4335_v47, %v3644_v48  ;;  %v3807_v42 = vor.u32 %v4375_v49, %v3804_v50  ;;  %v3747_v39 = vor.u32 %v4360_v31, %v3744_v32  ;;  %v4395_v47 = vld [vmem:[#allocation8 + $0x7fc] sm:$0xf]  ;;  %v3884_v48 = vld [vmem:[#allocation8 + $0x80c] sm:$0xf0]  ;;  %v3544_v53 = vld [vmem:[#allocation8 + $0x564] sm:$0xf0] }
  0xcc   :  { %2347 = vmatmul.bf16.vlgmr.msrb.gmra.mxu0 %v4704_v3  ;;  %2360 = vmatmul.bf16.vlgmr.msrb.gmra.mxu1 %v4706_v12  ;;  %v4435_v49 = vld [vmem:[#allocation8 + $0x93c] sm:$0xf]  ;;  %v4044_v50 = vld [vmem:[#allocation8 + $0x94c] sm:$0xf0]  ;;  %v3887_v16 = vor.u32 %v4395_v47, %v3884_v48  ;;  %v4430_v36 = vld [vmem:[#allocation8 + $0x914] sm:$0xf] }
  0xcd   :  { %2373 = vmatmul.bf16.vlgmr.msrb.gmra.mxu2 %v4708_v15  ;;  %2386 = vmatmul.bf16.vlgmr.msrb.gmra.mxu3 %v4710_v17  ;;  %v4047_v54 = vor.u32 %v4435_v49, %v4044_v50  ;;  %v4024_v57 = vld [vmem:[#allocation8 + $0x924] sm:$0xf0]  ;;  %v4420_v26 = vld [vmem:[#allocation8 + $0x8c4] sm:$0xf]  ;;  %v3984_v27 = vld [vmem:[#allocation8 + $0x8d4] sm:$0xf0] }
  0xce   :  { %2395 = vmatpush.bf16.msra.mxu0 %v2927_v62  ;;  %2408 = vmatpush.bf16.msra.mxu1 %v3087_v63  ;;  %v4410_v62 = vld [vmem:[#allocation8 + $0x874] sm:$0xf]  ;;  %v3944_v63 = vld [vmem:[#allocation8 + $0x884] sm:$0xf0]  ;;  %v3170_v31 = vld [vmem:[#allocation8 + $0x260] sm:$0xf] }
  0xcf   :  { %2421 = vmatpush.bf16.msra.mxu2 %v3247_v4  ;;  %2434 = vmatpush.bf16.msra.mxu3 %v3407_v0  ;;  %v4450_v4 = vld [vmem:[#allocation8 + $0x9b4] sm:$0xf]  ;;  %v3787_v0 = vor.u32 %v4370_v60, %v3784_v61  ;;  %v3947_v19 = vor.u32 %v4410_v62, %v3944_v63  ;;  %v4305_v60 = vld [vmem:[#allocation8 + $0x52c] sm:$0xf]  ;;  %v3524_v61 = vld [vmem:[#allocation8 + $0x53c] sm:$0xf0]  ;;  %v4027_v63 = vor.u32 %v4430_v36, %v4024_v57 }
  0xd0   :  { %v4107_v2 = vor.u32 %v4450_v4, %v4104_v13  ;;  %v4345_v4 = vld [vmem:[#allocation8 + $0x66c] sm:$0xf]  ;;  %v3684_v13 = vld [vmem:[#allocation8 + $0x67c] sm:$0xf0]  ;;  %v4218_v32 = vld [vmem:[#allocation8 + $0x270] sm:$0xf0] }
  0xd1   :  { %v3150_v49 = vld [vmem:[#allocation8 + $0x238] sm:$0xf]  ;;  %v4213_v50 = vld [vmem:[#allocation8 + $0x248] sm:$0xf0]  ;;  %v3130_v36 = vld [vmem:[#allocation8 + $0x210] sm:$0xf] }
  0xd2   :  { %2396 = vmatpush.bf16.msra.mxu0 %v2907_v22  ;;  %2409 = vmatpush.bf16.msra.mxu1 %v3067_v23  ;;  %v4405_v22 = vld [vmem:[#allocation8 + $0x84c] sm:$0xf]  ;;  %v3924_v23 = vld [vmem:[#allocation8 + $0x85c] sm:$0xf0]  ;;  %v4208_v57 = vld [vmem:[#allocation8 + $0x220] sm:$0xf0] }
  0xd3   :  { %2422 = vmatpush.bf16.msra.mxu2 %v3227_v25  ;;  %2435 = vmatpush.bf16.msra.mxu3 %v3387_v6  ;;  %v3607_v25 = vor.u32 %v4325_v18, %v3604_v1  ;;  %v3767_v6 = vor.u32 %v4365_v20, %v3764_v21  ;;  %v3927_v28 = vor.u32 %v4405_v22, %v3924_v23  ;;  %v4425_v18 = vld [vmem:[#allocation8 + $0x8ec] sm:$0xf]  ;;  %v4004_v1 = vld [vmem:[#allocation8 + $0x8fc] sm:$0xf0]  ;;  %v3504_v21 = vld [vmem:[#allocation8 + $0x514] sm:$0xf0] }
  0xd4   :  { %v3687_v20 = vor.u32 %v4345_v4, %v3684_v13  ;;  %v4340_v22 = vld [vmem:[#allocation8 + $0x644] sm:$0xf]  ;;  %v3664_v23 = vld [vmem:[#allocation8 + $0x654] sm:$0xf0]  ;;  %v4007_v24 = vor.u32 %v4425_v18, %v4004_v1  ;;  %v2950_v4 = vld [vmem:[#allocation8 + $0xa8] sm:$0xf] }
  0xd5   :  { %v4163_v13 = vld [vmem:[#allocation8 + $0xb8] sm:$0xf0]  ;;  %v3110_v18 = vld [vmem:[#allocation8 + $0x1e8] sm:$0xf] }
  0xd6   :  { %2397 = vmatpush.bf16.msra.mxu0 %v2887_v34  ;;  %2410 = vmatpush.bf16.msra.mxu1 %v3047_v35  ;;  %v3904_v34 = vld [vmem:[#allocation8 + $0x834] sm:$0xf0]  ;;  %v4440_v35 = vld [vmem:[#allocation8 + $0x964] sm:$0xf]  ;;  %v4203_v1 = vld [vmem:[#allocation8 + $0x1f8] sm:$0xf0] }
  0xd7   :  { %2423 = vmatpush.bf16.msra.mxu2 %v3207_v40  ;;  %2436 = vmatpush.bf16.msra.mxu3 %v3367_v41  ;;  %v4315_v40 = vld [vmem:[#allocation8 + $0x57c] sm:$0xf]  ;;  %v3564_v41 = vld [vmem:[#allocation8 + $0x58c] sm:$0xf0]  ;;  %v3907_v43 = vor.u32 %v4400_v33, %v3904_v34  ;;  %v4067_v44 = vor.u32 %v4440_v35, %v4064_v37  ;;  %v3330_v33 = vld [vmem:[#allocation8 + $0x3a0] sm:$0xf]  ;;  %v3667_v35 = vor.u32 %v4340_v22, %v3664_v23 }
  0xd8   :  { %v3567_v51 = vor.u32 %v4315_v40, %v3564_v41  ;;  %v4258_v37 = vld [vmem:[#allocation8 + $0x3b0] sm:$0xf0]  ;;  %v3987_v41 = vor.u32 %v4420_v26, %v3984_v27  ;;  %v2951_v22 = vor.u32 %v4163_v13, %v2950_v4  ;;  %v3111_v23 = vor.u32 %v4203_v1, %v3110_v18  ;;  %v3090_v26 = vld [vmem:[#allocation8 + $0x1c0] sm:$0xf]  ;;  %v3350_v4 = vld [vmem:[#allocation8 + $0x3c8] sm:$0xf] }
  0xd9   :  { %v3331_v47 = vor.u32 %v4258_v37, %v3330_v33  ;;  %v4198_v27 = vld [vmem:[#allocation8 + $0x1d0] sm:$0xf0]  ;;  %v4153_v37 = vld [vmem:[#allocation8 + $0x68] sm:$0xf0]  ;;  %v4263_v13 = vld [vmem:[#allocation8 + $0x3d8] sm:$0xf0] }
  0xda   :  { %2398 = vmatpush.bf16.msra.mxu0 %v2867_v8  ;;  %2411 = vmatpush.bf16.msra.mxu1 %v3027_v52  ;;  %v3727_v8 = vor.u32 %v4355_v45, %v3724_v46  ;;  %v4310_v52 = vld [vmem:[#allocation8 + $0x554] sm:$0xf]  ;;  %v2990_v45 = vld [vmem:[#allocation8 + $0xf8] sm:$0xf]  ;;  %v4173_v46 = vld [vmem:[#allocation8 + $0x108] sm:$0xf0] }
  0xdb   :  { %2424 = vmatpush.bf16.msra.mxu2 %v3187_v55  ;;  %2437 = vmatpush.bf16.msra.mxu3 %v3347_v29  ;;  %v4350_v55 = vld [vmem:[#allocation8 + $0x694] sm:$0xf]  ;;  %v3704_v29 = vld [vmem:[#allocation8 + $0x6a4] sm:$0xf0]  ;;  %v3810_v18 = vld [vmem:[#allocation8 + $0x760] sm:$0xf] }
  0xdc   :  { %v4378_v1 = vld [vmem:[#allocation8 + $0x770] sm:$0xf0] }
  0xdd   :  { %2399 = vmatmul.bf16.vlgmr.msra.gmra.mxu0 %v4690_v5  ;;  %2412 = vmatmul.bf16.vlgmr.msra.gmra.mxu1 %v4692_v9 }
  0xde   :  { %2443 = vmatpush.bf16.msrb.mxu0 %v3647_v56  ;;  %2456 = vmatpush.bf16.msrb.mxu1 %v3807_v42  ;;  %v4390_v56 = vld [vmem:[#allocation8 + $0x7d4] sm:$0xf]  ;;  %v3864_v42 = vld [vmem:[#allocation8 + $0x7e4] sm:$0xf0] }
  0xdf   :  { %2469 = vmatpush.bf16.msrb.mxu2 %v3967_v58  ;;  %2482 = vmatpush.bf16.msrb.mxu3 %v4127_v59  ;;  %v3547_v58 = vor.u32 %v4310_v52, %v3544_v53  ;;  %v3707_v59 = vor.u32 %v4350_v55, %v3704_v29  ;;  %v3867_v62 = vor.u32 %v4390_v56, %v3864_v42  ;;  %v3470_v52 = vld [vmem:[#allocation8 + $0x4b8] sm:$0xf]  ;;  %v4293_v53 = vld [vmem:[#allocation8 + $0x4c8] sm:$0xf0]  ;;  %v2970_v55 = vld [vmem:[#allocation8 + $0xd0] sm:$0xf] }
  0xe0   :  { %2425 = vmatmul.bf16.vlgmr.msra.gmra.mxu2 %v4694_v10  ;;  %2438 = vmatmul.bf16.vlgmr.msra.gmra.mxu3 %v4696_v11  ;;  %v4168_v29 = vld [vmem:[#allocation8 + $0xe0] sm:$0xf0]  ;;  %v3471_v42 = vor.u32 %v4293_v53, %v3470_v52  ;;  %v3050_v52 = vld [vmem:[#allocation8 + $0x170] sm:$0xf] }
  0xe1   :  { %v4188_v53 = vld [vmem:[#allocation8 + $0x180] sm:$0xf0] }
  0xe2   :  { %2444 = vmatpush.bf16.msrb.mxu0 %v3627_v14  ;;  %2457 = vmatpush.bf16.msrb.mxu1 %v3787_v0  ;;  %v4385_v14 = vld [vmem:[#allocation8 + $0x7ac] sm:$0xf]  ;;  %v3844_v0 = vld [vmem:[#allocation8 + $0x7bc] sm:$0xf0] }
  0xe3   :  { %2470 = vmatpush.bf16.msrb.mxu2 %v3947_v19  ;;  %2483 = vmatpush.bf16.msrb.mxu3 %v4107_v2  ;;  %v4300_v19 = vld [vmem:[#allocation8 + $0x504] sm:$0xf]  ;;  %v3527_v2 = vor.u32 %v4305_v60, %v3524_v61  ;;  %v3847_v7 = vor.u32 %v4385_v14, %v3844_v0  ;;  %v3450_v60 = vld [vmem:[#allocation8 + $0x490] sm:$0xf] }
  0xe4   :  { %v3507_v34 = vor.u32 %v4300_v19, %v3504_v21  ;;  %v4288_v61 = vld [vmem:[#allocation8 + $0x4a0] sm:$0xf0]  ;;  %v3270_v19 = vld [vmem:[#allocation8 + $0x328] sm:$0xf]  ;;  %v4283_v21 = vld [vmem:[#allocation8 + $0x478] sm:$0xf0] }
  0xe5   :  { %v3451_v0 = vor.u32 %v4288_v61, %v3450_v60 }
  0xe6   :  { %2445 = vmatpush.bf16.msrb.mxu0 %v3607_v25  ;;  %2458 = vmatpush.bf16.msrb.mxu1 %v3767_v6  ;;  %v4380_v25 = vld [vmem:[#allocation8 + $0x784] sm:$0xf]  ;;  %v3824_v6 = vld [vmem:[#allocation8 + $0x794] sm:$0xf0] }
  0xe7   :  { %2471 = vmatpush.bf16.msrb.mxu2 %v3927_v28  ;;  %2484 = vmatpush.bf16.msrb.mxu3 %v4087_v30  ;;  %v3010_v28 = vld [vmem:[#allocation8 + $0x120] sm:$0xf]  ;;  %v4178_v30 = vld [vmem:[#allocation8 + $0x130] sm:$0xf0]  ;;  %v3827_v40 = vor.u32 %v4380_v25, %v3824_v6 }
  0xea   :  { %2446 = vmatpush.bf16.msrb.mxu0 %v3587_v38  ;;  %2459 = vmatpush.bf16.msrb.mxu1 %v3747_v39  ;;  %v3490_v38 = vld [vmem:[#allocation8 + $0x4e0] sm:$0xf]  ;;  %v4298_v39 = vld [vmem:[#allocation8 + $0x4f0] sm:$0xf0] }
  0xeb   :  { %2472 = vmatpush.bf16.msrb.mxu2 %v3907_v43  ;;  %2485 = vmatpush.bf16.msrb.mxu3 %v4067_v44  ;;  %v3011_v43 = vor.u32 %v4178_v30, %v3010_v28  ;;  %v3171_v44 = vor.u32 %v4218_v32, %v3170_v31  ;;  %v3491_v48 = vor.u32 %v4298_v39, %v3490_v38  ;;  %v3250_v28 = vld [vmem:[#allocation8 + $0x300] sm:$0xf]  ;;  %v4238_v30 = vld [vmem:[#allocation8 + $0x310] sm:$0xf0] }
  0xec   :  { %v3410_v31 = vld [vmem:[#allocation8 + $0x440] sm:$0xf]  ;;  %v4278_v32 = vld [vmem:[#allocation8 + $0x450] sm:$0xf0]  ;;  %v3251_v38 = vor.u32 %v4238_v30, %v3250_v28 }
  0xed   :  { %v3411_v39 = vor.u32 %v4278_v32, %v3410_v31  ;;  %v3790_v31 = vld [vmem:[#allocation8 + $0x738] sm:$0xf]  ;;  %v4373_v32 = vld [vmem:[#allocation8 + $0x748] sm:$0xf0] }
  0xee   :  { %2447 = vmatpush.bf16.msrb.mxu0 %v3567_v51  ;;  %2460 = vmatpush.bf16.msrb.mxu1 %v3727_v8  ;;  %v3310_v51 = vld [vmem:[#allocation8 + $0x378] sm:$0xf]  ;;  %v4253_v8 = vld [vmem:[#allocation8 + $0x388] sm:$0xf0] }
  0xef   :  { %2473 = vmatpush.bf16.msrb.mxu2 %v3887_v16  ;;  %2486 = vmatpush.bf16.msrb.mxu3 %v4047_v54  ;;  %v2991_v16 = vor.u32 %v4173_v46, %v2990_v45  ;;  %v3151_v54 = vor.u32 %v4213_v50, %v3150_v49  ;;  %v3311_v56 = vor.u32 %v4253_v8, %v3310_v51  ;;  %v3390_v45 = vld [vmem:[#allocation8 + $0x418] sm:$0xf]  ;;  %v4273_v46 = vld [vmem:[#allocation8 + $0x428] sm:$0xf0]  ;;  %v2890_v49 = vld [vmem:[#allocation8 + $0x30] sm:$0xf] }
  0xf0   :  { %v4148_v50 = vld [vmem:[#allocation8 + $0x40] sm:$0xf0]  ;;  %v3391_v8 = vor.u32 %v4273_v46, %v3390_v45  ;;  %v3770_v45 = vld [vmem:[#allocation8 + $0x710] sm:$0xf] }
  0xf1   :  { %v4368_v46 = vld [vmem:[#allocation8 + $0x720] sm:$0xf0] }
  0xf2   :  { %2448 = vmatpush.bf16.msrb.mxu0 %v3547_v58  ;;  %2461 = vmatpush.bf16.msrb.mxu1 %v3707_v59  ;;  %v3290_v58 = vld [vmem:[#allocation8 + $0x350] sm:$0xf]  ;;  %v4248_v59 = vld [vmem:[#allocation8 + $0x360] sm:$0xf0] }
  0xf3   :  { %2474 = vmatpush.bf16.msrb.mxu2 %v3867_v62  ;;  %2487 = vmatpush.bf16.msrb.mxu3 %v4027_v63  ;;  %v2971_v62 = vor.u32 %v4168_v29, %v2970_v55  ;;  %v3131_v63 = vor.u32 %v4208_v57, %v3130_v36  ;;  %v3291_v14 = vor.u32 %v4248_v59, %v3290_v58  ;;  %v3370_v55 = vld [vmem:[#allocation8 + $0x3f0] sm:$0xf]  ;;  %v4268_v29 = vld [vmem:[#allocation8 + $0x400] sm:$0xf0]  ;;  %v4143_v57 = vld [vmem:[#allocation8 + $0x18] sm:$0xf0] }
  0xf4   :  { %v3051_v36 = vor.u32 %v4188_v53, %v3050_v52  ;;  %v3030_v58 = vld [vmem:[#allocation8 + $0x148] sm:$0xf]  ;;  %v4183_v59 = vld [vmem:[#allocation8 + $0x158] sm:$0xf0]  ;;  %v3371_v61 = vor.u32 %v4268_v29, %v3370_v55 }
  0xf5   :  { %v3590_v52 = vld [vmem:[#allocation8 + $0x5a8] sm:$0xf]  ;;  %v4323_v53 = vld [vmem:[#allocation8 + $0x5b8] sm:$0xf0] }
  0xf6   :  { %2449 = vmatpush.bf16.msrb.mxu0 %v3527_v2  ;;  %2462 = vmatpush.bf16.msrb.mxu1 %v3687_v20  ;;  %v4243_v2 = vld [vmem:[#allocation8 + $0x338] sm:$0xf0]  ;;  %v3430_v20 = vld [vmem:[#allocation8 + $0x468] sm:$0xf] }
  0xf7   :  { %2475 = vmatpush.bf16.msrb.mxu2 %v3847_v7  ;;  %2488 = vmatpush.bf16.msrb.mxu3 %v4007_v24  ;;  %v2930_v7 = vld [vmem:[#allocation8 + $0x80] sm:$0xf]  ;;  %v4158_v24 = vld [vmem:[#allocation8 + $0x90] sm:$0xf0]  ;;  %v3271_v25 = vor.u32 %v4243_v2, %v3270_v19  ;;  %v3431_v6 = vor.u32 %v4283_v21, %v3430_v20  ;;  %v3031_v20 = vor.u32 %v4183_v59, %v3030_v58  ;;  %v3750_v55 = vld [vmem:[#allocation8 + $0x6e8] sm:$0xf] }
  0xf8   :  { %v2931_v33 = vor.u32 %v4158_v24, %v2930_v7  ;;  %v3970_v19 = vld [vmem:[#allocation8 + $0x8a0] sm:$0xf]  ;;  %v4418_v21 = vld [vmem:[#allocation8 + $0x8b0] sm:$0xf0]  ;;  %v3351_v24 = vor.u32 %v4263_v13, %v3350_v4  ;;  %v4363_v29 = vld [vmem:[#allocation8 + $0x6f8] sm:$0xf0]  ;;  %v3591_v58 = vor.u32 %v4323_v53, %v3590_v52 }
  0xf9   :  { %v3971_v28 = vor.u32 %v4418_v21, %v3970_v19  ;;  %v3751_v59 = vor.u32 %v4363_v29, %v3750_v55  ;;  %v3730_v4 = vld [vmem:[#allocation8 + $0x6c0] sm:$0xf]  ;;  %v4358_v13 = vld [vmem:[#allocation8 + $0x6d0] sm:$0xf0]  ;;  %v4313_v21 = vld [vmem:[#allocation8 + $0x568] sm:$0xf0] }
  0xfa   :  { %2450 = vmatpush.bf16.msrb.mxu0 %v3507_v34  ;;  %2463 = vmatpush.bf16.msrb.mxu1 %v3667_v35  ;;  %v3091_v34 = vor.u32 %v4198_v27, %v3090_v26  ;;  %v2910_v35 = vld [vmem:[#allocation8 + $0x58] sm:$0xf]  ;;  %v4333_v27 = vld [vmem:[#allocation8 + $0x608] sm:$0xf0]  ;;  %v3990_v52 = vld [vmem:[#allocation8 + $0x8c8] sm:$0xf] }
  0xfb   :  { %2476 = vmatpush.bf16.msrb.mxu2 %v3827_v40  ;;  %2489 = vmatpush.bf16.msrb.mxu3 %v3987_v41  ;;  %v3070_v40 = vld [vmem:[#allocation8 + $0x198] sm:$0xf]  ;;  %v4193_v41 = vld [vmem:[#allocation8 + $0x1a8] sm:$0xf0]  ;;  %v4423_v53 = vld [vmem:[#allocation8 + $0x8d8] sm:$0xf0] }
  0xfc   :  { %v3630_v26 = vld [vmem:[#allocation8 + $0x5f8] sm:$0xf]  ;;  %v4216_v55 = vld [vmem:[#allocation8 + $0x264] sm:$0xf] }
  0xfd   :  { %2451 = vmatmul.bf16.vlgmr.msrb.gmra.mxu0 %v4704_v3  ;;  %2464 = vmatmul.bf16.vlgmr.msrb.gmra.mxu1 %v4706_v12  ;;  %v3172_v29 = vld [vmem:[#allocation8 + $0x274] sm:$0xf0] }
  0xfe   :  { %2495 = vmatpush.bf16.msra.mxu0 %v3011_v43  ;;  %2508 = vmatpush.bf16.msra.mxu1 %v3171_v44  ;;  %v3230_v43 = vld [vmem:[#allocation8 + $0x2d8] sm:$0xf]  ;;  %v4233_v44 = vld [vmem:[#allocation8 + $0x2e8] sm:$0xf0] }
  0xff   :  { %2521 = vmatpush.bf16.msra.mxu2 %v3331_v47  ;;  %2534 = vmatpush.bf16.msra.mxu3 %v3491_v48  ;;  %v2911_v47 = vor.u32 %v4153_v37, %v2910_v35  ;;  %v3071_v48 = vor.u32 %v4193_v41, %v3070_v40  ;;  %v3231_v51 = vor.u32 %v4233_v44, %v3230_v43  ;;  %v4110_v35 = vld [vmem:[#allocation8 + $0x9b8] sm:$0xf]  ;;  %v4453_v37 = vld [vmem:[#allocation8 + $0x9c8] sm:$0xf0]  ;;  %v3610_v40 = vld [vmem:[#allocation8 + $0x5d0] sm:$0xf] }
 0x100   :  { %2477 = vmatmul.bf16.vlgmr.msrb.gmra.mxu2 %v4708_v15  ;;  %2490 = vmatmul.bf16.vlgmr.msrb.gmra.mxu3 %v4710_v17  ;;  %v4328_v41 = vld [vmem:[#allocation8 + $0x5e0] sm:$0xf0]  ;;  %v4111_v44 = vor.u32 %v4453_v37, %v4110_v35  ;;  %v3690_v35 = vld [vmem:[#allocation8 + $0x670] sm:$0xf] }
 0x101   :  { %v4348_v37 = vld [vmem:[#allocation8 + $0x680] sm:$0xf0] }
 0x102   :  { %2496 = vmatpush.bf16.msra.mxu0 %v2991_v16  ;;  %2509 = vmatpush.bf16.msra.mxu1 %v3151_v54  ;;  %v3210_v16 = vld [vmem:[#allocation8 + $0x2b0] sm:$0xf]  ;;  %v4228_v54 = vld [vmem:[#allocation8 + $0x2c0] sm:$0xf0] }
 0x103   :  { %2522 = vmatpush.bf16.msra.mxu2 %v3311_v56  ;;  %2535 = vmatpush.bf16.msra.mxu3 %v3471_v42  ;;  %v2870_v56 = vld [vmem:[#allocation8 + $0x8] sm:$0xf]  ;;  %v2891_v42 = vor.u32 %v4148_v50, %v2890_v49  ;;  %v3211_v60 = vor.u32 %v4228_v54, %v3210_v16  ;;  %v4090_v49 = vld [vmem:[#allocation8 + $0x990] sm:$0xf]  ;;  %v4448_v50 = vld [vmem:[#allocation8 + $0x9a0] sm:$0xf0] }
 0x104   :  { %v2871_v2 = vor.u32 %v4143_v57, %v2870_v56  ;;  %v4091_v54 = vor.u32 %v4448_v50, %v4090_v49  ;;  %v3910_v56 = vld [vmem:[#allocation8 + $0x828] sm:$0xf]  ;;  %v4443_v57 = vld [vmem:[#allocation8 + $0x978] sm:$0xf0] }
 0x106   :  { %2497 = vmatpush.bf16.msra.mxu0 %v2971_v62  ;;  %2510 = vmatpush.bf16.msra.mxu1 %v3131_v63  ;;  %v3190_v62 = vld [vmem:[#allocation8 + $0x288] sm:$0xf]  ;;  %v4223_v63 = vld [vmem:[#allocation8 + $0x298] sm:$0xf0] }
 0x107   :  { %2523 = vmatpush.bf16.msra.mxu2 %v3291_v14  ;;  %2536 = vmatpush.bf16.msra.mxu3 %v3451_v0  ;;  %v3650_v14 = vld [vmem:[#allocation8 + $0x620] sm:$0xf]  ;;  %v4338_v0 = vld [vmem:[#allocation8 + $0x630] sm:$0xf0]  ;;  %v3191_v7 = vor.u32 %v4223_v63, %v3190_v62 }
 0x10a   :  { %2498 = vmatpush.bf16.msra.mxu0 %v2951_v22  ;;  %2511 = vmatpush.bf16.msra.mxu1 %v3111_v23  ;;  %v4130_v22 = vld [vmem:[#allocation8 + $0x9e0] sm:$0xf]  ;;  %v4458_v23 = vld [vmem:[#allocation8 + $0x9f0] sm:$0xf0] }
 0x10b   :  { %2524 = vmatpush.bf16.msra.mxu2 %v3271_v25  ;;  %2537 = vmatpush.bf16.msra.mxu3 %v3431_v6  ;;  %v3651_v25 = vor.u32 %v4338_v0, %v3650_v14  ;;  %v3811_v6 = vor.u32 %v4378_v1, %v3810_v18  ;;  %v4131_v30 = vor.u32 %v4458_v23, %v4130_v22  ;;  %v3890_v14 = vld [vmem:[#allocation8 + $0x800] sm:$0xf]  ;;  %v4398_v0 = vld [vmem:[#allocation8 + $0x810] sm:$0xf0] }
 0x10c   :  { %v4050_v18 = vld [vmem:[#allocation8 + $0x940] sm:$0xf]  ;;  %v4438_v1 = vld [vmem:[#allocation8 + $0x950] sm:$0xf0]  ;;  %v3891_v22 = vor.u32 %v4398_v0, %v3890_v14 }
 0x10d   :  { %v4051_v23 = vor.u32 %v4438_v1, %v4050_v18  ;;  %v4211_v18 = vld [vmem:[#allocation8 + $0x23c] sm:$0xf]  ;;  %v3152_v1 = vld [vmem:[#allocation8 + $0x24c] sm:$0xf0] }
 0x10e   :  { %2499 = vmatpush.bf16.msra.mxu0 %v2931_v33  ;;  %2512 = vmatpush.bf16.msra.mxu1 %v3091_v34  ;;  %v3950_v33 = vld [vmem:[#allocation8 + $0x878] sm:$0xf]  ;;  %v4413_v34 = vld [vmem:[#allocation8 + $0x888] sm:$0xf0] }
 0x10f   :  { %2525 = vmatpush.bf16.msra.mxu2 %v3251_v38  ;;  %2538 = vmatpush.bf16.msra.mxu3 %v3411_v39  ;;  %v3631_v38 = vor.u32 %v4333_v27, %v3630_v26  ;;  %v3791_v39 = vor.u32 %v4373_v32, %v3790_v31  ;;  %v3951_v43 = vor.u32 %v4413_v34, %v3950_v33  ;;  %v4030_v26 = vld [vmem:[#allocation8 + $0x918] sm:$0xf]  ;;  %v4433_v27 = vld [vmem:[#allocation8 + $0x928] sm:$0xf0]  ;;  %v3530_v31 = vld [vmem:[#allocation8 + $0x530] sm:$0xf] }
 0x110   :  { %v4308_v32 = vld [vmem:[#allocation8 + $0x540] sm:$0xf0]  ;;  %v4031_v34 = vor.u32 %v4433_v27, %v4030_v26  ;;  %v4206_v26 = vld [vmem:[#allocation8 + $0x214] sm:$0xf]  ;;  %v3132_v27 = vld [vmem:[#allocation8 + $0x224] sm:$0xf0] }
 0x112   :  { %2500 = vmatpush.bf16.msra.mxu0 %v2911_v47  ;;  %2513 = vmatpush.bf16.msra.mxu1 %v3071_v48  ;;  %v3930_v47 = vld [vmem:[#allocation8 + $0x850] sm:$0xf]  ;;  %v4408_v48 = vld [vmem:[#allocation8 + $0x860] sm:$0xf0] }
 0x113   :  { %2526 = vmatpush.bf16.msra.mxu2 %v3231_v51  ;;  %2539 = vmatpush.bf16.msra.mxu3 %v3391_v8  ;;  %v3611_v51 = vor.u32 %v4328_v41, %v3610_v40  ;;  %v3771_v8 = vor.u32 %v4368_v46, %v3770_v45  ;;  %v3931_v16 = vor.u32 %v4408_v48, %v3930_v47  ;;  %v4010_v40 = vld [vmem:[#allocation8 + $0x8f0] sm:$0xf]  ;;  %v4428_v41 = vld [vmem:[#allocation8 + $0x900] sm:$0xf0]  ;;  %v4303_v46 = vld [vmem:[#allocation8 + $0x518] sm:$0xf0] }
 0x114   :  { %v3691_v45 = vor.u32 %v4348_v37, %v3690_v35  ;;  %v3670_v47 = vld [vmem:[#allocation8 + $0x648] sm:$0xf]  ;;  %v4343_v48 = vld [vmem:[#allocation8 + $0x658] sm:$0xf0]  ;;  %v4011_v50 = vor.u32 %v4428_v41, %v4010_v40  ;;  %v3135_v37 = vor.u32 %v4206_v26, %v3132_v27  ;;  %v4186_v26 = vld [vmem:[#allocation8 + $0x174] sm:$0xf] }
 0x115   :  { %v3052_v27 = vld [vmem:[#allocation8 + $0x184] sm:$0xf0] }
 0x116   :  { %2501 = vmatpush.bf16.msra.mxu0 %v2891_v42  ;;  %2514 = vmatpush.bf16.msra.mxu1 %v3051_v36  ;;  %v4403_v42 = vld [vmem:[#allocation8 + $0x838] sm:$0xf0]  ;;  %v4070_v36 = vld [vmem:[#allocation8 + $0x968] sm:$0xf] }
 0x117   :  { %2527 = vmatpush.bf16.msra.mxu2 %v3211_v60  ;;  %2540 = vmatpush.bf16.msra.mxu3 %v3371_v61  ;;  %v3570_v60 = vld [vmem:[#allocation8 + $0x580] sm:$0xf]  ;;  %v4318_v61 = vld [vmem:[#allocation8 + $0x590] sm:$0xf0]  ;;  %v3911_v62 = vor.u32 %v4403_v42, %v3910_v56  ;;  %v4071_v63 = vor.u32 %v4443_v57, %v4070_v36  ;;  %v4256_v56 = vld [vmem:[#allocation8 + $0x3a4] sm:$0xf]  ;;  %v3671_v36 = vor.u32 %v4343_v48, %v3670_v47 }
 0x118   :  { %v3571_v19 = vor.u32 %v4318_v61, %v3570_v60  ;;  %v3332_v57 = vld [vmem:[#allocation8 + $0x3b4] sm:$0xf0]  ;;  %v3991_v61 = vor.u32 %v4423_v53, %v3990_v52  ;;  %v4281_v47 = vld [vmem:[#allocation8 + $0x46c] sm:$0xf]  ;;  %v3432_v48 = vld [vmem:[#allocation8 + $0x47c] sm:$0xf0] }
 0x119   :  { %v3335_v14 = vor.u32 %v4256_v56, %v3332_v57  ;;  %v3435_v53 = vor.u32 %v4281_v47, %v3432_v48  ;;  %v3412_v57 = vld [vmem:[#allocation8 + $0x454] sm:$0xf0] }
 0x11a   :  { %2502 = vmatpush.bf16.msra.mxu0 %v2871_v2  ;;  %2515 = vmatpush.bf16.msra.mxu1 %v3031_v20  ;;  %v3731_v2 = vor.u32 %v4358_v13, %v3730_v4  ;;  %v3550_v20 = vld [vmem:[#allocation8 + $0x558] sm:$0xf]  ;;  %v4171_v4 = vld [vmem:[#allocation8 + $0xfc] sm:$0xf]  ;;  %v2992_v13 = vld [vmem:[#allocation8 + $0x10c] sm:$0xf0] }
 0x11b   :  { %2528 = vmatpush.bf16.msra.mxu2 %v3191_v7  ;;  %2541 = vmatpush.bf16.msra.mxu3 %v3351_v24  ;;  %v3710_v7 = vld [vmem:[#allocation8 + $0x698] sm:$0xf]  ;;  %v4353_v24 = vld [vmem:[#allocation8 + $0x6a8] sm:$0xf0] }
 0x11d   :  { %2503 = vmatmul.bf16.vlgmr.msra.gmra.mxu0 %v4690_v5  ;;  %2516 = vmatmul.bf16.vlgmr.msra.gmra.mxu1 %v4692_v9 }
 0x11e   :  { %2547 = vmatpush.bf16.msrb.mxu0 %v3651_v25  ;;  %2560 = vmatpush.bf16.msrb.mxu1 %v3811_v6  ;;  %v3870_v25 = vld [vmem:[#allocation8 + $0x7d8] sm:$0xf]  ;;  %v4393_v6 = vld [vmem:[#allocation8 + $0x7e8] sm:$0xf0] }
 0x11f   :  { %2573 = vmatpush.bf16.msrb.mxu2 %v3971_v28  ;;  %2586 = vmatpush.bf16.msrb.mxu3 %v4131_v30  ;;  %v3551_v28 = vor.u32 %v4313_v21, %v3550_v20  ;;  %v3711_v30 = vor.u32 %v4353_v24, %v3710_v7  ;;  %v3871_v33 = vor.u32 %v4393_v6, %v3870_v25  ;;  %v4291_v20 = vld [vmem:[#allocation8 + $0x4bc] sm:$0xf]  ;;  %v3472_v21 = vld [vmem:[#allocation8 + $0x4cc] sm:$0xf0]  ;;  %v4166_v7 = vld [vmem:[#allocation8 + $0xd4] sm:$0xf] }
 0x120   :  { %2529 = vmatmul.bf16.vlgmr.msra.gmra.mxu2 %v4694_v10  ;;  %2542 = vmatmul.bf16.vlgmr.msra.gmra.mxu3 %v4696_v11  ;;  %v2972_v24 = vld [vmem:[#allocation8 + $0xe4] sm:$0xf0]  ;;  %v3475_v6 = vor.u32 %v4291_v20, %v3472_v21  ;;  %v3392_v20 = vld [vmem:[#allocation8 + $0x42c] sm:$0xf0] }
 0x121   :  { %v2975_v35 = vor.u32 %v4166_v7, %v2972_v24  ;;  %v4146_v7 = vld [vmem:[#allocation8 + $0x34] sm:$0xf]  ;;  %v2892_v24 = vld [vmem:[#allocation8 + $0x44] sm:$0xf0] }
 0x122   :  { %2548 = vmatpush.bf16.msrb.mxu0 %v3631_v38  ;;  %2561 = vmatpush.bf16.msrb.mxu1 %v3791_v39  ;;  %v3850_v38 = vld [vmem:[#allocation8 + $0x7b0] sm:$0xf]  ;;  %v4388_v39 = vld [vmem:[#allocation8 + $0x7c0] sm:$0xf0] }
 0x123   :  { %2574 = vmatpush.bf16.msrb.mxu2 %v3951_v43  ;;  %2587 = vmatpush.bf16.msrb.mxu3 %v4111_v44  ;;  %v3510_v43 = vld [vmem:[#allocation8 + $0x508] sm:$0xf]  ;;  %v3531_v44 = vor.u32 %v4308_v32, %v3530_v31  ;;  %v3851_v49 = vor.u32 %v4388_v39, %v3850_v38  ;;  %v4286_v31 = vld [vmem:[#allocation8 + $0x494] sm:$0xf]  ;;  %v4161_v38 = vld [vmem:[#allocation8 + $0xac] sm:$0xf] }
 0x124   :  { %v3511_v42 = vor.u32 %v4303_v46, %v3510_v43  ;;  %v3452_v32 = vld [vmem:[#allocation8 + $0x4a4] sm:$0xf0]  ;;  %v2952_v39 = vld [vmem:[#allocation8 + $0xbc] sm:$0xf0]  ;;  %v4201_v43 = vld [vmem:[#allocation8 + $0x1ec] sm:$0xf] }
 0x125   :  { %v3455_v41 = vor.u32 %v4286_v31, %v3452_v32  ;;  %v3272_v46 = vld [vmem:[#allocation8 + $0x33c] sm:$0xf0]  ;;  %v3212_v32 = vld [vmem:[#allocation8 + $0x2c4] sm:$0xf0] }
 0x126   :  { %2549 = vmatpush.bf16.msrb.mxu0 %v3611_v51  ;;  %2562 = vmatpush.bf16.msrb.mxu1 %v3771_v8  ;;  %v3830_v51 = vld [vmem:[#allocation8 + $0x788] sm:$0xf]  ;;  %v4383_v8 = vld [vmem:[#allocation8 + $0x798] sm:$0xf0] }
 0x127   :  { %2575 = vmatpush.bf16.msrb.mxu2 %v3931_v16  ;;  %2588 = vmatpush.bf16.msrb.mxu3 %v4091_v54  ;;  %v4176_v16 = vld [vmem:[#allocation8 + $0x124] sm:$0xf]  ;;  %v3012_v54 = vld [vmem:[#allocation8 + $0x134] sm:$0xf0]  ;;  %v3831_v60 = vor.u32 %v4383_v8, %v3830_v51 }
 0x128   :  { %v4156_v51 = vld [vmem:[#allocation8 + $0x84] sm:$0xf]  ;;  %v2932_v8 = vld [vmem:[#allocation8 + $0x94] sm:$0xf0] }
 0x12a   :  { %2550 = vmatpush.bf16.msrb.mxu0 %v3591_v58  ;;  %2563 = vmatpush.bf16.msrb.mxu1 %v3751_v59  ;;  %v4296_v58 = vld [vmem:[#allocation8 + $0x4e4] sm:$0xf]  ;;  %v3492_v59 = vld [vmem:[#allocation8 + $0x4f4] sm:$0xf0] }
 0x12b   :  { %2576 = vmatpush.bf16.msrb.mxu2 %v3911_v62  ;;  %2589 = vmatpush.bf16.msrb.mxu3 %v4071_v63  ;;  %v3015_v62 = vor.u32 %v4176_v16, %v3012_v54  ;;  %v3175_v63 = vor.u32 %v4216_v55, %v3172_v29  ;;  %v3495_v0 = vor.u32 %v4296_v58, %v3492_v59  ;;  %v4196_v16 = vld [vmem:[#allocation8 + $0x1c4] sm:$0xf]  ;;  %v3092_v54 = vld [vmem:[#allocation8 + $0x1d4] sm:$0xf0] }
 0x12c   :  { %v4236_v55 = vld [vmem:[#allocation8 + $0x304] sm:$0xf] }
 0x12e   :  { %2551 = vmatpush.bf16.msrb.mxu0 %v3571_v19  ;;  %2564 = vmatpush.bf16.msrb.mxu1 %v3731_v2  ;;  %v4251_v19 = vld [vmem:[#allocation8 + $0x37c] sm:$0xf]  ;;  %v3312_v2 = vld [vmem:[#allocation8 + $0x38c] sm:$0xf0] }
 0x12f   :  { %2577 = vmatpush.bf16.msrb.mxu2 %v3891_v22  ;;  %2590 = vmatpush.bf16.msrb.mxu3 %v4051_v23  ;;  %v2995_v22 = vor.u32 %v4171_v4, %v2992_v13  ;;  %v3155_v23 = vor.u32 %v4211_v18, %v3152_v1  ;;  %v3315_v25 = vor.u32 %v4251_v19, %v3312_v2  ;;  %v3072_v18 = vld [vmem:[#allocation8 + $0x1ac] sm:$0xf0]  ;;  %v4231_v1 = vld [vmem:[#allocation8 + $0x2dc] sm:$0xf] }
 0x130   :  { %v3232_v19 = vld [vmem:[#allocation8 + $0x2ec] sm:$0xf0]  ;;  %v4271_v2 = vld [vmem:[#allocation8 + $0x41c] sm:$0xf] }
 0x132   :  { %2552 = vmatpush.bf16.msrb.mxu0 %v3551_v28  ;;  %2565 = vmatpush.bf16.msrb.mxu1 %v3711_v30  ;;  %v4246_v28 = vld [vmem:[#allocation8 + $0x354] sm:$0xf]  ;;  %v3292_v30 = vld [vmem:[#allocation8 + $0x364] sm:$0xf0] }
 0x133   :  { %2578 = vmatpush.bf16.msrb.mxu2 %v3871_v33  ;;  %2591 = vmatpush.bf16.msrb.mxu3 %v4031_v34  ;;  %v3295_v40 = vor.u32 %v4246_v28, %v3292_v30  ;;  %v4226_v28 = vld [vmem:[#allocation8 + $0x2b4] sm:$0xf] }
 0x134   :  { %v3215_v47 = vor.u32 %v4226_v28, %v3212_v32 }
 0x136   :  { %2553 = vmatpush.bf16.msrb.mxu0 %v3531_v44  ;;  %2566 = vmatpush.bf16.msrb.mxu1 %v3691_v45  ;;  %v3112_v44 = vld [vmem:[#allocation8 + $0x1fc] sm:$0xf0]  ;;  %v4241_v45 = vld [vmem:[#allocation8 + $0x32c] sm:$0xf] }
 0x137   :  { %2579 = vmatpush.bf16.msrb.mxu2 %v3851_v49  ;;  %2592 = vmatpush.bf16.msrb.mxu3 %v4011_v50  ;;  %v2955_v49 = vor.u32 %v4161_v38, %v2952_v39  ;;  %v3115_v50 = vor.u32 %v4201_v43, %v3112_v44  ;;  %v3275_v52 = vor.u32 %v4241_v45, %v3272_v46  ;;  %v4141_v39 = vld [vmem:[#allocation8 + $0xc] sm:$0xf]  ;;  %v3032_v45 = vld [vmem:[#allocation8 + $0x15c] sm:$0xf0] }
 0x138   :  { %v3055_v43 = vor.u32 %v4186_v26, %v3052_v27  ;;  %v4181_v44 = vld [vmem:[#allocation8 + $0x14c] sm:$0xf] }
 0x139   :  { %v2296_v33 = vpop.f32.mrf.mxu0  ;;  %v2309_v34 = vpop.f32.mrf.mxu1  ;;  %v4221_v46 = vld [vmem:[#allocation8 + $0x28c] sm:$0xf] }
 0x13a   :  { %2554 = vmatpush.bf16.msrb.mxu0 %v3511_v42  ;;  %2567 = vmatpush.bf16.msrb.mxu1 %v3671_v36  ;;  %v3252_v42 = vld [vmem:[#allocation8 + $0x314] sm:$0xf0]  ;;  %v4276_v36 = vld [vmem:[#allocation8 + $0x444] sm:$0xf]  ;;  %v2310_v4 = vadd.f32 %v2309_v34, %v2296_v33  ;;  %v4266_v33 = vld [vmem:[#allocation8 + $0x3f4] sm:$0xf] }
 0x13b   :  { %2580 = vmatpush.bf16.msrb.mxu2 %v3831_v60  ;;  %2593 = vmatpush.bf16.msrb.mxu3 %v3991_v61  ;;  %v2935_v60 = vor.u32 %v4156_v51, %v2932_v8  ;;  %v3095_v61 = vor.u32 %v4196_v16, %v3092_v54  ;;  %v3255_v13 = vor.u32 %v4236_v55, %v3252_v42  ;;  %v3372_v34 = vld [vmem:[#allocation8 + $0x404] sm:$0xf0]  ;;  %v4261_v51 = vld [vmem:[#allocation8 + $0x3cc] sm:$0xf]  ;;  %v3352_v8 = vld [vmem:[#allocation8 + $0x3dc] sm:$0xf0] }
 0x13c   :  { %v3375_v48 = vor.u32 %v4266_v33, %v3372_v34  ;;  %v4376_v16 = vld [vmem:[#allocation8 + $0x764] sm:$0xf]  ;;  %v3812_v54 = vld [vmem:[#allocation8 + $0x774] sm:$0xf0]  ;;  %v3035_v42 = vor.u32 %v4181_v44, %v3032_v45 }
 0x13d   :  { %2555 = vmatmul.bf16.vlgmr.msrb.gmra.mxu0 %v4704_v3  ;;  %2568 = vmatmul.bf16.vlgmr.msrb.gmra.mxu1 %v4706_v12  ;;  %v4416_v55 = vld [vmem:[#allocation8 + $0x8a4] sm:$0xf] }
 0x13e   :  { %2599 = vmatpush.bf16.msra.mxu0 %v3015_v62  ;;  %2612 = vmatpush.bf16.msra.mxu1 %v3175_v63  ;;  %v4151_v62 = vld [vmem:[#allocation8 + $0x5c] sm:$0xf]  ;;  %v2912_v63 = vld [vmem:[#allocation8 + $0x6c] sm:$0xf0] }
 0x13f   :  { %2625 = vmatpush.bf16.msra.mxu2 %v3335_v14  ;;  %2638 = vmatpush.bf16.msra.mxu3 %v3495_v0  ;;  %v3415_v14 = vor.u32 %v4276_v36, %v3412_v57  ;;  %v4191_v0 = vld [vmem:[#allocation8 + $0x19c] sm:$0xf]  ;;  %v3972_v36 = vld [vmem:[#allocation8 + $0x8b4] sm:$0xf0]  ;;  %v4456_v57 = vld [vmem:[#allocation8 + $0x9e4] sm:$0xf] }
 0x140   :  { %2581 = vmatmul.bf16.vlgmr.msrb.gmra.mxu2 %v4708_v15  ;;  %2594 = vmatmul.bf16.vlgmr.msrb.gmra.mxu3 %v4710_v17  ;;  %v2322_v29 = vpop.f32.mrf.mxu2  ;;  %v2335_v56 = vpop.f32.mrf.mxu3 }
 0x141   :  { %v2298_v58 = vpop.f32.mrf.mxu0  ;;  %v2311_v59 = vpop.f32.mrf.mxu1  ;;  %v2323_v21 = vadd.f32 %v2322_v29, %v2310_v4  ;;  %v4735_v29 = vld [vmem:[%s4797_s4] sm:$0x1f] }
 0x142   :  { %2600 = vmatpush.bf16.msra.mxu0 %v2995_v22  ;;  %2613 = vmatpush.bf16.msra.mxu1 %v3155_v23  ;;  %v2915_v22 = vor.u32 %v4151_v62, %v2912_v63  ;;  %v3075_v23 = vor.u32 %v4191_v0, %v3072_v18  ;;  %v4132_v58 = vld [vmem:[#allocation8 + $0x9f4] sm:$0xf0]  ;;  %v3815_v63 = vor.u32 %v4376_v16, %v3812_v54  ;;  %v4331_v0 = vld [vmem:[#allocation8 + $0x5fc] sm:$0xf]  ;;  %v3632_v18 = vld [vmem:[#allocation8 + $0x60c] sm:$0xf0] }
 0x143   :  { %2626 = vmatpush.bf16.msra.mxu2 %v3315_v25  ;;  %2639 = vmatpush.bf16.msra.mxu3 %v3475_v6  ;;  %v3235_v25 = vor.u32 %v4231_v1, %v3232_v19  ;;  %v3395_v6 = vor.u32 %v4271_v2, %v3392_v20  ;;  %v3975_v1 = vor.u32 %v4416_v55, %v3972_v36  ;;  %v3912_v16 = vld [vmem:[#allocation8 + $0x83c] sm:$0xf0]  ;;  %v4441_v54 = vld [vmem:[#allocation8 + $0x96c] sm:$0xf] }
 0x144   :  { %v4135_v19 = vor.u32 %v4456_v57, %v4132_v58  ;;  %v3635_v27 = vor.u32 %v4331_v0, %v3632_v18  ;;  %v4072_v55 = vld [vmem:[#allocation8 + $0x97c] sm:$0xf0]  ;;  %v4316_v58 = vld [vmem:[#allocation8 + $0x584] sm:$0xf]  ;;  %v4052_v0 = vld [vmem:[#allocation8 + $0x954] sm:$0xf0] }
 0x146   :  { %2601 = vmatpush.bf16.msra.mxu0 %v2975_v35  ;;  %2614 = vmatpush.bf16.msra.mxu1 %v3135_v37  ;;  %v2336_v35 = vadd.f32 %v2335_v56, %v2323_v21 }
 0x147   :  { %2627 = vmatpush.bf16.msra.mxu2 %v3295_v40  ;;  %2640 = vmatpush.bf16.msra.mxu3 %v3455_v41  ;;  %v2872_v40 = vld [vmem:[#allocation8 + $0x1c] sm:$0xf0]  ;;  %v2895_v41 = vor.u32 %v4146_v7, %v2892_v24  ;;  %v4411_v7 = vld [vmem:[#allocation8 + $0x87c] sm:$0xf]  ;;  %v3952_v24 = vld [vmem:[#allocation8 + $0x88c] sm:$0xf0] }
 0x148   :  { %v2324_v30 = vpop.f32.mrf.mxu2  ;;  %v2337_v31 = vpop.f32.mrf.mxu3  ;;  %v2875_v56 = vor.u32 %v4141_v39, %v2872_v40  ;;  %v3955_v33 = vor.u32 %v4411_v7, %v3952_v24  ;;  %v3932_v39 = vld [vmem:[#allocation8 + $0x864] sm:$0xf0]  ;;  %v4446_v40 = vld [vmem:[#allocation8 + $0x994] sm:$0xf]  ;;  %v4391_v7 = vld [vmem:[#allocation8 + $0x7dc] sm:$0xf] }
 0x149   :  { %v2348_v37 = vpop.f32.mrf.mxu0  ;;  %v2361_v38 = vpop.f32.mrf.mxu1  ;;  %v4326_v30 = vld [vmem:[#allocation8 + $0x5d4] sm:$0xf]  ;;  %v3612_v31 = vld [vmem:[#allocation8 + $0x5e4] sm:$0xf0] }
 0x14a   :  { %2602 = vmatpush.bf16.msra.mxu0 %v2955_v49  ;;  %2615 = vmatpush.bf16.msra.mxu1 %v3115_v50  ;;  %v2349_v49 = vadd.f32 %v2348_v37, %v2336_v35  ;;  %v3192_v50 = vld [vmem:[#allocation8 + $0x29c] sm:$0xf0]  ;;  %v4366_v35 = vld [vmem:[#allocation8 + $0x714] sm:$0xf]  ;;  %v3772_v37 = vld [vmem:[#allocation8 + $0x724] sm:$0xf0]  ;;  %v3615_v44 = vor.u32 %v4326_v30, %v3612_v31 }
 0x14b   :  { %2628 = vmatpush.bf16.msra.mxu2 %v3275_v52  ;;  %2641 = vmatpush.bf16.msra.mxu3 %v3435_v53  ;;  %v4336_v52 = vld [vmem:[#allocation8 + $0x624] sm:$0xf]  ;;  %v3652_v53 = vld [vmem:[#allocation8 + $0x634] sm:$0xf0]  ;;  %v3775_v45 = vor.u32 %v4366_v35, %v3772_v37 }
 0x14c   :  { %v2362_v59 = vadd.f32 %v2361_v38, %v2349_v49  ;;  %v3655_v62 = vor.u32 %v4336_v52, %v3652_v53  ;;  %v4406_v38 = vld [vmem:[#allocation8 + $0x854] sm:$0xf]  ;;  %v3592_v49 = vld [vmem:[#allocation8 + $0x5bc] sm:$0xf0]  ;;  %v4401_v53 = vld [vmem:[#allocation8 + $0x82c] sm:$0xf] }
 0x14d   :  { %v3752_v52 = vld [vmem:[#allocation8 + $0x6fc] sm:$0xf0] }
 0x14e   :  { %2603 = vmatpush.bf16.msra.mxu0 %v2935_v60  ;;  %2616 = vmatpush.bf16.msra.mxu1 %v3095_v61  ;;  %v3195_v60 = vor.u32 %v4221_v46, %v3192_v50  ;;  %v3355_v61 = vor.u32 %v4261_v51, %v3352_v8  ;;  %v3935_v50 = vor.u32 %v4406_v38, %v3932_v39  ;;  %v4361_v8 = vld [vmem:[#allocation8 + $0x6ec] sm:$0xf]  ;;  %v4346_v38 = vld [vmem:[#allocation8 + $0x674] sm:$0xf]  ;;  %v3692_v39 = vld [vmem:[#allocation8 + $0x684] sm:$0xf0] }
 0x14f   :  { %2629 = vmatpush.bf16.msra.mxu2 %v3255_v13  ;;  %2642 = vmatpush.bf16.msra.mxu3 %v3415_v14  ;;  %v2827_v14 = vperm.slane %v4735_v29, 0  ;;  %v3755_v57 = vor.u32 %v4361_v8, %v3752_v52  ;;  %v4381_v52 = vld [vmem:[#allocation8 + $0x78c] sm:$0xf] }
 0x150   :  { %v2374_v4 = vpop.f32.mrf.mxu2  ;;  %v2387_v13 = vpop.f32.mrf.mxu3 }
 0x151   :  { %v2375_v2 = vadd.f32 %v2374_v4, %v2362_v59  ;;  %v2350_v20 = vpop.f32.mrf.mxu0  ;;  %v2363_v21 = vpop.f32.mrf.mxu1  ;;  %v3572_v59 = vld [vmem:[#allocation8 + $0x594] sm:$0xf0]  ;;  %v4396_v4 = vld [vmem:[#allocation8 + $0x804] sm:$0xf] }
 0x152   :  { %2604 = vmatpush.bf16.msra.mxu0 %v2915_v22  ;;  %2617 = vmatpush.bf16.msra.mxu1 %v3075_v23  ;;  %v4371_v22 = vld [vmem:[#allocation8 + $0x73c] sm:$0xf]  ;;  %v3792_v23 = vld [vmem:[#allocation8 + $0x74c] sm:$0xf0]  ;;  %v3575_v18 = vor.u32 %v4316_v58, %v3572_v59  ;;  %v3178_v59 = vld [vmem:[#allocation8 + $0x268] sm:$0xf] }
 0x153   :  { %2630 = vmatpush.bf16.msra.mxu2 %v3235_v25  ;;  %2643 = vmatpush.bf16.msra.mxu3 %v3395_v6  ;;  %v4451_v25 = vld [vmem:[#allocation8 + $0x9bc] sm:$0xf]  ;;  %v4112_v6 = vld [vmem:[#allocation8 + $0x9cc] sm:$0xf0]  ;;  %v2388_v26 = vadd.f32 %v2387_v13, %v2375_v2  ;;  %v3795_v28 = vor.u32 %v4371_v22, %v3792_v23  ;;  %v3892_v13 = vld [vmem:[#allocation8 + $0x814] sm:$0xf0] }
 0x154   :  { %v4115_v34 = vor.u32 %v4451_v25, %v4112_v6  ;;  %v3552_v2 = vld [vmem:[#allocation8 + $0x56c] sm:$0xf0]  ;;  %v3895_v20 = vor.u32 %v4396_v4, %v3892_v13  ;;  %v4351_v22 = vld [vmem:[#allocation8 + $0x69c] sm:$0xf]  ;;  %v3498_v13 = vld [vmem:[#allocation8 + $0x4e8] sm:$0xf] }
 0x155   :  { %v2837_v32 = vadd.f32 %v2827_v14, %v2388_v26  ;;  %v4436_v14 = vld [vmem:[#allocation8 + $0x944] sm:$0xf]  ;;  %v3712_v23 = vld [vmem:[#allocation8 + $0x6ac] sm:$0xf0]  ;;  %v4431_v26 = vld [vmem:[#allocation8 + $0x91c] sm:$0xf] }
 0x156   :  { %2605 = vmatpush.bf16.msra.mxu0 %v2895_v41  ;;  %2618 = vmatpush.bf16.msra.mxu1 %v3055_v43  ;;  %v4092_v41 = vld [vmem:[#allocation8 + $0x9a4] sm:$0xf0]  ;;  %v4055_v21 = vor.u32 %v4436_v14, %v4052_v0  ;;  %v3872_v6 = vld [vmem:[#allocation8 + $0x7ec] sm:$0xf0]  ;;  %v4179_v58 = vld [vmem:[#allocation8 + $0x138] sm:$0xf0] }
 0x157   :  { %2631 = vmatpush.bf16.msra.mxu2 %v3215_v47  ;;  %2644 = vmatpush.bf16.msra.mxu3 %v3375_v48  ;;  %v2842_v43 = vmax.f32 %v2837_v32, 0.0  ;;  %v4321_v48 = vld [vmem:[#allocation8 + $0x5ac] sm:$0xf]  ;;  %v4095_v51 = vor.u32 %v4446_v40, %v4092_v41  ;;  %v3715_v32 = vor.u32 %v4351_v22, %v3712_v23  ;;  %v3875_v35 = vor.u32 %v4391_v7, %v3872_v6  ;;  %v4386_v40 = vld [vmem:[#allocation8 + $0x7b4] sm:$0xf] }
 0x158   :  { %v2376_v46 = vpop.f32.mrf.mxu2  ;;  %v2389_v47 = vpop.f32.mrf.mxu3  ;;  %v3595_v36 = vor.u32 %v4321_v48, %v3592_v49  ;;  %v3852_v41 = vld [vmem:[#allocation8 + $0x7c4] sm:$0xf0]  ;;  %v3512_v48 = vld [vmem:[#allocation8 + $0x51c] sm:$0xf0]  ;;  %v4341_v49 = vld [vmem:[#allocation8 + $0x64c] sm:$0xf] }
 0x159   :  { %2847 = vst [vmem:[%s4798_s5] sm:$0xff] %v2842_v43  ;;  %v4426_v43 = vld [vmem:[#allocation8 + $0x8f4] sm:$0xf]  ;;  %v3695_v47 = vor.u32 %v4346_v38, %v3692_v39  ;;  %v4259_v4 = vld [vmem:[#allocation8 + $0x3b8] sm:$0xf0]  ;;  %v3158_v23 = vld [vmem:[#allocation8 + $0x240] sm:$0xf] }
 0x15a   :  { %2606 = vmatpush.bf16.msra.mxu0 %v2875_v56  ;;  %2619 = vmatpush.bf16.msra.mxu1 %v3035_v42  ;;  %v4745_v56 = vpop.f32.mrf.mxu0  ;;  %v4747_v42 = vpop.f32.mrf.mxu1  ;;  %v4299_v14 = vld [vmem:[#allocation8 + $0x4f8] sm:$0xf0]  ;;  %v4214_v7 = vld [vmem:[#allocation8 + $0x250] sm:$0xf0]  ;;  %v3318_v6 = vld [vmem:[#allocation8 + $0x380] sm:$0xf] }
 0x15b   :  { %2632 = vmatpush.bf16.msra.mxu2 %v3195_v60  ;;  %2645 = vmatpush.bf16.msra.mxu3 %v3355_v61  ;;  %v3915_v60 = vor.u32 %v4401_v53, %v3912_v16  ;;  %v4075_v61 = vor.u32 %v4441_v54, %v4072_v55  ;;  %v3832_v53 = vld [vmem:[#allocation8 + $0x79c] sm:$0xf0]  ;;  %v4421_v16 = vld [vmem:[#allocation8 + $0x8cc] sm:$0xf]  ;;  %v3499_v22 = vor.u32 %v4299_v14, %v3498_v13  ;;  %v3138_v38 = vld [vmem:[#allocation8 + $0x218] sm:$0xf] }
 0x15c   :  { %v3835_v0 = vor.u32 %v4381_v52, %v3832_v53  ;;  %v4209_v39 = vld [vmem:[#allocation8 + $0x228] sm:$0xf0]  ;;  %v4244_v52 = vld [vmem:[#allocation8 + $0x340] sm:$0xf0]  ;;  %v3438_v53 = vld [vmem:[#allocation8 + $0x470] sm:$0xf] }
 0x15d   :  { %2607 = vmatmul.bf16.vlgmr.msra.gmra.mxu0 %v4690_v5  ;;  %2620 = vmatmul.bf16.vlgmr.msra.gmra.mxu1 %v4692_v9  ;;  %v3258_v13 = vld [vmem:[#allocation8 + $0x308] sm:$0xf]  ;;  %v4239_v14 = vld [vmem:[#allocation8 + $0x318] sm:$0xf0] }
 0x15e   :  { %2651 = vmatpush.bf16.msrb.mxu0 %v3655_v62  ;;  %2664 = vmatpush.bf16.msrb.mxu1 %v3815_v63  ;;  %v4356_v62 = vld [vmem:[#allocation8 + $0x6c4] sm:$0xf]  ;;  %v3732_v63 = vld [vmem:[#allocation8 + $0x6d4] sm:$0xf0] }
 0x15f   :  { %2677 = vmatpush.bf16.msrb.mxu2 %v3975_v1  ;;  %2690 = vmatpush.bf16.msrb.mxu3 %v4135_v19  ;;  %v3735_v1 = vor.u32 %v4356_v62, %v3732_v63  ;;  %v4311_v19 = vld [vmem:[#allocation8 + $0x55c] sm:$0xf] }
 0x160   :  { %2633 = vmatmul.bf16.vlgmr.msra.gmra.mxu2 %v4694_v10  ;;  %2646 = vmatmul.bf16.vlgmr.msra.gmra.mxu3 %v4696_v11  ;;  %v3555_v31 = vor.u32 %v4311_v19, %v3552_v2  ;;  %v2998_v2 = vld [vmem:[#allocation8 + $0x100] sm:$0xf] }
 0x162   :  { %2652 = vmatpush.bf16.msrb.mxu0 %v3635_v27  ;;  %2665 = vmatpush.bf16.msrb.mxu1 %v3795_v28  ;;  %v4032_v27 = vld [vmem:[#allocation8 + $0x92c] sm:$0xf0]  ;;  %v2402_v28 = vpop.f32.mrf.mxu0  ;;  %v2415_v30 = vpop.f32.mrf.mxu1 }
 0x163   :  { %2678 = vmatpush.bf16.msrb.mxu2 %v3955_v33  ;;  %2691 = vmatpush.bf16.msrb.mxu3 %v4115_v34  ;;  %v4749_v24 = vpop.f32.mrf.mxu2  ;;  %v4751_v25 = vpop.f32.mrf.mxu3  ;;  %v4306_v33 = vld [vmem:[#allocation8 + $0x534] sm:$0xf]  ;;  %v3532_v34 = vld [vmem:[#allocation8 + $0x544] sm:$0xf0]  ;;  %v4035_v37 = vor.u32 %v4431_v26, %v4032_v27  ;;  %v3478_v27 = vld [vmem:[#allocation8 + $0x4c0] sm:$0xf] }
 0x164   :  { %v3535_v46 = vor.u32 %v4306_v33, %v3532_v34  ;;  %v4254_v26 = vld [vmem:[#allocation8 + $0x390] sm:$0xf0]  ;;  %v4169_v33 = vld [vmem:[#allocation8 + $0xe8] sm:$0xf0]  ;;  %v2414_v34 = vadd.f32 %v4747_v42, %v4745_v56  ;;  %v3139_v42 = vor.u32 %v4209_v39, %v3138_v38  ;;  %v2898_v39 = vld [vmem:[#allocation8 + $0x38] sm:$0xf] }
 0x165   :  { %v4294_v28 = vld [vmem:[#allocation8 + $0x4d0] sm:$0xf0] }
 0x166   :  { %2653 = vmatpush.bf16.msrb.mxu0 %v3615_v44  ;;  %2666 = vmatpush.bf16.msrb.mxu1 %v3775_v45  ;;  %v4012_v44 = vld [vmem:[#allocation8 + $0x904] sm:$0xf0]  ;;  %v4301_v45 = vld [vmem:[#allocation8 + $0x50c] sm:$0xf] }
 0x167   :  { %2679 = vmatpush.bf16.msrb.mxu2 %v3935_v50  ;;  %2692 = vmatpush.bf16.msrb.mxu3 %v4095_v51  ;;  %v3672_v50 = vld [vmem:[#allocation8 + $0x65c] sm:$0xf0]  ;;  %v3855_v51 = vor.u32 %v4386_v40, %v3852_v41  ;;  %v4015_v8 = vor.u32 %v4426_v43, %v4012_v44  ;;  %v3515_v62 = vor.u32 %v4301_v45, %v3512_v48  ;;  %v3298_v40 = vld [vmem:[#allocation8 + $0x358] sm:$0xf]  ;;  %v4249_v41 = vld [vmem:[#allocation8 + $0x368] sm:$0xf0] }
 0x168   :  { %v3675_v63 = vor.u32 %v4341_v49, %v3672_v50  ;;  %v3458_v43 = vld [vmem:[#allocation8 + $0x498] sm:$0xf]  ;;  %v4289_v44 = vld [vmem:[#allocation8 + $0x4a8] sm:$0xf0]  ;;  %v2427_v45 = vadd.f32 %v4749_v24, %v2414_v34  ;;  %v3299_v48 = vor.u32 %v4249_v41, %v3298_v40  ;;  %v3118_v50 = vld [vmem:[#allocation8 + $0x1f0] sm:$0xf] }
 0x169   :  { %v3459_v49 = vor.u32 %v4289_v44, %v3458_v43  ;;  %v4284_v24 = vld [vmem:[#allocation8 + $0x480] sm:$0xf0]  ;;  %v4149_v40 = vld [vmem:[#allocation8 + $0x48] sm:$0xf0] }
 0x16a   :  { %2654 = vmatpush.bf16.msrb.mxu0 %v3595_v36  ;;  %2667 = vmatpush.bf16.msrb.mxu1 %v3755_v57  ;;  %v3992_v36 = vld [vmem:[#allocation8 + $0x8dc] sm:$0xf0]  ;;  %v3018_v57 = vld [vmem:[#allocation8 + $0x128] sm:$0xf] }
 0x16b   :  { %2680 = vmatpush.bf16.msrb.mxu2 %v3915_v60  ;;  %2693 = vmatpush.bf16.msrb.mxu3 %v4075_v61  ;;  %v2428_v54 = vpop.f32.mrf.mxu2  ;;  %v2441_v55 = vpop.f32.mrf.mxu3  ;;  %v4219_v60 = vld [vmem:[#allocation8 + $0x278] sm:$0xf0]  ;;  %v3338_v61 = vld [vmem:[#allocation8 + $0x3a8] sm:$0xf] }
 0x16c   :  { %v3179_v19 = vor.u32 %v4219_v60, %v3178_v59  ;;  %v4159_v59 = vld [vmem:[#allocation8 + $0x98] sm:$0xf0] }
 0x16e   :  { %2655 = vmatpush.bf16.msrb.mxu0 %v3575_v18  ;;  %2668 = vmatpush.bf16.msrb.mxu1 %v3735_v1  ;;  %v3995_v18 = vor.u32 %v4421_v16, %v3992_v36  ;;  %v3019_v1 = vor.u32 %v4179_v58, %v3018_v57  ;;  %v2440_v16 = vadd.f32 %v4751_v25, %v2427_v45  ;;  %v2938_v58 = vld [vmem:[#allocation8 + $0x88] sm:$0xf]  ;;  %v3058_v45 = vld [vmem:[#allocation8 + $0x178] sm:$0xf] }
 0x16f   :  { %2681 = vmatpush.bf16.msrb.mxu2 %v3895_v20  ;;  %2694 = vmatpush.bf16.msrb.mxu3 %v4055_v21  ;;  %v4174_v20 = vld [vmem:[#allocation8 + $0x110] sm:$0xf0]  ;;  %v3339_v21 = vor.u32 %v4259_v4, %v3338_v61  ;;  %v4199_v4 = vld [vmem:[#allocation8 + $0x1d8] sm:$0xf0]  ;;  %v2939_v25 = vor.u32 %v4159_v59, %v2938_v58  ;;  %v3358_v58 = vld [vmem:[#allocation8 + $0x3d0] sm:$0xf] }
 0x170   :  { %v2999_v30 = vor.u32 %v4174_v20, %v2998_v2  ;;  %v4154_v2 = vld [vmem:[#allocation8 + $0x70] sm:$0xf0]  ;;  %v4264_v59 = vld [vmem:[#allocation8 + $0x3e0] sm:$0xf0] }
 0x172   :  { %2656 = vmatpush.bf16.msrb.mxu0 %v3555_v31  ;;  %2669 = vmatpush.bf16.msrb.mxu1 %v3715_v32  ;;  %v3159_v31 = vor.u32 %v4214_v7, %v3158_v23  ;;  %v2978_v32 = vld [vmem:[#allocation8 + $0xd8] sm:$0xf]  ;;  %v3078_v23 = vld [vmem:[#allocation8 + $0x1a0] sm:$0xf]  ;;  %v4194_v7 = vld [vmem:[#allocation8 + $0x1b0] sm:$0xf0] }
 0x173   :  { %2682 = vmatpush.bf16.msrb.mxu2 %v3875_v35  ;;  %2695 = vmatpush.bf16.msrb.mxu3 %v4035_v37  ;;  %v3319_v35 = vor.u32 %v4254_v26, %v3318_v6  ;;  %v3479_v37 = vor.u32 %v4294_v28, %v3478_v27  ;;  %v2979_v56 = vor.u32 %v4169_v33, %v2978_v32  ;;  %v3238_v6 = vld [vmem:[#allocation8 + $0x2e0] sm:$0xf]  ;;  %v4234_v28 = vld [vmem:[#allocation8 + $0x2f0] sm:$0xf0]  ;;  %v2828_v33 = vperm.slane %v4735_v29, 1 }
 0x174   :  { %v3079_v38 = vor.u32 %v4194_v7, %v3078_v23  ;;  %v3239_v43 = vor.u32 %v4234_v28, %v3238_v6  ;;  %v3638_v23 = vld [vmem:[#allocation8 + $0x600] sm:$0xf]  ;;  %v4334_v7 = vld [vmem:[#allocation8 + $0x610] sm:$0xf0] }
 0x175   :  { %v4374_v28 = vld [vmem:[#allocation8 + $0x750] sm:$0xf0] }
 0x176   :  { %2657 = vmatpush.bf16.msrb.mxu0 %v3535_v46  ;;  %2670 = vmatpush.bf16.msrb.mxu1 %v3695_v47  ;;  %v2958_v46 = vld [vmem:[#allocation8 + $0xb0] sm:$0xf]  ;;  %v4164_v47 = vld [vmem:[#allocation8 + $0xc0] sm:$0xf0] }
 0x177   :  { %2683 = vmatpush.bf16.msrb.mxu2 %v3855_v51  ;;  %2696 = vmatpush.bf16.msrb.mxu3 %v4015_v8  ;;  %v4204_v51 = vld [vmem:[#allocation8 + $0x200] sm:$0xf0]  ;;  %v3278_v8 = vld [vmem:[#allocation8 + $0x330] sm:$0xf]  ;;  %v2959_v36 = vor.u32 %v4164_v47, %v2958_v46  ;;  %v4229_v46 = vld [vmem:[#allocation8 + $0x2c8] sm:$0xf0] }
 0x178   :  { %v3119_v57 = vor.u32 %v4204_v51, %v3118_v50  ;;  %v3279_v61 = vor.u32 %v4244_v52, %v3278_v8  ;;  %v3378_v47 = vld [vmem:[#allocation8 + $0x3f8] sm:$0xf]  ;;  %v2878_v50 = vld [vmem:[#allocation8 + $0x10] sm:$0xf]  ;;  %v4144_v51 = vld [vmem:[#allocation8 + $0x20] sm:$0xf0]  ;;  %v2899_v52 = vor.u32 %v4149_v40, %v2898_v39 }
 0x179   :  { %v3038_v8 = vld [vmem:[#allocation8 + $0x150] sm:$0xf] }
 0x17a   :  { %2658 = vmatpush.bf16.msrb.mxu0 %v3515_v62  ;;  %2671 = vmatpush.bf16.msrb.mxu1 %v3675_v63  ;;  %v2452_v54 = vpop.f32.mrf.mxu0  ;;  %v2465_v55 = vpop.f32.mrf.mxu1  ;;  %v3439_v62 = vor.u32 %v4284_v24, %v3438_v53  ;;  %v3098_v63 = vld [vmem:[#allocation8 + $0x1c8] sm:$0xf]  ;;  %v4184_v24 = vld [vmem:[#allocation8 + $0x160] sm:$0xf0] }
 0x17b   :  { %2684 = vmatpush.bf16.msrb.mxu2 %v3835_v0  ;;  %2697 = vmatpush.bf16.msrb.mxu3 %v3995_v18  ;;  %v2453_v60 = vadd.f32 %v2452_v54, %v2440_v16  ;;  %v3418_v0 = vld [vmem:[#allocation8 + $0x448] sm:$0xf]  ;;  %v4279_v18 = vld [vmem:[#allocation8 + $0x458] sm:$0xf0]  ;;  %v3198_v16 = vld [vmem:[#allocation8 + $0x290] sm:$0xf] }
 0x17c   :  { %v4224_v54 = vld [vmem:[#allocation8 + $0x2a0] sm:$0xf0] }
 0x17d   :  { %2659 = vmatmul.bf16.vlgmr.msrb.gmra.mxu0 %v4704_v3  ;;  %2672 = vmatmul.bf16.vlgmr.msrb.gmra.mxu1 %v4706_v12  ;;  %v2466_v20 = vadd.f32 %v2465_v55, %v2453_v60 }
 0x17e   :  { %2703 = vmatpush.bf16.msra.mxu0 %v3019_v1  ;;  %2716 = vmatpush.bf16.msra.mxu1 %v3179_v19  ;;  %v3099_v1 = vor.u32 %v4199_v4, %v3098_v63  ;;  %v2918_v19 = vld [vmem:[#allocation8 + $0x60] sm:$0xf]  ;;  %v4339_v63 = vld [vmem:[#allocation8 + $0x638] sm:$0xf0]  ;;  %v3818_v4 = vld [vmem:[#allocation8 + $0x768] sm:$0xf] }
 0x17f   :  { %2729 = vmatpush.bf16.msra.mxu2 %v3339_v21  ;;  %2742 = vmatpush.bf16.msra.mxu3 %v3499_v22  ;;  %v3259_v21 = vor.u32 %v4239_v14, %v3258_v13  ;;  %v3419_v22 = vor.u32 %v4279_v18, %v3418_v0  ;;  %v4379_v13 = vld [vmem:[#allocation8 + $0x778] sm:$0xf0]  ;;  %v3978_v14 = vld [vmem:[#allocation8 + $0x8a8] sm:$0xf]  ;;  %v2879_v0 = vor.u32 %v4144_v51, %v2878_v50 }
 0x180   :  { %2685 = vmatmul.bf16.vlgmr.msrb.gmra.mxu2 %v4708_v15  ;;  %2698 = vmatmul.bf16.vlgmr.msrb.gmra.mxu3 %v4710_v17  ;;  %v3039_v18 = vor.u32 %v4184_v24, %v3038_v8  ;;  %v4364_v8 = vld [vmem:[#allocation8 + $0x700] sm:$0xf0] }
 0x181   :  { %v4444_v24 = vld [vmem:[#allocation8 + $0x980] sm:$0xf0] }
 0x182   :  { %2704 = vmatpush.bf16.msra.mxu0 %v2999_v30  ;;  %2717 = vmatpush.bf16.msra.mxu1 %v3159_v31  ;;  %v3398_v30 = vld [vmem:[#allocation8 + $0x420] sm:$0xf]  ;;  %v4274_v31 = vld [vmem:[#allocation8 + $0x430] sm:$0xf0]  ;;  %v2454_v34 = vpop.f32.mrf.mxu0 }
 0x183   :  { %2730 = vmatpush.bf16.msra.mxu2 %v3319_v35  ;;  %2743 = vmatpush.bf16.msra.mxu3 %v3479_v37  ;;  %v2478_v26 = vpop.f32.mrf.mxu2  ;;  %v2491_v27 = vpop.f32.mrf.mxu3  ;;  %v2919_v37 = vor.u32 %v4154_v2, %v2918_v19  ;;  %v3399_v44 = vor.u32 %v4274_v31, %v3398_v30  ;;  %v4459_v19 = vld [vmem:[#allocation8 + $0x9f8] sm:$0xf0]  ;;  %v3199_v2 = vor.u32 %v4224_v54, %v3198_v16  ;;  %v3958_v30 = vld [vmem:[#allocation8 + $0x880] sm:$0xf]  ;;  %v4414_v31 = vld [vmem:[#allocation8 + $0x890] sm:$0xf0] }
 0x184   :  { %v2479_v32 = vadd.f32 %v2478_v26, %v2466_v20  ;;  %v2467_v35 = vpop.f32.mrf.mxu1  ;;  %v3359_v20 = vor.u32 %v4264_v59, %v3358_v58  ;;  %v3639_v34 = vor.u32 %v4334_v7, %v3638_v23  ;;  %v3959_v39 = vor.u32 %v4414_v31, %v3958_v30  ;;  %v3738_v59 = vld [vmem:[#allocation8 + $0x6c8] sm:$0xf]  ;;  %v4394_v23 = vld [vmem:[#allocation8 + $0x7f0] sm:$0xf0]  ;;  %v4038_v7 = vld [vmem:[#allocation8 + $0x920] sm:$0xf] }
 0x185   :  { %v3538_v31 = vld [vmem:[#allocation8 + $0x538] sm:$0xf] }
 0x186   :  { %2705 = vmatpush.bf16.msra.mxu0 %v2979_v56  ;;  %2718 = vmatpush.bf16.msra.mxu1 %v3139_v42  ;;  %v2492_v41 = vadd.f32 %v2491_v27, %v2479_v32  ;;  %v4189_v56 = vld [vmem:[#allocation8 + $0x188] sm:$0xf0]  ;;  %v3218_v42 = vld [vmem:[#allocation8 + $0x2b8] sm:$0xf]  ;;  %v3798_v27 = vld [vmem:[#allocation8 + $0x740] sm:$0xf] }
 0x187   :  { %2731 = vmatpush.bf16.msra.mxu2 %v3299_v48  ;;  %2744 = vmatpush.bf16.msra.mxu3 %v3459_v49  ;;  %v4269_v48 = vld [vmem:[#allocation8 + $0x408] sm:$0xf0]  ;;  %v3059_v53 = vor.u32 %v4189_v56, %v3058_v45  ;;  %v4118_v32 = vld [vmem:[#allocation8 + $0x9c0] sm:$0xf]  ;;  %v3799_v35 = vor.u32 %v4374_v28, %v3798_v27  ;;  %v4098_v56 = vld [vmem:[#allocation8 + $0x998] sm:$0xf] }
 0x188   :  { %v2838_v49 = vadd.f32 %v2828_v33, %v2492_v41  ;;  %v4454_v33 = vld [vmem:[#allocation8 + $0x9d0] sm:$0xf0]  ;;  %v3778_v41 = vld [vmem:[#allocation8 + $0x718] sm:$0xf]  ;;  %v4409_v45 = vld [vmem:[#allocation8 + $0x868] sm:$0xf0] }
 0x189   :  { %v4119_v40 = vor.u32 %v4454_v33, %v4118_v32  ;;  %v4309_v32 = vld [vmem:[#allocation8 + $0x548] sm:$0xf0] }
 0x18a   :  { %2706 = vmatpush.bf16.msra.mxu0 %v2959_v36  ;;  %2719 = vmatpush.bf16.msra.mxu1 %v3119_v57  ;;  %v2843_v55 = vmax.f32 %v2838_v49, 0.0  ;;  %v3219_v36 = vor.u32 %v4229_v46, %v3218_v42  ;;  %v3379_v57 = vor.u32 %v4269_v48, %v3378_v47  ;;  %v4449_v42 = vld [vmem:[#allocation8 + $0x9a8] sm:$0xf0]  ;;  %v3598_v48 = vld [vmem:[#allocation8 + $0x5b0] sm:$0xf] }
 0x18b   :  { %2732 = vmatpush.bf16.msra.mxu2 %v3279_v61  ;;  %2745 = vmatpush.bf16.msra.mxu3 %v3439_v62  ;;  %v2480_v60 = vpop.f32.mrf.mxu2  ;;  %v2493_v61 = vpop.f32.mrf.mxu3  ;;  %v3658_v62 = vld [vmem:[#allocation8 + $0x628] sm:$0xf]  ;;  %v4324_v49 = vld [vmem:[#allocation8 + $0x5c0] sm:$0xf0]  ;;  %v4099_v51 = vor.u32 %v4449_v42, %v4098_v56 }
 0x18c   :  { %2848 = vst [vmem:[%s4798_s5 + $0x8] sm:$0xff] %v2843_v55  ;;  %v3578_v55 = vld [vmem:[#allocation8 + $0x588] sm:$0xf]  ;;  %v4359_v60 = vld [vmem:[#allocation8 + $0x6d8] sm:$0xf0] }
 0x18d   :  { %v3898_v61 = vld [vmem:[#allocation8 + $0x808] sm:$0xf]  ;;  %v4304_v56 = vld [vmem:[#allocation8 + $0x520] sm:$0xf0] }
 0x18e   :  { %2707 = vmatpush.bf16.msra.mxu0 %v2939_v25  ;;  %2720 = vmatpush.bf16.msra.mxu1 %v3099_v1  ;;  %v4419_v25 = vld [vmem:[#allocation8 + $0x8b8] sm:$0xf0]  ;;  %v4138_v1 = vld [vmem:[#allocation8 + $0x9e8] sm:$0xf] }
 0x18f   :  { %2733 = vmatpush.bf16.msra.mxu2 %v3259_v21  ;;  %2746 = vmatpush.bf16.msra.mxu3 %v3419_v22  ;;  %v3659_v21 = vor.u32 %v4339_v63, %v3658_v62  ;;  %v3819_v22 = vor.u32 %v4379_v13, %v3818_v4  ;;  %v3979_v6 = vor.u32 %v4419_v25, %v3978_v14  ;;  %v4399_v62 = vld [vmem:[#allocation8 + $0x818] sm:$0xf0]  ;;  %v4058_v63 = vld [vmem:[#allocation8 + $0x948] sm:$0xf] }
 0x190   :  { %v4139_v26 = vor.u32 %v4459_v19, %v4138_v1  ;;  %v4439_v4 = vld [vmem:[#allocation8 + $0x958] sm:$0xf0]  ;;  %v3739_v14 = vor.u32 %v4359_v60, %v3738_v59  ;;  %v3899_v25 = vor.u32 %v4399_v62, %v3898_v61  ;;  %v3718_v19 = vld [vmem:[#allocation8 + $0x6a0] sm:$0xf] }
 0x191   :  { %v4059_v1 = vor.u32 %v4439_v4, %v4058_v63  ;;  %v2829_v4 = vperm.slane %v4735_v29, 2 }
 0x192   :  { %2708 = vmatpush.bf16.msra.mxu0 %v2919_v37  ;;  %2721 = vmatpush.bf16.msra.mxu1 %v3079_v38  ;;  %v3618_v37 = vld [vmem:[#allocation8 + $0x5d8] sm:$0xf]  ;;  %v4329_v38 = vld [vmem:[#allocation8 + $0x5e8] sm:$0xf0] }
 0x193   :  { %2734 = vmatpush.bf16.msra.mxu2 %v3239_v43  ;;  %2747 = vmatpush.bf16.msra.mxu3 %v3399_v44  ;;  %v4369_v43 = vld [vmem:[#allocation8 + $0x728] sm:$0xf0]  ;;  %v3938_v44 = vld [vmem:[#allocation8 + $0x858] sm:$0xf]  ;;  %v3619_v46 = vor.u32 %v4329_v38, %v3618_v37 }
 0x194   :  { %v3779_v47 = vor.u32 %v4369_v43, %v3778_v41  ;;  %v3939_v50 = vor.u32 %v4409_v45, %v3938_v44  ;;  %v4349_v37 = vld [vmem:[#allocation8 + $0x688] sm:$0xf0]  ;;  %v3858_v38 = vld [vmem:[#allocation8 + $0x7b8] sm:$0xf]  ;;  %v3539_v43 = vor.u32 %v4309_v32, %v3538_v31  ;;  %v3518_v45 = vld [vmem:[#allocation8 + $0x510] sm:$0xf] }
 0x195   :  { %v4429_v41 = vld [vmem:[#allocation8 + $0x908] sm:$0xf0]  ;;  %v2830_v32 = vperm.slane %v4735_v29, 3 }
 0x196   :  { %2709 = vmatpush.bf16.msra.mxu0 %v2899_v52  ;;  %2722 = vmatpush.bf16.msra.mxu1 %v3059_v53  ;;  %v4404_v52 = vld [vmem:[#allocation8 + $0x840] sm:$0xf0]  ;;  %v4078_v53 = vld [vmem:[#allocation8 + $0x970] sm:$0xf] }
 0x197   :  { %2735 = vmatpush.bf16.msra.mxu2 %v3219_v36  ;;  %2748 = vmatpush.bf16.msra.mxu3 %v3379_v57  ;;  %v4319_v36 = vld [vmem:[#allocation8 + $0x598] sm:$0xf0]  ;;  %v4079_v58 = vor.u32 %v4444_v24, %v4078_v53 }
 0x198   :  { %v3579_v13 = vor.u32 %v4319_v36, %v3578_v55 }
 0x19a   :  { %2710 = vmatpush.bf16.msra.mxu0 %v2879_v0  ;;  %2723 = vmatpush.bf16.msra.mxu1 %v3039_v18  ;;  %v4769_v16 = vpop.f32.mrf.mxu0  ;;  %v3558_v0 = vld [vmem:[#allocation8 + $0x560] sm:$0xf]  ;;  %v4314_v18 = vld [vmem:[#allocation8 + $0x570] sm:$0xf0] }
 0x19b   :  { %2736 = vmatpush.bf16.msra.mxu2 %v3199_v2  ;;  %2749 = vmatpush.bf16.msra.mxu3 %v3359_v20  ;;  %v4354_v2 = vld [vmem:[#allocation8 + $0x6b0] sm:$0xf0]  ;;  %v3878_v20 = vld [vmem:[#allocation8 + $0x7e0] sm:$0xf]  ;;  %v3559_v28 = vor.u32 %v4314_v18, %v3558_v0 }
 0x19c   :  { %v3719_v30 = vor.u32 %v4354_v2, %v3718_v19  ;;  %v3879_v33 = vor.u32 %v4394_v23, %v3878_v20 }
 0x19d   :  { %2711 = vmatmul.bf16.vlgmr.msra.gmra.mxu0 %v4690_v5  ;;  %2724 = vmatmul.bf16.vlgmr.msra.gmra.mxu1 %v4692_v9  ;;  %v3758_v5 = vld [vmem:[#allocation8 + $0x6f0] sm:$0xf] }
 0x19e   :  { %2755 = vmatpush.bf16.msrb.mxu0 %v3659_v21  ;;  %2768 = vmatpush.bf16.msrb.mxu1 %v3819_v22  ;;  %v3918_v9 = vld [vmem:[#allocation8 + $0x830] sm:$0xf]  ;;  %v3759_v54 = vor.u32 %v4364_v8, %v3758_v5  ;;  %v4384_v5 = vld [vmem:[#allocation8 + $0x7a0] sm:$0xf0] }
 0x19f   :  { %2781 = vmatpush.bf16.msrb.mxu2 %v3979_v6  ;;  %2794 = vmatpush.bf16.msrb.mxu3 %v4139_v26  ;;  %v3919_v57 = vor.u32 %v4404_v52, %v3918_v9  ;;  %v4434_v6 = vld [vmem:[#allocation8 + $0x930] sm:$0xf0]  ;;  %v3998_v8 = vld [vmem:[#allocation8 + $0x8d0] sm:$0xf]  ;;  %v4424_v9 = vld [vmem:[#allocation8 + $0x8e0] sm:$0xf0]  ;;  %v3519_v52 = vor.u32 %v4304_v56, %v3518_v45 }
 0x1a0   :  { %2737 = vmatmul.bf16.vlgmr.msra.gmra.mxu2 %v4694_v10  ;;  %2750 = vmatmul.bf16.vlgmr.msra.gmra.mxu3 %v4696_v11  ;;  %v4771_v10 = vpop.f32.mrf.mxu1  ;;  %v3599_v11 = vor.u32 %v4324_v49, %v3598_v48  ;;  %v4344_v48 = vld [vmem:[#allocation8 + $0x660] sm:$0xf0]  ;;  %v3838_v49 = vld [vmem:[#allocation8 + $0x790] sm:$0xf] }
 0x1a1   :  { %v3839_v24 = vor.u32 %v4384_v5, %v3838_v49 }
 0x1a2   :  { %2756 = vmatpush.bf16.msrb.mxu0 %v3639_v34  ;;  %2769 = vmatpush.bf16.msrb.mxu1 %v3799_v35  ;;  %v2506_v26 = vpop.f32.mrf.mxu0  ;;  %v4039_v34 = vor.u32 %v4434_v6, %v4038_v7  ;;  %v3698_v35 = vld [vmem:[#allocation8 + $0x678] sm:$0xf] }
 0x1a3   :  { %2782 = vmatpush.bf16.msrb.mxu2 %v3959_v39  ;;  %2795 = vmatpush.bf16.msrb.mxu3 %v4119_v40  ;;  %v2530_v21 = vpop.f32.mrf.mxu2  ;;  %v2543_v22 = vpop.f32.mrf.mxu3  ;;  %v4389_v39 = vld [vmem:[#allocation8 + $0x7c8] sm:$0xf0]  ;;  %v4018_v40 = vld [vmem:[#allocation8 + $0x8f8] sm:$0xf]  ;;  %v3699_v44 = vor.u32 %v4349_v37, %v3698_v35 }
 0x1a4   :  { %v3859_v42 = vor.u32 %v4389_v39, %v3858_v38 }
 0x1a6   :  { %2757 = vmatpush.bf16.msrb.mxu0 %v3619_v46  ;;  %2770 = vmatpush.bf16.msrb.mxu1 %v3779_v47  ;;  %v4019_v46 = vor.u32 %v4429_v41, %v4018_v40  ;;  %v3678_v47 = vld [vmem:[#allocation8 + $0x650] sm:$0xf] }
 0x1a7   :  { %2783 = vmatpush.bf16.msrb.mxu2 %v3939_v50  ;;  %2796 = vmatpush.bf16.msrb.mxu3 %v4099_v51  ;;  %v3679_v53 = vor.u32 %v4344_v48, %v3678_v47 }
 0x1a8   :  { %v2519_v27 = vpop.f32.mrf.mxu1 }
 0x1aa   :  { %2758 = vmatpush.bf16.msrb.mxu0 %v3599_v11  ;;  %2771 = vmatpush.bf16.msrb.mxu1 %v3759_v54  ;;  %v3999_v11 = vor.u32 %v4424_v9, %v3998_v8  ;;  %v2518_v54 = vadd.f32 %v4771_v10, %v4769_v16 }
 0x1ab   :  { %2784 = vmatpush.bf16.msrb.mxu2 %v3919_v57  ;;  %2797 = vmatpush.bf16.msrb.mxu3 %v4079_v58  ;;  %v2532_v50 = vpop.f32.mrf.mxu2  ;;  %v2545_v51 = vpop.f32.mrf.mxu3 }
 0x1ac   :  { %v2531_v55 = vadd.f32 %v2530_v21, %v2518_v54 }
 0x1ae   :  { %2759 = vmatpush.bf16.msrb.mxu0 %v3579_v13  ;;  %2772 = vmatpush.bf16.msrb.mxu1 %v3739_v14  ;;  %v2544_v36 = vadd.f32 %v2543_v22, %v2531_v55 }
 0x1af   :  { %2785 = vmatpush.bf16.msrb.mxu2 %v3899_v25  ;;  %2798 = vmatpush.bf16.msrb.mxu3 %v4059_v1 }
 0x1b2   :  { %2760 = vmatpush.bf16.msrb.mxu0 %v3559_v28  ;;  %2773 = vmatpush.bf16.msrb.mxu1 %v3719_v30 }
 0x1b3   :  { %2786 = vmatpush.bf16.msrb.mxu2 %v3879_v33  ;;  %2799 = vmatpush.bf16.msrb.mxu3 %v4039_v34 }
 0x1b6   :  { %2761 = vmatpush.bf16.msrb.mxu0 %v3539_v43  ;;  %2774 = vmatpush.bf16.msrb.mxu1 %v3699_v44 }
 0x1b7   :  { %2787 = vmatpush.bf16.msrb.mxu2 %v3859_v42  ;;  %2800 = vmatpush.bf16.msrb.mxu3 %v4019_v46 }
 0x1ba   :  { %2762 = vmatpush.bf16.msrb.mxu0 %v3519_v52  ;;  %2775 = vmatpush.bf16.msrb.mxu1 %v3679_v53  ;;  %v2556_v57 = vpop.f32.mrf.mxu0  ;;  %v2569_v58 = vpop.f32.mrf.mxu1 }
 0x1bb   :  { %2788 = vmatpush.bf16.msrb.mxu2 %v3839_v24  ;;  %2801 = vmatpush.bf16.msrb.mxu3 %v3999_v11  ;;  %v2557_v59 = vadd.f32 %v2556_v57, %v2544_v36  ;;  %v4467_v24 = vld [vmem:[%s4797_s4] sm:$0x1f] }
 0x1bc   :  { %v2831_v11 = vperm.slane %v4467_v24, 4 }
 0x1bd   :  { %2763 = vmatmul.bf16.vlgmr.msrb.gmra.mxu0 %v4704_v3  ;;  %2776 = vmatmul.bf16.vlgmr.msrb.gmra.mxu1 %v4706_v12  ;;  %v2570_v60 = vadd.f32 %v2569_v58, %v2557_v59 }
 0x1be   :  { %2789 = vmatmul.bf16.vlgmr.msrb.gmra.mxu2 %v4708_v15  ;;  %2802 = vmatmul.bf16.vlgmr.msrb.gmra.mxu3 %v4710_v17 }
 0x1c2   :  { %v2558_v16 = vpop.f32.mrf.mxu0  ;;  %v2571_v10 = vpop.f32.mrf.mxu1 }
 0x1c3   :  { %v2582_v61 = vpop.f32.mrf.mxu2  ;;  %v2595_v62 = vpop.f32.mrf.mxu3 }
 0x1c4   :  { %v2583_v63 = vadd.f32 %v2582_v61, %v2570_v60 }
 0x1c6   :  { %v2596_v3 = vadd.f32 %v2595_v62, %v2583_v63 }
 0x1c8   :  { %v2839_v13 = vadd.f32 %v2829_v4, %v2596_v3 }
 0x1ca   :  { %v2844_v12 = vmax.f32 %v2839_v13, 0.0 }
 0x1cb   :  { %v2584_v14 = vpop.f32.mrf.mxu2  ;;  %v2597_v15 = vpop.f32.mrf.mxu3 }
 0x1cc   :  { %2849 = vst [vmem:[%s4798_s5 + $0x10] sm:$0xff] %v2844_v12 }
 0x1da   :  { %v2608_v17 = vpop.f32.mrf.mxu0  ;;  %v2621_v0 = vpop.f32.mrf.mxu1 }
 0x1db   :  { %v2622_v21 = vadd.f32 %v2621_v0, %v2608_v17 }
 0x1e2   :  { %v2610_v1 = vpop.f32.mrf.mxu0  ;;  %v2623_v19 = vpop.f32.mrf.mxu1 }
 0x1e3   :  { %v2634_v18 = vpop.f32.mrf.mxu2  ;;  %v2647_v25 = vpop.f32.mrf.mxu3 }
 0x1e4   :  { %v2635_v22 = vadd.f32 %v2634_v18, %v2622_v21 }
 0x1e6   :  { %v2648_v23 = vadd.f32 %v2647_v25, %v2635_v22 }
 0x1eb   :  { %v2636_v2 = vpop.f32.mrf.mxu2  ;;  %v2649_v20 = vpop.f32.mrf.mxu3 }
 0x1fa   :  { %v2660_v7 = vpop.f32.mrf.mxu0  ;;  %v2673_v6 = vpop.f32.mrf.mxu1 }
 0x1fb   :  { %v2661_v26 = vadd.f32 %v2660_v7, %v2648_v23 }
 0x1fd   :  { %v2674_v27 = vadd.f32 %v2673_v6, %v2661_v26 }
 0x202   :  { %v2662_v33 = vpop.f32.mrf.mxu0  ;;  %v2675_v34 = vpop.f32.mrf.mxu1 }
 0x203   :  { %v2686_v28 = vpop.f32.mrf.mxu2  ;;  %v2699_v30 = vpop.f32.mrf.mxu3 }
 0x204   :  { %v2687_v31 = vadd.f32 %v2686_v28, %v2674_v27 }
 0x206   :  { %v2700_v35 = vadd.f32 %v2699_v30, %v2687_v31 }
 0x208   :  { %v2840_v37 = vadd.f32 %v2830_v32, %v2700_v35 }
 0x20a   :  { %v2845_v38 = vmax.f32 %v2840_v37, 0.0 }
 0x20b   :  { %v2688_v39 = vpop.f32.mrf.mxu2  ;;  %v2701_v40 = vpop.f32.mrf.mxu3 }
 0x20c   :  { %2850 = vst [vmem:[%s4798_s5 + $0x18] sm:$0xff] %v2845_v38 }
 0x21a   :  { %v2712_v41 = vpop.f32.mrf.mxu0  ;;  %v2725_v43 = vpop.f32.mrf.mxu1 }
 0x21b   :  { %v2726_v29 = vadd.f32 %v2725_v43, %v2712_v41 }
 0x222   :  { %v2714_v56 = vpop.f32.mrf.mxu0  ;;  %v2727_v42 = vpop.f32.mrf.mxu1 }
 0x223   :  { %v2738_v44 = vpop.f32.mrf.mxu2  ;;  %v2751_v45 = vpop.f32.mrf.mxu3 }
 0x224   :  { %v2739_v48 = vadd.f32 %v2738_v44, %v2726_v29 }
 0x226   :  { %v2752_v49 = vadd.f32 %v2751_v45, %v2739_v48 }
 0x22b   :  { %v2740_v46 = vpop.f32.mrf.mxu2  ;;  %v2753_v47 = vpop.f32.mrf.mxu3 }
 0x23a   :  { %v2764_v50 = vpop.f32.mrf.mxu0  ;;  %v2777_v51 = vpop.f32.mrf.mxu1 }
 0x23b   :  { %v2765_v5 = vadd.f32 %v2764_v50, %v2752_v49 }
 0x23d   :  { %v2778_v8 = vadd.f32 %v2777_v51, %v2765_v5 }
 0x241   :  { %v2790_v9 = vpop.f32.mrf.mxu2  ;;  %v2803_v52 = vpop.f32.mrf.mxu3 }
 0x242   :  { %v2791_v53 = vadd.f32 %v2790_v9, %v2778_v8  ;;  %v2766_v54 = vpop.f32.mrf.mxu0  ;;  %v2779_v55 = vpop.f32.mrf.mxu1 }
 0x244   :  { %v2804_v36 = vadd.f32 %v2803_v52, %v2791_v53 }
 0x246   :  { %v2841_v57 = vadd.f32 %v2831_v11, %v2804_v36 }
 0x248   :  { %v2846_v58 = vmax.f32 %v2841_v57, 0.0 }
 0x249   :  { %v2792_v59 = vpop.f32.mrf.mxu2  ;;  %v2805_v60 = vpop.f32.mrf.mxu3 }
 0x24a   :  { %2851 = vst [vmem:[%s4798_s5 + $0x20] sm:$0xff] %v2846_v58 }
 0x24b   :  { %2856 = vsyncpa [#allocation5], 1 }
 0x24c   :  { %2857 = vsyncpa [#allocation7], 1 }

</bundles_post_ra>
